<compile_context>
chip_gen: v5e
topology: v5e:2x2
jax: 0.10.0
libtpu: 0.0.40
codegen_flags: <defaults>
</compile_context>

<pallas_src>
import functools

import jax
import jax.numpy as jnp
import numpy as np
from jax import lax
from jax.experimental import pallas as pl
from jax.experimental.pallas import tpu as pltpu


# ----------------------------------------------------------------------------
# The single fused Pallas kernel
# ----------------------------------------------------------------------------
def _forward_kernel(xc_ref,
                    w1_ref, b1_ref, w2_ref, b2_ref, w3_ref, b3_ref,
                    fc1w_ref, fc1b_ref, fc2w_ref, fc2b_ref, fc3w_ref, fc3b_ref,
                    o_ref, *, tb, l_in):
    f32, bf16 = jnp.float32, jnp.bfloat16

    def bias_relu_pool(acc, b_ref, pool, pool_mode):
        """Folded-BN bias + ReLU + pooling over groups of `pool` consecutive rows."""
        acc = jnp.maximum(acc + b_ref[...], 0.0)
        if pool > 1:
            m, cout = acc.shape
            acc = acc.reshape(m // pool, pool, cout)
            acc = (jnp.max(acc, axis=1) if pool_mode == "max"
                   else jnp.mean(acc, axis=1))
        return acc

    def conv_fused(h, w_ref, l_cur):
        """'same' Conv1d as ONE matmul.

        h: (m, cin) f32, rows ordered (sample, position), position fastest.
        w_ref: (K*cin, cout) bf16, columns ordered k*cin + c.
        The im2col LHS is built in VMEM by lane-concatenating K position-shifted
        slabs (pltpu.roll along sublanes); rows whose shifted position falls
        outside the sample are masked to zero (this realizes both the 'same'
        zero padding and the sample boundaries, including roll wrap-around).
        """
        m, cin = h.shape
        kcin, cout = w_ref.shape
        ksize = kcin // cin
        pad = ksize // 2

        row = lax.broadcasted_iota(jnp.int32, (m, 1), 0)
        if (l_cur & (l_cur - 1)) == 0:                 # power of two: AND, not rem
            pos = row & (l_cur - 1)
        else:
            pos = row % l_cur

        slabs = []
        for k in range(ksize):
            dk = k - pad                               # tap offset
            if dk == 0:
                slabs.append(h)
            else:
                rolled = pltpu.roll(h, shift=(-dk) % m, axis=0)   # rolled[r] = h[(r+dk) % m]
                valid = jnp.logical_and(pos + dk >= 0, pos + dk < l_cur)
                slabs.append(jnp.where(valid, rolled, 0.0))
        lhs = jnp.concatenate(slabs, axis=-1).astype(bf16)        # (m, K*cin), one cast/layer
        return jnp.dot(lhs, w_ref[...], preferred_element_type=f32)

    # ---- features -----------------------------------------------------------
    # conv1: im2col (m, 14) built host-side (lane-dense bf16 feed) -> one matmul.
    h = bias_relu_pool(
        jnp.dot(xc_ref[...], w1_ref[...], preferred_element_type=f32),
        b1_ref, 4, "max")                                         # (tb*L/4,  32)
    l1 = l_in // 4
    h = bias_relu_pool(conv_fused(h, w2_ref, l1), b2_ref, 4, "max")          # (tb*L/16, 64)
    l2 = l1 // 4
    h = bias_relu_pool(conv_fused(h, w3_ref, l2), b3_ref, l2 // 8, "avg")    # (tb*8,   128)

    # ---- classifier ---------------------------------------------------------
    # Flatten absorbed into fc1's weight layout: lane-concat the 8 pooled
    # position slabs -> (tb, 1024) and do ONE K=1024 matmul.
    kin, _ = fc1w_ref.shape
    c3 = w3_ref.shape[1]
    lpos = kin // c3
    hr = h.reshape(tb, lpos, c3)
    lhs = jnp.concatenate([hr[:, j, :] for j in range(lpos)], axis=-1).astype(bf16)
    h = jnp.maximum(jnp.dot(lhs, fc1w_ref[...], preferred_element_type=f32)
                    + fc1b_ref[...], 0.0)
    h = jnp.maximum(jnp.dot(h.astype(bf16), fc2w_ref[...], preferred_element_type=f32)
                    + fc2b_ref[...], 0.0)
    out = jnp.dot(h.astype(bf16), fc3w_ref[...], preferred_element_type=f32) + fc3b_ref[...]
    o_ref[...] = out.astype(o_ref.dtype)


# ----------------------------------------------------------------------------
# One-time parameter preparation (BN folding, tap fusion, fc1 permute, bf16)
# ----------------------------------------------------------------------------
def fold_bn(w, b, gamma, beta, mean, var, eps=1e-5):
    scale = gamma / jnp.sqrt(var + eps)
    return w * scale[:, None, None], (b - mean) * scale + beta


def prepare_params(p, eps=1e-5):
    prep = {}
    for i in (1, 2, 3):
        w, b = fold_bn(p[f"conv{i}_w"], p[f"conv{i}_b"], p[f"bn{i}_g"],
                       p[f"bn{i}_b"], p[f"bn{i}_m"], p[f"bn{i}_v"], eps)
        cout, cin, k = w.shape
        # (Cout, Cin, K) -> (K*Cin, Cout): fused-tap im2col weight, col = k*Cin + c.
        prep[f"w{i}"] = (jnp.transpose(w, (2, 1, 0))
                         .reshape(k * cin, cout).astype(jnp.bfloat16))
        prep[f"b{i}"] = b.reshape(1, -1).astype(jnp.float32)
    # fc1 (256, 1024) indexed [o, c*8 + l]  ->  (l*128 + c, o) so a lane-concat
    # of the 8 pooled position slabs feeds one K=1024 matmul.
    fout, fin = p["fc1_w"].shape
    c3 = p["conv3_w"].shape[0]
    lpos = fin // c3
    prep["fc1_w"] = (jnp.transpose(p["fc1_w"].reshape(fout, c3, lpos), (2, 1, 0))
                     .reshape(lpos * c3, fout).astype(jnp.bfloat16))
    prep["fc1_b"] = p["fc1_b"].reshape(1, -1).astype(jnp.float32)
    prep["fc2_w"] = p["fc2_w"].T.astype(jnp.bfloat16)
    prep["fc2_b"] = p["fc2_b"].reshape(1, -1).astype(jnp.float32)
    prep["fc3_w"] = p["fc3_w"].T.astype(jnp.bfloat16)
    prep["fc3_b"] = p["fc3_b"].reshape(1, -1).astype(jnp.float32)
    return prep


def init_params(key):
    ks = jax.random.split(key, 24)
    it = iter(ks)

    def nrm(shape, scale=0.1):
        return scale * jax.random.normal(next(it), shape, jnp.float32)

    p = {}
    for i, (cin, cout, ksz) in enumerate([(2, 32, 7), (32, 64, 5), (64, 128, 3)], 1):
        p[f"conv{i}_w"] = nrm((cout, cin, ksz))
        p[f"conv{i}_b"] = nrm((cout,))
        p[f"bn{i}_g"] = 1.0 + nrm((cout,))
        p[f"bn{i}_b"] = nrm((cout,))
        p[f"bn{i}_m"] = nrm((cout,))
        p[f"bn{i}_v"] = 1.0 + jnp.abs(nrm((cout,)))
    for i, (fin, fout) in enumerate([(128 * 8, 256), (256, 64), (64, 1)], 1):
        p[f"fc{i}_w"] = nrm((fout, fin), scale=0.05)   # PyTorch Linear: (out, in)
        p[f"fc{i}_b"] = nrm((fout,))
    return p


# ----------------------------------------------------------------------------
# Wrapper: batch padding, tile choice, host-side conv1 im2col, one pallas_call
# ----------------------------------------------------------------------------
def _choose_tile(n, block_batch):
    # Multiple of 8, and >= 2 grid steps when the batch allows it (v7x megacore).
    half = -(-n // 2)
    tb = min(block_batch, max(8, -(-half // 8) * 8))
    return max(8, (tb // 8) * 8)


def model_forward(x_ncl, prep, *, block_batch=64):
    n, cin, l = x_ncl.shape
    k1cin = prep["w1"].shape[0]
    assert k1cin % cin == 0
    k1 = k1cin // cin
    pad1 = k1 // 2
    assert l % 16 == 0 and (l // 16) % 8 == 0, \
        "pooling implemented for L % 16 == 0 and (L//16) % 8 == 0 (uniform adaptive bins)"
    # TODO(synk): general AdaptiveAvgPool1d with non-uniform bins not implemented.

    tb = _choose_tile(n, block_batch)
    n_pad = -(-n // tb) * tb
    if n_pad != n:
        x_ncl = jnp.pad(x_ncl, ((0, n_pad - n), (0, 0), (0, 0)))
    grid = (n_pad // tb,)
    num_classes = prep["fc3_w"].shape[1]

    # Host-side im2col for conv1 only (Cin=2 would waste 64x of the 128 lanes in
    # VMEM otherwise).  Columns ordered k*Cin + c to match the fused weights.
    xp = jnp.pad(x_ncl, ((0, 0), (0, 0), (pad1, pad1)))
    cols = jnp.stack([xp[:, :, k:k + l] for k in range(k1)], axis=1)   # (Np, K, Cin, L)
    x_col = (jnp.transpose(cols, (0, 3, 1, 2))
             .reshape(n_pad * l, k1 * cin).astype(jnp.bfloat16))

    # Advisory cost estimate so XLA schedules around the fused call sensibly.
    l1, l2 = l // 4, l // 16
    flops = 2 * n_pad * (l * prep["w1"].size + l1 * prep["w2"].size
                         + l2 * prep["w3"].size + prep["fc1_w"].size
                         + prep["fc2_w"].size + prep["fc3_w"].size)
    weight_bytes = sum(int(v.size) * v.dtype.itemsize for v in prep.values())
    bytes_accessed = int(x_col.size) * 2 + n_pad * num_classes * 4 + weight_bytes

    kernel = functools.partial(_forward_kernel, tb=tb, l_in=l)
    weight_names = ["w1", "b1", "w2", "b2", "w3", "b3",
                    "fc1_w", "fc1_b", "fc2_w", "fc2_b", "fc3_w", "fc3_b"]
    wspec = lambda a: pl.BlockSpec(a.shape, lambda i: (0, 0))   # VMEM-resident weights

    out = pl.pallas_call(
        kernel,
        out_shape=jax.ShapeDtypeStruct((n_pad, num_classes), jnp.float32),
        grid=grid,
        in_specs=[pl.BlockSpec((tb * l, k1 * cin), lambda i: (i, 0))]   # input rows
                 + [wspec(prep[name]) for name in weight_names],
        out_specs=pl.BlockSpec((tb, num_classes), lambda i: (i, 0)),
        compiler_params=pltpu.CompilerParams(
            dimension_semantics=("parallel",),
            vmem_limit_bytes=48 * 1024 * 1024),
        cost_estimate=pl.CostEstimate(flops=int(flops), transcendentals=0,
                                      bytes_accessed=int(bytes_accessed)),
    )(x_col, *[prep[name] for name in weight_names])
    return out[:n]


# ----------------------------------------------------------------------------
# Pure-JAX f32 reference (mirrors the PyTorch forward in eval mode)
# ----------------------------------------------------------------------------
def reference_forward(x, p, eps=1e-5):
    def conv(x, w, b, pad):
        y = lax.conv_general_dilated(x, w, (1,), [(pad, pad)],
                                     dimension_numbers=("NCH", "OIH", "NCH"))
        return y + b[None, :, None]

    def bn(x, g, be, m, v):
        return (x - m[None, :, None]) * (g / jnp.sqrt(v + eps))[None, :, None] + be[None, :, None]

    def mp4(x):
        nn_, c, l = x.shape
        return jnp.max(x.reshape(nn_, c, l // 4, 4), axis=-1)

    h = mp4(jnp.maximum(bn(conv(x, p["conv1_w"], p["conv1_b"], 3),
                           p["bn1_g"], p["bn1_b"], p["bn1_m"], p["bn1_v"]), 0.0))
    h = mp4(jnp.maximum(bn(conv(h, p["conv2_w"], p["conv2_b"], 2),
                           p["bn2_g"], p["bn2_b"], p["bn2_m"], p["bn2_v"]), 0.0))
    h = jnp.maximum(bn(conv(h, p["conv3_w"], p["conv3_b"], 1),
                       p["bn3_g"], p["bn3_b"], p["bn3_m"], p["bn3_v"]), 0.0)
    nn_, c, l = h.shape
    h = jnp.mean(h.reshape(nn_, c, 8, l // 8), axis=-1)   # AdaptiveAvgPool1d(8), L%8==0
    h = h.reshape(nn_, -1)
    h = jnp.maximum(h @ p["fc1_w"].T + p["fc1_b"], 0.0)
    h = jnp.maximum(h @ p["fc2_w"].T + p["fc2_b"], 0.0)
    return h @ p["fc3_w"].T + p["fc3_b"]


if __name__ == "__main__":
    key = jax.random.PRNGKey(0)
    pkey, xkey = jax.random.split(key)
    params = init_params(pkey)
    prep = prepare_params(params)          # one-time folding / fusion / bf16 cast

    # Small input consistent with the module: batch=16, channels=2, seq len=128.
    x = jax.random.normal(xkey, (16, 2, 128), jnp.float32)

    fwd = jax.jit(model_forward)
    out = jax.block_until_ready(fwd(x, prep))

    ref = reference_forward(x, params)     # f32 reference (PyTorch semantics)
    np.testing.assert_allclose(np.asarray(out), np.asarray(ref), rtol=3e-2, atol=3e-2)

    print("KERNEL_OK")
</pallas_src>

<mosaic_0001>
module attributes {stable_mosaic.version = 11 : i64} {
  func.func @_forward_kernel(%arg0: i32, %arg1: memref<1024x14xbf16, #tpu.memory_space<vmem>>, %arg2: memref<14x32xbf16, #tpu.memory_space<vmem>>, %arg3: memref<1x32xf32, #tpu.memory_space<vmem>>, %arg4: memref<160x64xbf16, #tpu.memory_space<vmem>>, %arg5: memref<1x64xf32, #tpu.memory_space<vmem>>, %arg6: memref<192x128xbf16, #tpu.memory_space<vmem>>, %arg7: memref<1x128xf32, #tpu.memory_space<vmem>>, %arg8: memref<1024x256xbf16, #tpu.memory_space<vmem>>, %arg9: memref<1x256xf32, #tpu.memory_space<vmem>>, %arg10: memref<256x64xbf16, #tpu.memory_space<vmem>>, %arg11: memref<1x64xf32, #tpu.memory_space<vmem>>, %arg12: memref<64x1xbf16, #tpu.memory_space<vmem>>, %arg13: memref<1x1xf32, #tpu.memory_space<vmem>>, %arg14: memref<8x1xf32, #tpu.memory_space<vmem>>) attributes {dimension_semantics = [#tpu.dimension_semantics<parallel>], iteration_bounds = array<i64: 2>, scalar_prefetch = 0 : i64, scratch_operands = 0 : i64, tpu.core_type = #tpu.core_type<tc>, window_params = [{transform_indices = @transform_0, window_bounds = array<i64: 1024, 14>}, {pipeline_mode = #tpu.pipeline_mode<synchronous>, transform_indices = @transform_1, window_bounds = array<i64: 14, 32>}, {pipeline_mode = #tpu.pipeline_mode<synchronous>, transform_indices = @transform_2, window_bounds = array<i64: 1, 32>}, {pipeline_mode = #tpu.pipeline_mode<synchronous>, transform_indices = @transform_3, window_bounds = array<i64: 160, 64>}, {pipeline_mode = #tpu.pipeline_mode<synchronous>, transform_indices = @transform_4, window_bounds = array<i64: 1, 64>}, {pipeline_mode = #tpu.pipeline_mode<synchronous>, transform_indices = @transform_5, window_bounds = array<i64: 192, 128>}, {pipeline_mode = #tpu.pipeline_mode<synchronous>, transform_indices = @transform_6, window_bounds = array<i64: 1, 128>}, {pipeline_mode = #tpu.pipeline_mode<synchronous>, transform_indices = @transform_7, window_bounds = array<i64: 1024, 256>}, {pipeline_mode = #tpu.pipeline_mode<synchronous>, transform_indices = @transform_8, window_bounds = array<i64: 1, 256>}, {pipeline_mode = #tpu.pipeline_mode<synchronous>, transform_indices = @transform_9, window_bounds = array<i64: 256, 64>}, {pipeline_mode = #tpu.pipeline_mode<synchronous>, transform_indices = @transform_10, window_bounds = array<i64: 1, 64>}, {pipeline_mode = #tpu.pipeline_mode<synchronous>, transform_indices = @transform_11, window_bounds = array<i64: 64, 1>}, {pipeline_mode = #tpu.pipeline_mode<synchronous>, transform_indices = @transform_12, window_bounds = array<i64: 1, 1>}, {transform_indices = @transform_13, window_bounds = array<i64: 8, 1>}]} {
    %c0 = arith.constant 0 : index
    %c0_0 = arith.constant 0 : index
    %0 = vector.load %arg1[%c0, %c0_0] : memref<1024x14xbf16, #tpu.memory_space<vmem>>, vector<1024x14xbf16>
    %c0_1 = arith.constant 0 : index
    %c0_2 = arith.constant 0 : index
    %1 = vector.load %arg2[%c0_1, %c0_2] : memref<14x32xbf16, #tpu.memory_space<vmem>>, vector<14x32xbf16>
    %cst = arith.constant dense<0.000000e+00> : vector<1024x32xf32>
    %2 = tpu.matmul %0, %1, %cst {dimension_numbers = #tpu.dot_dimension_numbers<[1], [0], [0], [1], [0, 0, 1, 1], [], []>} : vector<1024x14xbf16>, vector<14x32xbf16>, vector<1024x32xf32> -> vector<1024x32xf32>
    %c0_3 = arith.constant 0 : index
    %c0_4 = arith.constant 0 : index
    %3 = vector.load %arg3[%c0_3, %c0_4] : memref<1x32xf32, #tpu.memory_space<vmem>>, vector<1x32xf32>
    %4 = vector.broadcast %3 : vector<1x32xf32> to vector<1024x32xf32>
    %5 = arith.addf %2, %4 : vector<1024x32xf32>
    %cst_5 = arith.constant 0.000000e+00 : f32
    %6 = vector.broadcast %cst_5 : f32 to vector<1024x32xf32>
    %7 = arith.maximumf %5, %6 : vector<1024x32xf32>
    %8 = vector.shape_cast %7 : vector<1024x32xf32> to vector<256x4x32xf32>
    %cst_6 = arith.constant dense<0xFF800000> : vector<256x32xf32>
    %9 = vector.multi_reduction <maximumf>, %8, %cst_6 [1] : vector<256x4x32xf32> to vector<256x32xf32>
    %10 = tpu.iota {dimensions = array<i32: 0>} : vector<256x1xi32>
    %c31_i32 = arith.constant 31 : i32
    %11 = vector.broadcast %c31_i32 : i32 to vector<256x1xi32>
    %12 = arith.andi %10, %11 : vector<256x1xi32>
    %c2_i32 = arith.constant 2 : i32
    %13 = tpu.dynamic_rotate %9 by %c2_i32 dim 0 : vector<256x32xf32>, i32 -> vector<256x32xf32>
    %c-2_i32 = arith.constant -2 : i32
    %14 = vector.broadcast %c-2_i32 : i32 to vector<256x1xi32>
    %15 = arith.addi %12, %14 : vector<256x1xi32>
    %c0_i32 = arith.constant 0 : i32
    %16 = vector.broadcast %c0_i32 : i32 to vector<256x1xi32>
    %17 = arith.cmpi sge, %15, %16 : vector<256x1xi32>
    %c-2_i32_7 = arith.constant -2 : i32
    %18 = vector.broadcast %c-2_i32_7 : i32 to vector<256x1xi32>
    %19 = arith.addi %12, %18 : vector<256x1xi32>
    %c32_i32 = arith.constant 32 : i32
    %20 = vector.broadcast %c32_i32 : i32 to vector<256x1xi32>
    %21 = arith.cmpi slt, %19, %20 : vector<256x1xi32>
    %22 = arith.andi %17, %21 : vector<256x1xi1>
    %cst_8 = arith.constant 0.000000e+00 : f32
    %23 = vector.shape_cast %22 : vector<256x1xi1> to vector<256x1xi1>
    %24 = vector.broadcast %23 : vector<256x1xi1> to vector<256x32xi1>
    %25 = vector.broadcast %cst_8 : f32 to vector<256x32xf32>
    %26 = arith.select %24, %13, %25 : vector<256x32xi1>, vector<256x32xf32>
    %c1_i32 = arith.constant 1 : i32
    %27 = tpu.dynamic_rotate %9 by %c1_i32 dim 0 : vector<256x32xf32>, i32 -> vector<256x32xf32>
    %c-1_i32 = arith.constant -1 : i32
    %28 = vector.broadcast %c-1_i32 : i32 to vector<256x1xi32>
    %29 = arith.addi %12, %28 : vector<256x1xi32>
    %c0_i32_9 = arith.constant 0 : i32
    %30 = vector.broadcast %c0_i32_9 : i32 to vector<256x1xi32>
    %31 = arith.cmpi sge, %29, %30 : vector<256x1xi32>
    %c-1_i32_10 = arith.constant -1 : i32
    %32 = vector.broadcast %c-1_i32_10 : i32 to vector<256x1xi32>
    %33 = arith.addi %12, %32 : vector<256x1xi32>
    %c32_i32_11 = arith.constant 32 : i32
    %34 = vector.broadcast %c32_i32_11 : i32 to vector<256x1xi32>
    %35 = arith.cmpi slt, %33, %34 : vector<256x1xi32>
    %36 = arith.andi %31, %35 : vector<256x1xi1>
    %cst_12 = arith.constant 0.000000e+00 : f32
    %37 = vector.shape_cast %36 : vector<256x1xi1> to vector<256x1xi1>
    %38 = vector.broadcast %37 : vector<256x1xi1> to vector<256x32xi1>
    %39 = vector.broadcast %cst_12 : f32 to vector<256x32xf32>
    %40 = arith.select %38, %27, %39 : vector<256x32xi1>, vector<256x32xf32>
    %c255_i32 = arith.constant 255 : i32
    %41 = tpu.dynamic_rotate %9 by %c255_i32 dim 0 : vector<256x32xf32>, i32 -> vector<256x32xf32>
    %c1_i32_13 = arith.constant 1 : i32
    %42 = vector.broadcast %c1_i32_13 : i32 to vector<256x1xi32>
    %43 = arith.addi %12, %42 : vector<256x1xi32>
    %c0_i32_14 = arith.constant 0 : i32
    %44 = vector.broadcast %c0_i32_14 : i32 to vector<256x1xi32>
    %45 = arith.cmpi sge, %43, %44 : vector<256x1xi32>
    %c1_i32_15 = arith.constant 1 : i32
    %46 = vector.broadcast %c1_i32_15 : i32 to vector<256x1xi32>
    %47 = arith.addi %12, %46 : vector<256x1xi32>
    %c32_i32_16 = arith.constant 32 : i32
    %48 = vector.broadcast %c32_i32_16 : i32 to vector<256x1xi32>
    %49 = arith.cmpi slt, %47, %48 : vector<256x1xi32>
    %50 = arith.andi %45, %49 : vector<256x1xi1>
    %cst_17 = arith.constant 0.000000e+00 : f32
    %51 = vector.shape_cast %50 : vector<256x1xi1> to vector<256x1xi1>
    %52 = vector.broadcast %51 : vector<256x1xi1> to vector<256x32xi1>
    %53 = vector.broadcast %cst_17 : f32 to vector<256x32xf32>
    %54 = arith.select %52, %41, %53 : vector<256x32xi1>, vector<256x32xf32>
    %c254_i32 = arith.constant 254 : i32
    %55 = tpu.dynamic_rotate %9 by %c254_i32 dim 0 : vector<256x32xf32>, i32 -> vector<256x32xf32>
    %c2_i32_18 = arith.constant 2 : i32
    %56 = vector.broadcast %c2_i32_18 : i32 to vector<256x1xi32>
    %57 = arith.addi %12, %56 : vector<256x1xi32>
    %c0_i32_19 = arith.constant 0 : i32
    %58 = vector.broadcast %c0_i32_19 : i32 to vector<256x1xi32>
    %59 = arith.cmpi sge, %57, %58 : vector<256x1xi32>
    %c2_i32_20 = arith.constant 2 : i32
    %60 = vector.broadcast %c2_i32_20 : i32 to vector<256x1xi32>
    %61 = arith.addi %12, %60 : vector<256x1xi32>
    %c32_i32_21 = arith.constant 32 : i32
    %62 = vector.broadcast %c32_i32_21 : i32 to vector<256x1xi32>
    %63 = arith.cmpi slt, %61, %62 : vector<256x1xi32>
    %64 = arith.andi %59, %63 : vector<256x1xi1>
    %cst_22 = arith.constant 0.000000e+00 : f32
    %65 = vector.shape_cast %64 : vector<256x1xi1> to vector<256x1xi1>
    %66 = vector.broadcast %65 : vector<256x1xi1> to vector<256x32xi1>
    %67 = vector.broadcast %cst_22 : f32 to vector<256x32xf32>
    %68 = arith.select %66, %55, %67 : vector<256x32xi1>, vector<256x32xf32>
    %69 = tpu.concatenate %26, %40, %9, %54, %68 in 1 : vector<256x32xf32>, vector<256x32xf32>, vector<256x32xf32>, vector<256x32xf32>, vector<256x32xf32> -> vector<256x160xf32>
    %70 = arith.truncf %69 : vector<256x160xf32> to vector<256x160xbf16>
    %c0_23 = arith.constant 0 : index
    %c0_24 = arith.constant 0 : index
    %71 = vector.load %arg4[%c0_23, %c0_24] : memref<160x64xbf16, #tpu.memory_space<vmem>>, vector<160x64xbf16>
    %cst_25 = arith.constant dense<0.000000e+00> : vector<256x64xf32>
    %72 = tpu.matmul %70, %71, %cst_25 {dimension_numbers = #tpu.dot_dimension_numbers<[1], [0], [0], [1], [0, 0, 1, 1], [], []>} : vector<256x160xbf16>, vector<160x64xbf16>, vector<256x64xf32> -> vector<256x64xf32>
    %c0_26 = arith.constant 0 : index
    %c0_27 = arith.constant 0 : index
    %73 = vector.load %arg5[%c0_26, %c0_27] : memref<1x64xf32, #tpu.memory_space<vmem>>, vector<1x64xf32>
    %74 = vector.broadcast %73 : vector<1x64xf32> to vector<256x64xf32>
    %75 = arith.addf %72, %74 : vector<256x64xf32>
    %cst_28 = arith.constant 0.000000e+00 : f32
    %76 = vector.broadcast %cst_28 : f32 to vector<256x64xf32>
    %77 = arith.maximumf %75, %76 : vector<256x64xf32>
    %78 = vector.shape_cast %77 : vector<256x64xf32> to vector<64x4x64xf32>
    %cst_29 = arith.constant dense<0xFF800000> : vector<64x64xf32>
    %79 = vector.multi_reduction <maximumf>, %78, %cst_29 [1] : vector<64x4x64xf32> to vector<64x64xf32>
    %80 = tpu.iota {dimensions = array<i32: 0>} : vector<64x1xi32>
    %c7_i32 = arith.constant 7 : i32
    %81 = vector.broadcast %c7_i32 : i32 to vector<64x1xi32>
    %82 = arith.andi %80, %81 : vector<64x1xi32>
    %c1_i32_30 = arith.constant 1 : i32
    %83 = tpu.dynamic_rotate %79 by %c1_i32_30 dim 0 : vector<64x64xf32>, i32 -> vector<64x64xf32>
    %c-1_i32_31 = arith.constant -1 : i32
    %84 = vector.broadcast %c-1_i32_31 : i32 to vector<64x1xi32>
    %85 = arith.addi %82, %84 : vector<64x1xi32>
    %c0_i32_32 = arith.constant 0 : i32
    %86 = vector.broadcast %c0_i32_32 : i32 to vector<64x1xi32>
    %87 = arith.cmpi sge, %85, %86 : vector<64x1xi32>
    %c-1_i32_33 = arith.constant -1 : i32
    %88 = vector.broadcast %c-1_i32_33 : i32 to vector<64x1xi32>
    %89 = arith.addi %82, %88 : vector<64x1xi32>
    %c8_i32 = arith.constant 8 : i32
    %90 = vector.broadcast %c8_i32 : i32 to vector<64x1xi32>
    %91 = arith.cmpi slt, %89, %90 : vector<64x1xi32>
    %92 = arith.andi %87, %91 : vector<64x1xi1>
    %cst_34 = arith.constant 0.000000e+00 : f32
    %93 = vector.shape_cast %92 : vector<64x1xi1> to vector<64x1xi1>
    %94 = vector.broadcast %93 : vector<64x1xi1> to vector<64x64xi1>
    %95 = vector.broadcast %cst_34 : f32 to vector<64x64xf32>
    %96 = arith.select %94, %83, %95 : vector<64x64xi1>, vector<64x64xf32>
    %c63_i32 = arith.constant 63 : i32
    %97 = tpu.dynamic_rotate %79 by %c63_i32 dim 0 : vector<64x64xf32>, i32 -> vector<64x64xf32>
    %c1_i32_35 = arith.constant 1 : i32
    %98 = vector.broadcast %c1_i32_35 : i32 to vector<64x1xi32>
    %99 = arith.addi %82, %98 : vector<64x1xi32>
    %c0_i32_36 = arith.constant 0 : i32
    %100 = vector.broadcast %c0_i32_36 : i32 to vector<64x1xi32>
    %101 = arith.cmpi sge, %99, %100 : vector<64x1xi32>
    %c1_i32_37 = arith.constant 1 : i32
    %102 = vector.broadcast %c1_i32_37 : i32 to vector<64x1xi32>
    %103 = arith.addi %82, %102 : vector<64x1xi32>
    %c8_i32_38 = arith.constant 8 : i32
    %104 = vector.broadcast %c8_i32_38 : i32 to vector<64x1xi32>
    %105 = arith.cmpi slt, %103, %104 : vector<64x1xi32>
    %106 = arith.andi %101, %105 : vector<64x1xi1>
    %cst_39 = arith.constant 0.000000e+00 : f32
    %107 = vector.shape_cast %106 : vector<64x1xi1> to vector<64x1xi1>
    %108 = vector.broadcast %107 : vector<64x1xi1> to vector<64x64xi1>
    %109 = vector.broadcast %cst_39 : f32 to vector<64x64xf32>
    %110 = arith.select %108, %97, %109 : vector<64x64xi1>, vector<64x64xf32>
    %111 = tpu.concatenate %96, %79, %110 in 1 : vector<64x64xf32>, vector<64x64xf32>, vector<64x64xf32> -> vector<64x192xf32>
    %112 = arith.truncf %111 : vector<64x192xf32> to vector<64x192xbf16>
    %c0_40 = arith.constant 0 : index
    %c0_41 = arith.constant 0 : index
    %113 = vector.load %arg6[%c0_40, %c0_41] : memref<192x128xbf16, #tpu.memory_space<vmem>>, vector<192x128xbf16>
    %cst_42 = arith.constant dense<0.000000e+00> : vector<64x128xf32>
    %114 = tpu.matmul %112, %113, %cst_42 {dimension_numbers = #tpu.dot_dimension_numbers<[1], [0], [0], [1], [0, 0, 1, 1], [], []>} : vector<64x192xbf16>, vector<192x128xbf16>, vector<64x128xf32> -> vector<64x128xf32>
    %c0_43 = arith.constant 0 : index
    %c0_44 = arith.constant 0 : index
    %115 = vector.load %arg7[%c0_43, %c0_44] : memref<1x128xf32, #tpu.memory_space<vmem>>, vector<1x128xf32>
    %116 = vector.broadcast %115 : vector<1x128xf32> to vector<64x128xf32>
    %117 = arith.addf %114, %116 : vector<64x128xf32>
    %cst_45 = arith.constant 0.000000e+00 : f32
    %118 = vector.broadcast %cst_45 : f32 to vector<64x128xf32>
    %119 = arith.maximumf %117, %118 : vector<64x128xf32>
    %120 = vector.shape_cast %119 : vector<64x128xf32> to vector<8x8x128xf32>
    %121 = vector.extract_strided_slice %120 {offsets = [0, 0, 0], sizes = [8, 1, 128], strides = [1, 1, 1]} : vector<8x8x128xf32> to vector<8x1x128xf32>
    %122 = vector.shape_cast %121 : vector<8x1x128xf32> to vector<8x128xf32>
    %123 = vector.extract_strided_slice %120 {offsets = [0, 1, 0], sizes = [8, 1, 128], strides = [1, 1, 1]} : vector<8x8x128xf32> to vector<8x1x128xf32>
    %124 = vector.shape_cast %123 : vector<8x1x128xf32> to vector<8x128xf32>
    %125 = vector.extract_strided_slice %120 {offsets = [0, 2, 0], sizes = [8, 1, 128], strides = [1, 1, 1]} : vector<8x8x128xf32> to vector<8x1x128xf32>
    %126 = vector.shape_cast %125 : vector<8x1x128xf32> to vector<8x128xf32>
    %127 = vector.extract_strided_slice %120 {offsets = [0, 3, 0], sizes = [8, 1, 128], strides = [1, 1, 1]} : vector<8x8x128xf32> to vector<8x1x128xf32>
    %128 = vector.shape_cast %127 : vector<8x1x128xf32> to vector<8x128xf32>
    %129 = vector.extract_strided_slice %120 {offsets = [0, 4, 0], sizes = [8, 1, 128], strides = [1, 1, 1]} : vector<8x8x128xf32> to vector<8x1x128xf32>
    %130 = vector.shape_cast %129 : vector<8x1x128xf32> to vector<8x128xf32>
    %131 = vector.extract_strided_slice %120 {offsets = [0, 5, 0], sizes = [8, 1, 128], strides = [1, 1, 1]} : vector<8x8x128xf32> to vector<8x1x128xf32>
    %132 = vector.shape_cast %131 : vector<8x1x128xf32> to vector<8x128xf32>
    %133 = vector.extract_strided_slice %120 {offsets = [0, 6, 0], sizes = [8, 1, 128], strides = [1, 1, 1]} : vector<8x8x128xf32> to vector<8x1x128xf32>
    %134 = vector.shape_cast %133 : vector<8x1x128xf32> to vector<8x128xf32>
    %135 = vector.extract_strided_slice %120 {offsets = [0, 7, 0], sizes = [8, 1, 128], strides = [1, 1, 1]} : vector<8x8x128xf32> to vector<8x1x128xf32>
    %136 = vector.shape_cast %135 : vector<8x1x128xf32> to vector<8x128xf32>
    %137 = tpu.concatenate %122, %124, %126, %128, %130, %132, %134, %136 in 1 : vector<8x128xf32>, vector<8x128xf32>, vector<8x128xf32>, vector<8x128xf32>, vector<8x128xf32>, vector<8x128xf32>, vector<8x128xf32>, vector<8x128xf32> -> vector<8x1024xf32>
    %138 = arith.truncf %137 : vector<8x1024xf32> to vector<8x1024xbf16>
    %c0_46 = arith.constant 0 : index
    %c0_47 = arith.constant 0 : index
    %139 = vector.load %arg8[%c0_46, %c0_47] : memref<1024x256xbf16, #tpu.memory_space<vmem>>, vector<1024x256xbf16>
    %cst_48 = arith.constant dense<0.000000e+00> : vector<8x256xf32>
    %140 = tpu.matmul %138, %139, %cst_48 {dimension_numbers = #tpu.dot_dimension_numbers<[1], [0], [0], [1], [0, 0, 1, 1], [], []>} : vector<8x1024xbf16>, vector<1024x256xbf16>, vector<8x256xf32> -> vector<8x256xf32>
    %c0_49 = arith.constant 0 : index
    %c0_50 = arith.constant 0 : index
    %141 = vector.load %arg9[%c0_49, %c0_50] : memref<1x256xf32, #tpu.memory_space<vmem>>, vector<1x256xf32>
    %142 = vector.broadcast %141 : vector<1x256xf32> to vector<8x256xf32>
    %143 = arith.addf %140, %142 : vector<8x256xf32>
    %cst_51 = arith.constant 0.000000e+00 : f32
    %144 = vector.broadcast %cst_51 : f32 to vector<8x256xf32>
    %145 = arith.maximumf %143, %144 : vector<8x256xf32>
    %146 = arith.truncf %145 : vector<8x256xf32> to vector<8x256xbf16>
    %c0_52 = arith.constant 0 : index
    %c0_53 = arith.constant 0 : index
    %147 = vector.load %arg10[%c0_52, %c0_53] : memref<256x64xbf16, #tpu.memory_space<vmem>>, vector<256x64xbf16>
    %cst_54 = arith.constant dense<0.000000e+00> : vector<8x64xf32>
    %148 = tpu.matmul %146, %147, %cst_54 {dimension_numbers = #tpu.dot_dimension_numbers<[1], [0], [0], [1], [0, 0, 1, 1], [], []>} : vector<8x256xbf16>, vector<256x64xbf16>, vector<8x64xf32> -> vector<8x64xf32>
    %c0_55 = arith.constant 0 : index
    %c0_56 = arith.constant 0 : index
    %149 = vector.load %arg11[%c0_55, %c0_56] : memref<1x64xf32, #tpu.memory_space<vmem>>, vector<1x64xf32>
    %150 = vector.broadcast %149 : vector<1x64xf32> to vector<8x64xf32>
    %151 = arith.addf %148, %150 : vector<8x64xf32>
    %cst_57 = arith.constant 0.000000e+00 : f32
    %152 = vector.broadcast %cst_57 : f32 to vector<8x64xf32>
    %153 = arith.maximumf %151, %152 : vector<8x64xf32>
    %154 = arith.truncf %153 : vector<8x64xf32> to vector<8x64xbf16>
    %c0_58 = arith.constant 0 : index
    %c0_59 = arith.constant 0 : index
    %155 = vector.load %arg12[%c0_58, %c0_59] : memref<64x1xbf16, #tpu.memory_space<vmem>>, vector<64x1xbf16>
    %cst_60 = arith.constant dense<0.000000e+00> : vector<8x1xf32>
    %156 = tpu.matmul %154, %155, %cst_60 {dimension_numbers = #tpu.dot_dimension_numbers<[1], [0], [0], [1], [0, 0, 1, 1], [], []>} : vector<8x64xbf16>, vector<64x1xbf16>, vector<8x1xf32> -> vector<8x1xf32>
    %c0_61 = arith.constant 0 : index
    %c0_62 = arith.constant 0 : index
    %157 = vector.load %arg13[%c0_61, %c0_62] : memref<1x1xf32, #tpu.memory_space<vmem>>, vector<1x1xf32>
    %158 = vector.broadcast %157 : vector<1x1xf32> to vector<8x1xf32>
    %159 = arith.addf %156, %158 : vector<8x1xf32>
    %c0_63 = arith.constant 0 : index
    %c0_64 = arith.constant 0 : index
    %160 = vector.load %arg14[%c0_63, %c0_64] : memref<8x1xf32, #tpu.memory_space<vmem>>, vector<8x1xf32>
    tpu.vector_store %arg14[%c0_63, %c0_64], %159 {strides = array<i32>} : memref<8x1xf32, #tpu.memory_space<vmem>>, vector<8x1xf32>,
    return
  }
  func.func @transform_0(%arg0: i32) -> (i32, i32) {
    %c0_i32 = arith.constant 0 : i32
    %c0_i32_0 = arith.constant 0 : i32
    return %arg0, %c0_i32 : i32, i32
  }
  func.func @transform_1(%arg0: i32) -> (i32, i32) {
    %c0_i32 = arith.constant 0 : i32
    %c0_i32_0 = arith.constant 0 : i32
    %c0_i32_1 = arith.constant 0 : i32
    return %c0_i32, %c0_i32_0 : i32, i32
  }
  func.func @transform_2(%arg0: i32) -> (i32, i32) {
    %c0_i32 = arith.constant 0 : i32
    %c0_i32_0 = arith.constant 0 : i32
    %c0_i32_1 = arith.constant 0 : i32
    return %c0_i32, %c0_i32_0 : i32, i32
  }
  func.func @transform_3(%arg0: i32) -> (i32, i32) {
    %c0_i32 = arith.constant 0 : i32
    %c0_i32_0 = arith.constant 0 : i32
    %c0_i32_1 = arith.constant 0 : i32
    return %c0_i32, %c0_i32_0 : i32, i32
  }
  func.func @transform_4(%arg0: i32) -> (i32, i32) {
    %c0_i32 = arith.constant 0 : i32
    %c0_i32_0 = arith.constant 0 : i32
    %c0_i32_1 = arith.constant 0 : i32
    return %c0_i32, %c0_i32_0 : i32, i32
  }
  func.func @transform_5(%arg0: i32) -> (i32, i32) {
    %c0_i32 = arith.constant 0 : i32
    %c0_i32_0 = arith.constant 0 : i32
    %c0_i32_1 = arith.constant 0 : i32
    return %c0_i32, %c0_i32_0 : i32, i32
  }
  func.func @transform_6(%arg0: i32) -> (i32, i32) {
    %c0_i32 = arith.constant 0 : i32
    %c0_i32_0 = arith.constant 0 : i32
    %c0_i32_1 = arith.constant 0 : i32
    return %c0_i32, %c0_i32_0 : i32, i32
  }
  func.func @transform_7(%arg0: i32) -> (i32, i32) {
    %c0_i32 = arith.constant 0 : i32
    %c0_i32_0 = arith.constant 0 : i32
    %c0_i32_1 = arith.constant 0 : i32
    return %c0_i32, %c0_i32_0 : i32, i32
  }
  func.func @transform_8(%arg0: i32) -> (i32, i32) {
    %c0_i32 = arith.constant 0 : i32
    %c0_i32_0 = arith.constant 0 : i32
    %c0_i32_1 = arith.constant 0 : i32
    return %c0_i32, %c0_i32_0 : i32, i32
  }
  func.func @transform_9(%arg0: i32) -> (i32, i32) {
    %c0_i32 = arith.constant 0 : i32
    %c0_i32_0 = arith.constant 0 : i32
    %c0_i32_1 = arith.constant 0 : i32
    return %c0_i32, %c0_i32_0 : i32, i32
  }
  func.func @transform_10(%arg0: i32) -> (i32, i32) {
    %c0_i32 = arith.constant 0 : i32
    %c0_i32_0 = arith.constant 0 : i32
    %c0_i32_1 = arith.constant 0 : i32
    return %c0_i32, %c0_i32_0 : i32, i32
  }
  func.func @transform_11(%arg0: i32) -> (i32, i32) {
    %c0_i32 = arith.constant 0 : i32
    %c0_i32_0 = arith.constant 0 : i32
    %c0_i32_1 = arith.constant 0 : i32
    return %c0_i32, %c0_i32_0 : i32, i32
  }
  func.func @transform_12(%arg0: i32) -> (i32, i32) {
    %c0_i32 = arith.constant 0 : i32
    %c0_i32_0 = arith.constant 0 : i32
    %c0_i32_1 = arith.constant 0 : i32
    return %c0_i32, %c0_i32_0 : i32, i32
  }
  func.func @transform_13(%arg0: i32) -> (i32, i32) {
    %c0_i32 = arith.constant 0 : i32
    %c0_i32_0 = arith.constant 0 : i32
    return %arg0, %c0_i32 : i32, i32
  }
}

</mosaic_0001>

<bundles_post_ra>
// kernel: model_forward.1
= control target key start
LH: loop header
LB: loop body
LE: loop exit
PB: predicated region body
PF: predicated region fallthrough
CT: control target
= control target key end

     0   :  { %s10371_s27 = smov 0   ;;  %s14286_s0 = inlined_call_operand.vmem [shape: bf16[2048,14], index: 0, kind: input, shape index: {}]   ;;  %s14287_s1 = inlined_call_operand.vmem [shape: bf16[14,32], index: 1, kind: input, shape index: {}]   ;;  %s14288_s2 = inlined_call_operand.vmem [shape: f32[1,32], index: 2, kind: input, shape index: {}]   ;;  %s14289_s3 = inlined_call_operand.vmem [shape: bf16[160,64], index: 3, kind: input, shape index: {}]   ;;  %s14290_s4 = inlined_call_operand.vmem [shape: f32[1,64], index: 4, kind: input, shape index: {}]   ;;  %s14291_s5 = inlined_call_operand.vmem [shape: bf16[192,128], index: 5, kind: input, shape index: {}]   ;;  %s14292_s6 = inlined_call_operand.vmem [shape: f32[1,128], index: 6, kind: input, shape index: {}]   ;;  %s14293_s7 = inlined_call_operand.vmem [shape: bf16[1024,256], index: 7, kind: input, shape index: {}]   ;;  %s14294_s8 = inlined_call_operand.vmem [shape: f32[1,256], index: 8, kind: input, shape index: {}]   ;;  %s14295_s9 = inlined_call_operand.vmem [shape: bf16[256,64], index: 9, kind: input, shape index: {}]   ;;  %s14296_s10 = inlined_call_operand.vmem [shape: f32[1,64], index: 10, kind: input, shape index: {}]   ;;  %s14297_s11 = inlined_call_operand.vmem [shape: bf16[64,1], index: 11, kind: input, shape index: {}]   ;;  %s14298_s12 = inlined_call_operand.<no memory space> [shape: f32[1,1], index: 12, kind: input, shape index: {}]   ;;  %s14299_s13 = inlined_call_operand.vmem [shape: f32[16,1], index: 13, kind: output, shape index: {}]  }
   0x1   :  { %v18_v0 = vstv %s14298_s12 }
   0x2   :  { %19 = vst [vmem:[#allocation2] sm:$0x1] %v18_v0 }
   0x3 LB: > { %s10377_s28 = sadd.s32 4294967295, %s10293_s27   ;;  %p8735_p0 = scmp.ge.s32.totalorder %s10293_s27, 1  ;;  %s10293_s27 = sphi %s10371_s27, %s25_s27  }
   0x4   : > { %p390_p1 = scmp.lt.s32.totalorder %s10293_s27, 3 }
   0x6   : > { %p391_p2 = pnand %p8735_p0, %p390_p1 }
   0x8   : > { %394 = sbr.rel (%p391_p2) target bundleno = 2112 (0x840), region = 72 }
   0xd   : > { %v8997_v1 = vld [vmem:[%s14287_s1] sm:$0xf]  ;;  %v9830_v2 = vld [vmem:[%s14287_s1] sm:$0x70]  ;;  %vm1096_vm0 = vcmask 1046528   ;;  %s8736_s15 = sshll.u32 %s10377_s28, 7 }
   0xe   : > { %v8998_v3 = vor.u32 %v9830_v2, %v8997_v1  ;;  %p434_p3 = scmp.lt.s32.totalorder %s8736_s15, 255  ;;  %vm903_vm1 = vcmask 113664   ;;  %v10436_v25 = vld [vmem:[%s14288_s2] ss:$0 sm:$0xff]  ;;  %vm1941_vm2 = vcmask 257024   ;;  %vm4055_vm3 = vcmask 1041409  }
   0xf   : > { %vm4057_vm4 = vcmask 1042434   ;;  %vm4059_vm5 = vcmask 1043459   ;;  %vm4061_vm6 = vcmask 1044484   ;;  %vm14359_vm7 = vcmask 1045509   ;;  %s10295_s24 = smov 96   ;;  %s10296_s25 = smov 64  }
  0x10   : > { %v1098_v4 = vsel %vm1096_vm0, %v8998_v3, 0  ;;  %s14541_s15 = smov (!%p434_p3, %s8736_s15), 255  ;;  %vm4065_vm8 = vcmask 1046534   ;;  %vm4067_vm9 = vcmask 1047559   ;;  %s10297_s26 = smov 32   ;;  %vm5826_vm14 = vcmask 261120  }
  0x11   : > { %1107 = vmatpush.bf16.msra.mxu0 %v1098_v4  ;;  %10001 = vmatpush.bf16.msra.mxu1 %v1098_v4  ;;  %s8737_s16 = sshll.u32 %s14541_s15, 2  ;;  %p439_p4 = scmp.lt.s32.totalorder %s10377_s28, 1 }
  0x12   : > { %10002 = vmatpush.bf16.msra.mxu2 %v1098_v4  ;;  %s10391_s19 = scalar_lea.vmem %s14286_s0, %s8737_s16 }
  0x13   : > { %v9766_v5 = vld [vmem:[%s10391_s19] sm:$0xff]  ;;  %v9767_v8 = vld [vmem:[%s10391_s19 + $0x8] sm:$0xff]  ;;  %v9768_v11 = vld [vmem:[%s10391_s19 + $0x10] sm:$0xff]  ;;  %s14543_s28 = smov (!%p439_p4, %s10377_s28), 1 }
  0x14   : > { %v9802_v6 = vld [vmem:[%s10391_s19 + $0x120] sm:$0xff]  ;;  %8999 = vmatmul.msk.bf16.vlgmr.msra.gmra.mxu0 %vm903_vm1, %v9766_v5  ;;  %v9803_v9 = vld [vmem:[%s10391_s19 + $0x128] sm:$0xff]  ;;  %v9804_v12 = vld [vmem:[%s10391_s19 + $0x130] sm:$0xff]  ;;  %s8738_s22 = sshll.u32 %s14543_s28, 3 }
  0x15   : > { %v9806_v7 = vld [vmem:[%s10391_s19 + $0x140] sm:$0xff]  ;;  %9035 = vmatmul.msk.bf16.vlgmr.msra.gmra.mxu1 %vm903_vm1, %v9802_v6  ;;  %v9807_v10 = vld [vmem:[%s10391_s19 + $0x148] sm:$0xff]  ;;  %v9808_v13 = vld [vmem:[%s10391_s19 + $0x150] sm:$0xff]  ;;  %s442_s29 = scalar_lea.vmem %s14299_s13, %s8738_s22 }
  0x16   : > { %9039 = vmatmul.msk.bf16.vlgmr.msra.gmra.mxu2 %vm903_vm1, %v9806_v7  ;;  %v9769_v14 = vld [vmem:[%s10391_s19 + $0x18] sm:$0xff]  ;;  %v9770_v17 = vld [vmem:[%s10391_s19 + $0x20] sm:$0xff]  ;;  %v9771_v19 = vld [vmem:[%s10391_s19 + $0x28] sm:$0xff] }
  0x17   : > { %v9805_v15 = vld [vmem:[%s10391_s19 + $0x138] sm:$0xff]  ;;  %v9810_v18 = vld [vmem:[%s10391_s19 + $0x160] sm:$0xff]  ;;  %v9811_v20 = vld [vmem:[%s10391_s19 + $0x168] sm:$0xff] }
  0x18   : > { %v9809_v16 = vld [vmem:[%s10391_s19 + $0x158] sm:$0xff]  ;;  %v9772_v21 = vld [vmem:[%s10391_s19 + $0x30] sm:$0xff]  ;;  %v9774_v26 = vld [vmem:[%s10391_s19 + $0x40] sm:$0xff] }
  0x19   : > { %v9812_v22 = vld [vmem:[%s10391_s19 + $0x170] sm:$0xff]  ;;  %v9773_v23 = vld [vmem:[%s10391_s19 + $0x38] sm:$0xff]  ;;  %v9814_v28 = vld [vmem:[%s10391_s19 + $0x180] sm:$0xff] }
  0x1a   : > { %v9813_v24 = vld [vmem:[%s10391_s19 + $0x178] sm:$0xff]  ;;  %v9775_v51 = vld [vmem:[%s10391_s19 + $0x48] sm:$0xff] }
  0x1b   : > { %v9815_v52 = vld [vmem:[%s10391_s19 + $0x188] sm:$0xff] }
  0x24   : > { %9000 = vmatmul.msk.bf16.gmra.mxu0 %vm903_vm1, %v9767_v8 }
  0x25   : > { %9036 = vmatmul.msk.bf16.gmra.mxu1 %vm903_vm1, %v9803_v9 }
  0x26   : > { %9040 = vmatmul.msk.bf16.gmra.mxu2 %vm903_vm1, %v9807_v10 }
  0x34   : > { %9001 = vmatmul.msk.bf16.gmra.mxu0 %vm903_vm1, %v9768_v11 }
  0x35   : > { %9037 = vmatmul.msk.bf16.gmra.mxu1 %vm903_vm1, %v9804_v12 }
  0x36   : > { %9041 = vmatmul.msk.bf16.gmra.mxu2 %vm903_vm1, %v9808_v13 }
  0x44   : > { %9002 = vmatmul.msk.bf16.gmra.mxu0 %vm903_vm1, %v9769_v14 }
  0x45   : > { %9038 = vmatmul.msk.bf16.gmra.mxu1 %vm903_vm1, %v9805_v15 }
  0x46   : > { %9042 = vmatmul.msk.bf16.gmra.mxu2 %vm903_vm1, %v9809_v16 }
  0x54   : > { %9003 = vmatmul.msk.bf16.gmra.mxu0 %vm903_vm1, %v9770_v17 }
  0x56   : > { %9043 = vmatmul.msk.bf16.gmra.mxu2 %vm903_vm1, %v9810_v18 }
  0x64   : > { %9004 = vmatmul.msk.bf16.gmra.mxu0 %vm903_vm1, %v9771_v19 }
  0x66   : > { %9044 = vmatmul.msk.bf16.gmra.mxu2 %vm903_vm1, %v9811_v20 }
  0x74   : > { %9005 = vmatmul.msk.bf16.gmra.mxu0 %vm903_vm1, %v9772_v21 }
  0x76   : > { %9045 = vmatmul.msk.bf16.gmra.mxu2 %vm903_vm1, %v9812_v22 }
  0x84   : > { %9006 = vmatmul.msk.bf16.gmra.mxu0 %vm903_vm1, %v9773_v23 }
  0x86   : > { %9046 = vmatmul.msk.bf16.gmra.mxu2 %vm903_vm1, %v9813_v24 }
  0x91   : > { %v1109_v27 = vpop.f32.mrf.mxu0 }
  0x92   : > { %v1110_v29 = vadd.f32 %v10436_v25, %v1109_v27  ;;  %v1289_v18 = vpop.f32.mrf.mxu1 }
  0x93   : > { %v10460_v23 = vadd.f32 %v10436_v25, %v1289_v18 }
  0x94   : > { %v1429_v30 = vmax.f32 %v1110_v29, 0.0  ;;  %9007 = vmatmul.msk.bf16.gmra.mxu0 %vm903_vm1, %v9774_v26 }
  0x96   : > { %9047 = vmatmul.msk.bf16.gmra.mxu2 %vm903_vm1, %v9814_v28  ;;  %v1685_v31 = vrot.slane %v1429_v30, 4  ;;  %v1942_v38 = vsel %vm1941_vm2, %v1429_v30, -inf }
  0x97   : > { %v1943_v45 = vrot.slane %v1942_v38, 4 }
  0x98   : > { %v1949_v32 = vsel %vm1941_vm2, %v1685_v31, -inf }
  0x99   : > { %v1309_v33 = vpop.f32.mrf.mxu2  ;;  %v1111_v34 = vpop.f32.mrf.mxu0  ;;  %v1950_v37 = vrot.slane %v1949_v32, 4  ;;  %v1944_v56 = vmax.f32 %v1942_v38, %v1943_v45 }
  0x9a   : > { %v1310_v35 = vadd.f32 %v10436_v25, %v1309_v33  ;;  %v1112_v36 = vadd.f32 %v10436_v25, %v1111_v34 }
  0x9b   : > { %v1951_v46 = vmax.f32 %v1949_v32, %v1950_v37  ;;  %v1945_v1 = vrot.slane %v1944_v56, 2  ;;  %v9776_v37 = vld [vmem:[%s10391_s19 + $0x50] sm:$0xff] }
  0x9c   : > { %v1509_v39 = vmax.f32 %v1310_v35, 0.0  ;;  %v1430_v40 = vmax.f32 %v1112_v36, 0.0 }
  0x9d   : > { %v1952_v58 = vrot.slane %v1951_v46, 2  ;;  %v1946_v11 = vmax.f32 %v1944_v56, %v1945_v1 }
  0x9e   : > { %v1765_v41 = vrot.slane %v1509_v39, 4  ;;  %v3062_v42 = vsel %vm1941_vm2, %v1509_v39, -inf  ;;  %v1686_v43 = vrot.slane %v1430_v40, 4  ;;  %v1956_v44 = vsel %vm1941_vm2, %v1430_v40, -inf }
  0x9f   : > { %v3063_v47 = vrot.slane %v3062_v42, 4  ;;  %v1957_v49 = vrot.slane %v1956_v44, 4  ;;  %v1953_v5 = vmax.f32 %v1951_v46, %v1952_v58  ;;  %v1947_v28 = vrot.slane %v1946_v11, 1 }
  0xa0   : > { %v3069_v48 = vsel %vm1941_vm2, %v1765_v41, -inf  ;;  %v1963_v50 = vsel %vm1941_vm2, %v1686_v43, -inf  ;;  %v9816_v43 = vld [vmem:[%s10391_s19 + $0x190] sm:$0xff] }
  0xa1   : > { %v3064_v53 = vmax.f32 %v3062_v42, %v3063_v47  ;;  %v3070_v54 = vrot.slane %v3069_v48, 4  ;;  %v1964_v55 = vrot.slane %v1963_v50, 4  ;;  %v1958_v57 = vmax.f32 %v1956_v44, %v1957_v49  ;;  %v1114_v61 = vpop.f32.mrf.mxu0  ;;  %v1311_v0 = vpop.f32.mrf.mxu2 }
  0xa2   : > { %v1312_v3 = vadd.f32 %v10436_v25, %v1311_v0  ;;  %v1115_v4 = vadd.f32 %v10436_v25, %v1114_v61  ;;  %v1954_v15 = vrot.slane %v1953_v5, 1 }
  0xa3   : > { %v3065_v59 = vrot.slane %v3064_v53, 2  ;;  %v3071_v60 = vmax.f32 %v3069_v48, %v3070_v54  ;;  %v1965_v62 = vmax.f32 %v1963_v50, %v1964_v55  ;;  %v1959_v2 = vrot.slane %v1958_v57, 2 }
  0xa4   : > { %9008 = vmatmul.msk.bf16.gmra.mxu0 %vm903_vm1, %v9775_v51  ;;  %v1510_v9 = vmax.f32 %v1312_v3, 0.0  ;;  %v1431_v10 = vmax.f32 %v1115_v4, 0.0  ;;  %v1955_v32 = vmax.f32 %v1953_v5, %v1954_v15  ;;  %v1948_v48 = vmax.f32 %v1946_v11, %v1947_v28 }
  0xa5   : > { %v3072_v63 = vrot.slane %v3071_v60, 2  ;;  %v3066_v6 = vmax.f32 %v3064_v53, %v3065_v59  ;;  %v1966_v8 = vrot.slane %v1965_v62, 2  ;;  %v1960_v12 = vmax.f32 %v1958_v57, %v1959_v2 }
  0xa6   : > { %9048 = vmatmul.msk.bf16.gmra.mxu2 %vm903_vm1, %v9815_v52  ;;  %v1766_v13 = vrot.slane %v1510_v9, 4  ;;  %v3076_v14 = vsel %vm1941_vm2, %v1510_v9, -inf  ;;  %v1687_v22 = vrot.slane %v1431_v10, 4  ;;  %v1970_v27 = vsel %vm1941_vm2, %v1431_v10, -inf  ;;  %v1291_v10 = vpop.f32.mrf.mxu1 }
  0xa7   : > { %v3073_v7 = vmax.f32 %v3071_v60, %v3072_v63  ;;  %v3067_v16 = vrot.slane %v3066_v6, 1  ;;  %v3077_v17 = vrot.slane %v3076_v14, 4  ;;  %v1967_v20 = vmax.f32 %v1965_v62, %v1966_v8 }
  0xa8   : > { %v3083_v21 = vsel %vm1941_vm2, %v1766_v13, -inf  ;;  %v1961_v29 = vrot.slane %v1960_v12, 1  ;;  %v1971_v30 = vrot.slane %v1970_v27, 4  ;;  %v1977_v31 = vsel %vm1941_vm2, %v1687_v22, -inf }
  0xa9   : > { %v3074_v19 = vrot.slane %v3073_v7, 1  ;;  %v3078_v24 = vmax.f32 %v3076_v14, %v3077_v17  ;;  %v3084_v26 = vrot.slane %v3083_v21, 4  ;;  %v1978_v35 = vrot.slane %v1977_v31, 4  ;;  %v1116_v36 = vpop.f32.mrf.mxu0  ;;  %v1314_v42 = vpop.f32.mrf.mxu2 }
  0xaa   : > { %v3068_v38 = vmax.f32 %v3066_v6, %v3067_v16  ;;  %v1968_v40 = vrot.slane %v1967_v20, 1  ;;  %v1972_v41 = vmax.f32 %v1970_v27, %v1971_v30  ;;  %v1315_v47 = vadd.f32 %v10436_v25, %v1314_v42 }
  0xab   : > { %v3079_v33 = vrot.slane %v3078_v24, 2  ;;  %v3085_v34 = vmax.f32 %v3083_v21, %v3084_v26  ;;  %v3075_v39 = vmax.f32 %v3073_v7, %v3074_v19  ;;  %v1979_v46 = vmax.f32 %v1977_v31, %v1978_v35 }
  0xac   : > { %v1962_v49 = vmax.f32 %v1960_v12, %v1961_v29  ;;  %v1973_v50 = vrot.slane %v1972_v41, 2  ;;  %v10468_v51 = vadd.f32 %v10436_v25, %v1116_v36  ;;  %v1511_v55 = vmax.f32 %v1315_v47, 0.0  ;;  %v9817_v47 = vld [vmem:[%s10391_s19 + $0x198] sm:$0xff] }
  0xad   : > { %v3080_v44 = vmax.f32 %v3078_v24, %v3079_v33  ;;  %v3086_v45 = vrot.slane %v3085_v34, 2  ;;  %v1980_v54 = vrot.slane %v1979_v46, 2  ;;  %v4056_v56 = vsel %vm4055_vm3, %v1955_v32, %v1948_v48 }
  0xae   : > { %v4202_v57 = vsel %vm4055_vm3, %v3075_v39, %v3068_v38  ;;  %v1974_v58 = vmax.f32 %v1972_v41, %v1973_v50  ;;  %v1969_v59 = vmax.f32 %v1967_v20, %v1968_v40  ;;  %v4058_v63 = vsel %vm4057_vm4, %v1962_v49, %v4056_v56 }
  0xaf   : > { %v3081_v52 = vrot.slane %v3080_v44, 1  ;;  %v3087_v53 = vmax.f32 %v3085_v34, %v3086_v45  ;;  %v1981_v62 = vmax.f32 %v1979_v46, %v1980_v54  ;;  %v1767_v1 = vrot.slane %v1511_v55, 4  ;;  %v9777_v46 = vld [vmem:[%s10391_s19 + $0x58] sm:$0xff] }
  0xb0   : > { %v1975_v0 = vrot.slane %v1974_v58, 1  ;;  %v3090_v2 = vsel %vm1941_vm2, %v1511_v55, -inf  ;;  %v1432_v6 = vmax.f32 %v10468_v51, 0.0  ;;  %v4060_v12 = vsel %vm4059_vm5, %v1969_v59, %v4058_v63 }
  0xb1   : > { %v3082_v60 = vmax.f32 %v3080_v44, %v3081_v52  ;;  %v3088_v61 = vrot.slane %v3087_v53, 1  ;;  %v1982_v5 = vrot.slane %v1981_v62, 1  ;;  %v3091_v8 = vrot.slane %v3090_v2, 4  ;;  %v1316_v30 = vpop.f32.mrf.mxu2 }
  0xb2   : > { %v1976_v7 = vmax.f32 %v1974_v58, %v1975_v0  ;;  %v3097_v9 = vsel %vm1941_vm2, %v1767_v1, -inf  ;;  %v1501_v15 = vmax.f32 %v10460_v23, 0.0  ;;  %v1292_v18 = vadd.f32 %v10436_v25, %v1291_v10  ;;  %v10505_v0 = vpop.f32.mrf.mxu0 }
  0xb3   : > { %v3089_v3 = vmax.f32 %v3087_v53, %v3088_v61  ;;  %v4203_v4 = vsel %vm4057_vm4, %v3082_v60, %v4202_v57  ;;  %v1983_v11 = vmax.f32 %v1981_v62, %v1982_v5  ;;  %v3098_v13 = vrot.slane %v3097_v9, 4 }
  0xb4   : > { %9009 = vmatmul.msk.bf16.gmra.mxu0 %vm903_vm1, %v9776_v37  ;;  %v4062_v16 = vsel %vm4061_vm6, %v1976_v7, %v4060_v12  ;;  %v3092_v17 = vmax.f32 %v3090_v2, %v3091_v8  ;;  %v1984_v21 = vsel %vm1941_vm2, %v1432_v6, -inf  ;;  %v1757_v27 = vrot.slane %v1501_v15, 4 }
  0xb5   : > { %v4204_v14 = vsel %vm4059_vm5, %v3089_v3, %v4203_v4  ;;  %v4064_v19 = vsel %vm14359_vm7, %v1983_v11, %v4062_v16  ;;  %v3099_v20 = vmax.f32 %v3097_v9, %v3098_v13  ;;  %v1985_v24 = vrot.slane %v1984_v21, 4 }
  0xb6   : > { %9049 = vmatmul.msk.bf16.gmra.mxu2 %vm903_vm1, %v9816_v43  ;;  %v3093_v22 = vrot.slane %v3092_v17, 2  ;;  %v1502_v23 = vmax.f32 %v1292_v18, 0.0  ;;  %v1317_v32 = vadd.f32 %v10436_v25, %v1316_v30  ;;  %v2950_v33 = vsel %vm1941_vm2, %v1501_v15, -inf  ;;  %v1294_v43 = vpop.f32.mrf.mxu1 }
  0xb7   : > { %v3100_v26 = vrot.slane %v3099_v20, 2  ;;  %v1986_v29 = vmax.f32 %v1984_v21, %v1985_v24  ;;  %v2957_v38 = vsel %vm1941_vm2, %v1757_v27, -inf  ;;  %v2951_v41 = vrot.slane %v2950_v33, 4 }
  0xb8   : > { %v3094_v28 = vmax.f32 %v3092_v17, %v3093_v22  ;;  %v1512_v37 = vmax.f32 %v1317_v32, 0.0  ;;  %v1758_v42 = vrot.slane %v1502_v23, 4  ;;  %v2964_v48 = vsel %vm1941_vm2, %v1502_v23, -inf }
  0xb9   : > { %v3101_v31 = vmax.f32 %v3099_v20, %v3100_v26  ;;  %v1987_v35 = vrot.slane %v1986_v29, 2  ;;  %v1295_v49 = vadd.f32 %v10436_v25, %v1294_v43  ;;  %v2958_v53 = vrot.slane %v2957_v38, 4  ;;  %v1319_v15 = vpop.f32.mrf.mxu2 }
  0xba   : > { %v3095_v34 = vrot.slane %v3094_v28, 1  ;;  %v1768_v45 = vrot.slane %v1512_v37, 4  ;;  %v3104_v55 = vsel %vm1941_vm2, %v1512_v37, -inf  ;;  %v2965_v58 = vrot.slane %v2964_v48, 4  ;;  %v10511_v23 = vpop.f32.mrf.mxu0 }
  0xbb   : > { %v3102_v36 = vrot.slane %v3101_v31, 1  ;;  %v1988_v40 = vmax.f32 %v1986_v29, %v1987_v35  ;;  %v3105_v57 = vrot.slane %v3104_v55, 4  ;;  %v2971_v60 = vsel %vm1941_vm2, %v1758_v42, -inf }
  0xbc   : > { %v3096_v39 = vmax.f32 %v3094_v28, %v3095_v34  ;;  %v3111_v59 = vsel %vm1941_vm2, %v1768_v45, -inf  ;;  %v1503_v61 = vmax.f32 %v1295_v49, 0.0  ;;  %v2952_v1 = vmax.f32 %v2950_v33, %v2951_v41 }
  0xbd   : > { %v3103_v44 = vmax.f32 %v3101_v31, %v3102_v36  ;;  %v1989_v52 = vrot.slane %v1988_v40, 1  ;;  %v3106_v63 = vmax.f32 %v3104_v55, %v3105_v57  ;;  %v2959_v2 = vmax.f32 %v2957_v38, %v2958_v53 }
  0xbe   : > { %v4205_v50 = vsel %vm4061_vm6, %v3096_v39, %v4204_v14  ;;  %v3112_v3 = vrot.slane %v3111_v59, 4  ;;  %v2966_v5 = vmax.f32 %v2964_v48, %v2965_v58  ;;  %v2972_v7 = vrot.slane %v2971_v60, 4  ;;  %v1296_v36 = vpop.f32.mrf.mxu1 }
  0xbf   : > { %v4206_v54 = vsel %vm14359_vm7, %v3103_v44, %v4205_v50  ;;  %v1990_v56 = vmax.f32 %v1988_v40, %v1989_v52  ;;  %v3107_v4 = vrot.slane %v3106_v63, 2  ;;  %v2978_v9 = vsel %vm1941_vm2, %v1503_v61, -inf }
  0xc0   : > { %v3113_v8 = vmax.f32 %v3111_v59, %v3112_v3  ;;  %v2953_v11 = vrot.slane %v2952_v1, 2  ;;  %v2960_v12 = vrot.slane %v2959_v2, 2  ;;  %v1759_v13 = vrot.slane %v1503_v61, 4 }
  0xc1   : > { %v10503_v62 = vsel %vm4065_vm8, %v1990_v56, %v4064_v19  ;;  %v3108_v10 = vmax.f32 %v3106_v63, %v3107_v4  ;;  %v1320_v17 = vadd.f32 %v10436_v25, %v1319_v15  ;;  %v2967_v18 = vrot.slane %v2966_v5, 2  ;;  %v1321_v55 = vpop.f32.mrf.mxu2 }
  0xc2   : > { %v3114_v14 = vrot.slane %v3113_v8, 2  ;;  %v2973_v19 = vmax.f32 %v2971_v60, %v2972_v7  ;;  %v2979_v20 = vrot.slane %v2978_v9, 4  ;;  %v2954_v24 = vmax.f32 %v2952_v1, %v2953_v11  ;;  %v10521_v1 = vpop.f32.mrf.mxu0 }
  0xc3   : > { %v3109_v16 = vrot.slane %v3108_v10, 1  ;;  %v2961_v26 = vmax.f32 %v2959_v2, %v2960_v12  ;;  %v2985_v27 = vsel %vm1941_vm2, %v1759_v13, -inf  ;;  %v1513_v30 = vmax.f32 %v1320_v17, 0.0  ;;  %v9818_v17 = vld [vmem:[%s10391_s19 + $0x1a0] sm:$0xff] }
  0xc4   : > { %9010 = vmatmul.msk.bf16.gmra.mxu0 %vm903_vm1, %v9777_v46  ;;  %v3115_v21 = vmax.f32 %v3113_v8, %v3114_v14  ;;  %v2968_v31 = vmax.f32 %v2966_v5, %v2967_v18  ;;  %v2974_v32 = vrot.slane %v2973_v19, 2  ;;  %v2980_v33 = vmax.f32 %v2978_v9, %v2979_v20 }
  0xc5   : > { %v3110_v22 = vmax.f32 %v3108_v10, %v3109_v16  ;;  %v2986_v35 = vrot.slane %v2985_v27, 4  ;;  %v1769_v37 = vrot.slane %v1513_v30, 4  ;;  %v3118_v38 = vsel %vm1941_vm2, %v1513_v30, -inf  ;;  %v9778_v16 = vld [vmem:[%s10391_s19 + $0x60] sm:$0xff] }
  0xc6   : > { %9050 = vmatmul.msk.bf16.gmra.mxu2 %vm903_vm1, %v9817_v47  ;;  %v3116_v28 = vrot.slane %v3115_v21, 1  ;;  %v2955_v39 = vrot.slane %v2954_v24, 1  ;;  %v2962_v40 = vrot.slane %v2961_v26, 1  ;;  %v3119_v42 = vrot.slane %v3118_v38, 4  ;;  %v1299_v4 = vpop.f32.mrf.mxu1 }
  0xc7   : > { %v4207_v29 = vsel %vm4065_vm8, %v3110_v22, %v4206_v54  ;;  %v3125_v43 = vsel %vm1941_vm2, %v1769_v37, -inf  ;;  %v2975_v44 = vmax.f32 %v2973_v19, %v2974_v32  ;;  %v2969_v46 = vrot.slane %v2968_v31, 1 }
  0xc8   : > { %v3117_v34 = vmax.f32 %v3115_v21, %v3116_v28  ;;  %v3126_v45 = vrot.slane %v3125_v43, 4  ;;  %v2981_v47 = vrot.slane %v2980_v33, 2  ;;  %v2987_v48 = vmax.f32 %v2985_v27, %v2986_v35 }
  0xc9   : > { %v3120_v49 = vmax.f32 %v3118_v38, %v3119_v42  ;;  %v2956_v50 = vmax.f32 %v2954_v24, %v2955_v39  ;;  %v2963_v52 = vmax.f32 %v2961_v26, %v2962_v40  ;;  %v1688_v53 = vrot.slane %v1432_v6, 4 }
  0xca   : > { %v10515_v41 = vsel %vm4067_vm9, %v3117_v34, %v4207_v29  ;;  %v3127_v54 = vmax.f32 %v3125_v43, %v3126_v45  ;;  %v2976_v57 = vrot.slane %v2975_v44, 1  ;;  %v1322_v59 = vadd.f32 %v10436_v25, %v1321_v55  ;;  %v1324_v29 = vpop.f32.mrf.mxu2  ;;  %v10540_v43 = vpop.f32.mrf.mxu0 }
  0xcb   : > { %v3121_v56 = vrot.slane %v3120_v49, 2  ;;  %v2970_v60 = vmax.f32 %v2968_v31, %v2969_v46  ;;  %v2982_v61 = vmax.f32 %v2980_v33, %v2981_v47  ;;  %v2988_v63 = vrot.slane %v2987_v48, 2 }
  0xcc   : > { %v3128_v58 = vrot.slane %v3127_v54, 2  ;;  %v4188_v2 = vsel %vm4055_vm3, %v2963_v52, %v2956_v50  ;;  %v1991_v3 = vsel %vm1941_vm2, %v1688_v53, -inf  ;;  %v1120_v51 = vadd.f32 %v10436_v25, %v10505_v0 }
  0xcd   : > { %v1514_v6 = vmax.f32 %v1322_v59, 0.0  ;;  %v3122_v5 = vmax.f32 %v3120_v49, %v3121_v56  ;;  %v2977_v8 = vmax.f32 %v2975_v44, %v2976_v57  ;;  %v1300_v9 = vadd.f32 %v10436_v25, %v1299_v4 }
  0xce   : > { %v3129_v7 = vmax.f32 %v3127_v54, %v3128_v58  ;;  %v4189_v12 = vsel %vm4057_vm4, %v2970_v60, %v4188_v2  ;;  %v2983_v13 = vrot.slane %v2982_v61, 1  ;;  %v2989_v14 = vmax.f32 %v2987_v48, %v2988_v63 }
  0xcf   : > { %v1770_v10 = vrot.slane %v1514_v6, 4  ;;  %v3132_v11 = vsel %vm1941_vm2, %v1514_v6, -inf  ;;  %v1992_v15 = vrot.slane %v1991_v3, 4  ;;  %v1297_v18 = vadd.f32 %v10436_v25, %v1296_v36 }
  0xd0   : > { %v1433_v0 = vmax.f32 %v1120_v51, 0.0  ;;  %v3133_v19 = vrot.slane %v3132_v11, 4  ;;  %v3123_v21 = vrot.slane %v3122_v5, 1  ;;  %v3130_v22 = vrot.slane %v3129_v7, 1 }
  0xd1   : > { %v3139_v20 = vsel %vm1941_vm2, %v1770_v10, -inf  ;;  %v4190_v26 = vsel %vm4059_vm5, %v2977_v8, %v4189_v12  ;;  %v1505_v27 = vmax.f32 %v1300_v9, 0.0  ;;  %v2984_v30 = vmax.f32 %v2982_v61, %v2983_v13 }
  0xd2   : > { %v3140_v24 = vrot.slane %v3139_v20, 4  ;;  %v3134_v28 = vmax.f32 %v3132_v11, %v3133_v19  ;;  %v2990_v31 = vrot.slane %v2989_v14, 1  ;;  %v1993_v32 = vmax.f32 %v1991_v3, %v1992_v15  ;;  %v10554_v8 = vpop.f32.mrf.mxu2  ;;  %v10566_v19 = vpop.f32.mrf.mxu0 }
  0xd3   : > { %v1504_v34 = vmax.f32 %v1297_v18, 0.0  ;;  %v1689_v35 = vrot.slane %v1433_v0, 4  ;;  %v1122_v36 = vadd.f32 %v10436_v25, %v10511_v23  ;;  %v3124_v38 = vmax.f32 %v3122_v5, %v3123_v21 }
  0xd4   : > { %9011 = vmatmul.msk.bf16.gmra.mxu0 %vm903_vm1, %v9778_v16  ;;  %v3141_v33 = vmax.f32 %v3139_v20, %v3140_v24  ;;  %v3135_v37 = vrot.slane %v3134_v28, 2  ;;  %v3131_v39 = vmax.f32 %v3129_v7, %v3130_v22  ;;  %v1325_v42 = vadd.f32 %v10436_v25, %v1324_v29  ;;  %v1301_v22 = vpop.f32.mrf.mxu1 }
  0xd5   : > { %v1761_v44 = vrot.slane %v1505_v27, 4  ;;  %v4191_v46 = vsel %vm4061_vm6, %v2984_v30, %v4190_v26  ;;  %v1994_v47 = vrot.slane %v1993_v32, 2  ;;  %v1998_v48 = vsel %vm1941_vm2, %v1433_v0, -inf }
  0xd6   : > { %9051 = vmatmul.msk.bf16.gmra.mxu2 %vm903_vm1, %v9818_v17  ;;  %v3142_v40 = vrot.slane %v3141_v33, 2  ;;  %v3136_v45 = vmax.f32 %v3134_v28, %v3135_v37  ;;  %v2005_v50 = vsel %vm1941_vm2, %v1689_v35, -inf  ;;  %v1434_v52 = vmax.f32 %v1122_v36, 0.0  ;;  %v9819_v28 = vld [vmem:[%s10391_s19 + $0x1a8] sm:$0xff] }
  0xd7   : > { %v1515_v53 = vmax.f32 %v1325_v42, 0.0  ;;  %v2991_v54 = vmax.f32 %v2989_v14, %v2990_v31  ;;  %v1760_v55 = vrot.slane %v1504_v34, 4  ;;  %v4209_v56 = vsel %vm4055_vm3, %v3131_v39, %v3124_v38 }
  0xd8   : > { %v3143_v49 = vmax.f32 %v3141_v33, %v3142_v40  ;;  %v3137_v23 = vrot.slane %v3136_v45, 1  ;;  %v2992_v58 = vsel %vm1941_vm2, %v1504_v34, -inf  ;;  %v3006_v59 = vsel %vm1941_vm2, %v1505_v27, -inf  ;;  %v9779_v27 = vld [vmem:[%s10391_s19 + $0x68] sm:$0xff] }
  0xd9   : > { %v3013_v60 = vsel %vm1941_vm2, %v1761_v44, -inf  ;;  %v1999_v63 = vrot.slane %v1998_v48, 4  ;;  %v2006_v2 = vrot.slane %v2005_v50, 4  ;;  %v1125_v51 = vadd.f32 %v10436_v25, %v10521_v1 }
  0xda   : > { %v3144_v57 = vrot.slane %v3143_v49, 1  ;;  %v3138_v61 = vmax.f32 %v3136_v45, %v3137_v23  ;;  %v10551_v6 = vmax.f32 %v1993_v32, %v1994_v47  ;;  %v1690_v4 = vrot.slane %v1434_v52, 4 }
  0xdb   : > { %v1771_v7 = vrot.slane %v1515_v53, 4  ;;  %v2993_v9 = vrot.slane %v2992_v58, 4  ;;  %v3007_v10 = vrot.slane %v3006_v59, 4  ;;  %v3014_v11 = vrot.slane %v3013_v60, 4 }
  0xdc   : > { %v3145_v3 = vmax.f32 %v3143_v49, %v3144_v57  ;;  %v4210_v5 = vsel %vm4057_vm4, %v3138_v61, %v4209_v56  ;;  %v2012_v12 = vsel %vm1941_vm2, %v1434_v52, -inf  ;;  %v2999_v13 = vsel %vm1941_vm2, %v1760_v55, -inf }
  0xdd   : > { %v3146_v14 = vsel %vm1941_vm2, %v1515_v53, -inf  ;;  %v3153_v1 = vsel %vm1941_vm2, %v1771_v7, -inf  ;;  %v10564_v16 = vsel %vm14359_vm7, %v2991_v54, %v4191_v46  ;;  %v2000_v17 = vmax.f32 %v1998_v48, %v1999_v63  ;;  %v1329_v54 = vpop.f32.mrf.mxu2 }
  0xde   : > { %v10561_v15 = vsel %vm4059_vm5, %v3145_v3, %v4210_v5  ;;  %v2007_v18 = vmax.f32 %v2005_v50, %v2006_v2  ;;  %v1435_v0 = vmax.f32 %v1125_v51, 0.0  ;;  %v2013_v20 = vrot.slane %v2012_v12, 4  ;;  %v1131_v5 = vpop.f32.mrf.mxu0 }
  0xdf   : > { %v2019_v21 = vsel %vm1941_vm2, %v1690_v4, -inf  ;;  %v3147_v24 = vrot.slane %v3146_v14, 4  ;;  %v3154_v26 = vrot.slane %v3153_v1, 4  ;;  %v3000_v29 = vrot.slane %v2999_v13, 4 }
  0xe0   : > { %v3008_v30 = vmax.f32 %v3006_v59, %v3007_v10  ;;  %v3015_v31 = vmax.f32 %v3013_v60, %v3014_v11  ;;  %v1302_v32 = vadd.f32 %v10436_v25, %v1301_v22  ;;  %v2994_v33 = vmax.f32 %v2992_v58, %v2993_v9 }
  0xe1   : > { %v3148_v34 = vmax.f32 %v3146_v14, %v3147_v24  ;;  %v3155_v35 = vmax.f32 %v3153_v1, %v3154_v26  ;;  %v2008_v36 = vrot.slane %v2007_v18, 2  ;;  %v2020_v37 = vrot.slane %v2019_v21, 4 }
  0xe2   : > { %v1691_v38 = vrot.slane %v1435_v0, 4  ;;  %v2026_v39 = vsel %vm1941_vm2, %v1435_v0, -inf  ;;  %v2001_v40 = vrot.slane %v2000_v17, 2  ;;  %v2014_v42 = vmax.f32 %v2012_v12, %v2013_v20 }
  0xe3   : > { %v3149_v44 = vrot.slane %v3148_v34, 2  ;;  %v3156_v45 = vrot.slane %v3155_v35, 2  ;;  %v3001_v46 = vmax.f32 %v2999_v13, %v3000_v29  ;;  %v3009_v47 = vrot.slane %v3008_v30, 2 }
  0xe4   : > { %9012 = vmatmul.msk.bf16.gmra.mxu0 %vm903_vm1, %v9779_v27  ;;  %v3016_v48 = vrot.slane %v3015_v31, 2  ;;  %v1506_v49 = vmax.f32 %v1302_v32, 0.0  ;;  %v1996_v50 = vrot.slane %v10551_v6, 1  ;;  %v2027_v52 = vrot.slane %v2026_v39, 4 }
  0xe5   : > { %v3150_v23 = vmax.f32 %v3148_v34, %v3149_v44  ;;  %v3157_v53 = vmax.f32 %v3155_v35, %v3156_v45  ;;  %v2995_v55 = vrot.slane %v2994_v33, 2  ;;  %v2009_v56 = vmax.f32 %v2007_v18, %v2008_v36 }
  0xe6   : > { %9052 = vmatmul.msk.bf16.gmra.mxu2 %vm903_vm1, %v9819_v28  ;;  %v2021_v57 = vmax.f32 %v2019_v21, %v2020_v37  ;;  %v2033_v58 = vsel %vm1941_vm2, %v1691_v38, -inf  ;;  %v2002_v59 = vmax.f32 %v2000_v17, %v2001_v40  ;;  %v2015_v60 = vrot.slane %v2014_v42, 2 }
  0xe7   : > { %v3151_v61 = vrot.slane %v3150_v23, 1  ;;  %v3158_v63 = vrot.slane %v3157_v53, 1  ;;  %v3002_v2 = vrot.slane %v3001_v46, 2  ;;  %v3010_v3 = vmax.f32 %v3008_v30, %v3009_v47 }
  0xe8   : > { %v3017_v51 = vmax.f32 %v3015_v31, %v3016_v48  ;;  %v3020_v4 = vsel %vm1941_vm2, %v1506_v49, -inf  ;;  %v2028_v7 = vmax.f32 %v2026_v39, %v2027_v52  ;;  %v2034_v9 = vrot.slane %v2033_v58, 4  ;;  %v1134_v52 = vpop.f32.mrf.mxu0 }
  0xe9   : > { %v3152_v10 = vmax.f32 %v3150_v23, %v3151_v61  ;;  %v3159_v11 = vmax.f32 %v3157_v53, %v3158_v63  ;;  %v10579_v12 = vmax.f32 %v10551_v6, %v1996_v50  ;;  %v2010_v13 = vrot.slane %v2009_v56, 1  ;;  %v9780_v23 = vld [vmem:[%s10391_s19 + $0x70] sm:$0xff] }
  0xea   : > { %v2022_v14 = vrot.slane %v2021_v57, 2  ;;  %v1762_v1 = vrot.slane %v1506_v49, 4  ;;  %v10581_v17 = vmax.f32 %v2994_v33, %v2995_v55  ;;  %v2003_v18 = vrot.slane %v2002_v59, 1  ;;  %v9820_v53 = vld [vmem:[%s10391_s19 + $0x1b0] sm:$0xff] }
  0xeb   : > { %v2016_v0 = vmax.f32 %v2014_v42, %v2015_v60  ;;  %v4212_v20 = vsel %vm4061_vm6, %v3152_v10, %v10561_v15  ;;  %v3011_v21 = vrot.slane %v3010_v3, 1  ;;  %v3021_v22 = vrot.slane %v3020_v4, 4 }
  0xec   : > { %v10586_v24 = vsel %vm14359_vm7, %v3159_v11, %v4212_v20  ;;  %v1127_v26 = vadd.f32 %v10436_v25, %v10540_v43  ;;  %v10590_v6 = vmax.f32 %v3001_v46, %v3002_v2  ;;  %v3018_v27 = vrot.slane %v3017_v51, 1  ;;  %v1331_v43 = vpop.f32.mrf.mxu2 }
  0xed   : > { %v2029_v28 = vrot.slane %v2028_v7, 2  ;;  %v2035_v29 = vmax.f32 %v2033_v58, %v2034_v9  ;;  %v2011_v30 = vmax.f32 %v2009_v56, %v2010_v13  ;;  %v2023_v31 = vmax.f32 %v2021_v57, %v2022_v14 }
  0xee   : > { %v3027_v32 = vsel %vm1941_vm2, %v1762_v1, -inf  ;;  %v1330_v33 = vadd.f32 %v10436_v25, %v1329_v54  ;;  %v2997_v15 = vrot.slane %v10581_v17, 1  ;;  %v2004_v34 = vmax.f32 %v2002_v59, %v2003_v18 }
  0xef   : > { %v2017_v35 = vrot.slane %v2016_v0, 1  ;;  %v1130_v36 = vadd.f32 %v10436_v25, %v10566_v19  ;;  %v3012_v37 = vmax.f32 %v3010_v3, %v3011_v21  ;;  %v3022_v38 = vmax.f32 %v3020_v4, %v3021_v22 }
  0xf0   : > { %v1436_v39 = vmax.f32 %v1127_v26, 0.0  ;;  %v1517_v40 = vmax.f32 %v1330_v33, 0.0  ;;  %v3019_v42 = vmax.f32 %v3017_v51, %v3018_v27  ;;  %v3028_v44 = vrot.slane %v3027_v32, 4 }
  0xf1   : > { %v2030_v45 = vmax.f32 %v2028_v7, %v2029_v28  ;;  %v2036_v46 = vrot.slane %v2035_v29, 2  ;;  %v3004_v47 = vrot.slane %v10590_v6, 1  ;;  %v4069_v48 = vsel %vm4055_vm3, %v2011_v30, %v2004_v34 }
  0xf2   : > { %v2024_v49 = vrot.slane %v2023_v31, 1  ;;  %v1773_v50 = vrot.slane %v1517_v40, 4  ;;  %v2018_v19 = vmax.f32 %v2016_v0, %v2017_v35  ;;  %v1437_v54 = vmax.f32 %v1130_v36, 0.0 }
  0xf3   : > { %v1132_v55 = vadd.f32 %v10436_v25, %v1131_v5  ;;  %v1332_v56 = vadd.f32 %v10436_v25, %v1331_v43  ;;  %v3023_v57 = vrot.slane %v3022_v38, 2  ;;  %v1692_v58 = vrot.slane %v1436_v39, 4 }
  0xf4   : > { %v3174_v59 = vsel %vm1941_vm2, %v1517_v40, -inf  ;;  %v3181_v60 = vsel %vm1941_vm2, %v1773_v50, -inf  ;;  %9013 = vmatmul.msk.bf16.gmra.mxu0 %vm903_vm1, %v9780_v23  ;;  %v10608_v61 = vsel %vm4055_vm3, %v3019_v42, %v3012_v37  ;;  %v10610_v63 = vmax.f32 %v3027_v32, %v3028_v44  ;;  %v1334_v27 = vpop.f32.mrf.mxu2 }
  0xf5   : > { %v2031_v2 = vrot.slane %v2030_v45, 1  ;;  %v2037_v3 = vmax.f32 %v2035_v29, %v2036_v46  ;;  %v2025_v51 = vmax.f32 %v2023_v31, %v2024_v49  ;;  %v2040_v4 = vsel %vm1941_vm2, %v1436_v39, -inf  ;;  %v1136_v39 = vpop.f32.mrf.mxu0  ;;  %v1304_v46 = vpop.f32.mrf.mxu1 }
  0xf6   : > { %9053 = vmatmul.msk.bf16.gmra.mxu2 %vm903_vm1, %v9820_v53  ;;  %v3175_v5 = vrot.slane %v3174_v59, 4  ;;  %v3182_v7 = vrot.slane %v3181_v60, 4  ;;  %v4070_v9 = vsel %vm4057_vm4, %v2018_v19, %v4069_v48  ;;  %v1693_v10 = vrot.slane %v1437_v54, 4 }
  0xf7   : > { %v1438_v11 = vmax.f32 %v1132_v55, 0.0  ;;  %v1518_v13 = vmax.f32 %v1332_v56, 0.0  ;;  %v10614_v14 = vmax.f32 %v3022_v38, %v3023_v57  ;;  %v2047_v1 = vsel %vm1941_vm2, %v1692_v58, -inf }
  0xf8   : > { %v3176_v18 = vmax.f32 %v3174_v59, %v3175_v5  ;;  %v3183_v0 = vmax.f32 %v3181_v60, %v3182_v7  ;;  %v2032_v20 = vmax.f32 %v2030_v45, %v2031_v2  ;;  %v2038_v21 = vrot.slane %v2037_v3, 1 }
  0xf9   : > { %v2041_v22 = vrot.slane %v2040_v4, 4  ;;  %v1774_v26 = vrot.slane %v1518_v13, 4  ;;  %v3030_v28 = vrot.slane %v10610_v63, 2  ;;  %v4071_v29 = vsel %vm4059_vm5, %v2025_v51, %v4070_v9 }
  0xfa   : > { %v2054_v30 = vsel %vm1941_vm2, %v1437_v54, -inf  ;;  %v3188_v31 = vsel %vm1941_vm2, %v1518_v13, -inf  ;;  %v2048_v32 = vrot.slane %v2047_v1, 4  ;;  %v2061_v33 = vsel %vm1941_vm2, %v1693_v10, -inf }
  0xfb   : > { %v1694_v34 = vrot.slane %v1438_v11, 4  ;;  %v2068_v35 = vsel %vm1941_vm2, %v1438_v11, -inf  ;;  %v3177_v36 = vrot.slane %v3176_v18, 2  ;;  %v3184_v43 = vrot.slane %v3183_v0, 2 }
  0xfc   : > { %v3189_v37 = vrot.slane %v3188_v31, 4  ;;  %v3195_v38 = vsel %vm1941_vm2, %v1774_v26, -inf  ;;  %v2039_v40 = vmax.f32 %v2037_v3, %v2038_v21  ;;  %v4072_v42 = vsel %vm4061_vm6, %v2032_v20, %v4071_v29 }
  0xfd   : > { %v2042_v44 = vmax.f32 %v2040_v4, %v2041_v22  ;;  %v2055_v45 = vrot.slane %v2054_v30, 4  ;;  %v2062_v48 = vrot.slane %v2061_v33, 4  ;;  %v2069_v49 = vrot.slane %v2068_v35, 4 }
  0xfe   : > { %v3190_v50 = vmax.f32 %v3188_v31, %v3189_v37  ;;  %v3196_v23 = vrot.slane %v3195_v38, 4  ;;  %v10626_v53 = vadd.f32 %v10436_v25, %v1304_v46  ;;  %v2049_v19 = vmax.f32 %v2047_v1, %v2048_v32  ;;  %v10635_v1 = vpop.f32.mrf.mxu2 }
  0xff   : > { %v2075_v54 = vsel %vm1941_vm2, %v1694_v34, -inf  ;;  %v1135_v55 = vadd.f32 %v10436_v25, %v1134_v52  ;;  %v3178_v56 = vmax.f32 %v3176_v18, %v3177_v36  ;;  %v3185_v57 = vmax.f32 %v3183_v0, %v3184_v43  ;;  %v1139_v34 = vpop.f32.mrf.mxu0 }
 0x100   : > { %v3191_v58 = vrot.slane %v3190_v50, 2  ;;  %v3197_v59 = vmax.f32 %v3195_v38, %v3196_v23  ;;  %v10631_v60 = vsel %vm14359_vm7, %v2039_v40, %v4072_v42  ;;  %v2043_v2 = vrot.slane %v2042_v44, 2 }
 0x101   : > { %v2056_v3 = vmax.f32 %v2054_v30, %v2055_v45  ;;  %v1439_v51 = vmax.f32 %v1135_v55, 0.0  ;;  %v2063_v4 = vmax.f32 %v2061_v33, %v2062_v48  ;;  %v2070_v5 = vmax.f32 %v2068_v35, %v2069_v49 }
 0x102   : > { %v3198_v7 = vrot.slane %v3197_v59, 2  ;;  %v1335_v9 = vadd.f32 %v10436_v25, %v1334_v27  ;;  %v2076_v10 = vrot.slane %v2075_v54, 4  ;;  %v3192_v11 = vmax.f32 %v3190_v50, %v3191_v58 }
 0x103   : > { %v1695_v13 = vrot.slane %v1439_v51, 4  ;;  %v2082_v52 = vsel %vm1941_vm2, %v1439_v51, -inf  ;;  %v2050_v18 = vrot.slane %v2049_v19, 2  ;;  %v3179_v0 = vrot.slane %v3178_v56, 1 }
 0x104   : > { %v3186_v20 = vrot.slane %v3185_v57, 1  ;;  %v1519_v21 = vmax.f32 %v1335_v9, 0.0  ;;  %v2057_v22 = vrot.slane %v2056_v3, 2  ;;  %v2083_v26 = vrot.slane %v2082_v52, 4 }
 0x105   : > { %v2089_v29 = vsel %vm1941_vm2, %v1695_v13, -inf  ;;  %v1137_v30 = vadd.f32 %v10436_v25, %v1136_v39  ;;  %v10639_v31 = vmax.f32 %v2042_v44, %v2043_v2  ;;  %v2064_v27 = vrot.slane %v2063_v4, 2 }
 0x106   : > { %v2071_v32 = vrot.slane %v2070_v5, 2  ;;  %v3199_v33 = vmax.f32 %v3197_v59, %v3198_v7  ;;  %v2077_v35 = vmax.f32 %v2075_v54, %v2076_v10  ;;  %v3193_v36 = vrot.slane %v3192_v11, 1  ;;  %v1339_v13 = vpop.f32.mrf.mxu2 }
 0x107   : > { %v1775_v43 = vrot.slane %v1519_v21, 4  ;;  %v3202_v37 = vsel %vm1941_vm2, %v1519_v21, -inf  ;;  %v3180_v38 = vmax.f32 %v3178_v56, %v3179_v0  ;;  %v3187_v40 = vmax.f32 %v3185_v57, %v3186_v20  ;;  %v10650_v20 = vld [vmem:[%s14288_s2] ss:$0 sm:$0xff] }
 0x108   : > { %v2090_v42 = vrot.slane %v2089_v29, 4  ;;  %v1440_v45 = vmax.f32 %v1137_v30, 0.0  ;;  %v2058_v46 = vmax.f32 %v2056_v3, %v2057_v22  ;;  %v2084_v48 = vmax.f32 %v2082_v52, %v2083_v26 }
 0x109   : > { %v3203_v49 = vrot.slane %v3202_v37, 4  ;;  %v3209_v25 = vsel %vm1941_vm2, %v1775_v43, -inf  ;;  %v2051_v39 = vmax.f32 %v2049_v19, %v2050_v18  ;;  %v2065_v44 = vmax.f32 %v2063_v4, %v2064_v27  ;;  %v1141_v27 = vpop.f32.mrf.mxu0 }
 0x10a   : > { %v3200_v50 = vrot.slane %v3199_v33, 1  ;;  %v3210_v23 = vrot.slane %v3209_v25, 4  ;;  %v2072_v55 = vmax.f32 %v2070_v5, %v2071_v32  ;;  %v2078_v58 = vrot.slane %v2077_v35, 2 }
 0x10b   : > { %v3194_v54 = vmax.f32 %v3192_v11, %v3193_v36  ;;  %v3204_v59 = vmax.f32 %v3202_v37, %v3203_v49  ;;  %v4216_v2 = vsel %vm4055_vm3, %v3187_v40, %v3180_v38  ;;  %v2091_v51 = vmax.f32 %v2089_v29, %v2090_v42 }
 0x10c   : > { %v3211_v56 = vmax.f32 %v3209_v25, %v3210_v23  ;;  %v1696_v57 = vrot.slane %v1440_v45, 4  ;;  %v2045_v7 = vrot.slane %v10639_v31, 1  ;;  %v2059_v3 = vrot.slane %v2058_v46, 1 }
 0x10d   : > { %v2085_v9 = vrot.slane %v2084_v48, 2  ;;  %v3205_v10 = vrot.slane %v3204_v59, 2  ;;  %v2066_v52 = vrot.slane %v2065_v44, 1  ;;  %v3201_v19 = vmax.f32 %v3199_v33, %v3200_v50 }
 0x10e   : > { %v3212_v4 = vrot.slane %v3211_v56, 2  ;;  %v2096_v18 = vsel %vm1941_vm2, %v1440_v45, -inf  ;;  %v2079_v5 = vmax.f32 %v2077_v35, %v2078_v58  ;;  %v4217_v11 = vsel %vm4057_vm4, %v3194_v54, %v4216_v2  ;;  %v9781_v54 = vld [vmem:[%s10391_s19 + $0x78] sm:$0xff] }
 0x10f   : > { %v3206_v0 = vmax.f32 %v3204_v59, %v3205_v10  ;;  %v1140_v21 = vadd.f32 %v10650_v20, %v1139_v34  ;;  %v2073_v22 = vrot.slane %v2072_v55, 1  ;;  %v2092_v26 = vrot.slane %v2091_v51, 2  ;;  %v9821_v59 = vld [vmem:[%s10391_s19 + $0x1b8] sm:$0xff]  ;;  %9014 = vmatmul.msk.bf16.gmra.mxu0 %vm903_vm1, %v9781_v54 }
 0x110   : > { %v3213_v29 = vmax.f32 %v3211_v56, %v3212_v4  ;;  %v2103_v30 = vsel %vm1941_vm2, %v1696_v57, -inf  ;;  %v2052_v32 = vrot.slane %v2051_v39, 1  ;;  %v2086_v33 = vmax.f32 %v2084_v48, %v2085_v9  ;;  %9054 = vmatmul.msk.bf16.gmra.mxu2 %vm903_vm1, %v9821_v59 }
 0x111   : > { %v3207_v35 = vrot.slane %v3206_v0, 1  ;;  %v2097_v36 = vrot.slane %v2096_v18, 4  ;;  %v2060_v43 = vmax.f32 %v2058_v46, %v2059_v3  ;;  %v2067_v37 = vmax.f32 %v2065_v44, %v2066_v52  ;;  %v1341_v52 = vpop.f32.mrf.mxu2 }
 0x112   : > { %v3214_v38 = vrot.slane %v3213_v29, 1  ;;  %v4218_v40 = vsel %vm4059_vm5, %v3201_v19, %v4217_v11  ;;  %v2080_v42 = vrot.slane %v2079_v5, 1  ;;  %v2104_v34 = vrot.slane %v2103_v30, 4 }
 0x113   : > { %v3208_v45 = vmax.f32 %v3206_v0, %v3207_v35  ;;  %v1441_v49 = vmax.f32 %v1140_v21, 0.0  ;;  %v2074_v25 = vmax.f32 %v2072_v55, %v2073_v22  ;;  %v2093_v50 = vmax.f32 %v2091_v51, %v2092_v26 }
 0x114   : > { %v3215_v23 = vmax.f32 %v3213_v29, %v3214_v38  ;;  %v1340_v58 = vadd.f32 %v10650_v20, %v1339_v13  ;;  %v2087_v48 = vrot.slane %v2086_v33, 1  ;;  %v2098_v56 = vmax.f32 %v2096_v18, %v2097_v36  ;;  %v1144_v29 = vpop.f32.mrf.mxu0 }
 0x115   : > { %v4219_v2 = vsel %vm4061_vm6, %v3208_v45, %v4218_v40  ;;  %v1697_v46 = vrot.slane %v1441_v49, 4  ;;  %v3025_v44 = vrot.slane %v10614_v14, 1  ;;  %v2046_v57 = vmax.f32 %v10639_v31, %v2045_v7 }
 0x116   : > { %v10661_v3 = vmax.f32 %v2051_v39, %v2052_v32  ;;  %v10664_v9 = vsel %vm14359_vm7, %v3215_v23, %v4219_v2  ;;  %v4076_v55 = vsel %vm4055_vm3, %v2067_v37, %v2060_v43  ;;  %v2081_v51 = vmax.f32 %v2079_v5, %v2080_v42 }
 0x117   : > { %v2105_v10 = vmax.f32 %v2103_v30, %v2104_v34  ;;  %v2110_v13 = vsel %vm1941_vm2, %v1441_v49, -inf  ;;  %v4077_v19 = vsel %vm4057_vm4, %v2074_v25, %v4076_v55  ;;  %v2094_v4 = vrot.slane %v2093_v50, 1 }
 0x118   : > { %v1521_v31 = vmax.f32 %v1340_v58, 0.0  ;;  %v1142_v39 = vadd.f32 %v10650_v20, %v1141_v27  ;;  %v2088_v7 = vmax.f32 %v2086_v33, %v2087_v48  ;;  %v2099_v18 = vrot.slane %v2098_v56, 2 }
 0x119   : > { %v2117_v11 = vsel %vm1941_vm2, %v1697_v46, -inf  ;;  %v1342_v0 = vadd.f32 %v10650_v20, %v1341_v52  ;;  %v10676_v21 = vsel %vm4065_vm8, %v2046_v57, %v10631_v60  ;;  %v2111_v5 = vrot.slane %v2110_v13, 4 }
 0x11a   : > { %v1777_v22 = vrot.slane %v1521_v31, 4  ;;  %v3230_v26 = vsel %vm1941_vm2, %v1521_v31, -inf  ;;  %v4078_v30 = vsel %vm4059_vm5, %v2081_v51, %v4077_v19  ;;  %v2106_v32 = vrot.slane %v2105_v10, 2 }
 0x11b   : > { %v3231_v35 = vrot.slane %v3230_v26, 4  ;;  %v1442_v27 = vmax.f32 %v1142_v39, 0.0  ;;  %v2095_v33 = vmax.f32 %v2093_v50, %v2094_v4  ;;  %v2118_v36 = vrot.slane %v2117_v11, 4 }
 0x11c   : > { %v3237_v43 = vsel %vm1941_vm2, %v1777_v22, -inf  ;;  %v1522_v37 = vmax.f32 %v1342_v0, 0.0  ;;  %v4079_v38 = vsel %vm4061_vm6, %v2088_v7, %v4078_v30  ;;  %v2100_v40 = vmax.f32 %v2098_v56, %v2099_v18 }
 0x11d   : > { %v3232_v60 = vmax.f32 %v3230_v26, %v3231_v35  ;;  %v3238_v42 = vrot.slane %v3237_v43, 4  ;;  %v2112_v45 = vmax.f32 %v2110_v13, %v2111_v5  ;;  %v1698_v34 = vrot.slane %v1442_v27, 4  ;;  %v10687_v13 = vpop.f32.mrf.mxu2  ;;  %v1146_v26 = vpop.f32.mrf.mxu0 }
 0x11e   : > { %v2124_v49 = vsel %vm1941_vm2, %v1442_v27, -inf  ;;  %v1778_v25 = vrot.slane %v1522_v37, 4  ;;  %v2107_v23 = vmax.f32 %v2105_v10, %v2106_v32  ;;  %v1145_v59 = vadd.f32 %v10650_v20, %v1144_v29 }
 0x11f   : > { %v3233_v58 = vrot.slane %v3232_v60, 2  ;;  %v3239_v54 = vmax.f32 %v3237_v43, %v3238_v42  ;;  %v2119_v50 = vmax.f32 %v2117_v11, %v2118_v36  ;;  %v2125_v48 = vrot.slane %v2124_v49, 4 }
 0x120   : > { %v3244_v2 = vsel %vm1941_vm2, %v1522_v37, -inf  ;;  %v3251_v46 = vsel %vm1941_vm2, %v1778_v25, -inf  ;;  %v4080_v56 = vsel %vm14359_vm7, %v2095_v33, %v4079_v38  ;;  %v2101_v57 = vrot.slane %v2100_v40, 1 }
 0x121   : > { %v3234_v55 = vmax.f32 %v3232_v60, %v3233_v58  ;;  %v3240_v51 = vrot.slane %v3239_v54, 2  ;;  %v2113_v52 = vrot.slane %v2112_v45, 2  ;;  %v2131_v10 = vsel %vm1941_vm2, %v1698_v34, -inf  ;;  %v9782_v34 = vld [vmem:[%s10391_s19 + $0x80] sm:$0xff] }
 0x122   : > { %v3245_v19 = vrot.slane %v3244_v2, 4  ;;  %v3252_v4 = vrot.slane %v3251_v46, 4  ;;  %v2108_v31 = vrot.slane %v2107_v23, 1  ;;  %v1443_v18 = vmax.f32 %v1145_v59, 0.0  ;;  %9015 = vmatmul.msk.bf16.gmra.mxu0 %vm903_vm1, %v9782_v34 }
 0x123   : > { %v3235_v39 = vrot.slane %v3234_v55, 1  ;;  %v3241_v7 = vmax.f32 %v3239_v54, %v3240_v51  ;;  %v2120_v11 = vrot.slane %v2119_v50, 2  ;;  %v2126_v0 = vmax.f32 %v2124_v49, %v2125_v48  ;;  %v9822_v49 = vld [vmem:[%s10391_s19 + $0x1c0] sm:$0xff] }
 0x124   : > { %v3246_v5 = vmax.f32 %v3244_v2, %v3245_v19  ;;  %v3253_v22 = vmax.f32 %v3251_v46, %v3252_v4  ;;  %v2102_v29 = vmax.f32 %v2100_v40, %v2101_v57  ;;  %v2132_v32 = vrot.slane %v2131_v10, 4  ;;  %9055 = vmatmul.msk.bf16.gmra.mxu2 %vm903_vm1, %v9822_v49 }
 0x125   : > { %v3242_v30 = vrot.slane %v3241_v7, 1  ;;  %v1699_v35 = vrot.slane %v1443_v18, 4  ;;  %v2114_v27 = vmax.f32 %v2112_v45, %v2113_v52  ;;  %v2138_v43 = vsel %vm1941_vm2, %v1443_v18, -inf }
 0x126   : > { %v3247_v33 = vrot.slane %v3246_v5, 2  ;;  %v3254_v36 = vrot.slane %v3253_v22, 2  ;;  %v3236_v37 = vmax.f32 %v3234_v55, %v3235_v39  ;;  %v2139_v60 = vrot.slane %v2138_v43, 4 }
 0x127   : > { %v3243_v38 = vmax.f32 %v3241_v7, %v3242_v30  ;;  %v2145_v42 = vsel %vm1941_vm2, %v1699_v35, -inf  ;;  %v2121_v25 = vmax.f32 %v2119_v50, %v2120_v11  ;;  %v2127_v58 = vrot.slane %v2126_v0, 2 }
 0x128   : > { %v3248_v54 = vmax.f32 %v3246_v5, %v3247_v33  ;;  %v3255_v59 = vmax.f32 %v3253_v22, %v3254_v36  ;;  %v2109_v40 = vmax.f32 %v2107_v23, %v2108_v31  ;;  %v4081_v48 = vsel %vm4065_vm8, %v2102_v29, %v4080_v56 }
 0x129   : > { %v2133_v2 = vmax.f32 %v2131_v10, %v2132_v32  ;;  %v3734_v45 = vlaneseq  ;;  %v2140_v55 = vmax.f32 %v2138_v43, %v2139_v60  ;;  %v2146_v51 = vrot.slane %v2145_v42, 4  ;;  %v10708_v10 = vpop.f32.mrf.mxu2 }
 0x12a   : > { %v3249_v46 = vrot.slane %v3248_v54, 1  ;;  %v3256_v57 = vrot.slane %v3255_v59, 1  ;;  %v10700_v50 = vmax.f32 %v10610_v63, %v3030_v28  ;;  %v2115_v52 = vrot.slane %v2114_v27, 1 }
 0x12b   : > { %v4223_v23 = vsel %vm4055_vm3, %v3243_v38, %v3236_v37  ;;  %v10706_v56 = vsel %vm4067_vm9, %v10579_v12, %v10503_v62  ;;  %v2122_v19 = vrot.slane %v2121_v25, 1  ;;  %v2128_v4 = vmax.f32 %v2126_v0, %v2127_v58  ;;  %v1149_v0 = vpop.f32.mrf.mxu0 }
 0x12c   : > { %14366 = vst [vmem:[#allocation3_spill] sm:$0xff] %v10706_v56  ;;  %v3250_v31 = vmax.f32 %v3248_v54, %v3249_v46  ;;  %v3257_v39 = vmax.f32 %v3255_v59, %v3256_v57  ;;  %v2134_v7 = vrot.slane %v2133_v2, 2  ;;  %v10710_v18 = vshrl.u32 %v3734_v45, 7 }
 0x12d   : > { %v10715_v63 = vsel %vm4067_vm9, %v10661_v3, %v10676_v21  ;;  %v10718_v28 = vsel %vm4067_vm9, %v2109_v40, %v4081_v48  ;;  %v2141_v12 = vrot.slane %v2140_v55, 2  ;;  %v2147_v11 = vmax.f32 %v2145_v42, %v2146_v51 }
 0x12e   : > { %14367 = vst [vmem:[#allocation4_spill] sm:$0xff] %v10718_v28  ;;  %v4224_v62 = vsel %vm4057_vm4, %v3250_v31, %v4223_v23  ;;  %v4897_v5 = vrot.slane %v10715_v63, 1  ;;  %v14300_v22 = vrot.slane %v10706_v56, 1  ;;  %v4898_v29 = vrot.slane %v10718_v28, 1 }
 0x12f   : > { %vm4928_vm10 = vcmp.lt.s32.totalorder %v10710_v18, 7  ;;  %v1345_v3 = vadd.f32 %v10650_v20, %v10687_v13  ;;  %v2116_v21 = vmax.f32 %v2114_v27, %v2115_v52  ;;  %v2123_v30 = vmax.f32 %v2121_v25, %v2122_v19 }
 0x130   : > { %v10728_v32 = vsel %vm4059_vm5, %v3257_v39, %v4224_v62  ;;  %v1147_v35 = vadd.f32 %v10650_v20, %v1146_v26  ;;  %v2129_v33 = vrot.slane %v2128_v4, 1  ;;  %v4958_v36 = vsel %vm4928_vm10, %v4897_v5, %v4898_v29 }
 0x131   : > { %v4959_v43 = vsel %vm4928_vm10, %v14300_v22, %v4897_v5  ;;  %v1523_v37 = vmax.f32 %v1345_v3, 0.0  ;;  %v2135_v13 = vmax.f32 %v2133_v2, %v2134_v7  ;;  %v1150_v60 = vadd.f32 %v10650_v20, %v1149_v0  ;;  %v1349_v46 = vpop.f32.mrf.mxu2 }
 0x132   : > { %v10026_v27 = vpack.i.bf16 %v4958_v36, %v4959_v43  ;;  %v1444_v38 = vmax.f32 %v1147_v35, 0.0  ;;  %v2142_v42 = vmax.f32 %v2140_v55, %v2141_v12  ;;  %v2148_v34 = vrot.slane %v2147_v11, 2 }
 0x133   : > { %v1779_v26 = vrot.slane %v1523_v37, 4  ;;  %v3258_v49 = vsel %vm1941_vm2, %v1523_v37, -inf  ;;  %v1445_v59 = vmax.f32 %v1150_v60, 0.0  ;;  %v3026_v40 = vmax.f32 %v10614_v14, %v3025_v44  ;;  %v1151_v14 = vpop.f32.mrf.mxu0 }
 0x134   : > { %10027 = vrot.lane.b32.xlu1 %v10026_v27, %s10295_s24  ;;  %v3259_v25 = vrot.slane %v3258_v49, 4  ;;  %v1700_v58 = vrot.slane %v1444_v38, 4  ;;  %v2152_v54 = vsel %vm1941_vm2, %v1444_v38, -inf  ;;  %v4083_v48 = vsel %vm4055_vm3, %v2123_v30, %v2116_v21 }
 0x135   : > { %v3265_v2 = vsel %vm1941_vm2, %v1779_v26, -inf  ;;  %v2153_v45 = vrot.slane %v2152_v54, 4  ;;  %v2130_v57 = vmax.f32 %v2128_v4, %v2129_v33  ;;  %v2136_v23 = vrot.slane %v2135_v13, 1 }
 0x136   : > { %v3260_v55 = vmax.f32 %v3258_v49, %v3259_v25  ;;  %v3266_v51 = vrot.slane %v3265_v2, 4  ;;  %v2159_v52 = vsel %vm1941_vm2, %v1700_v58, -inf  ;;  %v1701_v39 = vrot.slane %v1445_v59, 4  ;;  %v9783_v58 = vld [vmem:[%s10391_s19 + $0x88] sm:$0xff] }
 0x137   : > { %v2154_v19 = vmax.f32 %v2152_v54, %v2153_v45  ;;  %v2160_v31 = vrot.slane %v2159_v52, 4  ;;  %v2143_v7 = vrot.slane %v2142_v42, 1  ;;  %v2149_v62 = vmax.f32 %v2147_v11, %v2148_v34  ;;  %v9823_v54 = vld [vmem:[%s10391_s19 + $0x1c8] sm:$0xff]  ;;  %9016 = vmatmul.msk.bf16.gmra.mxu0 %vm903_vm1, %v9783_v58 }
 0x138   : > { %v3261_v12 = vrot.slane %v3260_v55, 2  ;;  %v3267_v5 = vmax.f32 %v3265_v2, %v3266_v51  ;;  %v2166_v3 = vsel %vm1941_vm2, %v1445_v59, -inf  ;;  %v2173_v21 = vsel %vm1941_vm2, %v1701_v39, -inf  ;;  %9056 = vmatmul.msk.bf16.gmra.mxu2 %vm903_vm1, %v9823_v54 }
 0x139   : > { %v2155_v44 = vrot.slane %v2154_v19, 2  ;;  %v2161_v0 = vmax.f32 %v2159_v52, %v2160_v31  ;;  %v1507_v4 = vmax.f32 %v10626_v53, 0.0  ;;  %v4084_v30 = vsel %vm4057_vm4, %v2130_v57, %v4083_v48  ;;  %v1351_v57 = vpop.f32.mrf.mxu2 }
 0x13a   : > { %v3262_v35 = vmax.f32 %v3260_v55, %v3261_v12  ;;  %v3268_v33 = vrot.slane %v3267_v5, 2  ;;  %v2137_v36 = vmax.f32 %v2135_v13, %v2136_v23  ;;  %v2167_v37 = vrot.slane %v2166_v3, 4 }
 0x13b   : > { %v2156_v43 = vmax.f32 %v2154_v19, %v2155_v44  ;;  %v2162_v11 = vrot.slane %v2161_v0, 2  ;;  %v2150_v27 = vrot.slane %v2149_v62, 1  ;;  %v2174_v34 = vrot.slane %v2173_v21, 4 }
 0x13c   : > { %v3263_v38 = vrot.slane %v3262_v35, 1  ;;  %v3269_v60 = vmax.f32 %v3267_v5, %v3268_v33  ;;  %v10756_v26 = vmax.f32 %v10581_v17, %v2997_v15  ;;  %v2144_v53 = vmax.f32 %v2142_v42, %v2143_v7 }
 0x13d   : > { %v2157_v49 = vrot.slane %v2156_v43, 1  ;;  %v2163_v25 = vmax.f32 %v2161_v0, %v2162_v11  ;;  %v10763_v13 = vmax.f32 %v10590_v6, %v3004_v47  ;;  %v3032_v59 = vrot.slane %v10700_v50, 1 }
 0x13e   : > { %v3264_v48 = vmax.f32 %v3262_v35, %v3263_v38  ;;  %v3270_v2 = vrot.slane %v3269_v60, 1  ;;  %v10768_v45 = vsel %vm4057_vm4, %v3026_v40, %v10608_v61  ;;  %v10771_v17 = vsel %vm1941_vm2, %v1507_v4, -inf }
 0x13f   : > { %14368 = vst [vmem:[#allocation5_spill] sm:$0xff] %v10763_v13  ;;  %v4085_v15 = vsel %vm4059_vm5, %v2137_v36, %v4084_v30  ;;  %v2168_v42 = vmax.f32 %v2166_v3, %v2167_v37  ;;  %v2151_v6 = vmax.f32 %v2149_v62, %v2150_v27  ;;  %v2175_v51 = vmax.f32 %v2173_v21, %v2174_v34  ;;  %v1154_v62 = vpop.f32.mrf.mxu0 }
 0x140   : > { %v3271_v47 = vmax.f32 %v3269_v60, %v3270_v2  ;;  %v4226_v55 = vsel %vm4061_vm6, %v3264_v48, %v10728_v32  ;;  %v4086_v61 = vsel %vm4061_vm6, %v2144_v53, %v4085_v15  ;;  %v2158_v40 = vmax.f32 %v2156_v43, %v2157_v49 }
 0x141   : > { %v2164_v52 = vrot.slane %v2163_v25, 1  ;;  %v1350_v23 = vadd.f32 %v10650_v20, %v1349_v46  ;;  %v10781_v19 = vmax.f32 %v10700_v50, %v3032_v59  ;;  %v1152_v39 = vadd.f32 %v10650_v20, %v1151_v14  ;;  %v1354_v48 = vpop.f32.mrf.mxu2 }
 0x142   : > { %v10784_v31 = vsel %vm14359_vm7, %v3271_v47, %v4226_v55  ;;  %v1352_v7 = vadd.f32 %v10650_v20, %v1351_v57  ;;  %v10788_v12 = vrot.slane %v1507_v4, 4  ;;  %v3035_v32 = vrot.slane %v10771_v17, 4 }
 0x143   : > { %14369 = vst [vmem:[#allocation6_spill] sm:$0xff] %v10784_v31  ;;  %v2169_v5 = vrot.slane %v2168_v42, 2  ;;  %v1525_v44 = vmax.f32 %v1350_v23, 0.0  ;;  %v2176_v0 = vrot.slane %v2175_v51, 2  ;;  %v1446_v3 = vmax.f32 %v1152_v39, 0.0 }
 0x144   : > { %v1526_v46 = vmax.f32 %v1352_v7, 0.0  ;;  %v4087_v50 = vsel %vm14359_vm7, %v2151_v6, %v4086_v61  ;;  %v2165_v21 = vmax.f32 %v2163_v25, %v2164_v52  ;;  %v1155_v38 = vadd.f32 %v10650_v20, %v1154_v62 }
 0x145   : > { %v1781_v30 = vrot.slane %v1525_v44, 4  ;;  %v3286_v35 = vsel %vm1941_vm2, %v1525_v44, -inf  ;;  %v4088_v14 = vsel %vm4065_vm8, %v2158_v40, %v4087_v50  ;;  %v1702_v36 = vrot.slane %v1446_v3, 4 }
 0x146   : > { %v3287_v33 = vrot.slane %v3286_v35, 4  ;;  %v2180_v4 = vsel %vm1941_vm2, %v1446_v3, -inf  ;;  %v1782_v43 = vrot.slane %v1526_v46, 4  ;;  %v3300_v27 = vsel %vm1941_vm2, %v1526_v46, -inf }
 0x147   : > { %v3293_v11 = vsel %vm1941_vm2, %v1781_v30, -inf  ;;  %v2181_v37 = vrot.slane %v2180_v4, 4  ;;  %v2187_v53 = vsel %vm1941_vm2, %v1702_v36, -inf  ;;  %v3301_v49 = vrot.slane %v3300_v27, 4  ;;  %v1156_v7 = vpop.f32.mrf.mxu0  ;;  %v9824_v30 = vld [vmem:[%s10391_s19 + $0x1d0] sm:$0xff] }
 0x148   : > { %v3288_v60 = vmax.f32 %v3286_v35, %v3287_v33  ;;  %v3294_v34 = vrot.slane %v3293_v11, 4  ;;  %v2170_v25 = vmax.f32 %v2168_v42, %v2169_v5  ;;  %v3307_v54 = vsel %vm1941_vm2, %v1782_v43, -inf  ;;  %9057 = vmatmul.msk.bf16.gmra.mxu2 %vm903_vm1, %v9824_v30 }
 0x149   : > { %v2182_v58 = vmax.f32 %v2180_v4, %v2181_v37  ;;  %v10801_v59 = vsel %vm4067_vm9, %v2165_v21, %v4088_v14  ;;  %v3302_v57 = vmax.f32 %v3300_v27, %v3301_v49  ;;  %v3308_v6 = vrot.slane %v3307_v54, 4  ;;  %v9784_v21 = vld [vmem:[%s10391_s19 + $0x90] sm:$0xff] }
 0x14a   : > { %v3289_v2 = vrot.slane %v3288_v60, 2  ;;  %v3295_v15 = vmax.f32 %v3293_v11, %v3294_v34  ;;  %v2177_v47 = vmax.f32 %v2175_v51, %v2176_v0  ;;  %v2188_v55 = vrot.slane %v2187_v53, 4  ;;  %9017 = vmatmul.msk.bf16.gmra.mxu0 %vm903_vm1, %v9784_v21 }
 0x14b   : > { %v10036_v61 = vpack.i.bf16 %v10801_v59, %v10718_v28  ;;  %v1447_v40 = vmax.f32 %v1155_v38, 0.0  ;;  %v3303_v23 = vrot.slane %v3302_v57, 2  ;;  %v3309_v39 = vmax.f32 %v3307_v54, %v3308_v6 }
 0x14c   : > { %v3290_v52 = vmax.f32 %v3288_v60, %v3289_v2  ;;  %v3296_v42 = vrot.slane %v3295_v15, 2  ;;  %v2171_v62 = vrot.slane %v2170_v25, 1  ;;  %v2183_v5 = vrot.slane %v2182_v58, 2 }
 0x14d   : > { %10037 = vrot.lane.b32.xlu2 %v10036_v61, %s10296_s25  ;;  %v1703_v44 = vrot.slane %v1447_v40, 4  ;;  %v2194_v51 = vsel %vm1941_vm2, %v1447_v40, -inf  ;;  %v3304_v46 = vmax.f32 %v3302_v57, %v3303_v23  ;;  %v3310_v50 = vrot.slane %v3309_v39, 2 }
 0x14e   : > { %v3291_v0 = vrot.slane %v3290_v52, 1  ;;  %v3297_v3 = vmax.f32 %v3295_v15, %v3296_v42  ;;  %v2178_v35 = vrot.slane %v2177_v47, 1  ;;  %v2189_v14 = vmax.f32 %v2187_v53, %v2188_v55  ;;  %v1356_v55 = vpop.f32.mrf.mxu2 }
 0x14f   : > { %v2195_v33 = vrot.slane %v2194_v51, 4  ;;  %v2201_v36 = vsel %vm1941_vm2, %v1703_v44, -inf  ;;  %v3305_v11 = vrot.slane %v3304_v46, 1  ;;  %v3311_v37 = vmax.f32 %v3309_v39, %v3310_v50  ;;  %v1159_v23 = vpop.f32.mrf.mxu0 }
 0x150   : > { %v3292_v4 = vmax.f32 %v3290_v52, %v3291_v0  ;;  %v3298_v43 = vrot.slane %v3297_v3, 1  ;;  %v10814_v27 = vsel %vm1941_vm2, %v10788_v12, -inf  ;;  %v10819_v38 = vsel %vm4059_vm5, %v10781_v19, %v10768_v45 }
 0x151   : > { %v2184_v60 = vmax.f32 %v2182_v58, %v2183_v5  ;;  %v2202_v34 = vrot.slane %v2201_v36, 4  ;;  %v10824_v53 = vmax.f32 %v10771_v17, %v3035_v32  ;;  %v3306_v54 = vmax.f32 %v3304_v46, %v3305_v11 }
 0x152   : > { %v3299_v49 = vmax.f32 %v3297_v3, %v3298_v43  ;;  %v3312_v2 = vrot.slane %v3311_v37, 1  ;;  %v2172_v15 = vmax.f32 %v2170_v25, %v2171_v62  ;;  %v2179_v57 = vmax.f32 %v2177_v47, %v2178_v35 }
 0x153   : > { %v2190_v6 = vrot.slane %v2189_v14, 2  ;;  %v2196_v12 = vmax.f32 %v2194_v51, %v2195_v33  ;;  %v4609_v45 = vrot.slane %v10718_v28, 7  ;;  %v14301_v19 = vrot.slane %v10801_v59, 7 }
 0x154   : > { %v4230_v61 = vsel %vm4055_vm3, %v3299_v49, %v3292_v4  ;;  %v3313_v40 = vmax.f32 %v3311_v37, %v3312_v2  ;;  %v2185_v58 = vrot.slane %v2184_v60, 1  ;;  %v2203_v17 = vmax.f32 %v2201_v36, %v2202_v34 }
 0x155   : > { %v4231_v52 = vsel %vm4057_vm4, %v3306_v54, %v4230_v61  ;;  %v14302_v32 = vrot.slane %v10715_v63, 7  ;;  %vm4639_vm11 = vcmp.lt.s32.totalorder %v10710_v18, 1  ;;  %v1355_v25 = vadd.f32 %v10650_v20, %v1354_v48 }
 0x156   : > { %v10834_v47 = vsel %vm4059_vm5, %v3313_v40, %v4231_v52  ;;  %v1157_v42 = vadd.f32 %v10650_v20, %v1156_v7  ;;  %v2191_v39 = vmax.f32 %v2189_v14, %v2190_v6  ;;  %v2197_v62 = vrot.slane %v2196_v12, 2 }
 0x157   : > { %v4668_v5 = vsel %vm4639_vm11, %v4609_v45, %v14301_v19  ;;  %v4669_v44 = vsel %vm4639_vm11, %v14302_v32, %v4609_v45  ;;  %v1527_v48 = vmax.f32 %v1355_v25, 0.0  ;;  %v1357_v3 = vadd.f32 %v10650_v20, %v1356_v55  ;;  %v1359_v55 = vpop.f32.mrf.mxu2 }
 0x158   : > { %v10031_v51 = vpack.i.bf16 %v4668_v5, %v4669_v44  ;;  %v1448_v0 = vmax.f32 %v1157_v42, 0.0  ;;  %v3042_v7 = vrot.slane %v10814_v27, 4  ;;  %v4090_v46 = vsel %vm4055_vm3, %v2179_v57, %v2172_v15 }
 0x159   : > { %v2204_v50 = vrot.slane %v2203_v17, 2  ;;  %v1160_v21 = vadd.f32 %v10650_v20, %v1159_v23  ;;  %v1783_v30 = vrot.slane %v1527_v48, 4  ;;  %v3314_v35 = vsel %vm1941_vm2, %v1527_v48, -inf }
 0x15a   : > { %10032 = vrot.lane.b32.xlu1 %v10031_v51, %s10297_s26  ;;  %v1704_v14 = vrot.slane %v1448_v0, 4  ;;  %v2208_v33 = vsel %vm1941_vm2, %v1448_v0, -inf  ;;  %v2186_v36 = vmax.f32 %v2184_v60, %v2185_v58  ;;  %v2198_v4 = vmax.f32 %v2196_v12, %v2197_v62  ;;  %v1161_v0 = vpop.f32.mrf.mxu0 }
 0x15b   : > { %v3315_v43 = vrot.slane %v3314_v35, 4  ;;  %v2209_v11 = vrot.slane %v2208_v33, 4  ;;  %v2192_v37 = vrot.slane %v2191_v39, 1  ;;  %v3321_v34 = vsel %vm1941_vm2, %v1783_v30, -inf }
 0x15c   : > { %v2215_v49 = vsel %vm1941_vm2, %v1704_v14, -inf  ;;  %v1528_v54 = vmax.f32 %v1357_v3, 0.0  ;;  %v2205_v2 = vmax.f32 %v2203_v17, %v2204_v50  ;;  %v3322_v57 = vrot.slane %v3321_v34, 4 }
 0x15d   : > { %v3316_v15 = vmax.f32 %v3314_v35, %v3315_v43  ;;  %v1449_v6 = vmax.f32 %v1160_v21, 0.0  ;;  %v2210_v61 = vmax.f32 %v2208_v33, %v2209_v11  ;;  %v2216_v40 = vrot.slane %v2215_v49, 4  ;;  %v9825_v11 = vld [vmem:[%s10391_s19 + $0x1d8] sm:$0xff] }
 0x15e   : > { %v1784_v45 = vrot.slane %v1528_v54, 4  ;;  %v3328_v52 = vsel %vm1941_vm2, %v1528_v54, -inf  ;;  %v2199_v60 = vrot.slane %v2198_v4, 1  ;;  %v3323_v58 = vmax.f32 %v3321_v34, %v3322_v57  ;;  %9058 = vmatmul.msk.bf16.gmra.mxu2 %vm903_vm1, %v9825_v11 }
 0x15f   : > { %v3317_v12 = vrot.slane %v3316_v15, 2  ;;  %v3329_v25 = vrot.slane %v3328_v52, 4  ;;  %v3037_v42 = vrot.slane %v10824_v53, 2  ;;  %v2193_v23 = vmax.f32 %v2191_v39, %v2192_v37  ;;  %v9785_v39 = vld [vmem:[%s10391_s19 + $0x98] sm:$0xff] }
 0x160   : > { %v4091_v62 = vsel %vm4057_vm4, %v2186_v36, %v4090_v46  ;;  %v3335_v17 = vsel %vm1941_vm2, %v1784_v45, -inf  ;;  %v3324_v44 = vrot.slane %v3323_v58, 2  ;;  %v1705_v48 = vrot.slane %v1449_v6, 4  ;;  %9018 = vmatmul.msk.bf16.gmra.mxu0 %vm903_vm1, %v9785_v39 }
 0x161   : > { %v3318_v5 = vmax.f32 %v3316_v15, %v3317_v12  ;;  %v3330_v51 = vmax.f32 %v3328_v52, %v3329_v25  ;;  %v2206_v3 = vrot.slane %v2205_v2, 1  ;;  %v2211_v50 = vrot.slane %v2210_v61, 2 }
 0x162   : > { %v2217_v21 = vmax.f32 %v2215_v49, %v2216_v40  ;;  %v3336_v30 = vrot.slane %v3335_v17, 4  ;;  %v2200_v35 = vmax.f32 %v2198_v4, %v2199_v60  ;;  %v3325_v33 = vmax.f32 %v3323_v58, %v3324_v44  ;;  %v1361_v58 = vpop.f32.mrf.mxu2 }
 0x163   : > { %v3319_v14 = vrot.slane %v3318_v5, 1  ;;  %v3331_v43 = vrot.slane %v3330_v51, 2  ;;  %v4092_v46 = vsel %vm4059_vm5, %v2193_v23, %v4091_v62  ;;  %v2222_v37 = vsel %vm1941_vm2, %v1449_v6, -inf }
 0x164   : > { %v3337_v36 = vmax.f32 %v3335_v17, %v3336_v30  ;;  %v1360_v34 = vadd.f32 %v10650_v20, %v1359_v55  ;;  %v3326_v15 = vrot.slane %v3325_v33, 1  ;;  %v2229_v45 = vsel %vm1941_vm2, %v1705_v48, -inf }
 0x165   : > { %v3320_v54 = vmax.f32 %v3318_v5, %v3319_v14  ;;  %v3332_v57 = vmax.f32 %v3330_v51, %v3331_v43  ;;  %v2207_v4 = vmax.f32 %v2205_v2, %v2206_v3  ;;  %v2212_v49 = vmax.f32 %v2210_v61, %v2211_v50 }
 0x166   : > { %v2218_v40 = vrot.slane %v2217_v21, 2  ;;  %v3338_v52 = vrot.slane %v3337_v36, 2  ;;  %v4093_v60 = vsel %vm4061_vm6, %v2200_v35, %v4092_v46  ;;  %v3327_v12 = vmax.f32 %v3325_v33, %v3326_v15  ;;  %v1164_v35 = vpop.f32.mrf.mxu0 }
 0x167   : > { %v4233_v6 = vsel %vm4061_vm6, %v3320_v54, %v10834_v47  ;;  %v3333_v55 = vrot.slane %v3332_v57, 1  ;;  %v10872_v25 = vmax.f32 %v10814_v27, %v3042_v7  ;;  %v2223_v62 = vrot.slane %v2222_v37, 4 }
 0x168   : > { %v3339_v23 = vmax.f32 %v3337_v36, %v3338_v52  ;;  %v2230_v17 = vrot.slane %v2229_v45, 4  ;;  %v4234_v2 = vsel %vm14359_vm7, %v3327_v12, %v4233_v6  ;;  %v1529_v5 = vmax.f32 %v1360_v34, 0.0 }
 0x169   : > { %v3334_v61 = vmax.f32 %v3332_v57, %v3333_v55  ;;  %v1162_v44 = vadd.f32 %v10650_v20, %v1161_v0  ;;  %v4094_v51 = vsel %vm14359_vm7, %v2207_v4, %v4093_v60  ;;  %v2213_v48 = vrot.slane %v2212_v49, 1 }
 0x16a   : > { %v2219_v47 = vmax.f32 %v2217_v21, %v2218_v40  ;;  %v3340_v3 = vrot.slane %v3339_v23, 1  ;;  %v1785_v30 = vrot.slane %v1529_v5, 4  ;;  %v3342_v27 = vsel %vm1941_vm2, %v1529_v5, -inf }
 0x16b   : > { %v4235_v50 = vsel %vm4065_vm8, %v3334_v61, %v4234_v2  ;;  %v1450_v7 = vmax.f32 %v1162_v44, 0.0  ;;  %v2224_v33 = vmax.f32 %v2222_v37, %v2223_v62  ;;  %v2231_v43 = vmax.f32 %v2229_v45, %v2230_v17 }
 0x16c   : > { %v3341_v14 = vmax.f32 %v3339_v23, %v3340_v3  ;;  %v3343_v39 = vrot.slane %v3342_v27, 4  ;;  %v3349_v11 = vsel %vm1941_vm2, %v1785_v30, -inf  ;;  %v1362_v36 = vadd.f32 %v10650_v20, %v1361_v58  ;;  %v1364_v23 = vpop.f32.mrf.mxu2 }
 0x16d   : > { %v1706_v46 = vrot.slane %v1450_v7, 4  ;;  %v2236_v0 = vsel %vm1941_vm2, %v1450_v7, -inf  ;;  %v2214_v21 = vmax.f32 %v2212_v49, %v2213_v48  ;;  %v3350_v15 = vrot.slane %v3349_v11, 4 }
 0x16e   : > { %v10883_v34 = vsel %vm4067_vm9, %v3341_v14, %v4235_v50  ;;  %v3344_v54 = vmax.f32 %v3342_v27, %v3343_v39  ;;  %v2237_v57 = vrot.slane %v2236_v0, 4  ;;  %v1530_v40 = vmax.f32 %v1362_v36, 0.0 }
 0x16f   : > { %14370 = vst [vmem:[#allocation7_spill] sm:$0xff] %v10883_v34  ;;  %v2243_v4 = vsel %vm1941_vm2, %v1706_v46, -inf  ;;  %v1165_v37 = vadd.f32 %v10650_v20, %v1164_v35  ;;  %v2220_v45 = vrot.slane %v2219_v47, 1  ;;  %v2225_v52 = vrot.slane %v2224_v33, 2  ;;  %v1166_v46 = vpop.f32.mrf.mxu0 }
 0x170   : > { %v3345_v60 = vrot.slane %v3344_v54, 2  ;;  %v3351_v12 = vmax.f32 %v3349_v11, %v3350_v15  ;;  %v2232_v6 = vrot.slane %v2231_v43, 2  ;;  %v1786_v55 = vrot.slane %v1530_v40, 4 }
 0x171   : > { %v3356_v58 = vsel %vm1941_vm2, %v1530_v40, -inf  ;;  %v1451_v49 = vmax.f32 %v1165_v37, 0.0  ;;  %v2244_v2 = vrot.slane %v2243_v4, 4  ;;  %v2238_v5 = vmax.f32 %v2236_v0, %v2237_v57  ;;  %v1306_v57 = vpop.f32.mrf.mxu1 }
 0x172   : > { %v3346_v62 = vmax.f32 %v3344_v54, %v3345_v60  ;;  %v3352_v17 = vrot.slane %v3351_v12, 2  ;;  %v3357_v61 = vrot.slane %v3356_v58, 4  ;;  %v3363_v44 = vsel %vm1941_vm2, %v1786_v55, -inf  ;;  %v9786_v55 = vld [vmem:[%s10391_s19 + $0xa0] sm:$0xff] }
 0x173   : > { %v1707_v48 = vrot.slane %v1451_v49, 4  ;;  %v2250_v3 = vsel %vm1941_vm2, %v1451_v49, -inf  ;;  %v2221_v50 = vmax.f32 %v2219_v47, %v2220_v45  ;;  %v4095_v35 = vsel %vm4065_vm8, %v2214_v21, %v4094_v51  ;;  %9019 = vmatmul.msk.bf16.gmra.mxu0 %vm903_vm1, %v9786_v55 }
 0x174   : > { %v3347_v30 = vrot.slane %v3346_v62, 1  ;;  %v3353_v27 = vmax.f32 %v3351_v12, %v3352_v17  ;;  %v3358_v7 = vmax.f32 %v3356_v58, %v3357_v61  ;;  %v3364_v14 = vrot.slane %v3363_v44, 4  ;;  %v9826_v58 = vld [vmem:[%s10391_s19 + $0x1e0] sm:$0xff] }
 0x175   : > { %v2251_v39 = vrot.slane %v2250_v3, 4  ;;  %v10892_v11 = vadd.s32 24, %v10710_v18  ;;  %v2226_v0 = vmax.f32 %v2224_v33, %v2225_v52  ;;  %v2257_v15 = vsel %vm1941_vm2, %v1707_v48, -inf  ;;  %9059 = vmatmul.msk.bf16.gmra.mxu2 %vm903_vm1, %v9826_v58 }
 0x176   : > { %v3354_v36 = vrot.slane %v3353_v27, 1  ;;  %v3359_v54 = vrot.slane %v3358_v7, 2  ;;  %v3348_v47 = vmax.f32 %v3346_v62, %v3347_v30  ;;  %v2239_v40 = vrot.slane %v2238_v5, 2 }
 0x177   : > { %14371 = vst [vmem:[#allocation8_spill] sm:$0xff] %v10892_v11  ;;  %v2245_v37 = vmax.f32 %v2243_v4, %v2244_v2  ;;  %v3365_v45 = vmax.f32 %v3363_v44, %v3364_v14  ;;  %v10896_v51 = vsel %vm4067_vm9, %v2221_v50, %v4095_v35  ;;  %v2233_v21 = vmax.f32 %v2231_v43, %v2232_v6 }
 0x178   : > { %v3355_v60 = vmax.f32 %v3353_v27, %v3354_v36  ;;  %v3360_v12 = vmax.f32 %v3358_v7, %v3359_v54  ;;  %v2252_v17 = vmax.f32 %v2250_v3, %v2251_v39  ;;  %v2258_v33 = vrot.slane %v2257_v15, 4  ;;  %v10912_v3 = vpop.f32.mrf.mxu2 }
 0x179   : > { %v3366_v49 = vrot.slane %v3365_v45, 2  ;;  %v14303_v52 = vand.u32 31, %v10892_v11  ;;  %v10904_v62 = vmax.f32 %v10824_v53, %v3037_v42  ;;  %v10907_v4 = vadd.f32 %v10650_v20, %v1306_v57 }
 0x17a   : > { %v2227_v2 = vrot.slane %v2226_v0, 1  ;;  %v3361_v61 = vrot.slane %v3360_v12, 1  ;;  %v4237_v43 = vsel %vm4055_vm3, %v3355_v60, %v3348_v47  ;;  %v2240_v6 = vmax.f32 %v2238_v5, %v2239_v40 }
 0x17b   : > { %v2246_v44 = vrot.slane %v2245_v37, 2  ;;  %v3367_v48 = vmax.f32 %v3365_v45, %v3366_v49  ;;  %v2234_v50 = vrot.slane %v2233_v21, 1  ;;  %v4899_v53 = vrot.slane %v10801_v59, 1  ;;  %v10925_v45 = vpop.f32.mrf.mxu0 }
 0x17c   : > { %v3362_v30 = vmax.f32 %v3360_v12, %v3361_v61  ;;  %v4900_v42 = vrot.slane %v10896_v51, 1  ;;  %v2253_v7 = vrot.slane %v2252_v17, 2  ;;  %v2259_v35 = vmax.f32 %v2257_v15, %v2258_v33 }
 0x17d   : > { %v3368_v27 = vrot.slane %v3367_v48, 1  ;;  %v4964_v14 = vadd.s32 1, %v14303_v52  ;;  %v1365_v36 = vadd.f32 %v10650_v20, %v1364_v23  ;;  %v1167_v54 = vadd.f32 %v10650_v20, %v1166_v46 }
 0x17e   : > { %v4238_v39 = vsel %vm4057_vm4, %v3362_v30, %v4237_v43  ;;  %v4956_v5 = vsel %vm4928_vm10, %v4899_v53, %v4900_v42  ;;  %v2241_v57 = vrot.slane %v2240_v6, 1  ;;  %v2247_v47 = vmax.f32 %v2245_v37, %v2246_v44 }
 0x17f   : > { %v3369_v40 = vmax.f32 %v3367_v48, %v3368_v27  ;;  %vm5028_vm12 = vcmp.lt.s32.totalorder %v4964_v14, 32  ;;  %v4957_v15 = vsel %vm4928_vm10, %v4898_v29, %v4899_v53  ;;  %v1531_v12 = vmax.f32 %v1365_v36, 0.0 }
 0x180   : > { %v5156_v60 = vsel %vm5028_vm12, %v4956_v5, 0.0  ;;  %v1452_v55 = vmax.f32 %v1167_v54, 0.0  ;;  %v2254_v58 = vmax.f32 %v2252_v17, %v2253_v7  ;;  %v2260_v49 = vrot.slane %v2259_v35, 2  ;;  %v1369_v36 = vpop.f32.mrf.mxu2 }
 0x181   : > { %v10041_v33 = vpack.i.bf16 %v5156_v60, %v4957_v15  ;;  %v10932_v23 = vsel %vm4059_vm5, %v3369_v40, %v4238_v39  ;;  %v1787_v20 = vrot.slane %v1531_v12, 4  ;;  %v3370_v46 = vsel %vm1941_vm2, %v1531_v12, -inf }
 0x182   : > { %v1708_v37 = vrot.slane %v1452_v55, 4  ;;  %v2264_v61 = vsel %vm1941_vm2, %v1452_v55, -inf  ;;  %v1508_v43 = vmax.f32 %v10907_v4, 0.0  ;;  %v2228_v44 = vmax.f32 %v2226_v0, %v2227_v2  ;;  %v10943_v0 = vld [vmem:[%s14288_s2] ss:$0 sm:$0xff] }
 0x183   : > { %10042 = vrot.lane.b32.xlu2 %v10041_v33, %s10295_s24  ;;  %v3371_v29 = vrot.slane %v3370_v46, 4  ;;  %v2265_v48 = vrot.slane %v2264_v61, 4  ;;  %v2235_v30 = vmax.f32 %v2233_v21, %v2234_v50  ;;  %v2248_v17 = vrot.slane %v2247_v47, 1 }
 0x184   : > { %v3377_v53 = vsel %vm1941_vm2, %v1787_v20, -inf  ;;  %v2271_v27 = vsel %vm1941_vm2, %v1708_v37, -inf  ;;  %v2242_v54 = vmax.f32 %v2240_v6, %v2241_v57  ;;  %v2255_v40 = vrot.slane %v2254_v58, 1 }
 0x185   : > { %v3372_v7 = vmax.f32 %v3370_v46, %v3371_v29  ;;  %v3378_v14 = vrot.slane %v3377_v53, 4  ;;  %v2266_v39 = vmax.f32 %v2264_v61, %v2265_v48  ;;  %v2272_v5 = vrot.slane %v2271_v27, 4  ;;  %v1171_v46 = vpop.f32.mrf.mxu0 }
 0x186   : > { %v2261_v15 = vmax.f32 %v2259_v35, %v2260_v49  ;;  %v1370_v21 = vadd.f32 %v10943_v0, %v1369_v36  ;;  %v3044_v12 = vrot.slane %v10872_v25, 2  ;;  %v1327_v55 = vadd.f32 %v10943_v0, %v10554_v8 }
 0x187   : > { %v3373_v4 = vrot.slane %v3372_v7, 2  ;;  %v3379_v2 = vmax.f32 %v3377_v53, %v3378_v14  ;;  %v2267_v50 = vrot.slane %v2266_v39, 2  ;;  %v2273_v60 = vmax.f32 %v2271_v27, %v2272_v5 }
 0x188   : > { %v4097_v6 = vsel %vm4055_vm3, %v2235_v30, %v2228_v44  ;;  %v2249_v57 = vmax.f32 %v2247_v47, %v2248_v17  ;;  %v3048_v37 = vsel %vm1941_vm2, %v1508_v43, -inf  ;;  %v2256_v29 = vmax.f32 %v2254_v58, %v2255_v40 }
 0x189   : > { %v3374_v35 = vmax.f32 %v3372_v7, %v3373_v4  ;;  %v3380_v49 = vrot.slane %v3379_v2, 2  ;;  %v2268_v33 = vmax.f32 %v2266_v39, %v2267_v50  ;;  %v2274_v20 = vrot.slane %v2273_v60, 2  ;;  %v9787_v7 = vld [vmem:[%s10391_s19 + $0xa8] sm:$0xff] }
 0x18a   : > { %v4098_v61 = vsel %vm4057_vm4, %v2242_v54, %v4097_v6  ;;  %v2262_v48 = vrot.slane %v2261_v15, 1  ;;  %v1533_v8 = vmax.f32 %v1370_v21, 0.0  ;;  %v3039_v44 = vrot.slane %v10904_v62, 1  ;;  %v9827_v39 = vld [vmem:[%s10391_s19 + $0x1e8] sm:$0xff]  ;;  %9020 = vmatmul.msk.bf16.gmra.mxu0 %vm903_vm1, %v9787_v7 }
 0x18b   : > { %v3375_v53 = vrot.slane %v3374_v35, 1  ;;  %v3381_v27 = vmax.f32 %v3379_v2, %v3380_v49  ;;  %v2275_v14 = vmax.f32 %v2273_v60, %v2274_v20  ;;  %v3045_v47 = vmax.f32 %v10872_v25, %v3044_v12  ;;  %9060 = vmatmul.msk.bf16.gmra.mxu2 %vm903_vm1, %v9827_v39 }
 0x18c   : > { %v1764_v30 = vrot.slane %v1508_v43, 4  ;;  %v2269_v17 = vrot.slane %v2268_v33, 1  ;;  %v1516_v5 = vmax.f32 %v1327_v55, 0.0  ;;  %v4099_v36 = vsel %vm4059_vm5, %v2249_v57, %v4098_v61 }
 0x18d   : > { %v3376_v4 = vmax.f32 %v3374_v35, %v3375_v53  ;;  %v3382_v50 = vrot.slane %v3381_v27, 1  ;;  %v3049_v54 = vrot.slane %v3048_v37, 4  ;;  %v2263_v58 = vmax.f32 %v2261_v15, %v2262_v48  ;;  %v1371_v48 = vpop.f32.mrf.mxu2 }
 0x18e   : > { %v4100_v40 = vsel %vm4061_vm6, %v2256_v29, %v4099_v36  ;;  %v2276_v2 = vrot.slane %v2275_v14, 1  ;;  %v1170_v43 = vadd.f32 %v10943_v0, %v10925_v45  ;;  %v1789_v60 = vrot.slane %v1533_v8, 4 }
 0x18f   : > { %v3383_v21 = vmax.f32 %v3381_v27, %v3382_v50  ;;  %v4240_v25 = vsel %vm4061_vm6, %v3376_v4, %v10932_v23  ;;  %v3040_v12 = vmax.f32 %v10904_v62, %v3039_v44  ;;  %v3046_v55 = vrot.slane %v3045_v47, 1  ;;  %v1174_v44 = vpop.f32.mrf.mxu0 }
 0x190   : > { %v3055_v15 = vsel %vm1941_vm2, %v1764_v30, -inf  ;;  %v2270_v6 = vmax.f32 %v2268_v33, %v2269_v17  ;;  %v1772_v57 = vrot.slane %v1516_v5, 4  ;;  %v3398_v49 = vsel %vm1941_vm2, %v1533_v8, -inf }
 0x191   : > { %v10967_v35 = vsel %vm14359_vm7, %v3383_v21, %v4240_v25  ;;  %v3405_v20 = vsel %vm1941_vm2, %v1789_v60, -inf  ;;  %v3050_v61 = vmax.f32 %v3048_v37, %v3049_v54  ;;  %v3160_v23 = vsel %vm1941_vm2, %v1516_v5, -inf }
 0x192   : > { %14372 = vst [vmem:[#allocation9_spill] sm:$0xff] %v10967_v35  ;;  %v4101_v45 = vsel %vm14359_vm7, %v2263_v58, %v4100_v40  ;;  %v2277_v29 = vmax.f32 %v2275_v14, %v2276_v2  ;;  %v1453_v62 = vmax.f32 %v1170_v43, 0.0  ;;  %v3399_v53 = vrot.slane %v3398_v49, 4 }
 0x193   : > { %v3406_v27 = vrot.slane %v3405_v20, 4  ;;  %v1372_v33 = vadd.f32 %v10943_v0, %v1371_v48  ;;  %v3047_v30 = vmax.f32 %v3045_v47, %v3046_v55  ;;  %v4198_v17 = vsel %vm4061_vm6, %v3040_v12, %v10819_v38 }
 0x194   : > { %v1172_v8 = vadd.f32 %v10943_v0, %v1171_v46  ;;  %v4102_v37 = vsel %vm4065_vm8, %v2270_v6, %v4101_v45  ;;  %v3056_v7 = vrot.slane %v3055_v15, 4  ;;  %v3161_v39 = vrot.slane %v3160_v23, 4 }
 0x195   : > { %v3400_v5 = vmax.f32 %v3398_v49, %v3399_v53  ;;  %v3407_v36 = vmax.f32 %v3405_v20, %v3406_v27  ;;  %v3051_v14 = vrot.slane %v3050_v61, 2  ;;  %v3167_v4 = vsel %vm1941_vm2, %v1772_v57, -inf }
 0x196   : > { %v1534_v50 = vmax.f32 %v1372_v33, 0.0  ;;  %v10980_v54 = vsel %vm4067_vm9, %v2277_v29, %v4102_v37  ;;  %v1709_v58 = vrot.slane %v1453_v62, 4  ;;  %v10987_v46 = vsel %vm4065_vm8, %v10756_v26, %v10564_v16  ;;  %v1374_v33 = vpop.f32.mrf.mxu2  ;;  %v9788_v37 = vld [vmem:[%s10391_s19 + $0xb0] sm:$0xff] }
 0x197   : > { %v3401_v47 = vrot.slane %v3400_v5, 2  ;;  %v3408_v40 = vrot.slane %v3407_v36, 2  ;;  %v10051_v38 = vpack.i.bf16 %v10980_v54, %v10896_v51  ;;  %14373 = vst [vmem:[#allocation10_spill] sm:$0xff] %v10987_v46  ;;  %v10990_v2 = vsel %vm14359_vm7, %v3047_v30, %v4198_v17 }
 0x198   : > { %v1454_v21 = vmax.f32 %v1172_v8, 0.0  ;;  %v1790_v25 = vrot.slane %v1534_v50, 4  ;;  %v10992_v43 = vmax.f32 %v3055_v15, %v3056_v7  ;;  %v3168_v60 = vrot.slane %v3167_v4, 4 }
 0x199   : > { %v3412_v12 = vsel %vm1941_vm2, %v1534_v50, -inf  ;;  %10052 = vrot.lane.b32.xlu1 %v10051_v38, %s10296_s25  ;;  %v1175_v55 = vadd.f32 %v10943_v0, %v1174_v44  ;;  %v3402_v6 = vmax.f32 %v3400_v5, %v3401_v47  ;;  %v3409_v57 = vmax.f32 %v3407_v36, %v3408_v40 }
 0x19a   : > { %v3413_v49 = vrot.slane %v3412_v12, 4  ;;  %v3419_v16 = vsel %vm1941_vm2, %v1790_v25, -inf  ;;  %v10998_v26 = vmax.f32 %v3050_v61, %v3051_v14  ;;  %v11000_v20 = vmax.f32 %v3160_v23, %v3161_v39  ;;  %v1176_v61 = vpop.f32.mrf.mxu0  ;;  %v9828_v23 = vld [vmem:[%s10391_s19 + $0x1f0] sm:$0xff]  ;;  %9021 = vmatmul.msk.bf16.gmra.mxu0 %vm903_vm1, %v9788_v37 }
 0x19b   : > { %v2285_v15 = vsel %vm1941_vm2, %v1709_v58, -inf  ;;  %v3420_v45 = vrot.slane %v3419_v16, 4  ;;  %v2278_v29 = vsel %vm1941_vm2, %v1453_v62, -inf  ;;  %v1710_v48 = vrot.slane %v1454_v21, 4  ;;  %9061 = vmatmul.msk.bf16.gmra.mxu2 %vm903_vm1, %v9828_v23 }
 0x19c   : > { %v3414_v53 = vmax.f32 %v3412_v12, %v3413_v49  ;;  %v1455_v27 = vmax.f32 %v1175_v55, 0.0  ;;  %v3058_v44 = vrot.slane %v10992_v43, 2  ;;  %v2292_v30 = vsel %vm1941_vm2, %v1454_v21, -inf }
 0x19d   : > { %v3421_v17 = vmax.f32 %v3419_v16, %v3420_v45  ;;  %v1375_v8 = vadd.f32 %v10943_v0, %v1374_v33  ;;  %v2286_v7 = vrot.slane %v2285_v15, 4  ;;  %v3403_v39 = vrot.slane %v3402_v6, 1 }
 0x19e   : > { %v3410_v5 = vrot.slane %v3409_v57, 1  ;;  %v3415_v36 = vrot.slane %v3414_v53, 2  ;;  %v3163_v62 = vrot.slane %v11000_v20, 2  ;;  %v11010_v14 = vmax.f32 %v3167_v4, %v3168_v60 }
 0x19f   : > { %v2279_v50 = vrot.slane %v2278_v29, 4  ;;  %v3422_v58 = vrot.slane %v3421_v17, 2  ;;  %v2293_v47 = vrot.slane %v2292_v30, 4  ;;  %v2299_v40 = vsel %vm1941_vm2, %v1710_v48, -inf }
 0x1a0   : > { %v3416_v38 = vmax.f32 %v3414_v53, %v3415_v36  ;;  %v1711_v21 = vrot.slane %v1455_v27, 4  ;;  %v2306_v12 = vsel %vm1941_vm2, %v1455_v27, -inf  ;;  %v1535_v55 = vmax.f32 %v1375_v8, 0.0 }
 0x1a1   : > { %v3423_v25 = vmax.f32 %v3421_v17, %v3422_v58  ;;  %v1177_v49 = vadd.f32 %v10943_v0, %v1176_v61  ;;  %v2287_v16 = vmax.f32 %v2285_v15, %v2286_v7  ;;  %v3404_v4 = vmax.f32 %v3402_v6, %v3403_v39 }
 0x1a2   : > { %v3411_v60 = vmax.f32 %v3409_v57, %v3410_v5  ;;  %v3417_v45 = vrot.slane %v3416_v38, 1  ;;  %v2280_v33 = vmax.f32 %v2278_v29, %v2279_v50  ;;  %v2300_v22 = vrot.slane %v2299_v40, 4  ;;  %v1179_v50 = vpop.f32.mrf.mxu0 }
 0x1a3   : > { %v1791_v37 = vrot.slane %v1535_v55, 4  ;;  %v3426_v23 = vsel %vm1941_vm2, %v1535_v55, -inf  ;;  %v2294_v19 = vmax.f32 %v2292_v30, %v2293_v47  ;;  %v2307_v32 = vrot.slane %v2306_v12, 4  ;;  %v11022_v30 = vpop.f32.mrf.mxu2  ;;  %v9840_v55 = vld [vmem:[%s14289_s3 + $0x48] sm:$0xff] }
 0x1a4   : > { %v2313_v48 = vsel %vm1941_vm2, %v1711_v21, -inf  ;;  %v3427_v53 = vrot.slane %v3426_v23, 4  ;;  %v3418_v17 = vmax.f32 %v3416_v38, %v3417_v45  ;;  %v3424_v36 = vrot.slane %v3423_v25, 1  ;;  %10003 = vmatpush.bf16.msra.mxu3 %v9840_v55  ;;  %6184 = vmatpush.bf16.msrb.mxu2 %v9840_v55 }
 0x1a5   : > { %v3433_v27 = vsel %vm1941_vm2, %v1791_v37, -inf  ;;  %v1456_v8 = vmax.f32 %v1177_v49, 0.0  ;;  %v2288_v61 = vrot.slane %v2287_v16, 2  ;;  %v4244_v6 = vsel %vm4055_vm3, %v3411_v60, %v3404_v4 }
 0x1a6   : > { %v3428_v57 = vmax.f32 %v3426_v23, %v3427_v53  ;;  %v3434_v15 = vrot.slane %v3433_v27, 4  ;;  %v2301_v29 = vmax.f32 %v2299_v40, %v2300_v22  ;;  %v2314_v7 = vrot.slane %v2313_v48, 4 }
 0x1a7   : > { %v1712_v39 = vrot.slane %v1456_v8, 4  ;;  %v2320_v5 = vsel %vm1941_vm2, %v1456_v8, -inf  ;;  %v2295_v58 = vrot.slane %v2294_v19, 2  ;;  %v2308_v47 = vmax.f32 %v2306_v12, %v2307_v32 }
 0x1a8   : > { %v3429_v38 = vrot.slane %v3428_v57, 2  ;;  %v3435_v21 = vmax.f32 %v3433_v27, %v3434_v15  ;;  %v3053_v49 = vrot.slane %v10998_v26, 1  ;;  %v2281_v4 = vrot.slane %v2280_v33, 2 }
 0x1a9   : > { %v3425_v60 = vmax.f32 %v3423_v25, %v3424_v36  ;;  %v4245_v22 = vsel %vm4057_vm4, %v3418_v17, %v4244_v6  ;;  %v2321_v37 = vrot.slane %v2320_v5, 4  ;;  %v2327_v23 = vsel %vm1941_vm2, %v1712_v39, -inf }
 0x1aa   : > { %v3430_v40 = vmax.f32 %v3428_v57, %v3429_v38  ;;  %v3436_v45 = vrot.slane %v3435_v21, 2  ;;  %v11033_v32 = vmax.f32 %v10992_v43, %v3058_v44  ;;  %v2289_v12 = vmax.f32 %v2287_v16, %v2288_v61  ;;  %v9839_v38 = vld [vmem:[%s14289_s3 + $0x40] sm:$0xff] }
 0x1ab   : > { %v2302_v53 = vrot.slane %v2301_v29, 2  ;;  %v2315_v27 = vmax.f32 %v2313_v48, %v2314_v7  ;;  %v2296_v8 = vmax.f32 %v2294_v19, %v2295_v58  ;;  %v2309_v15 = vrot.slane %v2308_v47, 2  ;;  %10004 = vmatpush.bf16.msra.mxu3 %v9839_v38  ;;  %6185 = vmatpush.bf16.msrb.mxu2 %v9839_v38 }
 0x1ac   : > { %v3431_v25 = vrot.slane %v3430_v40, 1  ;;  %v3437_v36 = vmax.f32 %v3435_v21, %v3436_v45  ;;  %v1337_v17 = vadd.f32 %v10943_v0, %v10635_v1  ;;  %v2282_v6 = vmax.f32 %v2280_v33, %v2281_v4  ;;  %v9789_v45 = vld [vmem:[%s10391_s19 + $0xb8] sm:$0xff] }
 0x1ad   : > { %v4246_v57 = vsel %vm4059_vm5, %v3425_v60, %v4245_v22  ;;  %v2328_v39 = vrot.slane %v2327_v23, 4  ;;  %v2322_v16 = vmax.f32 %v2320_v5, %v2321_v37  ;;  %v1180_v48 = vadd.f32 %v10943_v0, %v1179_v50  ;;  %v1379_v22 = vpop.f32.mrf.mxu2  ;;  %9022 = vmatmul.msk.bf16.gmra.mxu0 %vm903_vm1, %v9789_v45 }
 0x1ae   : > { %v3432_v43 = vmax.f32 %v3430_v40, %v3431_v25  ;;  %v3438_v44 = vrot.slane %v3437_v36, 1  ;;  %v3170_v19 = vrot.slane %v11010_v14, 2  ;;  %v2290_v61 = vrot.slane %v2289_v12, 1  ;;  %v1181_v40 = vpop.f32.mrf.mxu0 }
 0x1af   : > { %v2303_v7 = vmax.f32 %v2301_v29, %v2302_v53  ;;  %v2316_v1 = vrot.slane %v2315_v27, 2  ;;  %v2297_v33 = vrot.slane %v2296_v8, 1  ;;  %v2310_v58 = vmax.f32 %v2308_v47, %v2309_v15  ;;  %v9829_v29 = vld [vmem:[%s10391_s19 + $0x1f8] sm:$0xff] }
 0x1b0   : > { %v3439_v21 = vmax.f32 %v3437_v36, %v3438_v44  ;;  %v4247_v55 = vsel %vm4061_vm6, %v3432_v43, %v4246_v57  ;;  %v11047_v5 = vmax.f32 %v11000_v20, %v3163_v62  ;;  %v1520_v50 = vmax.f32 %v1337_v17, 0.0  ;;  %9062 = vmatmul.msk.bf16.gmra.mxu2 %vm903_vm1, %v9829_v29 }
 0x1b1   : > { %v2283_v4 = vrot.slane %v2282_v6, 1  ;;  %v2329_v60 = vmax.f32 %v2327_v23, %v2328_v39  ;;  %v11052_v37 = vmax.f32 %v10998_v26, %v3053_v49  ;;  %v2323_v53 = vrot.slane %v2322_v16, 2 }
 0x1b2   : > { %v11055_v47 = vsel %vm14359_vm7, %v3439_v21, %v4247_v55  ;;  %v1457_v15 = vmax.f32 %v1180_v48, 0.0  ;;  %v3060_v25 = vrot.slane %v11033_v32, 1  ;;  %v2291_v36 = vmax.f32 %v2289_v12, %v2290_v61 }
 0x1b3   : > { %v2304_v20 = vrot.slane %v2303_v7, 1  ;;  %v2317_v62 = vmax.f32 %v2315_v27, %v2316_v1  ;;  %v11061_v23 = vmax.f32 %v11010_v14, %v3170_v19  ;;  %v2298_v17 = vmax.f32 %v2296_v8, %v2297_v33 }
 0x1b4   : > { %v2311_v26 = vrot.slane %v2310_v58, 1  ;;  %v1380_v49 = vadd.f32 %v10943_v0, %v1379_v22  ;;  %v1776_v57 = vrot.slane %v1520_v50, 4  ;;  %v3216_v39 = vsel %vm1941_vm2, %v1520_v50, -inf }
 0x1b5   : > { %v2284_v38 = vmax.f32 %v2282_v6, %v2283_v4  ;;  %v2330_v43 = vrot.slane %v2329_v60, 2  ;;  %v2324_v44 = vmax.f32 %v2322_v16, %v2323_v53  ;;  %v1713_v12 = vrot.slane %v1457_v15, 4 }
 0x1b6   : > { %v1537_v48 = vmax.f32 %v1380_v49, 0.0  ;;  %v1182_v27 = vadd.f32 %v10943_v0, %v1181_v40  ;;  %v3165_v61 = vrot.slane %v11047_v5, 1  ;;  %v2305_v14 = vmax.f32 %v2303_v7, %v2304_v20  ;;  %v1381_v20 = vpop.f32.mrf.mxu2 }
 0x1b7   : > { %v4104_v1 = vsel %vm4055_vm3, %v2291_v36, %v2284_v38  ;;  %v2318_v19 = vrot.slane %v2317_v62, 1  ;;  %v2312_v33 = vmax.f32 %v2310_v58, %v2311_v26  ;;  %v3217_v50 = vrot.slane %v3216_v39, 4 }
 0x1b8   : > { %v4105_v8 = vsel %vm4057_vm4, %v2298_v17, %v4104_v1  ;;  %v1793_v21 = vrot.slane %v1537_v48, 4  ;;  %v3454_v55 = vsel %vm1941_vm2, %v1537_v48, -inf  ;;  %v3223_v6 = vsel %vm1941_vm2, %v1776_v57, -inf  ;;  %v1184_v17 = vpop.f32.mrf.mxu0 }
 0x1b9   : > { %v2331_v16 = vmax.f32 %v2329_v60, %v2330_v43  ;;  %v2334_v4 = vsel %vm1941_vm2, %v1457_v15, -inf  ;;  %v2325_v22 = vrot.slane %v2324_v44, 1  ;;  %v2341_v40 = vsel %vm1941_vm2, %v1713_v12, -inf }
 0x1ba   : > { %v3461_v45 = vsel %vm1941_vm2, %v1793_v21, -inf  ;;  %v1458_v29 = vmax.f32 %v1182_v27, 0.0  ;;  %v1347_v7 = vadd.f32 %v10943_v0, %v10708_v10  ;;  %v2319_v53 = vmax.f32 %v2317_v62, %v2318_v19 }
 0x1bb   : > { %v4106_v58 = vsel %vm4059_vm5, %v2305_v14, %v4105_v8  ;;  %v3455_v36 = vrot.slane %v3454_v55, 4  ;;  %v11078_v26 = vmax.f32 %v11033_v32, %v3060_v25  ;;  %v2335_v15 = vrot.slane %v2334_v4, 4 }
 0x1bc   : > { %v4107_v60 = vsel %vm4061_vm6, %v2312_v33, %v4106_v58  ;;  %v1382_v49 = vadd.f32 %v10943_v0, %v1381_v20  ;;  %v3224_v57 = vrot.slane %v3223_v6, 4  ;;  %v2332_v38 = vrot.slane %v2331_v16, 1 }
 0x1bd   : > { %v2342_v43 = vrot.slane %v2341_v40, 4  ;;  %v3462_v12 = vrot.slane %v3461_v45, 4  ;;  %v2326_v48 = vmax.f32 %v2324_v44, %v2325_v22  ;;  %v1714_v10 = vrot.slane %v1458_v29, 4 }
 0x1be   : > { %v1538_v62 = vmax.f32 %v1382_v49, 0.0  ;;  %v1185_v27 = vadd.f32 %v10943_v0, %v1184_v17  ;;  %v11083_v1 = vmax.f32 %v3216_v39, %v3217_v50  ;;  %v1524_v14 = vmax.f32 %v1347_v7, 0.0 }
 0x1bf   : > { %v4108_v32 = vsel %vm14359_vm7, %v2319_v53, %v4107_v60  ;;  %v3456_v25 = vmax.f32 %v3454_v55, %v3455_v36  ;;  %v2336_v19 = vmax.f32 %v2334_v4, %v2335_v15  ;;  %v2348_v8 = vsel %vm1941_vm2, %v1458_v29, -inf }
 0x1c0   : > { %v1794_v33 = vrot.slane %v1538_v62, 4  ;;  %v3468_v21 = vsel %vm1941_vm2, %v1538_v62, -inf  ;;  %v2333_v58 = vmax.f32 %v2331_v16, %v2332_v38  ;;  %v2343_v20 = vmax.f32 %v2341_v40, %v2342_v43  ;;  %v1384_v38 = vpop.f32.mrf.mxu2  ;;  %v1186_v43 = vpop.f32.mrf.mxu0 }
 0x1c1   : > { %v3463_v52 = vmax.f32 %v3461_v45, %v3462_v12  ;;  %v3469_v44 = vrot.slane %v3468_v21, 4  ;;  %v4109_v22 = vsel %vm4065_vm8, %v2326_v48, %v4108_v32  ;;  %v2355_v17 = vsel %vm1941_vm2, %v1714_v10, -inf }
 0x1c2   : > { %v3475_v39 = vsel %vm1941_vm2, %v1794_v33, -inf  ;;  %v1459_v50 = vmax.f32 %v1185_v27, 0.0  ;;  %v3457_v55 = vrot.slane %v3456_v25, 2  ;;  %v2349_v4 = vrot.slane %v2348_v8, 4 }
 0x1c3   : > { %v3470_v29 = vmax.f32 %v3468_v21, %v3469_v44  ;;  %v11093_v53 = vmax.f32 %v11047_v5, %v3165_v61  ;;  %v11095_v16 = vmax.f32 %v3223_v6, %v3224_v57  ;;  %v2337_v40 = vrot.slane %v2336_v19, 2  ;;  %v9790_v61 = vld [vmem:[%s10391_s19 + $0xc0] sm:$0xff] }
 0x1c4   : > { %v3476_v45 = vrot.slane %v3475_v39, 4  ;;  %v2344_v36 = vrot.slane %v2343_v20, 2  ;;  %v3464_v60 = vrot.slane %v3463_v52, 2  ;;  %v2356_v15 = vrot.slane %v2355_v17, 4  ;;  %9023 = vmatmul.msk.bf16.gmra.mxu0 %vm903_vm1, %v9790_v61 }
 0x1c5   : > { %v11098_v49 = vsel %vm4067_vm9, %v2333_v58, %v4109_v22  ;;  %v11101_v48 = vrot.slane %v1524_v14, 4  ;;  %v1715_v10 = vrot.slane %v1459_v50, 4  ;;  %v2362_v5 = vsel %vm1941_vm2, %v1459_v50, -inf }
 0x1c6   : > { %v11106_v6 = vsel %vm1941_vm2, %v1524_v14, -inf  ;;  %v3458_v57 = vmax.f32 %v3456_v25, %v3457_v55  ;;  %v2350_v62 = vmax.f32 %v2348_v8, %v2349_v4  ;;  %v3471_v27 = vrot.slane %v3470_v29, 2 }
 0x1c7   : > { %v11108_v32 = vmax.f32 %v2336_v19, %v2337_v40  ;;  %v3477_v33 = vmax.f32 %v3475_v39, %v3476_v45  ;;  %v5190_v21 = vrot.slane %v10980_v54, 2  ;;  %v14305_v58 = vrot.slane %v11098_v49, 2 }
 0x1c8   : > { %v11113_v44 = vmax.f32 %v2343_v20, %v2344_v36  ;;  %v3465_v22 = vmax.f32 %v3463_v52, %v3464_v60  ;;  %v2357_v50 = vmax.f32 %v2355_v17, %v2356_v15  ;;  %v2363_v7 = vrot.slane %v2362_v5, 4 }
 0x1c9   : > { %v2369_v14 = vsel %vm1941_vm2, %v1715_v10, -inf  ;;  %v14306_v25 = vrot.slane %v10896_v51, 2  ;;  %vm14355_vm13 = vcmp.lt.s32.totalorder %v10710_v18, 6  ;;  %v4901_v19 = vrot.slane %v10980_v54, 1 }
 0x1ca   : > { %v3459_v8 = vrot.slane %v3458_v57, 1  ;;  %v2351_v39 = vrot.slane %v2350_v62, 2  ;;  %v3472_v55 = vmax.f32 %v3470_v29, %v3471_v27  ;;  %v5243_v20 = vsel %vm14355_vm13, %v5190_v21, %v14305_v58 }
 0x1cb   : > { %v3478_v4 = vrot.slane %v3477_v33, 2  ;;  %v5244_v52 = vsel %vm14355_vm13, %v14306_v25, %v5190_v21  ;;  %v14304_v17 = vrot.slane %v11098_v49, 1  ;;  %v3466_v40 = vrot.slane %v3465_v22, 1 }
 0x1cc   : > { %v2364_v45 = vmax.f32 %v2362_v5, %v2363_v7  ;;  %v2370_v36 = vrot.slane %v2369_v14, 4  ;;  %v5930_v60 = vpack.c.bf16 %v5243_v20, %v5244_v52  ;;  %v4955_v15 = vsel %vm4928_vm10, %v4900_v42, %v4901_v19  ;;  %v11140_v20 = vpop.f32.mrf.mxu2  ;;  %v1189_v52 = vpop.f32.mrf.mxu0 }
 0x1cd   : > { %v4954_v29 = vsel %vm4928_vm10, %v4901_v19, %v14304_v17  ;;  %v1385_v10 = vadd.f32 %v10943_v0, %v1384_v38  ;;  %v1187_v61 = vadd.f32 %v10943_v0, %v1186_v43  ;;  %v2339_v27 = vrot.slane %v11108_v32, 1 }
 0x1ce   : > { %v2352_v21 = vmax.f32 %v2350_v62, %v2351_v39  ;;  %v2358_v7 = vrot.slane %v2357_v50, 2  ;;  %9105 = vmatmul.msk.bf16.vlgmr.msra.gmra.mxu3 %vm5826_vm14, %v5930_v60  ;;  %v10056_v5 = vpack.i.bf16 %v4954_v29, %v4955_v15  ;;  %v3473_v17 = vrot.slane %v3472_v55, 1 }
 0x1cf   : > { %v3479_v58 = vmax.f32 %v3477_v33, %v3478_v4  ;;  %v1539_v25 = vmax.f32 %v1385_v10, 0.0  ;;  %v1460_v12 = vmax.f32 %v1187_v61, 0.0  ;;  %v3460_v35 = vmax.f32 %v3458_v57, %v3459_v8 }
 0x1d0   : > { %v3467_v42 = vmax.f32 %v3465_v22, %v3466_v40  ;;  %v2365_v19 = vrot.slane %v2364_v45, 2  ;;  %v2371_v38 = vmax.f32 %v2369_v14, %v2370_v36  ;;  %10057 = vrot.lane.b32.xlu2 %v10056_v5, %s10295_s24  ;;  %v2346_v29 = vrot.slane %v11113_v44, 1 }
 0x1d1   : > { %v1795_v43 = vrot.slane %v1539_v25, 4  ;;  %v3482_v62 = vsel %vm1941_vm2, %v1539_v25, -inf  ;;  %v1716_v39 = vrot.slane %v1460_v12, 4  ;;  %v2376_v60 = vsel %vm1941_vm2, %v1460_v12, -inf }
 0x1d2   : > { %v2359_v15 = vmax.f32 %v2357_v50, %v2358_v7  ;;  %v3483_v34 = vrot.slane %v3482_v62, 4  ;;  %v2377_v31 = vrot.slane %v2376_v60, 4  ;;  %v3474_v33 = vmax.f32 %v3472_v55, %v3473_v17 }
 0x1d3   : > { %v3480_v4 = vrot.slane %v3479_v58, 1  ;;  %v3489_v57 = vsel %vm1941_vm2, %v1795_v43, -inf  ;;  %v2383_v22 = vsel %vm1941_vm2, %v1716_v39, -inf  ;;  %v4251_v25 = vsel %vm4055_vm3, %v3467_v42, %v3460_v35 }
 0x1d4   : > { %v3484_v14 = vmax.f32 %v3482_v62, %v3483_v34  ;;  %v3490_v8 = vrot.slane %v3489_v57, 4  ;;  %v2378_v40 = vmax.f32 %v2376_v60, %v2377_v31  ;;  %v2384_v36 = vrot.slane %v2383_v22, 4  ;;  %v1389_v35 = vpop.f32.mrf.mxu2  ;;  %v1191_v42 = vpop.f32.mrf.mxu0 }
 0x1d5   : > { %v2353_v10 = vrot.slane %v2352_v21, 1  ;;  %v2366_v61 = vmax.f32 %v2364_v45, %v2365_v19  ;;  %v2372_v12 = vrot.slane %v2371_v38, 2  ;;  %v2347_v55 = vmax.f32 %v11113_v44, %v2346_v29 }
 0x1d6   : > { %v3485_v5 = vrot.slane %v3484_v14, 2  ;;  %v3491_v13 = vmax.f32 %v3489_v57, %v3490_v8  ;;  %v2379_v50 = vrot.slane %v2378_v40, 2  ;;  %v2385_v7 = vmax.f32 %v2383_v22, %v2384_v36  ;;  %v9791_v8 = vld [vmem:[%s10391_s19 + $0xc8] sm:$0xff] }
 0x1d7   : > { %v2360_v17 = vrot.slane %v2359_v15, 1  ;;  %v3481_v46 = vmax.f32 %v3479_v58, %v3480_v4  ;;  %v1190_v43 = vadd.f32 %v10943_v0, %v1189_v52  ;;  %v4252_v34 = vsel %vm4057_vm4, %v3474_v33, %v4251_v25  ;;  %9024 = vmatmul.msk.bf16.gmra.mxu0 %vm903_vm1, %v9791_v8 }
 0x1d8   : > { %v3486_v62 = vmax.f32 %v3484_v14, %v3485_v5  ;;  %v3492_v31 = vrot.slane %v3491_v13, 2  ;;  %v2386_v39 = vrot.slane %v2385_v7, 2  ;;  %v2340_v45 = vmax.f32 %v11108_v32, %v2339_v27 }
 0x1d9   : > { %v2354_v19 = vmax.f32 %v2352_v21, %v2353_v10  ;;  %v2367_v60 = vrot.slane %v2366_v61, 1  ;;  %v2373_v57 = vmax.f32 %v2371_v38, %v2372_v12  ;;  %v3273_v22 = vrot.slane %v11106_v6, 4 }
 0x1da   : > { %v3487_v44 = vrot.slane %v3486_v62, 1  ;;  %v3493_v29 = vmax.f32 %v3491_v13, %v3492_v31  ;;  %v2380_v58 = vmax.f32 %v2378_v40, %v2379_v50  ;;  %v4111_v52 = vsel %vm4055_vm3, %v2347_v55, %v2340_v45 }
 0x1db   : > { %v2361_v4 = vmax.f32 %v2359_v15, %v2360_v17  ;;  %v4253_v33 = vsel %vm4059_vm5, %v3481_v46, %v4252_v34  ;;  %v1461_v14 = vmax.f32 %v1190_v43, 0.0  ;;  %v2387_v5 = vmax.f32 %v2385_v7, %v2386_v39 }
 0x1dc   : > { %v3488_v36 = vmax.f32 %v3486_v62, %v3487_v44  ;;  %v3494_v25 = vrot.slane %v3493_v29, 1  ;;  %v5186_v32 = vrot.slane %v10715_v63, 2  ;;  %v4112_v27 = vsel %vm4057_vm4, %v2354_v19, %v4111_v52  ;;  %v1194_v52 = vpop.f32.mrf.mxu0 }
 0x1dd   : > { %v2368_v21 = vmax.f32 %v2366_v61, %v2367_v60  ;;  %v2374_v38 = vrot.slane %v2373_v57, 1  ;;  %v14308_v10 = vrot.slane %v10706_v56, 2  ;;  %v2381_v40 = vrot.slane %v2380_v58, 1 }
 0x1de   : > { %v3495_v13 = vmax.f32 %v3493_v29, %v3494_v25  ;;  %v4254_v15 = vsel %vm4061_vm6, %v3488_v36, %v4253_v33  ;;  %v5187_v46 = vrot.slane %v10718_v28, 2  ;;  %v14374_v12 = vrot.slane %v11083_v1, 2  ;;  %v1391_v29 = vpop.f32.mrf.mxu2 }
 0x1df   : > { %v3226_v7 = vrot.slane %v11095_v16, 2  ;;  %v3274_v55 = vmax.f32 %v11106_v6, %v3273_v22  ;;  %v1717_v61 = vrot.slane %v1461_v14, 4  ;;  %v2388_v43 = vrot.slane %v2387_v5, 1 }
 0x1e0   : > { %v3220_v50 = vmax.f32 %v11083_v1, %v14374_v12  ;;  %v11169_v17 = vsel %vm14359_vm7, %v3495_v13, %v4254_v15  ;;  %v5247_v34 = vsel %vm14355_vm13, %v5186_v32, %v5187_v46  ;;  %v5248_v62 = vsel %vm14355_vm13, %v14308_v10, %v5186_v32 }
 0x1e1   : > { %14375 = vst [vmem:[#allocation11_spill] sm:$0xff] %v11169_v17  ;;  %v3279_v1 = vsel %vm1941_vm2, %v11101_v48, -inf  ;;  %v2375_v31 = vmax.f32 %v2373_v57, %v2374_v38  ;;  %v4113_v6 = vsel %vm4059_vm5, %v2361_v4, %v4112_v27  ;;  %v5926_v39 = vpack.c.bf16 %v5247_v34, %v5248_v62 }
 0x1e2   : > { %v14376_v45 = vrot.slane %v11061_v23, 1  ;;  %v4114_v60 = vsel %vm4061_vm6, %v2368_v21, %v4113_v6  ;;  %v2382_v22 = vmax.f32 %v2380_v58, %v2381_v40  ;;  %v2390_v44 = vsel %vm1941_vm2, %v1461_v14, -inf }
 0x1e3   : > { %v3227_v33 = vmax.f32 %v11095_v16, %v3226_v7  ;;  %v2397_v48 = vsel %vm1941_vm2, %v1717_v61, -inf  ;;  %9103 = vmatmul.msk.bf16.vlgmr.msrb.gmra.mxu2 %vm5826_vm14, %v5926_v39  ;;  %v1390_v57 = vadd.f32 %v10943_v0, %v1389_v35  ;;  %v1192_v4 = vadd.f32 %v10943_v0, %v1191_v42 }
 0x1e4   : > { %v11185_v19 = vmax.f32 %v11061_v23, %v14376_v45  ;;  %v3221_v8 = vrot.slane %v3220_v50, 1  ;;  %v3275_v23 = vrot.slane %v3274_v55, 2  ;;  %v3280_v36 = vrot.slane %v3279_v1, 4 }
 0x1e5   : > { %v2389_v25 = vmax.f32 %v2387_v5, %v2388_v43  ;;  %v4115_v58 = vsel %vm14359_vm7, %v2375_v31, %v4114_v60  ;;  %v2391_v32 = vrot.slane %v2390_v44, 4  ;;  %v1541_v14 = vmax.f32 %v1390_v57, 0.0 }
 0x1e6   : > { %v1462_v27 = vmax.f32 %v1192_v4, 0.0  ;;  %v2398_v21 = vrot.slane %v2397_v48, 4  ;;  %v1392_v16 = vadd.f32 %v10943_v0, %v1391_v29  ;;  %v4116_v38 = vsel %vm4065_vm8, %v2382_v22, %v4115_v58  ;;  %v1394_v58 = vpop.f32.mrf.mxu2 }
 0x1e7   : > { %v1195_v13 = vadd.f32 %v10943_v0, %v1194_v52  ;;  %v1797_v15 = vrot.slane %v1541_v14, 4  ;;  %v3510_v35 = vsel %vm1941_vm2, %v1541_v14, -inf  ;;  %v11201_v61 = vsel %vm4067_vm9, %v2389_v25, %v4116_v38 }
 0x1e8   : > { %v1718_v42 = vrot.slane %v1462_v27, 4  ;;  %v2404_v40 = vsel %vm1941_vm2, %v1462_v27, -inf  ;;  %v3511_v12 = vrot.slane %v3510_v35, 4  ;;  %v1542_v7 = vmax.f32 %v1392_v16, 0.0 }
 0x1e9   : > { %v2405_v5 = vrot.slane %v2404_v40, 4  ;;  %v1367_v43 = vadd.f32 %v10943_v0, %v10912_v3  ;;  %v2392_v34 = vmax.f32 %v2390_v44, %v2391_v32  ;;  %v3517_v62 = vsel %vm1941_vm2, %v1797_v15, -inf  ;;  %v1196_v32 = vpop.f32.mrf.mxu0 }
 0x1ea   : > { %v10066_v31 = vpack.i.bf16 %v11201_v61, %v11098_v49  ;;  %v2399_v6 = vmax.f32 %v2397_v48, %v2398_v21  ;;  %v3518_v39 = vrot.slane %v3517_v62, 4  ;;  %v2411_v45 = vsel %vm1941_vm2, %v1718_v42, -inf }
 0x1eb   : > { %v1463_v60 = vmax.f32 %v1195_v13, 0.0  ;;  %v3228_v22 = vrot.slane %v3227_v33, 1  ;;  %v3512_v29 = vmax.f32 %v3510_v35, %v3511_v12  ;;  %v1798_v52 = vrot.slane %v1542_v7, 4 }
 0x1ec   : > { %v3524_v57 = vsel %vm1941_vm2, %v1542_v7, -inf  ;;  %10067 = vrot.lane.b32.xlu1 %v10066_v31, %s10296_s25  ;;  %v3222_v4 = vmax.f32 %v3220_v50, %v3221_v8  ;;  %v3281_v3 = vmax.f32 %v3279_v1, %v3280_v36  ;;  %v3519_v44 = vmax.f32 %v3517_v62, %v3518_v39 }
 0x1ed   : > { %v2406_v25 = vmax.f32 %v2404_v40, %v2405_v5  ;;  %v11211_v14 = vmax.f32 %v3274_v55, %v3275_v23  ;;  %v2412_v48 = vrot.slane %v2411_v45, 4  ;;  %v3525_v27 = vrot.slane %v3524_v57, 4  ;;  %v9792_v23 = vld [vmem:[%s10391_s19 + $0xd0] sm:$0xff] }
 0x1ee   : > { %v3531_v21 = vsel %vm1941_vm2, %v1798_v52, -inf  ;;  %v1532_v16 = vmax.f32 %v1367_v43, 0.0  ;;  %v2393_v38 = vrot.slane %v2392_v34, 2  ;;  %v2400_v13 = vrot.slane %v2399_v6, 2  ;;  %9025 = vmatmul.msk.bf16.gmra.mxu0 %vm903_vm1, %v9792_v23  ;;  %v11255_v23 = vld [vmem:[%s14288_s2] ss:$0 sm:$0xff] }
 0x1ef   : > { %v1719_v15 = vrot.slane %v1463_v60, 4  ;;  %v3513_v35 = vrot.slane %v3512_v29, 2  ;;  %v3520_v42 = vrot.slane %v3519_v44, 2  ;;  %v3526_v12 = vmax.f32 %v3524_v57, %v3525_v27 }
 0x1f0   : > { %v3532_v50 = vrot.slane %v3531_v21, 4  ;;  %v11214_v1 = vmax.f32 %v3227_v33, %v3228_v22  ;;  %v3282_v8 = vrot.slane %v3281_v3, 2  ;;  %v2407_v36 = vrot.slane %v2406_v25, 2 }
 0x1f1   : > { %v2418_v55 = vsel %vm1941_vm2, %v1463_v60, -inf  ;;  %v11220_v40 = vsel %vm4065_vm8, %v3222_v4, %v10664_v9  ;;  %v2413_v5 = vmax.f32 %v2411_v45, %v2412_v48  ;;  %v3527_v7 = vrot.slane %v3526_v12, 2 }
 0x1f2   : > { %14377 = vst [vmem:[#allocation12_spill] sm:$0xff] %v11214_v1  ;;  %v3533_v43 = vmax.f32 %v3531_v21, %v3532_v50  ;;  %v11223_v31 = vmax.f32 %v2392_v34, %v2393_v38  ;;  %v11225_v39 = vmax.f32 %v2399_v6, %v2400_v13  ;;  %v2425_v33 = vsel %vm1941_vm2, %v1719_v15, -inf  ;;  %v11244_v15 = vpop.f32.mrf.mxu2 }
 0x1f3   : > { %14378 = vst [vmem:[#allocation13_spill] sm:$0xff] %v11220_v40  ;;  %v11230_v60 = vsel %vm1941_vm2, %v1532_v16, -inf  ;;  %v3514_v22 = vmax.f32 %v3512_v29, %v3513_v35  ;;  %v3521_v52 = vmax.f32 %v3519_v44, %v3520_v42  ;;  %v2419_v9 = vrot.slane %v2418_v55, 4 }
 0x1f4   : > { %v11232_v57 = vmax.f32 %v3281_v3, %v3282_v8  ;;  %v11234_v45 = vrot.slane %v1532_v16, 4  ;;  %v11236_v4 = vmax.f32 %v2406_v25, %v2407_v36  ;;  %v5188_v34 = vrot.slane %v10801_v59, 2  ;;  %v1199_v16 = vpop.f32.mrf.mxu0 }
 0x1f5   : > { %v2414_v6 = vrot.slane %v2413_v5, 2  ;;  %v3528_v48 = vmax.f32 %v3526_v12, %v3527_v7  ;;  %v3534_v27 = vrot.slane %v3533_v43, 2  ;;  %v2426_v21 = vrot.slane %v2425_v33, 4 }
 0x1f6   : > { %v2395_v13 = vrot.slane %v11223_v31, 1  ;;  %v2402_v29 = vrot.slane %v11225_v39, 1  ;;  %v14379_v44 = vand.u32 31, %v10892_v11  ;;  %v3515_v25 = vrot.slane %v3514_v22, 1 }
 0x1f7   : > { %v3522_v35 = vrot.slane %v3521_v52, 1  ;;  %v2420_v42 = vmax.f32 %v2418_v55, %v2419_v9  ;;  %v14380_v50 = vrot.slane %v10896_v51, 2  ;;  %v2409_v8 = vrot.slane %v11236_v4, 1 }
 0x1f8   : > { %v5253_v3 = vadd.s32 2, %v14379_v44  ;;  %v1395_v36 = vadd.f32 %v10943_v0, %v1394_v58  ;;  %v1197_v7 = vadd.f32 %v11255_v23, %v1196_v32  ;;  %v11258_v44 = vmax.f32 %v2413_v5, %v2414_v6 }
 0x1f9   : > { %v5245_v12 = vsel %vm14355_vm13, %v5188_v34, %v14380_v50  ;;  %v3529_v55 = vrot.slane %v3528_v48, 1  ;;  %v3535_v9 = vmax.f32 %v3533_v43, %v3534_v27  ;;  %v2427_v10 = vmax.f32 %v2425_v33, %v2426_v21 }
 0x1fa   : > { %vm5317_vm15 = vcmp.lt.s32.totalorder %v5253_v3, 32  ;;  %v5246_v50 = vsel %vm14355_vm13, %v5187_v46, %v5188_v34  ;;  %v1543_v62 = vmax.f32 %v1395_v36, 0.0  ;;  %v1464_v0 = vmax.f32 %v1197_v7, 0.0 }
 0x1fb   : > { %v5445_v3 = vsel %vm5317_vm15, %v5245_v12, 0.0  ;;  %v3516_v58 = vmax.f32 %v3514_v22, %v3515_v25  ;;  %v3523_v38 = vmax.f32 %v3521_v52, %v3522_v35  ;;  %v1200_v17 = vadd.f32 %v11255_v23, %v1199_v16 }
 0x1fc   : > { %v5928_v11 = vpack.c.bf16 %v5445_v3, %v5246_v50  ;;  %v1799_v1 = vrot.slane %v1543_v62, 4  ;;  %v3538_v32 = vsel %vm1941_vm2, %v1543_v62, -inf  ;;  %v1720_v5 = vrot.slane %v1464_v0, 4  ;;  %v1201_v3 = vpop.f32.mrf.mxu0 }
 0x1fd   : > { %v2432_v43 = vsel %vm1941_vm2, %v1464_v0, -inf  ;;  %v3536_v33 = vrot.slane %v3535_v9, 1  ;;  %v2421_v6 = vrot.slane %v2420_v42, 2  ;;  %v3539_v27 = vrot.slane %v3538_v32, 4 }
 0x1fe   : > { %9104 = vmatmul.msk.bf16.gmra.mxu2 %vm5826_vm14, %v5928_v11  ;;  %v2433_v46 = vrot.slane %v2432_v43, 4  ;;  %v3530_v34 = vmax.f32 %v3528_v48, %v3529_v55  ;;  %v3545_v21 = vsel %vm1941_vm2, %v1799_v1, -inf  ;;  %v2439_v22 = vsel %vm1941_vm2, %v1720_v5, -inf  ;;  %v1399_v11 = vpop.f32.mrf.mxu2 }
 0x1ff   : > { %v1465_v52 = vmax.f32 %v1200_v17, 0.0  ;;  %v3540_v25 = vmax.f32 %v3538_v32, %v3539_v27  ;;  %v3546_v16 = vrot.slane %v3545_v21, 4  ;;  %v2440_v12 = vrot.slane %v2439_v22, 4 }
 0x200   : > { %v2434_v35 = vmax.f32 %v2432_v43, %v2433_v46  ;;  %v4258_v62 = vsel %vm4055_vm3, %v3523_v38, %v3516_v58  ;;  %v2428_v36 = vrot.slane %v2427_v10, 2  ;;  %v3537_v0 = vmax.f32 %v3535_v9, %v3536_v33  ;;  %v9793_v46 = vld [vmem:[%s10391_s19 + $0xd8] sm:$0xff] }
 0x201   : > { %v1721_v7 = vrot.slane %v1465_v52, 4  ;;  %v2446_v50 = vsel %vm1941_vm2, %v1465_v52, -inf  ;;  %v2422_v48 = vmax.f32 %v2420_v42, %v2421_v6  ;;  %v3541_v55 = vrot.slane %v3540_v25, 2  ;;  %9026 = vmatmul.msk.bf16.gmra.mxu0 %vm903_vm1, %v9793_v46 }
 0x202   : > { %v3547_v1 = vmax.f32 %v3545_v21, %v3546_v16  ;;  %v2435_v28 = vrot.slane %v2434_v35, 2  ;;  %v2441_v5 = vmax.f32 %v2439_v22, %v2440_v12  ;;  %v2447_v17 = vrot.slane %v2446_v50, 4 }
 0x203   : > { %v2453_v32 = vsel %vm1941_vm2, %v1721_v7, -inf  ;;  %v2396_v43 = vmax.f32 %v11223_v31, %v2395_v13  ;;  %v4259_v38 = vsel %vm4057_vm4, %v3530_v34, %v4258_v62  ;;  %v3542_v58 = vmax.f32 %v3540_v25, %v3541_v55 }
 0x204   : > { %v3548_v27 = vrot.slane %v3547_v1, 2  ;;  %v2403_v52 = vmax.f32 %v11225_v39, %v2402_v29  ;;  %v2416_v40 = vrot.slane %v11258_v44, 1  ;;  %v2429_v9 = vmax.f32 %v2427_v10, %v2428_v36 }
 0x205   : > { %v2454_v42 = vrot.slane %v2453_v32, 4  ;;  %v2410_v33 = vmax.f32 %v11236_v4, %v2409_v8  ;;  %v2423_v6 = vrot.slane %v2422_v48, 1  ;;  %v3543_v21 = vrot.slane %v3542_v58, 1 }
 0x206   : > { %v3549_v22 = vmax.f32 %v3547_v1, %v3548_v27  ;;  %v4260_v31 = vsel %vm4059_vm5, %v3537_v0, %v4259_v38  ;;  %v2436_v13 = vmax.f32 %v2434_v35, %v2435_v28  ;;  %v2442_v34 = vrot.slane %v2441_v5, 2  ;;  %v1401_v1 = vpop.f32.mrf.mxu2 }
 0x207   : > { %v2448_v25 = vmax.f32 %v2446_v50, %v2447_v17  ;;  %v14381_v16 = vrot.slane %v11230_v60, 4  ;;  %v11288_v10 = vsel %vm1941_vm2, %v11234_v45, -inf  ;;  %v3544_v4 = vmax.f32 %v3542_v58, %v3543_v21  ;;  %v1204_v17 = vpop.f32.mrf.mxu0 }
 0x208   : > { %v3550_v29 = vrot.slane %v3549_v22, 1  ;;  %v4118_v8 = vsel %vm4055_vm3, %v2403_v52, %v2396_v43  ;;  %v2417_v12 = vmax.f32 %v11258_v44, %v2416_v40  ;;  %v2430_v62 = vrot.slane %v2429_v9, 1 }
 0x209   : > { %v11284_v39 = vmax.f32 %v11230_v60, %v14381_v16  ;;  %v2455_v36 = vmax.f32 %v2453_v32, %v2454_v42  ;;  %v4119_v28 = vsel %vm4057_vm4, %v2410_v33, %v4118_v8  ;;  %v2424_v35 = vmax.f32 %v2422_v48, %v2423_v6 }
 0x20a   : > { %v3551_v7 = vmax.f32 %v3549_v22, %v3550_v29  ;;  %v4261_v50 = vsel %vm4061_vm6, %v3544_v4, %v4260_v31  ;;  %v2437_v60 = vrot.slane %v2436_v13, 1  ;;  %v2443_v0 = vmax.f32 %v2441_v5, %v2442_v34 }
 0x20b   : > { %v2449_v55 = vrot.slane %v2448_v25, 2  ;;  %v1400_v45 = vadd.f32 %v11255_v23, %v1399_v11  ;;  %v3392_v38 = vrot.slane %v11288_v10, 4  ;;  %v1202_v40 = vadd.f32 %v11255_v23, %v1201_v3 }
 0x20c   : > { %v11297_v43 = vsel %vm14359_vm7, %v3551_v7, %v4261_v50  ;;  %v1402_v44 = vadd.f32 %v11255_v23, %v1401_v1  ;;  %v3387_v48 = vrot.slane %v11284_v39, 2  ;;  %v2431_v32 = vmax.f32 %v2429_v9, %v2430_v62 }
 0x20d   : > { %14382 = vst [vmem:[#allocation14_spill] sm:$0xff] %v11297_v43  ;;  %v4120_v58 = vsel %vm4059_vm5, %v2417_v12, %v4119_v28  ;;  %v2456_v5 = vrot.slane %v2455_v36, 2  ;;  %v1545_v27 = vmax.f32 %v1400_v45, 0.0  ;;  %v1466_v46 = vmax.f32 %v1202_v40, 0.0 }
 0x20e   : > { %v1546_v11 = vmax.f32 %v1402_v44, 0.0  ;;  %v1205_v52 = vadd.f32 %v11255_v23, %v1204_v17  ;;  %v4121_v42 = vsel %vm4061_vm6, %v2424_v35, %v4120_v58  ;;  %v2438_v33 = vmax.f32 %v2436_v13, %v2437_v60  ;;  %v1404_v44 = vpop.f32.mrf.mxu2 }
 0x20f   : > { %v2444_v6 = vrot.slane %v2443_v0, 1  ;;  %v2450_v21 = vmax.f32 %v2448_v25, %v2449_v55  ;;  %v1801_v22 = vrot.slane %v1545_v27, 4  ;;  %v3566_v3 = vsel %vm1941_vm2, %v1545_v27, -inf  ;;  %v11312_v58 = vpop.f32.mrf.mxu0 }
 0x210   : > { %v1722_v31 = vrot.slane %v1466_v46, 4  ;;  %v2460_v34 = vsel %vm1941_vm2, %v1466_v46, -inf  ;;  %v2457_v9 = vmax.f32 %v2455_v36, %v2456_v5  ;;  %v3567_v16 = vrot.slane %v3566_v3, 4 }
 0x211   : > { %v2461_v4 = vrot.slane %v2460_v34, 4  ;;  %v1802_v29 = vrot.slane %v1546_v11, 4  ;;  %v3573_v8 = vsel %vm1941_vm2, %v1801_v22, -inf  ;;  %v3580_v62 = vsel %vm1941_vm2, %v1546_v11, -inf }
 0x212   : > { %v2467_v12 = vsel %vm1941_vm2, %v1722_v31, -inf  ;;  %v1467_v28 = vmax.f32 %v1205_v52, 0.0  ;;  %v3568_v13 = vmax.f32 %v3566_v3, %v3567_v16  ;;  %v3574_v35 = vrot.slane %v3573_v8, 4 }
 0x213   : > { %v2462_v25 = vmax.f32 %v2460_v34, %v2461_v4  ;;  %v2468_v7 = vrot.slane %v2467_v12, 4  ;;  %v3581_v50 = vrot.slane %v3580_v62, 4  ;;  %v3587_v60 = vsel %vm1941_vm2, %v1802_v29, -inf }
 0x214   : > { %v1723_v55 = vrot.slane %v1467_v28, 4  ;;  %v2474_v36 = vsel %vm1941_vm2, %v1467_v28, -inf  ;;  %v3569_v45 = vrot.slane %v3568_v13, 2  ;;  %v3575_v1 = vmax.f32 %v3573_v8, %v3574_v35 }
 0x215   : > { %v2463_v17 = vrot.slane %v2462_v25, 2  ;;  %v2469_v40 = vmax.f32 %v2467_v12, %v2468_v7  ;;  %v4122_v5 = vsel %vm14359_vm7, %v2431_v32, %v4121_v42  ;;  %v2445_v27 = vmax.f32 %v2443_v0, %v2444_v6 }
 0x216   : > { %v3582_v46 = vmax.f32 %v3580_v62, %v3581_v50  ;;  %v3588_v11 = vrot.slane %v3587_v60, 4  ;;  %v4123_v52 = vsel %vm4065_vm8, %v2438_v33, %v4122_v5  ;;  %v2458_v22 = vrot.slane %v2457_v9, 1  ;;  %v9794_v50 = vld [vmem:[%s10391_s19 + $0xe0] sm:$0xff] }
 0x217   : > { %v3576_v3 = vrot.slane %v3575_v1, 2  ;;  %v2475_v31 = vrot.slane %v2474_v36, 4  ;;  %v3570_v34 = vmax.f32 %v3568_v13, %v3569_v45  ;;  %v2464_v16 = vmax.f32 %v2462_v25, %v2463_v17  ;;  %v1209_v5 = vpop.f32.mrf.mxu0  ;;  %9027 = vmatmul.msk.bf16.gmra.mxu0 %vm903_vm1, %v9794_v50 }
 0x218   : > { %v2470_v4 = vrot.slane %v2469_v40, 2  ;;  %v2481_v29 = vsel %vm1941_vm2, %v1723_v55, -inf  ;;  %v11318_v8 = vmax.f32 %v11284_v39, %v3387_v48  ;;  %v11321_v12 = vmax.f32 %v11288_v10, %v3392_v38 }
 0x219   : > { %v2451_v0 = vrot.slane %v2450_v21, 1  ;;  %v11324_v32 = vadd.s32 56, %v10710_v18  ;;  %v14384_v42 = vrot.slane %v11211_v14, 1  ;;  %v3583_v62 = vrot.slane %v3582_v46, 2 }
 0x21a   : > { %v3589_v28 = vmax.f32 %v3587_v60, %v3588_v11  ;;  %v11333_v39 = vsel %vm4067_vm9, %v2445_v27, %v4123_v52  ;;  %v2459_v48 = vmax.f32 %v2457_v9, %v2458_v22  ;;  %v3577_v13 = vmax.f32 %v3575_v1, %v3576_v3 }
 0x21b   : > { %14383 = vst [vmem:[#allocation15_spill] sm:$0xff] %v11324_v32  ;;  %v11329_v33 = vmax.f32 %v11211_v14, %v14384_v42  ;;  %v2482_v10 = vrot.slane %v2481_v29, 4  ;;  %v3571_v38 = vrot.slane %v3570_v34, 1  ;;  %v2465_v35 = vrot.slane %v2464_v16, 1 }
 0x21c   : > { %v2471_v25 = vmax.f32 %v2469_v40, %v2470_v4  ;;  %v2476_v7 = vmax.f32 %v2474_v36, %v2475_v31  ;;  %v2452_v45 = vmax.f32 %v2450_v21, %v2451_v0  ;;  %v3774_v17 = vand.u32 31, %v11324_v32  ;;  %v11347_v21 = vpop.f32.mrf.mxu2 }
 0x21d   : > { %v11341_v60 = vadd.f32 %v11255_v23, %v11022_v30  ;;  %v3584_v9 = vmax.f32 %v3582_v46, %v3583_v62  ;;  %v3590_v1 = vrot.slane %v3589_v28, 2  ;;  %v5192_v27 = vrot.slane %v11201_v61, 2 }
 0x21e   : > { %v4125_v36 = vsel %vm4055_vm3, %v2459_v48, %v2452_v45  ;;  %v3578_v40 = vrot.slane %v3577_v13, 1  ;;  %v2483_v11 = vmax.f32 %v2481_v29, %v2482_v10  ;;  %v14313_v52 = vrot.slane %v11333_v39, 2 }
 0x21f   : > { %v3572_v22 = vmax.f32 %v3570_v34, %v3571_v38  ;;  %v2466_v3 = vmax.f32 %v2464_v16, %v2465_v35  ;;  %v2472_v31 = vrot.slane %v2471_v25, 1  ;;  %v2477_v4 = vrot.slane %v2476_v7, 2 }
 0x220   : > { %v5241_v30 = vsel %vm14355_vm13, %v5192_v27, %v14313_v52  ;;  %v5257_v46 = vadd.s32 2, %v3774_v17  ;;  %v4903_v0 = vrot.slane %v11201_v61, 1  ;;  %v14312_v42 = vrot.slane %v11333_v39, 1 }
 0x221   : > { %v3585_v62 = vrot.slane %v3584_v9, 1  ;;  %v3591_v29 = vmax.f32 %v3589_v28, %v3590_v1  ;;  %v4968_v48 = vadd.s32 1, %v3774_v17  ;;  %v1405_v10 = vadd.f32 %v11255_v23, %v1404_v44 }
 0x222   : > { %v3579_v50 = vmax.f32 %v3577_v13, %v3578_v40  ;;  %v2484_v34 = vrot.slane %v2483_v11, 2  ;;  %vm5321_vm0 = vcmp.lt.s32.totalorder %v5257_v46, 32  ;;  %v4952_v16 = vsel %vm4928_vm10, %v4903_v0, %v14312_v42 }
 0x223   : > { %v14385_v38 = vrot.slane %v11098_v49, 2  ;;  %v5449_v45 = vsel %vm5321_vm0, %v5241_v30, 0.0  ;;  %vm5032_vm12 = vcmp.lt.s32.totalorder %v4968_v48, 32  ;;  %v1547_v55 = vmax.f32 %v1405_v10, 0.0 }
 0x224   : > { %v14386_v17 = vrot.slane %v11098_v49, 1  ;;  %v5160_v13 = vsel %vm5032_vm12, %v4952_v16, 0.0  ;;  %v1207_v1 = vadd.f32 %v11255_v23, %v11312_v58  ;;  %v1210_v42 = vadd.f32 %v11255_v23, %v1209_v5 }
 0x225   : > { %v5242_v35 = vsel %vm14355_vm13, %v14385_v38, %v5192_v27  ;;  %v1803_v46 = vrot.slane %v1547_v55, 4  ;;  %v3594_v6 = vsel %vm1941_vm2, %v1547_v55, -inf  ;;  %v11372_v27 = vpop.f32.mrf.mxu0  ;;  %v3592_v30 = vrot.slane %v3591_v29, 1 }
 0x226   : > { %v5932_v28 = vpack.c.bf16 %v5449_v45, %v5242_v35  ;;  %v4953_v44 = vsel %vm4928_vm10, %v14386_v17, %v4903_v0  ;;  %v2478_v48 = vmax.f32 %v2476_v7, %v2477_v4  ;;  %v3595_v10 = vrot.slane %v3594_v6, 4 }
 0x227   : > { %v10071_v40 = vpack.i.bf16 %v5160_v13, %v4953_v44  ;;  %v1468_v38 = vmax.f32 %v1207_v1, 0.0  ;;  %v4265_v0 = vsel %vm4055_vm3, %v3579_v50, %v3572_v22  ;;  %v3586_v16 = vmax.f32 %v3584_v9, %v3585_v62  ;;  %v1409_v44 = vpop.f32.mrf.mxu2 }
 0x228   : > { %9106 = vmatmul.msk.bf16.gmra.mxu3 %vm5826_vm14, %v5932_v28  ;;  %v3601_v58 = vsel %vm1941_vm2, %v1803_v46, -inf  ;;  %v1469_v35 = vmax.f32 %v1210_v42, 0.0  ;;  %v3596_v45 = vmax.f32 %v3594_v6, %v3595_v10  ;;  %v2473_v13 = vmax.f32 %v2471_v25, %v2472_v31 }
 0x229   : > { %10072 = vrot.lane.b32.xlu2 %v10071_v40, %s10295_s24  ;;  %v3602_v55 = vrot.slane %v3601_v58, 4  ;;  %v1724_v17 = vrot.slane %v1468_v38, 4  ;;  %v2488_v5 = vsel %vm1941_vm2, %v1468_v38, -inf  ;;  %v2485_v7 = vmax.f32 %v2483_v11, %v2484_v34 }
 0x22a   : > { %v2489_v4 = vrot.slane %v2488_v5, 4  ;;  %v1725_v28 = vrot.slane %v1469_v35, 4  ;;  %v3593_v52 = vmax.f32 %v3591_v29, %v3592_v30  ;;  %v3597_v1 = vrot.slane %v3596_v45, 2 }
 0x22b   : > { %v3603_v14 = vmax.f32 %v3601_v58, %v3602_v55  ;;  %v2495_v9 = vsel %vm1941_vm2, %v1724_v17, -inf  ;;  %v4266_v22 = vsel %vm4057_vm4, %v3586_v16, %v4265_v0  ;;  %v2502_v6 = vsel %vm1941_vm2, %v1469_v35, -inf }
 0x22c   : > { %v2490_v62 = vmax.f32 %v2488_v5, %v2489_v4  ;;  %v2496_v50 = vrot.slane %v2495_v9, 4  ;;  %v4126_v42 = vsel %vm4057_vm4, %v2466_v3, %v4125_v36  ;;  %v2479_v40 = vrot.slane %v2478_v48, 1  ;;  %v9795_v36 = vld [vmem:[%s10391_s19 + $0xe8] sm:$0xff] }
 0x22d   : > { %v3598_v46 = vmax.f32 %v3596_v45, %v3597_v1  ;;  %v3604_v25 = vrot.slane %v3603_v14, 2  ;;  %v2503_v34 = vrot.slane %v2502_v6, 4  ;;  %v2509_v29 = vsel %vm1941_vm2, %v1725_v28, -inf  ;;  %v1214_v17 = vpop.f32.mrf.mxu0  ;;  %9028 = vmatmul.msk.bf16.gmra.mxu0 %vm903_vm1, %v9795_v36 }
 0x22e   : > { %v2491_v11 = vrot.slane %v2490_v62, 2  ;;  %v2497_v31 = vmax.f32 %v2495_v9, %v2496_v50  ;;  %v2486_v30 = vrot.slane %v2485_v7, 1  ;;  %v4267_v0 = vsel %vm4059_vm5, %v3593_v52, %v4266_v22 }
 0x22f   : > { %v3599_v10 = vrot.slane %v3598_v46, 1  ;;  %v3605_v38 = vmax.f32 %v3603_v14, %v3604_v25  ;;  %v2504_v55 = vmax.f32 %v2502_v6, %v2503_v34  ;;  %v2510_v35 = vrot.slane %v2509_v29, 4  ;;  %v1411_v6 = vpop.f32.mrf.mxu2 }
 0x230   : > { %v2492_v16 = vmax.f32 %v2490_v62, %v2491_v11  ;;  %v2498_v58 = vrot.slane %v2497_v31, 2  ;;  %v2480_v3 = vmax.f32 %v2478_v48, %v2479_v40  ;;  %v1410_v4 = vadd.f32 %v11255_v23, %v1409_v44 }
 0x231   : > { %v3600_v5 = vmax.f32 %v3598_v46, %v3599_v10  ;;  %v3606_v45 = vrot.slane %v3605_v38, 1  ;;  %v2505_v50 = vrot.slane %v2504_v55, 2  ;;  %v2511_v28 = vmax.f32 %v2509_v29, %v2510_v35 }
 0x232   : > { %v2493_v1 = vrot.slane %v2492_v16, 1  ;;  %v2499_v9 = vmax.f32 %v2497_v31, %v2498_v58  ;;  %v1536_v14 = vmax.f32 %v11341_v60, 0.0  ;;  %v4127_v52 = vsel %vm4059_vm5, %v2473_v13, %v4126_v42 }
 0x233   : > { %v3607_v22 = vmax.f32 %v3605_v38, %v3606_v45  ;;  %v4268_v62 = vsel %vm4061_vm6, %v3600_v5, %v4267_v0  ;;  %v2487_v25 = vmax.f32 %v2485_v7, %v2486_v30  ;;  %v2506_v40 = vmax.f32 %v2504_v55, %v2505_v50 }
 0x234   : > { %v2500_v48 = vrot.slane %v2499_v9, 1  ;;  %v2512_v46 = vrot.slane %v2511_v28, 2  ;;  %v4128_v44 = vsel %vm4061_vm6, %v2480_v3, %v4127_v52  ;;  %v2494_v31 = vmax.f32 %v2492_v16, %v2493_v1 }
 0x235   : > { %v11393_v11 = vsel %vm14359_vm7, %v3607_v22, %v4268_v62  ;;  %v1549_v34 = vmax.f32 %v1410_v4, 0.0  ;;  %v14388_v29 = vrot.slane %v11321_v12, 2  ;;  %v2507_v13 = vrot.slane %v2506_v40, 1 }
 0x236   : > { %14387 = vst [vmem:[#allocation16_spill] sm:$0xff] %v11393_v11  ;;  %v2513_v42 = vmax.f32 %v2511_v28, %v2512_v46  ;;  %v1212_v7 = vadd.f32 %v11255_v23, %v11372_v27  ;;  %v11402_v30 = vrot.slane %v1536_v14, 4  ;;  %v2501_v10 = vmax.f32 %v2499_v9, %v2500_v48  ;;  %v11412_v9 = vpop.f32.mrf.mxu0 }
 0x237   : > { %v11398_v60 = vmax.f32 %v11321_v12, %v14388_v29  ;;  %v1805_v38 = vrot.slane %v1549_v34, 4  ;;  %v3622_v0 = vsel %vm1941_vm2, %v1549_v34, -inf  ;;  %v4129_v58 = vsel %vm14359_vm7, %v2487_v25, %v4128_v44 }
 0x238   : > { %v2514_v16 = vrot.slane %v2513_v42, 1  ;;  %v3623_v55 = vrot.slane %v3622_v0, 4  ;;  %v1470_v35 = vmax.f32 %v1212_v7, 0.0  ;;  %v11407_v36 = vsel %vm1941_vm2, %v1536_v14, -inf }
 0x239   : > { %v3629_v12 = vsel %vm1941_vm2, %v1805_v38, -inf  ;;  %v1412_v3 = vadd.f32 %v11255_v23, %v1411_v6  ;;  %v4130_v27 = vsel %vm4065_vm8, %v2494_v31, %v4129_v58  ;;  %v2508_v5 = vmax.f32 %v2506_v40, %v2507_v13  ;;  %v1414_v31 = vpop.f32.mrf.mxu2 }
 0x23a   : > { %v3624_v45 = vmax.f32 %v3622_v0, %v3623_v55  ;;  %v3630_v4 = vrot.slane %v3629_v12, 4  ;;  %v1726_v1 = vrot.slane %v1470_v35, 4  ;;  %v2516_v50 = vsel %vm1941_vm2, %v1470_v35, -inf }
 0x23b   : > { %v1550_v28 = vmax.f32 %v1412_v3, 0.0  ;;  %v11416_v52 = vsel %vm4067_vm9, %v2501_v10, %v4130_v27  ;;  %v1215_v14 = vadd.f32 %v11255_v23, %v1214_v17  ;;  %v2515_v22 = vmax.f32 %v2513_v42, %v2514_v16 }
 0x23c   : > { %v3625_v62 = vrot.slane %v3624_v45, 2  ;;  %v3631_v25 = vmax.f32 %v3629_v12, %v3630_v4  ;;  %v2517_v6 = vrot.slane %v2516_v50, 4  ;;  %v2523_v48 = vsel %vm1941_vm2, %v1726_v1, -inf }
 0x23d   : > { %v1806_v40 = vrot.slane %v1550_v28, 4  ;;  %v3636_v46 = vsel %vm1941_vm2, %v1550_v28, -inf  ;;  %v10081_v44 = vpack.i.bf16 %v11416_v52, %v11333_v39  ;;  %v2524_v7 = vrot.slane %v2523_v48, 4  ;;  %v9796_v28 = vld [vmem:[%s10391_s19 + $0xf0] sm:$0xff] }
 0x23e   : > { %v3626_v34 = vmax.f32 %v3624_v45, %v3625_v62  ;;  %v3632_v29 = vrot.slane %v3631_v25, 2  ;;  %v2518_v13 = vmax.f32 %v2516_v50, %v2517_v6  ;;  %v3637_v10 = vrot.slane %v3636_v46, 4  ;;  %9029 = vmatmul.msk.bf16.gmra.mxu0 %vm903_vm1, %v9796_v28 }
 0x23f   : > { %v3643_v17 = vsel %vm1941_vm2, %v1806_v40, -inf  ;;  %10082 = vrot.lane.b32.xlu1 %v10081_v44, %s10296_s25  ;;  %v1471_v42 = vmax.f32 %v1215_v14, 0.0  ;;  %v1415_v38 = vadd.f32 %v11255_v23, %v1414_v31  ;;  %v2525_v55 = vmax.f32 %v2523_v48, %v2524_v7  ;;  %v1219_v48 = vpop.f32.mrf.mxu0 }
 0x240   : > { %v3627_v0 = vrot.slane %v3626_v34, 1  ;;  %v3633_v58 = vmax.f32 %v3631_v25, %v3632_v29  ;;  %v2519_v16 = vrot.slane %v2518_v13, 2  ;;  %v3638_v35 = vmax.f32 %v3636_v46, %v3637_v10 }
 0x241   : > { %v3644_v12 = vrot.slane %v3643_v17, 4  ;;  %v1727_v3 = vrot.slane %v1471_v42, 4  ;;  %v2530_v27 = vsel %vm1941_vm2, %v1471_v42, -inf  ;;  %v2526_v50 = vrot.slane %v2525_v55, 2 }
 0x242   : > { %v3628_v45 = vmax.f32 %v3626_v34, %v3627_v0  ;;  %v3634_v4 = vrot.slane %v3633_v58, 1  ;;  %v2520_v1 = vmax.f32 %v2518_v13, %v2519_v16  ;;  %v3639_v62 = vrot.slane %v3638_v35, 2 }
 0x243   : > { %v3645_v6 = vmax.f32 %v3643_v17, %v3644_v12  ;;  %v2531_v40 = vrot.slane %v2530_v27, 4  ;;  %v2537_v14 = vsel %vm1941_vm2, %v1727_v3, -inf  ;;  %v2527_v25 = vmax.f32 %v2525_v55, %v2526_v50 }
 0x244   : > { %v3635_v44 = vmax.f32 %v3633_v58, %v3634_v4  ;;  %v2521_v31 = vrot.slane %v2520_v1, 1  ;;  %v2538_v29 = vrot.slane %v2537_v14, 4  ;;  %v3640_v46 = vmax.f32 %v3638_v35, %v3639_v62  ;;  %v1416_v58 = vpop.f32.mrf.mxu2 }
 0x245   : > { %v3646_v7 = vrot.slane %v3645_v6, 2  ;;  %v2532_v10 = vmax.f32 %v2530_v27, %v2531_v40  ;;  %v1551_v34 = vmax.f32 %v1415_v38, 0.0  ;;  %v4132_v13 = vsel %vm4055_vm3, %v2515_v22, %v2508_v5 }
 0x246   : > { %v2522_v42 = vmax.f32 %v2520_v1, %v2521_v31  ;;  %v2528_v0 = vrot.slane %v2527_v25, 1  ;;  %v2539_v16 = vmax.f32 %v2537_v14, %v2538_v29  ;;  %v3641_v17 = vrot.slane %v3640_v46, 1 }
 0x247   : > { %v3647_v12 = vmax.f32 %v3645_v6, %v3646_v7  ;;  %v2533_v32 = vrot.slane %v2532_v10, 2  ;;  %v1807_v3 = vrot.slane %v1551_v34, 4  ;;  %v4272_v55 = vsel %vm4055_vm3, %v3635_v44, %v3628_v45 }
 0x248   : > { %v2529_v4 = vmax.f32 %v2527_v25, %v2528_v0  ;;  %v2540_v50 = vrot.slane %v2539_v16, 2  ;;  %v3650_v28 = vsel %vm1941_vm2, %v1551_v34, -inf  ;;  %v3642_v35 = vmax.f32 %v3640_v46, %v3641_v17 }
 0x249   : > { %v3648_v62 = vrot.slane %v3647_v12, 1  ;;  %v2534_v27 = vmax.f32 %v2532_v10, %v2533_v32  ;;  %v3651_v38 = vrot.slane %v3650_v28, 4  ;;  %v4133_v5 = vsel %vm4057_vm4, %v2522_v42, %v4132_v13 }
 0x24a   : > { %v2541_v22 = vmax.f32 %v2539_v16, %v2540_v50  ;;  %v3657_v1 = vsel %vm1941_vm2, %v1807_v3, -inf  ;;  %v1217_v6 = vadd.f32 %v11255_v23, %v11412_v9  ;;  %v4273_v14 = vsel %vm4057_vm4, %v3642_v35, %v4272_v55  ;;  %v1221_v16 = vpop.f32.mrf.mxu0 }
 0x24b   : > { %v3649_v40 = vmax.f32 %v3647_v12, %v3648_v62  ;;  %v2535_v45 = vrot.slane %v2534_v27, 1  ;;  %v3652_v44 = vmax.f32 %v3650_v28, %v3651_v38  ;;  %v3658_v25 = vrot.slane %v3657_v1, 4 }
 0x24c   : > { %v2542_v31 = vrot.slane %v2541_v22, 1  ;;  %v1472_v29 = vmax.f32 %v1217_v6, 0.0  ;;  %v1417_v46 = vadd.f32 %v11255_v23, %v1416_v58  ;;  %v1220_v34 = vadd.f32 %v11255_v23, %v1219_v48 }
 0x24d   : > { %v4274_v32 = vsel %vm4059_vm5, %v3649_v40, %v4273_v14  ;;  %v2536_v7 = vmax.f32 %v2534_v27, %v2535_v45  ;;  %v3653_v10 = vrot.slane %v3652_v44, 2  ;;  %v4134_v13 = vsel %vm4059_vm5, %v2529_v4, %v4133_v5  ;;  %v1419_v4 = vpop.f32.mrf.mxu2 }
 0x24e   : > { %v3659_v42 = vmax.f32 %v3657_v1, %v3658_v25  ;;  %v1728_v9 = vrot.slane %v1472_v29, 4  ;;  %v2544_v0 = vsel %vm1941_vm2, %v1472_v29, -inf  ;;  %v2543_v17 = vmax.f32 %v2541_v22, %v2542_v31 }
 0x24f   : > { %v3654_v12 = vmax.f32 %v3652_v44, %v3653_v10  ;;  %v2545_v3 = vrot.slane %v2544_v0, 4  ;;  %v1552_v55 = vmax.f32 %v1417_v46, 0.0  ;;  %v4135_v50 = vsel %vm4061_vm6, %v2536_v7, %v4134_v13 }
 0x250   : > { %v3660_v58 = vrot.slane %v3659_v42, 2  ;;  %v2551_v28 = vsel %vm1941_vm2, %v1728_v9, -inf  ;;  %v1473_v35 = vmax.f32 %v1220_v34, 0.0 }
 0x251   : > { %v3655_v62 = vrot.slane %v3654_v12, 1  ;;  %v2546_v27 = vmax.f32 %v2544_v0, %v2545_v3  ;;  %v2552_v48 = vrot.slane %v2551_v28, 4  ;;  %v1808_v38 = vrot.slane %v1552_v55, 4 }
 0x252   : > { %v3661_v5 = vmax.f32 %v3659_v42, %v3660_v58  ;;  %v3664_v1 = vsel %vm1941_vm2, %v1552_v55, -inf  ;;  %v1729_v6 = vrot.slane %v1473_v35, 4  ;;  %v2558_v22 = vsel %vm1941_vm2, %v1473_v35, -inf  ;;  %v9797_v35 = vld [vmem:[%s10391_s19 + $0xf8] sm:$0xff]  ;;  %v1224_v11 = vpop.f32.mrf.mxu0 }
 0x253   : > { %v3656_v40 = vmax.f32 %v3654_v12, %v3655_v62  ;;  %v2547_v14 = vrot.slane %v2546_v27, 2  ;;  %v2553_v45 = vmax.f32 %v2551_v28, %v2552_v48  ;;  %v3665_v44 = vrot.slane %v3664_v1, 4  ;;  %9030 = vmatmul.msk.bf16.gmra.mxu0 %vm903_vm1, %v9797_v35 }
 0x254   : > { %v3662_v31 = vrot.slane %v3661_v5, 1  ;;  %v3671_v25 = vsel %vm1941_vm2, %v1808_v38, -inf  ;;  %v2559_v29 = vrot.slane %v2558_v22, 4  ;;  %v2565_v46 = vsel %vm1941_vm2, %v1729_v6, -inf }
 0x255   : > { %v4275_v7 = vsel %vm4061_vm6, %v3656_v40, %v4274_v32  ;;  %v2548_v10 = vmax.f32 %v2546_v27, %v2547_v14  ;;  %v2554_v34 = vrot.slane %v2553_v45, 2  ;;  %v3666_v13 = vmax.f32 %v3664_v1, %v3665_v44 }
 0x256   : > { %v3663_v42 = vmax.f32 %v3661_v5, %v3662_v31  ;;  %v3672_v9 = vrot.slane %v3671_v25, 4  ;;  %v2560_v0 = vmax.f32 %v2558_v22, %v2559_v29  ;;  %v2566_v3 = vrot.slane %v2565_v46, 4 }
 0x257   : > { %v2549_v12 = vrot.slane %v2548_v10, 1  ;;  %v2555_v55 = vmax.f32 %v2553_v45, %v2554_v34  ;;  %v3667_v58 = vrot.slane %v3666_v13, 2  ;;  %v1420_v28 = vadd.f32 %v11255_v23, %v1419_v4 }
 0x258   : > { %v4276_v62 = vsel %vm14359_vm7, %v3663_v42, %v4275_v7  ;;  %v3673_v48 = vmax.f32 %v3671_v25, %v3672_v9  ;;  %v2561_v38 = vrot.slane %v2560_v0, 2  ;;  %v2567_v6 = vmax.f32 %v2565_v46, %v2566_v3  ;;  %v1421_v25 = vpop.f32.mrf.mxu2 }
 0x259   : > { %v2550_v32 = vmax.f32 %v2548_v10, %v2549_v12  ;;  %v2556_v27 = vrot.slane %v2555_v55, 1  ;;  %v3668_v40 = vmax.f32 %v3666_v13, %v3667_v58  ;;  %v1553_v1 = vmax.f32 %v1420_v28, 0.0 }
 0x25a   : > { %v3674_v5 = vrot.slane %v3673_v48, 2  ;;  %v2562_v22 = vmax.f32 %v2560_v0, %v2561_v38  ;;  %v2568_v14 = vrot.slane %v2567_v6, 2  ;;  %v1222_v45 = vadd.f32 %v11255_v23, %v1221_v16 }
 0x25b   : > { %v4136_v4 = vsel %vm14359_vm7, %v2543_v17, %v4135_v50  ;;  %v2557_v44 = vmax.f32 %v2555_v55, %v2556_v27  ;;  %v3669_v31 = vrot.slane %v3668_v40, 1  ;;  %v1809_v29 = vrot.slane %v1553_v1, 4 }
 0x25c   : > { %v3675_v7 = vmax.f32 %v3673_v48, %v3674_v5  ;;  %v2563_v46 = vrot.slane %v2562_v22, 1  ;;  %v2569_v34 = vmax.f32 %v2567_v6, %v2568_v14  ;;  %v3678_v10 = vsel %vm1941_vm2, %v1553_v1, -inf }
 0x25d   : > { %v3670_v13 = vmax.f32 %v3668_v40, %v3669_v31  ;;  %v3679_v42 = vrot.slane %v3678_v10, 4  ;;  %v3685_v9 = vsel %vm1941_vm2, %v1809_v29, -inf  ;;  %v1474_v3 = vmax.f32 %v1222_v45, 0.0 }
 0x25e   : > { %v4137_v0 = vsel %vm4065_vm8, %v2550_v32, %v4136_v4  ;;  %v3676_v12 = vrot.slane %v3675_v7, 1  ;;  %v2570_v16 = vrot.slane %v2569_v34, 1  ;;  %v3686_v58 = vrot.slane %v3685_v9, 4  ;;  %v11467_v4 = vpop.f32.mrf.mxu0 }
 0x25f   : > { %v4277_v17 = vsel %vm4065_vm8, %v3670_v13, %v4276_v62  ;;  %v3680_v50 = vmax.f32 %v3678_v10, %v3679_v42  ;;  %v1730_v55 = vrot.slane %v1474_v3, 4  ;;  %v2572_v28 = vsel %vm1941_vm2, %v1474_v3, -inf }
 0x260   : > { %v3677_v35 = vmax.f32 %v3675_v7, %v3676_v12  ;;  %v2564_v48 = vmax.f32 %v2562_v22, %v2563_v46  ;;  %v3687_v38 = vmax.f32 %v3685_v9, %v3686_v58  ;;  %v2573_v6 = vrot.slane %v2572_v28, 4  ;;  %v1424_v9 = vpop.f32.mrf.mxu2 }
 0x261   : > { %v3681_v27 = vrot.slane %v3680_v50, 2  ;;  %v2579_v40 = vsel %vm1941_vm2, %v1730_v55, -inf  ;;  %v1422_v1 = vadd.f32 %v11255_v23, %v1421_v25  ;;  %v1225_v32 = vadd.f32 %v11255_v23, %v1224_v11 }
 0x262   : > { %v11465_v5 = vsel %vm4067_vm9, %v3677_v35, %v4277_v17  ;;  %v2571_v14 = vmax.f32 %v2569_v34, %v2570_v16  ;;  %v3688_v62 = vrot.slane %v3687_v38, 2  ;;  %v2574_v45 = vmax.f32 %v2572_v28, %v2573_v6 }
 0x263   : > { %14389 = vst [vmem:[#allocation17_spill] sm:$0xff] %v11465_v5  ;;  %v3682_v31 = vmax.f32 %v3680_v50, %v3681_v27  ;;  %v2580_v29 = vrot.slane %v2579_v40, 4  ;;  %v1554_v22 = vmax.f32 %v1422_v1, 0.0  ;;  %v1475_v7 = vmax.f32 %v1225_v32, 0.0 }
 0x264   : > { %v3689_v46 = vmax.f32 %v3687_v38, %v3688_v62  ;;  %v2575_v10 = vrot.slane %v2574_v45, 2  ;;  %v11470_v13 = vsel %vm4067_vm9, %v2557_v44, %v4137_v0  ;;  %v5194_v25 = vrot.slane %v11416_v52, 2 }
 0x265   : > { %14390 = vst [vmem:[#allocation18_spill] sm:$0xff] %v11470_v13  ;;  %v3683_v23 = vrot.slane %v3682_v31, 1  ;;  %v2581_v11 = vmax.f32 %v2579_v40, %v2580_v29  ;;  %v1810_v42 = vrot.slane %v1554_v22, 4  ;;  %v3692_v34 = vsel %vm1941_vm2, %v1554_v22, -inf }
 0x266   : > { %v3690_v3 = vrot.slane %v3689_v46, 1  ;;  %v2576_v12 = vmax.f32 %v2574_v45, %v2575_v10  ;;  %v3693_v16 = vrot.slane %v3692_v34, 4  ;;  %v1731_v58 = vrot.slane %v1475_v7, 4  ;;  %v1229_v29 = vpop.f32.mrf.mxu0 }
 0x267   : > { %v3684_v17 = vmax.f32 %v3682_v31, %v3683_v23  ;;  %v2582_v50 = vrot.slane %v2581_v11, 2  ;;  %v3699_v55 = vsel %vm1941_vm2, %v1810_v42, -inf  ;;  %v2586_v28 = vsel %vm1941_vm2, %v1475_v7, -inf  ;;  %v9798_v23 = vld [vmem:[%s10391_s19 + $0x100] sm:$0xff] }
 0x268   : > { %v3691_v44 = vmax.f32 %v3689_v46, %v3690_v3  ;;  %v2577_v0 = vrot.slane %v2576_v12, 1  ;;  %v3694_v35 = vmax.f32 %v3692_v34, %v3693_v16  ;;  %v3700_v38 = vrot.slane %v3699_v55, 4  ;;  %9031 = vmatmul.msk.bf16.gmra.mxu0 %vm903_vm1, %v9798_v23 }
 0x269   : > { %v2583_v6 = vmax.f32 %v2581_v11, %v2582_v50  ;;  %v2587_v27 = vrot.slane %v2586_v28, 4  ;;  %v2593_v40 = vsel %vm1941_vm2, %v1731_v58, -inf  ;;  %v14316_v1 = vrot.slane %v11470_v13, 2 }
 0x26a   : > { %v4139_v32 = vsel %vm4055_vm3, %v2571_v14, %v2564_v48  ;;  %v2578_v62 = vmax.f32 %v2576_v12, %v2577_v0  ;;  %v3695_v45 = vrot.slane %v3694_v35, 2  ;;  %v3701_v31 = vmax.f32 %v3699_v55, %v3700_v38 }
 0x26b   : > { %v2584_v22 = vrot.slane %v2583_v6, 1  ;;  %v2588_v10 = vmax.f32 %v2586_v28, %v2587_v27  ;;  %v2594_v7 = vrot.slane %v2593_v40, 4  ;;  %v5239_v46 = vsel %vm14355_vm13, %v5194_v25, %v14316_v1  ;;  %v1426_v27 = vpop.f32.mrf.mxu2 }
 0x26c   : > { %v4279_v11 = vsel %vm4055_vm3, %v3691_v44, %v3684_v17  ;;  %v3696_v42 = vmax.f32 %v3694_v35, %v3695_v45  ;;  %v3702_v34 = vrot.slane %v3701_v31, 2  ;;  %v14391_v3 = vrot.slane %v11333_v39, 2 }
 0x26d   : > { %v4140_v14 = vsel %vm4057_vm4, %v2578_v62, %v4139_v32  ;;  %v2589_v12 = vrot.slane %v2588_v10, 2  ;;  %v2595_v16 = vmax.f32 %v2593_v40, %v2594_v7  ;;  %v4905_v28 = vrot.slane %v11416_v52, 1 }
 0x26e   : > { %v5240_v48 = vsel %vm14355_vm13, %v14391_v3, %v5194_v25  ;;  %v3697_v50 = vrot.slane %v3696_v42, 1  ;;  %v3703_v55 = vmax.f32 %v3701_v31, %v3702_v34  ;;  %v14315_v17 = vrot.slane %v11470_v13, 1  ;;  %v11497_v25 = vld [vmem:[%s14288_s2] ss:$0 sm:$0xff]  ;;  %v11512_v34 = vpop.f32.mrf.mxu0 }
 0x26f   : > { %v5934_v58 = vpack.c.bf16 %v5239_v46, %v5240_v48  ;;  %v2585_v44 = vmax.f32 %v2583_v6, %v2584_v22  ;;  %v2590_v0 = vmax.f32 %v2588_v10, %v2589_v12  ;;  %v2596_v35 = vrot.slane %v2595_v16, 2 }
 0x270   : > { %v1425_v38 = vadd.f32 %v11497_v25, %v1424_v9  ;;  %v3698_v40 = vmax.f32 %v3696_v42, %v3697_v50  ;;  %v3704_v32 = vrot.slane %v3703_v55, 1  ;;  %v4950_v62 = vsel %vm4928_vm10, %v4905_v28, %v14315_v17 }
 0x271   : > { %9107 = vmatmul.msk.bf16.gmra.mxu3 %vm5826_vm14, %v5934_v58  ;;  %v14392_v6 = vrot.slane %v11333_v39, 1  ;;  %v2591_v31 = vrot.slane %v2590_v0, 1  ;;  %v2597_v22 = vmax.f32 %v2595_v16, %v2596_v35  ;;  %v1227_v23 = vadd.f32 %v11497_v25, %v11467_v4 }
 0x272   : > { %v1555_v7 = vmax.f32 %v1425_v38, 0.0  ;;  %v3705_v46 = vmax.f32 %v3703_v55, %v3704_v32  ;;  %v4280_v9 = vsel %vm4057_vm4, %v3698_v40, %v4279_v11  ;;  %v1427_v42 = vadd.f32 %v11497_v25, %v1426_v27 }
 0x273   : > { %v4951_v45 = vsel %vm4928_vm10, %v14392_v6, %v4905_v28  ;;  %v2592_v3 = vmax.f32 %v2590_v0, %v2591_v31  ;;  %v2598_v48 = vrot.slane %v2597_v22, 1  ;;  %v4141_v16 = vsel %vm4059_vm5, %v2585_v44, %v4140_v14 }
 0x274   : > { %v10086_v10 = vpack.i.bf16 %v4950_v62, %v4951_v45  ;;  %v1811_v12 = vrot.slane %v1555_v7, 4  ;;  %v3706_v58 = vsel %vm1941_vm2, %v1555_v7, -inf  ;;  %v1476_v55 = vmax.f32 %v1227_v23, 0.0  ;;  %v9799_v23 = vld [vmem:[%s10391_s19 + $0x108] sm:$0xff] }
 0x275   : > { %v3707_v50 = vrot.slane %v3706_v58, 4  ;;  %v1556_v28 = vmax.f32 %v1427_v42, 0.0  ;;  %v4281_v11 = vsel %vm4059_vm5, %v3705_v46, %v4280_v9  ;;  %v11518_v35 = vmax.f32 %v2597_v22, %v2598_v48 }
 0x276   : > { %10087 = vrot.lane.b32.xlu2 %v10086_v10, %s10295_s24  ;;  %v3713_v4 = vsel %vm1941_vm2, %v1811_v12, -inf  ;;  %v1230_v38 = vadd.f32 %v11497_v25, %v1229_v29  ;;  %v1732_v40 = vrot.slane %v1476_v55, 4  ;;  %v2600_v32 = vsel %vm1941_vm2, %v1476_v55, -inf }
 0x277   : > { %v3708_v0 = vmax.f32 %v3706_v58, %v3707_v50  ;;  %v3714_v27 = vrot.slane %v3713_v4, 4  ;;  %v4142_v62 = vsel %vm4061_vm6, %v2592_v3, %v4141_v16  ;;  %v2601_v14 = vrot.slane %v2600_v32, 4  ;;  %v1234_v3 = vpop.f32.mrf.mxu0 }
 0x278   : > { %v1812_v44 = vrot.slane %v1556_v28, 4  ;;  %v3720_v6 = vsel %vm1941_vm2, %v1556_v28, -inf  ;;  %v2607_v22 = vsel %vm1941_vm2, %v1732_v40, -inf  ;;  %v1477_v9 = vmax.f32 %v1230_v38, 0.0  ;;  %9032 = vmatmul.msk.bf16.gmra.mxu0 %vm903_vm1, %v9799_v23 }
 0x279   : > { %v3709_v45 = vrot.slane %v3708_v0, 2  ;;  %v3715_v31 = vmax.f32 %v3713_v4, %v3714_v27  ;;  %v3721_v10 = vrot.slane %v3720_v6, 4  ;;  %v2602_v7 = vmax.f32 %v2600_v32, %v2601_v14 }
 0x27a   : > { %v2608_v46 = vrot.slane %v2607_v22, 4  ;;  %v3727_v29 = vsel %vm1941_vm2, %v1812_v44, -inf  ;;  %v1733_v55 = vrot.slane %v1477_v9, 4  ;;  %v2614_v28 = vsel %vm1941_vm2, %v1477_v9, -inf }
 0x27b   : > { %v3710_v42 = vmax.f32 %v3708_v0, %v3709_v45  ;;  %v3716_v48 = vrot.slane %v3715_v31, 2  ;;  %v3722_v12 = vmax.f32 %v3720_v6, %v3721_v10  ;;  %v3728_v58 = vrot.slane %v3727_v29, 4 }
 0x27c   : > { %v2603_v16 = vrot.slane %v2602_v7, 2  ;;  %v2609_v50 = vmax.f32 %v2607_v22, %v2608_v46  ;;  %v2615_v1 = vrot.slane %v2614_v28, 4  ;;  %v2621_v38 = vsel %vm1941_vm2, %v1733_v55, -inf }
 0x27d   : > { %v3711_v4 = vrot.slane %v3710_v42, 1  ;;  %v3717_v27 = vmax.f32 %v3715_v31, %v3716_v48  ;;  %v3723_v40 = vrot.slane %v3722_v12, 2  ;;  %v3729_v17 = vmax.f32 %v3727_v29, %v3728_v58 }
 0x27e   : > { %v2604_v32 = vmax.f32 %v2602_v7, %v2603_v16  ;;  %v2610_v14 = vrot.slane %v2609_v50, 2  ;;  %v2616_v46 = vmax.f32 %v2614_v28, %v2615_v1  ;;  %v2622_v5 = vrot.slane %v2621_v38, 4 }
 0x27f   : > { %v3712_v0 = vmax.f32 %v3710_v42, %v3711_v4  ;;  %v3718_v44 = vrot.slane %v3717_v27, 1  ;;  %v3724_v6 = vmax.f32 %v3722_v12, %v3723_v40  ;;  %v3730_v45 = vrot.slane %v3729_v17, 2 }
 0x280   : > { %v2605_v10 = vrot.slane %v2604_v32, 1  ;;  %v2611_v22 = vmax.f32 %v2609_v50, %v2610_v14  ;;  %v2617_v16 = vrot.slane %v2616_v46, 2  ;;  %v2623_v43 = vmax.f32 %v2621_v38, %v2622_v5 }
 0x281   : > { %v3719_v9 = vmax.f32 %v3717_v27, %v3718_v44  ;;  %v4282_v31 = vsel %vm4061_vm6, %v3712_v0, %v4281_v11  ;;  %v3725_v48 = vrot.slane %v3724_v6, 1  ;;  %v3731_v29 = vmax.f32 %v3729_v17, %v3730_v45  ;;  %v1236_v11 = vpop.f32.mrf.mxu0 }
 0x282   : > { %v2606_v7 = vmax.f32 %v2604_v32, %v2605_v10  ;;  %v2612_v58 = vrot.slane %v2611_v22, 1  ;;  %v14393_v55 = vrot.slane %v11232_v57, 1  ;;  %v14394_v42 = vrot.slane %v11318_v8, 1 }
 0x283   : > { %v3396_v1 = vrot.slane %v11398_v60, 1  ;;  %v3726_v50 = vmax.f32 %v3724_v6, %v3725_v48  ;;  %v3732_v17 = vrot.slane %v3731_v29, 1  ;;  %v2618_v4 = vmax.f32 %v2616_v46, %v2617_v16 }
 0x284   : > { %v11535_v23 = vmax.f32 %v11232_v57, %v14393_v55  ;;  %v11540_v12 = vmax.f32 %v11318_v8, %v14394_v42  ;;  %v2613_v28 = vmax.f32 %v2611_v22, %v2612_v58  ;;  %v2624_v27 = vrot.slane %v2623_v43, 2  ;;  %v9800_v58 = vld [vmem:[%s10391_s19 + $0x110] sm:$0xff] }
 0x285   : > { %v4143_v40 = vsel %vm14359_vm7, %v11518_v35, %v4142_v62  ;;  %v4283_v57 = vsel %vm14359_vm7, %v3719_v9, %v4282_v31  ;;  %v1232_v32 = vadd.f32 %v11497_v25, %v11512_v34  ;;  %v11551_v8 = vsel %vm1941_vm2, %v11402_v30, -inf }
 0x286   : > { %14395 = vst [vmem:[#allocation19_spill] sm:$0xff] %v11540_v12  ;;  %v2619_v14 = vrot.slane %v2618_v4, 1  ;;  %v2625_v38 = vmax.f32 %v2623_v43, %v2624_v27  ;;  %v4144_v0 = vsel %vm4065_vm8, %v2606_v7, %v4143_v40  ;;  %v1235_v35 = vadd.f32 %v11497_v25, %v1234_v3 }
 0x287   : > { %v1478_v44 = vmax.f32 %v1232_v32, 0.0  ;;  %v11555_v6 = vsel %vm4067_vm9, %v2613_v28, %v4144_v0  ;;  %v1237_v62 = vadd.f32 %v11497_v25, %v1236_v11  ;;  %v3733_v45 = vmax.f32 %v3731_v29, %v3732_v17 }
 0x288   : > { %14396 = vst [vmem:[#allocation20_spill] sm:$0xff] %v11555_v6  ;;  %v4284_v34 = vsel %vm4065_vm8, %v3726_v50, %v4283_v57  ;;  %v2626_v10 = vrot.slane %v2625_v38, 1  ;;  %v10096_v30 = vpack.i.bf16 %v11555_v6, %v11470_v13  ;;  %v1479_v46 = vmax.f32 %v1235_v35, 0.0  ;;  %9033 = vmatmul.msk.bf16.gmra.mxu0 %vm903_vm1, %v9800_v58 }
 0x289   : > { %v1734_v22 = vrot.slane %v1478_v44, 4  ;;  %v2628_v43 = vsel %vm1941_vm2, %v1478_v44, -inf  ;;  %v1480_v9 = vmax.f32 %v1237_v62, 0.0  ;;  %v2620_v31 = vmax.f32 %v2618_v4, %v2619_v14  ;;  %v1239_v50 = vpop.f32.mrf.mxu0 }
 0x28a   : > { %v2627_v48 = vmax.f32 %v2625_v38, %v2626_v10  ;;  %v2629_v7 = vrot.slane %v2628_v43, 4  ;;  %10097 = vrot.lane.b32.xlu1 %v10096_v30, %s10296_s25  ;;  %v14319_v3 = vand.u32 31, %v10710_v18  ;;  %v1735_v16 = vrot.slane %v1479_v46, 4 }
 0x28b   : > { %v2635_v29 = vsel %vm1941_vm2, %v1734_v22, -inf  ;;  %v2642_v55 = vsel %vm1941_vm2, %v1479_v46, -inf  ;;  %v1736_v42 = vrot.slane %v1480_v9, 4  ;;  %v11569_v27 = vsel %vm4067_vm9, %v3733_v45, %v4284_v34 }
 0x28c   : > { %v2630_v11 = vmax.f32 %v2628_v43, %v2629_v7  ;;  %v2636_v28 = vrot.slane %v2635_v29, 4  ;;  %v2643_v17 = vrot.slane %v2642_v55, 4  ;;  %v4146_v4 = vsel %vm4055_vm3, %v2627_v48, %v2620_v31 }
 0x28d   : > { %v2649_v40 = vsel %vm1941_vm2, %v1735_v16, -inf  ;;  %v2656_v57 = vsel %vm1941_vm2, %v1480_v9, -inf  ;;  %v2663_v32 = vsel %vm1941_vm2, %v1736_v42, -inf  ;;  %v4607_v10 = vrot.slane %v10706_v56, 7 }
 0x28e   : > { %v2631_v14 = vrot.slane %v2630_v11, 2  ;;  %v2637_v38 = vmax.f32 %v2635_v29, %v2636_v28  ;;  %v2644_v0 = vmax.f32 %v2642_v55, %v2643_v17  ;;  %v2650_v44 = vrot.slane %v2649_v40, 4 }
 0x28f   : > { %v2657_v35 = vrot.slane %v2656_v57, 4  ;;  %v2664_v62 = vrot.slane %v2663_v32, 4  ;;  %v14318_v45 = vrot.slane %v11569_v27, 7  ;;  %v14397_v31 = vrot.slane %v10715_v63, 7 }
 0x290   : > { %v2632_v34 = vmax.f32 %v2630_v11, %v2631_v14  ;;  %v2638_v30 = vrot.slane %v2637_v38, 2  ;;  %v2645_v22 = vrot.slane %v2644_v0, 2  ;;  %v2651_v43 = vmax.f32 %v2649_v40, %v2650_v44 }
 0x291   : > { %v2658_v46 = vmax.f32 %v2656_v57, %v2657_v35  ;;  %v2665_v9 = vmax.f32 %v2663_v32, %v2664_v62  ;;  %v4670_v48 = vsel %vm4639_vm11, %v4607_v10, %v14397_v31  ;;  %v4671_v7 = vsel %vm4639_vm11, %v14318_v45, %v4607_v10  ;;  %v1241_v40 = vpop.f32.mrf.mxu0 }
 0x292   : > { %v2633_v58 = vrot.slane %v2632_v34, 1  ;;  %v2639_v29 = vmax.f32 %v2637_v38, %v2638_v30  ;;  %v2646_v16 = vmax.f32 %v2644_v0, %v2645_v22  ;;  %v2652_v55 = vrot.slane %v2651_v43, 2 }
 0x293   : > { %v2659_v42 = vrot.slane %v2658_v46, 2  ;;  %v2666_v11 = vrot.slane %v2665_v9, 2  ;;  %v4672_v28 = vadd.s32 4294967295, %v14319_v3  ;;  %v1240_v17 = vadd.f32 %v11497_v25, %v1239_v50 }
 0x294   : > { %v2634_v57 = vmax.f32 %v2632_v34, %v2633_v58  ;;  %v2640_v32 = vrot.slane %v2639_v29, 1  ;;  %v2647_v14 = vrot.slane %v2646_v16, 1  ;;  %v2653_v44 = vmax.f32 %v2651_v43, %v2652_v55 }
 0x295   : > { %v2660_v35 = vmax.f32 %v2658_v46, %v2659_v42  ;;  %v2667_v62 = vmax.f32 %v2665_v9, %v2666_v11  ;;  %vm4704_vm15 = vcmp.ge.s32.totalorder %v4672_v28, 0  ;;  %v1481_v10 = vmax.f32 %v1240_v17, 0.0  ;;  %v9801_v42 = vld [vmem:[%s10391_s19 + $0x118] sm:$0xff] }
 0x296   : > { %v2641_v31 = vmax.f32 %v2639_v29, %v2640_v32  ;;  %v4147_v38 = vsel %vm4057_vm4, %v2634_v57, %v4146_v4  ;;  %v2648_v0 = vmax.f32 %v2646_v16, %v2647_v14  ;;  %v2654_v30 = vrot.slane %v2653_v44, 1 }
 0x297   : > { %v2661_v22 = vrot.slane %v2660_v35, 1  ;;  %v2668_v45 = vrot.slane %v2667_v62, 1  ;;  %v4864_v3 = vsel %vm4704_vm15, %v4671_v7, 0.0  ;;  %v1737_v5 = vrot.slane %v1481_v10, 4 }
 0x298   : > { %v4148_v50 = vsel %vm4059_vm5, %v2641_v31, %v4147_v38  ;;  %v2655_v34 = vmax.f32 %v2653_v44, %v2654_v30  ;;  %v10016_v58 = vpack.i.bf16 %v4670_v48, %v4864_v3  ;;  %v2670_v43 = vsel %vm1941_vm2, %v1481_v10, -inf  ;;  %9034 = vmatmul.msk.bf16.gmra.mxu0 %vm903_vm1, %v9801_v42 }
 0x299   : > { %v11595_v46 = vmax.f32 %v11398_v60, %v3396_v1  ;;  %v14399_v4 = vrot.slane %v11407_v36, 4  ;;  %v4149_v29 = vsel %vm4061_vm6, %v2648_v0, %v4148_v50  ;;  %v2671_v7 = vrot.slane %v2670_v43, 4 }
 0x29a   : > { %v2662_v55 = vmax.f32 %v2660_v35, %v2661_v22  ;;  %10017 = vrot.lane.b32.xlu0 %v10016_v58, %s10297_s26  ;;  %v2677_v3 = vsel %vm1941_vm2, %v1737_v5, -inf  ;;  %v1242_v48 = vadd.f32 %v11497_v25, %v1241_v40  ;;  %v2669_v60 = vmax.f32 %v2667_v62, %v2668_v45 }
 0x29b   : > { %14398 = vst [vmem:[#allocation21_spill] sm:$0xff] %v11595_v46  ;;  %v11600_v9 = vmax.f32 %v11407_v36, %v14399_v4  ;;  %v2672_v1 = vmax.f32 %v2670_v43, %v2671_v7  ;;  %v2678_v11 = vrot.slane %v2677_v3, 4  ;;  %v11609_v28 = vadd.s32 32, %v10710_v18  ;;  %v1244_v36 = vpop.f32.mrf.mxu0 }
 0x29c   : > { %v4150_v17 = vsel %vm14359_vm7, %v2655_v34, %v4149_v29  ;;  %v10021_v57 = vpack.i.bf16 %v10715_v63, %v10706_v56  ;;  %v1482_v32 = vmax.f32 %v1242_v48, 0.0  ;;  %v4611_v14 = vrot.slane %v10896_v51, 7 }
 0x29d   : > { %14400 = vst [vmem:[#allocation22_spill] sm:$0xff] %v11609_v28  ;;  %v2673_v44 = vrot.slane %v2672_v1, 2  ;;  %v2679_v5 = vmax.f32 %v2677_v3, %v2678_v11  ;;  %v14320_v40 = vand.u32 31, %v11609_v28  ;;  %v1245_v45 = vadd.f32 %v11497_v25, %v1244_v36 }
 0x29e   : > { %v4151_v35 = vsel %vm4065_vm8, %v2662_v55, %v4150_v17  ;;  %v1738_v62 = vrot.slane %v1482_v32, 4  ;;  %v2684_v10 = vsel %vm1941_vm2, %v1482_v32, -inf  ;;  %v4612_v31 = vrot.slane %v10980_v54, 7 }
 0x29f   : > { %v2674_v38 = vmax.f32 %v2672_v1, %v2673_v44  ;;  %v2680_v0 = vrot.slane %v2679_v5, 2  ;;  %v2685_v30 = vrot.slane %v2684_v10, 4  ;;  %v4676_v22 = vadd.s32 4294967295, %v14320_v40 }
 0x2a0   : > { %v2691_v50 = vsel %vm1941_vm2, %v1738_v62, -inf  ;;  %v14401_v34 = vrot.slane %v10801_v59, 7  ;;  %v1483_v43 = vmax.f32 %v1245_v45, 0.0  ;;  %v14321_v4 = vrot.slane %v11201_v61, 7 }
 0x2a1   : > { %v2675_v29 = vrot.slane %v2674_v38, 1  ;;  %v2681_v7 = vmax.f32 %v2679_v5, %v2680_v0  ;;  %v2686_v55 = vmax.f32 %v2684_v10, %v2685_v30  ;;  %v2692_v3 = vrot.slane %v2691_v50, 4 }
 0x2a2   : > { %v4667_v58 = vsel %vm4639_vm11, %v14401_v34, %v4611_v14  ;;  %10022 = vrot.lane.b32.xlu0 %v10021_v57, %s10296_s25  ;;  %vm4708_vm1 = vcmp.ge.s32.totalorder %v4676_v22, 0  ;;  %v1739_v48 = vrot.slane %v1483_v43, 4  ;;  %v2698_v42 = vsel %vm1941_vm2, %v1483_v43, -inf }
 0x2a3   : > { %v4613_v1 = vrot.slane %v11098_v49, 7  ;;  %v11633_v11 = vsel %vm4067_vm9, %v2669_v60, %v4151_v35  ;;  %v2682_v36 = vrot.slane %v2681_v7, 1  ;;  %v2687_v17 = vrot.slane %v2686_v55, 2  ;;  %v1246_v44 = vpop.f32.mrf.mxu0 }
 0x2a4   : > { %14402 = vst [vmem:[#allocation23_spill] sm:$0xff] %v11633_v11  ;;  %v2693_v32 = vmax.f32 %v2691_v50, %v2692_v3  ;;  %v4666_v5 = vsel %vm4639_vm11, %v4611_v14, %v4612_v31  ;;  %v2699_v45 = vrot.slane %v2698_v42, 4  ;;  %v2705_v62 = vsel %vm1941_vm2, %v1739_v48, -inf }
 0x2a5   : > { %v4664_v57 = vsel %vm4639_vm11, %v4613_v1, %v14321_v4  ;;  %v2676_v10 = vmax.f32 %v2674_v38, %v2675_v29  ;;  %v2688_v0 = vmax.f32 %v2686_v55, %v2687_v17  ;;  %v4868_v60 = vsel %vm4708_vm1, %v4667_v58, 0.0 }
 0x2a6   : > { %v2694_v30 = vrot.slane %v2693_v32, 2  ;;  %v2683_v35 = vmax.f32 %v2681_v7, %v2682_v36  ;;  %v2700_v34 = vmax.f32 %v2698_v42, %v2699_v45  ;;  %v2706_v50 = vrot.slane %v2705_v62, 4 }
 0x2a7   : > { %v3746_v43 = vadd.s32 88, %v10710_v18  ;;  %v2689_v3 = vrot.slane %v2688_v0, 1  ;;  %v10046_v40 = vpack.i.bf16 %v4666_v5, %v4868_v60  ;;  %v5196_v48 = vrot.slane %v11555_v6, 2 }
 0x2a8   : > { %v2695_v14 = vmax.f32 %v2693_v32, %v2694_v30  ;;  %v2701_v16 = vrot.slane %v2700_v34, 2  ;;  %v2707_v46 = vmax.f32 %v2705_v62, %v2706_v50  ;;  %v14324_v4 = vrot.slane %v11633_v11, 2 }
 0x2a9   : > { %v3778_v12 = vand.u32 31, %v3746_v43  ;;  %v2690_v38 = vmax.f32 %v2688_v0, %v2689_v3  ;;  %v4665_v22 = vsel %vm4639_vm11, %v4612_v31, %v4613_v1  ;;  %v4907_v58 = vrot.slane %v11555_v6, 1 }
 0x2aa   : > { %v2696_v29 = vrot.slane %v2695_v14, 1  ;;  %10047 = vrot.lane.b32.xlu0 %v10046_v40, %s10297_s26  ;;  %v2702_v7 = vmax.f32 %v2700_v34, %v2701_v16  ;;  %v2708_v55 = vrot.slane %v2707_v46, 2  ;;  %v5237_v42 = vsel %vm14355_vm13, %v5196_v48, %v14324_v4 }
 0x2ab   : > { %v5261_v36 = vadd.s32 2, %v3778_v12  ;;  %v4153_v17 = vsel %vm4055_vm3, %v2683_v35, %v2676_v10  ;;  %v14403_v5 = vrot.slane %v11470_v13, 2  ;;  %v14323_v1 = vrot.slane %v11633_v11, 1  ;;  %v1249_v45 = vpop.f32.mrf.mxu0 }
 0x2ac   : > { %v2697_v32 = vmax.f32 %v2695_v14, %v2696_v29  ;;  %v4154_v16 = vsel %vm4057_vm4, %v2690_v38, %v4153_v17  ;;  %v2709_v40 = vmax.f32 %v2707_v46, %v2708_v55  ;;  %v4972_v62 = vadd.s32 1, %v3778_v12  ;;  %v11670_v46 = vpop.permute.xlu1 %10027 }
 0x2ad   : > { %v5238_v31 = vsel %vm14355_vm13, %v14403_v5, %v5196_v48  ;;  %vm5325_vm0 = vcmp.lt.s32.totalorder %v5261_v36, 32  ;;  %v2703_v0 = vrot.slane %v2702_v7, 1  ;;  %v4948_v10 = vsel %vm4928_vm10, %v4907_v58, %v14323_v1 }
 0x2ae   : > { %v5453_v30 = vsel %vm5325_vm0, %v5237_v42, 0.0  ;;  %v1247_v60 = vadd.f32 %v11497_v25, %v1246_v44  ;;  %v2710_v35 = vrot.slane %v2709_v40, 1  ;;  %v14404_v50 = vrot.slane %v11470_v13, 1 }
 0x2af   : > { %v5936_v34 = vpack.c.bf16 %v5453_v30, %v5238_v31  ;;  %vm5036_vm12 = vcmp.lt.s32.totalorder %v4972_v62, 32  ;;  %v11673_v14 = vadd.s32 64, %v10710_v18  ;;  %v4615_v48 = vrot.slane %v11333_v39, 7 }
 0x2b0   : > { %v4949_v43 = vsel %vm4928_vm10, %v14404_v50, %v4907_v58  ;;  %v5164_v12 = vsel %vm5036_vm12, %v4948_v10, 0.0  ;;  %v1484_v3 = vmax.f32 %v1247_v60, 0.0  ;;  %v3443_v38 = vrot.slane %v11600_v9, 2 }
 0x2b1   : > { %v10061_v44 = vpack.i.bf16 %v4664_v57, %v4665_v22  ;;  %9108 = vmatmul.msk.bf16.gmra.mxu3 %vm5826_vm14, %v5936_v34  ;;  %v10101_v29 = vpack.i.bf16 %v5164_v12, %v4949_v43  ;;  %v4616_v55 = vrot.slane %v11416_v52, 7  ;;  %v2704_v42 = vmax.f32 %v2702_v7, %v2703_v0 }
 0x2b2   : > { %v1740_v58 = vrot.slane %v1484_v3, 4  ;;  %v2712_v36 = vsel %vm1941_vm2, %v1484_v3, -inf  ;;  %v14322_v17 = vand.u32 31, %v11673_v14  ;;  %v4155_v31 = vsel %vm4059_vm5, %v2697_v32, %v4154_v16 }
 0x2b3   : > { %10062 = vrot.lane.b32.xlu0 %v10061_v44, %s10297_s26  ;;  %10102 = vrot.lane.b32.xlu2 %v10101_v29, %s10295_s24  ;;  %v2713_v57 = vrot.slane %v2712_v36, 4  ;;  %v1250_v22 = vadd.f32 %v11497_v25, %v1249_v45  ;;  %v2711_v62 = vmax.f32 %v2709_v40, %v2710_v35  ;;  %v14405_v7 = vrot.slane %v11201_v61, 7  ;;  %v1251_v60 = vpop.f32.mrf.mxu0 }
 0x2b4   : > { %v2719_v30 = vsel %vm1941_vm2, %v1740_v58, -inf  ;;  %v4680_v10 = vadd.s32 4294967295, %v14322_v17  ;;  %v4662_v34 = vsel %vm4639_vm11, %v4615_v48, %v4616_v55  ;;  %v4156_v45 = vsel %vm4061_vm6, %v2704_v42, %v4155_v31 }
 0x2b5   : > { %v4663_v0 = vsel %vm4639_vm11, %v14405_v7, %v4615_v48  ;;  %v2714_v32 = vmax.f32 %v2712_v36, %v2713_v57  ;;  %v2720_v16 = vrot.slane %v2719_v30, 4  ;;  %v1485_v50 = vmax.f32 %v1250_v22, 0.0 }
 0x2b6   : > { %vm4712_vm15 = vcmp.ge.s32.totalorder %v4680_v10, 0  ;;  %v4618_v40 = vrot.slane %v11555_v6, 7  ;;  %v1252_v35 = vadd.f32 %v11497_v25, %v1251_v60  ;;  %v4617_v36 = vrot.slane %v11470_v13, 7 }
 0x2b7   : > { %v2715_v43 = vrot.slane %v2714_v32, 2  ;;  %v2721_v12 = vmax.f32 %v2719_v30, %v2720_v16  ;;  %v4872_v3 = vsel %vm4712_vm15, %v4663_v0, 0.0  ;;  %v1741_v44 = vrot.slane %v1485_v50, 4 }
 0x2b8   : > { %v10076_v29 = vpack.i.bf16 %v4662_v34, %v4872_v3  ;;  %v2726_v58 = vsel %vm1941_vm2, %v1485_v50, -inf  ;;  %v11701_v57 = vadd.s32 96, %v10710_v18  ;;  %v14407_v7 = vrot.slane %v11551_v8, 4 }
 0x2b9   : > { %v2716_v48 = vmax.f32 %v2714_v32, %v2715_v43  ;;  %v2722_v22 = vrot.slane %v2721_v12, 2  ;;  %v2727_v42 = vrot.slane %v2726_v58, 4  ;;  %v2733_v31 = vsel %vm1941_vm2, %v1741_v44, -inf }
 0x2ba   : > { %14406 = vst [vmem:[#allocation24_spill] sm:$0xff] %v11701_v57  ;;  %v11707_v10 = vmax.f32 %v11551_v8, %v14407_v7  ;;  %v4157_v30 = vsel %vm14359_vm7, %v2711_v62, %v4156_v45  ;;  %v2734_v0 = vrot.slane %v2733_v31, 4  ;;  %v1486_v60 = vmax.f32 %v1252_v35, 0.0 }
 0x2bb   : > { %v2717_v16 = vrot.slane %v2716_v48, 1  ;;  %v2723_v34 = vmax.f32 %v2721_v12, %v2722_v22  ;;  %10077 = vrot.lane.b32.xlu0 %v10076_v29, %s10297_s26  ;;  %v2728_v50 = vmax.f32 %v2726_v58, %v2727_v42  ;;  %v4660_v32 = vsel %vm4639_vm11, %v4617_v36, %v4618_v40  ;;  %v1254_v17 = vpop.f32.mrf.mxu0 }
 0x2bc   : > { %v2735_v43 = vmax.f32 %v2733_v31, %v2734_v0  ;;  %v1742_v3 = vrot.slane %v1486_v60, 4  ;;  %v2740_v44 = vsel %vm1941_vm2, %v1486_v60, -inf  ;;  %v14325_v8 = vand.u32 31, %v11701_v57 }
 0x2bd   : > { %v2718_v7 = vmax.f32 %v2716_v48, %v2717_v16  ;;  %v2724_v5 = vrot.slane %v2723_v34, 1  ;;  %v4661_v62 = vsel %vm4639_vm11, %v4616_v55, %v4617_v36  ;;  %v2741_v45 = vrot.slane %v2740_v44, 4 }
 0x2be   : > { %v2736_v35 = vrot.slane %v2735_v43, 2  ;;  %v10091_v12 = vpack.i.bf16 %v4660_v32, %v4661_v62  ;;  %v2747_v29 = vsel %vm1941_vm2, %v1742_v3, -inf  ;;  %v1255_v58 = vadd.f32 %v11497_v25, %v1254_v17 }
 0x2bf   : > { %v2725_v22 = vmax.f32 %v2723_v34, %v2724_v5  ;;  %v2729_v42 = vrot.slane %v2728_v50, 2  ;;  %v2742_v31 = vmax.f32 %v2740_v44, %v2741_v45  ;;  %v2748_v0 = vrot.slane %v2747_v29, 4 }
 0x2c0   : > { %v4158_v60 = vsel %vm4065_vm8, %v2718_v7, %v4157_v30  ;;  %v1487_v1 = vmax.f32 %v1255_v58, 0.0  ;;  %v4619_v48 = vrot.slane %v11633_v11, 7  ;;  %v4684_v16 = vadd.s32 4294967295, %v14325_v8 }
 0x2c1   : > { %v2737_v55 = vmax.f32 %v2735_v43, %v2736_v35  ;;  %v2743_v36 = vrot.slane %v2742_v31, 2  ;;  %v2749_v4 = vmax.f32 %v2747_v29, %v2748_v0  ;;  %v11724_v32 = vsel %vm4067_vm9, %v2725_v22, %v4158_v60 }
 0x2c2   : > { %14408 = vst [vmem:[#allocation25_spill] sm:$0xff] %v11724_v32  ;;  %v11728_v17 = vadd.f32 %v11497_v25, %v11140_v20  ;;  %v10111_v5 = vpack.i.bf16 %v11724_v32, %v11633_v11  ;;  %v1743_v30 = vrot.slane %v1487_v1, 4  ;;  %v2754_v34 = vsel %vm1941_vm2, %v1487_v1, -inf }
 0x2c3   : > { %v2730_v3 = vmax.f32 %v2728_v50, %v2729_v42  ;;  %10092 = vrot.lane.b32.xlu0 %v10091_v12, %s10297_s26  ;;  %v2744_v44 = vmax.f32 %v2742_v31, %v2743_v36  ;;  %v2750_v43 = vrot.slane %v2749_v4, 2  ;;  %v2755_v7 = vrot.slane %v2754_v34, 4  ;;  %v1256_v35 = vpop.f32.mrf.mxu0 }
 0x2c4   : > { %10112 = vrot.lane.b32.xlu1 %v10111_v5, %s10296_s25  ;;  %v2761_v62 = vsel %vm1941_vm2, %v1743_v30, -inf  ;;  %v14326_v45 = vrot.slane %v11724_v32, 7  ;;  %v4659_v20 = vsel %vm4639_vm11, %v4618_v40, %v4619_v48  ;;  %vm4716_vm1 = vcmp.ge.s32.totalorder %v4684_v16, 0 }
 0x2c5   : > { %v2738_v29 = vrot.slane %v2737_v55, 1  ;;  %v2751_v58 = vmax.f32 %v2749_v4, %v2750_v43  ;;  %v2756_v1 = vmax.f32 %v2754_v34, %v2755_v7  ;;  %v2762_v50 = vrot.slane %v2761_v62, 4 }
 0x2c6   : > { %v3444_v12 = vmax.f32 %v11600_v9, %v3443_v38  ;;  %v2745_v22 = vrot.slane %v2744_v44, 1  ;;  %v4658_v42 = vsel %vm4639_vm11, %v4619_v48, %v14326_v45  ;;  %v1257_v31 = vadd.f32 %v11497_v25, %v1256_v35  ;;  %v11751_v45 = vpop.permute.xlu2 %10037 }
 0x2c7   : > { %v2731_v0 = vrot.slane %v2730_v3, 1  ;;  %v2757_v40 = vrot.slane %v2756_v1, 2  ;;  %v2763_v60 = vmax.f32 %v2761_v62, %v2762_v50  ;;  %v4876_v16 = vsel %vm4716_vm1, %v4659_v20, 0.0 }
 0x2c8   : > { %v3450_v4 = vrot.slane %v11707_v10, 2  ;;  %v1540_v36 = vmax.f32 %v11728_v17, 0.0  ;;  %v10106_v5 = vpack.i.bf16 %v4658_v42, %v4876_v16  ;;  %v1488_v30 = vmax.f32 %v1257_v31, 0.0 }
 0x2c9   : > { %v2739_v34 = vmax.f32 %v2737_v55, %v2738_v29  ;;  %v2752_v9 = vrot.slane %v2751_v58, 1  ;;  %v2758_v38 = vmax.f32 %v2756_v1, %v2757_v40  ;;  %v2764_v43 = vrot.slane %v2763_v60, 2 }
 0x2ca   : > { %v2746_v8 = vmax.f32 %v2744_v44, %v2745_v22  ;;  %v1744_v48 = vrot.slane %v1488_v30, 4  ;;  %v2768_v35 = vsel %vm1941_vm2, %v1488_v30, -inf  ;;  %v2732_v62 = vmax.f32 %v2730_v3, %v2731_v0 }
 0x2cb   : > { %v2759_v20 = vrot.slane %v2758_v38, 1  ;;  %v2765_v50 = vmax.f32 %v2763_v60, %v2764_v43  ;;  %10107 = vrot.lane.b32.xlu0 %v10106_v5, %s10297_s26  ;;  %v2769_v17 = vrot.slane %v2768_v35, 4  ;;  %v3445_v42 = vrot.slane %v3444_v12, 1  ;;  %v1259_v31 = vpop.f32.mrf.mxu0 }
 0x2cc   : > { %v3451_v55 = vmax.f32 %v11707_v10, %v3450_v4  ;;  %v3496_v29 = vsel %vm1941_vm2, %v1540_v36, -inf  ;;  %v2775_v1 = vsel %vm1941_vm2, %v1744_v48, -inf  ;;  %v4160_v44 = vsel %vm4055_vm3, %v2739_v34, %v2732_v62 }
 0x2cd   : > { %v2753_v22 = vmax.f32 %v2751_v58, %v2752_v9  ;;  %v2770_v40 = vmax.f32 %v2768_v35, %v2769_v17  ;;  %v2776_v16 = vrot.slane %v2775_v1, 4  ;;  %v4161_v0 = vsel %vm4057_vm4, %v2746_v8, %v4160_v44 }
 0x2ce   : > { %v2766_v60 = vrot.slane %v2765_v50, 1  ;;  %v1260_v5 = vadd.f32 %v11497_v25, %v1259_v31  ;;  %v2760_v10 = vmax.f32 %v2758_v38, %v2759_v20  ;;  %v3446_v7 = vmax.f32 %v3444_v12, %v3445_v42 }
 0x2cf   : > { %v2771_v4 = vrot.slane %v2770_v40, 2  ;;  %v2777_v43 = vmax.f32 %v2775_v1, %v2776_v16  ;;  %v1796_v48 = vrot.slane %v1540_v36, 4  ;;  %v3497_v57 = vrot.slane %v3496_v29, 4 }
 0x2d0   : > { %v1489_v6 = vmax.f32 %v1260_v5, 0.0  ;;  %v3452_v34 = vrot.slane %v3451_v55, 1  ;;  %v4162_v58 = vsel %vm4059_vm5, %v2753_v22, %v4161_v0  ;;  %v2767_v62 = vmax.f32 %v2765_v50, %v2766_v60 }
 0x2d1   : > { %v2772_v9 = vmax.f32 %v2770_v40, %v2771_v4  ;;  %v2778_v35 = vrot.slane %v2777_v43, 2  ;;  %v4214_v31 = vsel %vm4065_vm8, %v11093_v53, %v10586_v24  ;;  %v4163_v38 = vsel %vm4061_vm6, %v2760_v10, %v4162_v58  ;;  %v9838_v10 = vld [vmem:[%s14289_s3 + $0x38] sm:$0xff] }
 0x2d2   : > { %v1745_v17 = vrot.slane %v1489_v6, 4  ;;  %v2782_v8 = vsel %vm1941_vm2, %v1489_v6, -inf  ;;  %v11770_v42 = vsel %vm4065_vm8, %v3446_v7, %v11055_v47  ;;  %v11772_v1 = vmax.f32 %v3496_v29, %v3497_v57  ;;  %6089 = vmatpush.bf16.msrb.mxu1 %v9838_v10 }
 0x2d3   : > { %v2773_v20 = vrot.slane %v2772_v9, 1  ;;  %v2779_v12 = vmax.f32 %v2777_v43, %v2778_v35  ;;  %v2783_v36 = vrot.slane %v2782_v8, 4  ;;  %v3503_v50 = vsel %vm1941_vm2, %v1796_v48, -inf  ;;  %v1261_v6 = vpop.f32.mrf.mxu0 }
 0x2d4   : > { %v2789_v44 = vsel %vm1941_vm2, %v1745_v17, -inf  ;;  %v11776_v53 = vmax.f32 %v3451_v55, %v3452_v34  ;;  %v4164_v0 = vsel %vm14359_vm7, %v2767_v62, %v4163_v38  ;;  %v1262_v60 = vadd.f32 %v11497_v25, %v1261_v6 }
 0x2d5   : > { %v2774_v22 = vmax.f32 %v2772_v9, %v2773_v20  ;;  %v2780_v40 = vrot.slane %v2779_v12, 1  ;;  %v2784_v16 = vmax.f32 %v2782_v8, %v2783_v36  ;;  %v2790_v24 = vrot.slane %v2789_v44, 4 }
 0x2d6   : > { %v11782_v47 = vsel %vm4067_vm9, %v11185_v19, %v4214_v31  ;;  %v3499_v55 = vrot.slane %v11772_v1, 2  ;;  %v3504_v4 = vrot.slane %v3503_v50, 4  ;;  %v1490_v43 = vmax.f32 %v1262_v60, 0.0 }
 0x2d7   : > { %v2781_v57 = vmax.f32 %v2779_v12, %v2780_v40  ;;  %v4165_v7 = vsel %vm4065_vm8, %v2774_v22, %v4164_v0  ;;  %v2785_v29 = vrot.slane %v2784_v16, 2  ;;  %v2791_v5 = vmax.f32 %v2789_v44, %v2790_v24 }
 0x2d8   : > { %v5198_v58 = vrot.slane %v11724_v32, 2  ;;  %v4909_v9 = vrot.slane %v11724_v32, 1  ;;  %v1746_v35 = vrot.slane %v1490_v43, 4  ;;  %v2796_v62 = vsel %vm1941_vm2, %v1490_v43, -inf }
 0x2d9   : > { %v11792_v34 = vsel %vm4067_vm9, %v2781_v57, %v4165_v7  ;;  %v2792_v19 = vrot.slane %v2791_v5, 2  ;;  %v2786_v31 = vmax.f32 %v2784_v16, %v2785_v29  ;;  %v2797_v20 = vrot.slane %v2796_v62, 4 }
 0x2da   : > { %v14334_v17 = vrot.slane %v11792_v34, 2  ;;  %v14333_v8 = vrot.slane %v11792_v34, 1  ;;  %v4200_v12 = vsel %vm4065_vm8, %v11052_v37, %v10990_v2  ;;  %v11804_v36 = vadd.f32 %v11497_v25, %v11244_v15  ;;  %v9837_v2 = vld [vmem:[%s14289_s3 + $0x30] sm:$0xff] }
 0x2db   : > { %v2793_v38 = vmax.f32 %v2791_v5, %v2792_v19  ;;  %v2803_v44 = vsel %vm1941_vm2, %v1746_v35, -inf  ;;  %v1264_v6 = vpop.f32.mrf.mxu0  ;;  %v2798_v37 = vmax.f32 %v2796_v62, %v2797_v20  ;;  %v14409_v16 = vrot.slane %v11633_v11, 2  ;;  %6090 = vmatpush.bf16.msrb.mxu1 %v9837_v2 }
 0x2dc   : > { %v5235_v22 = vsel %vm14355_vm13, %v5198_v58, %v14334_v17  ;;  %v4946_v40 = vsel %vm4928_vm10, %v4909_v9, %v14333_v8  ;;  %v2804_v15 = vrot.slane %v2803_v44, 4  ;;  %v14410_v0 = vrot.slane %v11633_v11, 1 }
 0x2dd   : > { %v5236_v24 = vsel %vm14355_vm13, %v14409_v16, %v5198_v58  ;;  %v1265_v57 = vadd.f32 %v11497_v25, %v1264_v6  ;;  %v11829_v5 = vsel %vm4067_vm9, %v11078_v26, %v4200_v12  ;;  %v2787_v10 = vrot.slane %v2786_v31, 1 }
 0x2de   : > { %v4947_v60 = vsel %vm4928_vm10, %v14410_v0, %v4909_v9  ;;  %v5938_v7 = vpack.c.bf16 %v5235_v22, %v5236_v24  ;;  %v2794_v43 = vrot.slane %v2793_v38, 1  ;;  %v2799_v19 = vrot.slane %v2798_v37, 2  ;;  %v9835_v24 = vld [vmem:[%s14289_s3 + $0x20] sm:$0xff] }
 0x2df   : > { %v10116_v29 = vpack.i.bf16 %v4946_v40, %v4947_v60  ;;  %v2805_v35 = vmax.f32 %v2803_v44, %v2804_v15  ;;  %v1491_v62 = vmax.f32 %v1265_v57, 0.0  ;;  %v14330_v58 = vrot.slane %v10515_v41, 1  ;;  %v9836_v44 = vld [vmem:[%s14289_s3 + $0x28] sm:$0xff] }
 0x2e0   : > { %9109 = vmatmul.msk.bf16.gmra.mxu3 %vm5826_vm14, %v5938_v7  ;;  %v4917_v9 = vrot.slane %v11782_v47, 1  ;;  %v11836_v20 = vadd.s32 160, %v10710_v18  ;;  %v11838_v6 = vmax.f32 %v3503_v50, %v3504_v4  ;;  %v1544_v26 = vmax.f32 %v11804_v36, 0.0  ;;  %6091 = vmatpush.bf16.msrb.mxu1 %v9836_v44 }
 0x2e1   : > { %10117 = vrot.lane.b32.xlu2 %v10116_v29, %s10295_s24  ;;  %v2800_v12 = vmax.f32 %v2798_v37, %v2799_v19  ;;  %v2806_v22 = vrot.slane %v2805_v35, 2  ;;  %v1747_v40 = vrot.slane %v1491_v62, 4  ;;  %v2810_v2 = vsel %vm1941_vm2, %v1491_v62, -inf }
 0x2e2   : > { %v14332_v15 = vrot.slane %v11829_v5, 7  ;;  %v11852_v50 = vsel %vm4928_vm10, %v14330_v58, %v4917_v9  ;;  %v2788_v4 = vmax.f32 %v2786_v31, %v2787_v10  ;;  %v2795_v37 = vmax.f32 %v2793_v38, %v2794_v43 }
 0x2e3   : > { %v2811_v16 = vrot.slane %v2810_v2, 4  ;;  %v14335_v0 = vrot.slane %v10515_v41, 2  ;;  %v2817_v60 = vsel %vm1941_vm2, %v1747_v40, -inf  ;;  %v1266_v57 = vpop.f32.mrf.mxu0  ;;  %v3787_v7 = vand.u32 31, %v11836_v20 }
 0x2e4   : > { %v4627_v29 = vrot.slane %v10515_v41, 7  ;;  %v14331_v19 = vrot.slane %v11782_v47, 7  ;;  %vm4350_vm0 = vcmp.lt.s32.totalorder %v10710_v18, 2  ;;  %v2801_v31 = vrot.slane %v2800_v12, 1  ;;  %6092 = vmatpush.bf16.msrb.mxu1 %v9835_v24 }
 0x2e5   : > { %v2807_v38 = vmax.f32 %v2805_v35, %v2806_v22  ;;  %v2812_v10 = vmax.f32 %v2810_v2, %v2811_v16  ;;  %v2818_v43 = vrot.slane %v2817_v60, 4  ;;  %v1267_v62 = vadd.f32 %v11497_v25, %v1266_v57 }
 0x2e6   : > { %v11868_v44 = vsel %vm4639_vm11, %v4627_v29, %v14331_v19  ;;  %v4692_v40 = vadd.s32 4294967295, %v3787_v7  ;;  %v14336_v48 = vrot.slane %v11782_v47, 2  ;;  %v11876_v58 = vsel %vm1941_vm2, %v1544_v26, -inf }
 0x2e7   : > { %14411 = vst [vmem:[#allocation26_spill] sm:$0xff] %v11868_v44  ;;  %v2813_v35 = vrot.slane %v2812_v10, 2  ;;  %v2819_v22 = vmax.f32 %v2817_v60, %v2818_v43  ;;  %v4651_v25 = vsel %vm4639_vm11, %v14332_v15, %v4627_v29  ;;  %v4167_v2 = vsel %vm4055_vm3, %v2795_v37, %v2788_v4  ;;  %v9834_v29 = vld [vmem:[%s14289_s3 + $0x18] sm:$0xff] }
 0x2e8   : > { %v1492_v16 = vmax.f32 %v1267_v62, 0.0  ;;  %vm4724_vm12 = vcmp.ge.s32.totalorder %v4692_v40, 0  ;;  %v11889_v57 = vsel %vm14355_vm13, %v14335_v0, %v14336_v48  ;;  %v2802_v19 = vmax.f32 %v2800_v12, %v2801_v31  ;;  %6093 = vmatpush.bf16.msrb.mxu1 %v9834_v29  ;;  %v14414_v0 = vld [vmem:[#allocation13_spill] sm:$0xff]  ;;  %v14415_v12 = vld [vmem:[#allocation12_spill] sm:$0xff] }
 0x2e9   : > { %14412 = vst [vmem:[#allocation27_spill] sm:$0xff] %v11889_v57  ;;  %v2808_v60 = vrot.slane %v2807_v38, 1  ;;  %v2814_v24 = vmax.f32 %v2812_v10, %v2813_v35  ;;  %v2820_v43 = vrot.slane %v2819_v22, 2  ;;  %v11895_v37 = vsel %vm4724_vm12, %v4651_v25, 0.0 }
 0x2ea   : > { %v1748_v15 = vrot.slane %v1492_v16, 4  ;;  %v2824_v4 = vsel %vm1941_vm2, %v1492_v16, -inf  ;;  %14413 = vst [vmem:[#allocation28_spill] sm:$0xff] %v11895_v37  ;;  %v4338_v62 = vrot.slane %v10515_v41, 6  ;;  %v11901_v31 = vsel %vm4067_vm9, %v14415_v12, %v14414_v0  ;;  %v11912_v0 = vld [vmem:[%s14288_s2] ss:$0 sm:$0xff] }
 0x2eb   : > { %v2815_v40 = vrot.slane %v2814_v24, 1  ;;  %v2821_v8 = vmax.f32 %v2819_v22, %v2820_v43  ;;  %v2825_v17 = vrot.slane %v2824_v4, 4  ;;  %v1269_v35 = vpop.f32.mrf.mxu0  ;;  %v14337_v3 = vrot.slane %v11901_v31, 1 }
 0x2ec   : > { %v2831_v10 = vsel %vm1941_vm2, %v1748_v15, -inf  ;;  %v14338_v16 = vrot.slane %v11782_v47, 6  ;;  %v2809_v30 = vmax.f32 %v2807_v38, %v2808_v60  ;;  %v4168_v22 = vsel %vm4057_vm4, %v2802_v19, %v4167_v2 }
 0x2ed   : > { %v2826_v43 = vmax.f32 %v2824_v4, %v2825_v17  ;;  %v2832_v29 = vrot.slane %v2831_v10, 4  ;;  %v2822_v48 = vrot.slane %v2821_v8, 1  ;;  %v1270_v15 = vadd.f32 %v11912_v0, %v1269_v35 }
 0x2ee   : > { %v11921_v12 = vsel %vm4928_vm10, %v4917_v9, %v14337_v3  ;;  %v11927_v17 = vsel %vm4350_vm0, %v4338_v62, %v14338_v16  ;;  %v2816_v19 = vmax.f32 %v2814_v24, %v2815_v40  ;;  %v3506_v4 = vrot.slane %v11838_v6, 2  ;;  %v9833_v9 = vld [vmem:[%s14289_s3 + $0x10] sm:$0xff]  ;;  %v9832_v16 = vld [vmem:[%s14289_s3 + $0x8] sm:$0xff] }
 0x2ef   : > { %14416 = vst [vmem:[#allocation13_spill] sm:$0xff] %v11927_v17  ;;  %v2827_v38 = vrot.slane %v2826_v43, 2  ;;  %v2833_v2 = vmax.f32 %v2831_v10, %v2832_v29  ;;  %v1800_v35 = vrot.slane %v1544_v26, 4  ;;  %v1493_v25 = vmax.f32 %v1270_v15, 0.0  ;;  %6094 = vmatpush.bf16.msrb.mxu1 %v9833_v9 }
 0x2f0   : > { %v11941_v24 = vmax.f32 %v11772_v1, %v3499_v55  ;;  %v3553_v40 = vrot.slane %v11876_v58, 4  ;;  %v4169_v36 = vsel %vm4059_vm5, %v2809_v30, %v4168_v22  ;;  %v2823_v26 = vmax.f32 %v2821_v8, %v2822_v48 }
 0x2f1   : > { %v2828_v10 = vmax.f32 %v2826_v43, %v2827_v38  ;;  %v2834_v29 = vrot.slane %v2833_v2, 2  ;;  %v1749_v15 = vrot.slane %v1493_v25, 4  ;;  %v4403_v3 = vadd.s32 4294967294, %v3787_v7 }
 0x2f2   : > { %v4170_v60 = vsel %vm4061_vm6, %v2816_v19, %v4169_v36  ;;  %v14417_v17 = vrot.slane %v11829_v5, 6  ;;  %v11956_v30 = vmax.f32 %v11838_v6, %v3506_v4  ;;  %v3559_v48 = vsel %vm1941_vm2, %v1800_v35, -inf  ;;  %v10033_v36 = vpop.permute.xlu1 %10032 }
 0x2f3   : > { %v2829_v1 = vrot.slane %v2828_v10, 1  ;;  %v2835_v55 = vmax.f32 %v2833_v2, %v2834_v29  ;;  %v2845_v8 = vsel %vm1941_vm2, %v1749_v15, -inf  ;;  %v1271_v22 = vpop.f32.mrf.mxu0  ;;  %vm4435_vm15 = vcmp.ge.s32.totalorder %v4403_v3, 0  ;;  %6095 = vmatpush.bf16.msrb.mxu1 %v9832_v16  ;;  %v9831_v16 = vld [vmem:[%s14289_s3] sm:$0xff] }
 0x2f4   : > { %v4362_v43 = vsel %vm4350_vm0, %v14417_v17, %v4338_v62  ;;  %14418 = vst [vmem:[#allocation12_spill] sm:$0xff] %v11956_v30  ;;  %v2838_v19 = vsel %vm1941_vm2, %v1493_v25, -inf  ;;  %v2846_v38 = vrot.slane %v2845_v8, 4  ;;  %v4171_v9 = vsel %vm14359_vm7, %v2823_v26, %v4170_v60 }
 0x2f5   : > { %v2830_v20 = vmax.f32 %v2828_v10, %v2829_v1  ;;  %v2836_v7 = vrot.slane %v2835_v55, 1  ;;  %v1272_v62 = vadd.f32 %v11912_v0, %v1271_v22  ;;  %v11964_v6 = vsel %vm4435_vm15, %v4362_v43, 0.0  ;;  %v14420_v10 = vld [vmem:[#allocation4_spill] sm:$0xff] }
 0x2f6   : > { %14419 = vst [vmem:[#allocation29_spill] sm:$0xff] %v11964_v6  ;;  %v3554_v17 = vmax.f32 %v11876_v58, %v3553_v40  ;;  %v3560_v4 = vrot.slane %v3559_v48, 4  ;;  %v4320_v29 = vrot.slane %v14420_v10, 6  ;;  %v1407_v25 = vadd.f32 %v11912_v0, %v11347_v21 }
 0x2f7   : > { %v2837_v35 = vmax.f32 %v2835_v55, %v2836_v7  ;;  %v4172_v3 = vsel %vm4065_vm8, %v2830_v20, %v4171_v9  ;;  %v2839_v15 = vrot.slane %v2838_v19, 4  ;;  %v1494_v1 = vmax.f32 %v1272_v62, 0.0  ;;  %6096 = vmatpush.bf16.msrb.mxu1 %v9831_v16 }
 0x2f8   : > { %v2847_v26 = vmax.f32 %v2845_v8, %v2846_v38  ;;  %v4621_v40 = vrot.slane %v11792_v34, 7  ;;  %v10034_v20 = vunpack.i.l.bf16 %v10033_v36  ;;  %v3555_v7 = vrot.slane %v3554_v17, 2 }
 0x2f9   : > { %v11976_v58 = vsel %vm4067_vm9, %v2837_v35, %v4172_v3  ;;  %v1750_v55 = vrot.slane %v1494_v1, 4  ;;  %v2852_v43 = vsel %vm1941_vm2, %v1494_v1, -inf  ;;  %v3561_v9 = vmax.f32 %v3559_v48, %v3560_v4  ;;  %v11989_v1 = vpop.permute.xlu2 %10042 }
 0x2fa   : > { %v10126_v21 = vpack.i.bf16 %v11976_v58, %v11792_v34  ;;  %v14339_v22 = vrot.slane %v11976_v58, 7  ;;  %v2853_v62 = vrot.slane %v2852_v43, 4  ;;  %v1548_v10 = vmax.f32 %v1407_v25, 0.0 }
 0x2fb   : > { %v2840_v8 = vmax.f32 %v2838_v19, %v2839_v15  ;;  %v2859_v38 = vsel %vm1941_vm2, %v1750_v55, -inf  ;;  %v1274_v35 = vpop.f32.mrf.mxu0  ;;  %v2848_v60 = vrot.slane %v2847_v26, 2  ;;  %v14421_v48 = vrot.slane %v11724_v32, 7 }
 0x2fc   : > { %10127 = vrot.lane.b32.xlu1 %v10126_v21, %s10296_s25  ;;  %v4656_v3 = vsel %vm4639_vm11, %v4621_v40, %v14339_v22  ;;  %v2854_v16 = vmax.f32 %v2852_v43, %v2853_v62  ;;  %v2860_v2 = vrot.slane %v2859_v38, 4  ;;  %v14422_v4 = vrot.slane %v10715_v63, 6 }
 0x2fd   : > { %v4657_v19 = vsel %vm4639_vm11, %v14421_v48, %v4621_v40  ;;  %v10035_v15 = vunpack.i.h.bf16 %v10033_v36  ;;  %v1275_v55 = vadd.f32 %v11912_v0, %v1274_v35  ;;  %v14423_v22 = vrot.slane %v10801_v59, 6 }
 0x2fe   : > { %v4380_v25 = vsel %vm4350_vm0, %v14422_v4, %v4320_v29  ;;  %v10121_v21 = vpack.i.bf16 %v4656_v3, %v4657_v19  ;;  %v2855_v6 = vrot.slane %v2854_v16, 2  ;;  %v2861_v32 = vmax.f32 %v2859_v38, %v2860_v2 }
 0x2ff   : > { %v4379_v43 = vsel %vm4350_vm0, %v4320_v29, %v14423_v22  ;;  %v12005_v62 = vsel %vm5826_vm14, %v4380_v25, %v10034_v20  ;;  %v12008_v48 = vmax.f32 %v3554_v17, %v3555_v7  ;;  %v2841_v11 = vrot.slane %v2840_v8, 2  ;;  %v12013_v29 = vpop.permute.xlu1 %10052 }
 0x300   : > { %v1495_v4 = vmax.f32 %v1275_v55, 0.0  ;;  %10122 = vrot.lane.b32.xlu0 %v10121_v21, %s10297_s26  ;;  %v3562_v35 = vrot.slane %v3561_v9, 2  ;;  %v3608_v3 = vsel %vm1941_vm2, %v1548_v10, -inf  ;;  %v2849_v19 = vmax.f32 %v2847_v26, %v2848_v60 }
 0x301   : > { %14424 = vst [vmem:[#allocation4_spill] sm:$0xff] %v12008_v48  ;;  %v2862_v22 = vrot.slane %v2861_v32, 2  ;;  %v12018_v17 = vsel %vm5826_vm14, %v4379_v43, %v10035_v15  ;;  %v1804_v7 = vrot.slane %v1548_v10, 4  ;;  %v2856_v25 = vmax.f32 %v2854_v16, %v2855_v6 }
 0x302   : > { %v1751_v20 = vrot.slane %v1495_v4, 4  ;;  %v2866_v2 = vsel %vm1941_vm2, %v1495_v4, -inf  ;;  %v3609_v40 = vrot.slane %v3608_v3, 4  ;;  %v2842_v36 = vmax.f32 %v2840_v8, %v2841_v11 }
 0x303   : > { %v2867_v55 = vrot.slane %v2866_v2, 4  ;;  %v1276_v26 = vpop.f32.mrf.mxu0  ;;  %v12022_v13 = vmax.f32 %v3561_v9, %v3562_v35  ;;  %v2850_v38 = vrot.slane %v2849_v19, 1  ;;  %v2863_v30 = vmax.f32 %v2861_v32, %v2862_v22 }
 0x304   : > { %v2873_v60 = vsel %vm1941_vm2, %v1751_v20, -inf  ;;  %v1277_v15 = vadd.f32 %v11912_v0, %v1276_v26  ;;  %v14426_v6 = vrot.slane %v11901_v31, 2  ;;  %v14427_v10 = vrot.slane %v11782_v47, 2 }
 0x305   : > { %14425 = vst [vmem:[#allocation30_spill] sm:$0xff] %v12022_v13  ;;  %v2868_v4 = vmax.f32 %v2866_v2, %v2867_v55  ;;  %v2874_v44 = vrot.slane %v2873_v60, 4  ;;  %v3615_v8 = vsel %vm1941_vm2, %v1804_v7, -inf  ;;  %v2857_v9 = vrot.slane %v2856_v25, 1 }
 0x306   : > { %v12032_v11 = vsel %vm14355_vm13, %v14427_v10, %v14426_v6  ;;  %v12035_v35 = vmax.f32 %v3608_v3, %v3609_v40  ;;  %v2843_v20 = vrot.slane %v2842_v36, 1  ;;  %v1496_v2 = vmax.f32 %v1277_v15, 0.0 }
 0x307   : > { %v2869_v16 = vrot.slane %v2868_v4, 2  ;;  %v2875_v43 = vmax.f32 %v2873_v60, %v2874_v44  ;;  %v14428_v22 = vand.u32 31, %v10710_v18  ;;  %v2851_v10 = vmax.f32 %v2849_v19, %v2850_v38 }
 0x308   : > { %v2864_v37 = vrot.slane %v2863_v30, 1  ;;  %v1752_v7 = vrot.slane %v1496_v2, 4  ;;  %v2880_v48 = vsel %vm1941_vm2, %v1496_v2, -inf  ;;  %v2858_v44 = vmax.f32 %v2856_v25, %v2857_v9 }
 0x309   : > { %v4383_v55 = vadd.s32 4294967294, %v14428_v22  ;;  %v2870_v21 = vmax.f32 %v2868_v4, %v2869_v16  ;;  %v2876_v6 = vrot.slane %v2875_v43, 2  ;;  %v2881_v60 = vrot.slane %v2880_v48, 4 }
 0x30a   : > { %v3616_v15 = vrot.slane %v3615_v8, 4  ;;  %v2844_v13 = vmax.f32 %v2842_v36, %v2843_v20  ;;  %v4318_v32 = vrot.slane %v10706_v56, 6  ;;  %v2887_v57 = vsel %vm1941_vm2, %v1752_v7, -inf }
 0x30b   : > { %v2871_v40 = vrot.slane %v2870_v21, 1  ;;  %v2877_v3 = vmax.f32 %v2875_v43, %v2876_v6  ;;  %v1279_v22 = vpop.f32.mrf.mxu0  ;;  %vm4415_vm1 = vcmp.ge.s32.totalorder %v4383_v55, 0  ;;  %v2882_v19 = vmax.f32 %v2880_v48, %v2881_v60 }
 0x30c   : > { %v10018_v4 = vpop.permute.xlu0 %10017  ;;  %v2888_v38 = vrot.slane %v2887_v57, 4  ;;  %v4174_v16 = vsel %vm4055_vm3, %v2851_v10, %v2844_v13  ;;  %v2865_v2 = vmax.f32 %v2863_v30, %v2864_v37  ;;  %v14429_v25 = vrot.slane %v11569_v27, 6 }
 0x30d   : > { %v2878_v36 = vrot.slane %v2877_v3, 1  ;;  %v4175_v43 = vsel %vm4057_vm4, %v2858_v44, %v4174_v16  ;;  %v2872_v20 = vmax.f32 %v2870_v21, %v2871_v40  ;;  %v2883_v6 = vrot.slane %v2882_v19, 2 }
 0x30e   : > { %v4382_v9 = vsel %vm4350_vm0, %v14429_v25, %v4318_v32  ;;  %v2889_v7 = vmax.f32 %v2887_v57, %v2888_v38  ;;  %v12053_v56 = vmax.f32 %v3615_v8, %v3616_v15  ;;  %v10019_v48 = vunpack.i.l.bf16 %v10018_v4 }
 0x30f   : > { %v1280_v60 = vadd.f32 %v11912_v0, %v1279_v22  ;;  %v10020_v13 = vunpack.i.h.bf16 %v10018_v4  ;;  %v14430_v37 = vrot.slane %v10715_v63, 6  ;;  %v2884_v10 = vmax.f32 %v2882_v19, %v2883_v6 }
 0x310   : > { %v2890_v25 = vrot.slane %v2889_v7, 2  ;;  %v4176_v44 = vsel %vm4059_vm5, %v2865_v2, %v4175_v43  ;;  %v4575_v21 = vsel %vm4415_vm1, %v4382_v9, 0.0  ;;  %v2879_v57 = vmax.f32 %v2877_v3, %v2878_v36  ;;  %v12069_v9 = vpop.permute.xlu2 %10057 }
 0x311   : > { %v4381_v30 = vsel %vm4350_vm0, %v4318_v32, %v14430_v37  ;;  %v1497_v40 = vmax.f32 %v1280_v60, 0.0  ;;  %v4177_v8 = vsel %vm4061_vm6, %v2872_v20, %v4176_v44  ;;  %vm5859_vm12 = vcmask 523264  }
 0x312   : > { %v2885_v15 = vrot.slane %v2884_v10, 1  ;;  %v2891_v38 = vmax.f32 %v2889_v7, %v2890_v25  ;;  %v5827_v22 = vsel %vm5826_vm14, %v4575_v21, %v10019_v48  ;;  %vm5892_vm15 = vcmask 785408   ;;  %v12079_v21 = vpop.permute.xlu1 %10067 }
 0x313   : > { %v1753_v63 = vrot.slane %v1497_v40, 4  ;;  %v1281_v4 = vpop.f32.mrf.mxu0  ;;  %v12065_v32 = vadd.s32 120, %v10710_v18  ;;  %v5828_v19 = vsel %vm5826_vm14, %v4381_v30, %v10020_v13  ;;  %v4178_v36 = vsel %vm14359_vm7, %v2879_v57, %v4177_v8 }
 0x314   : > { %v10023_v16 = vpop.permute.xlu0 %10022  ;;  %v2886_v55 = vmax.f32 %v2884_v10, %v2885_v15  ;;  %v2892_v2 = vrot.slane %v2891_v38, 1  ;;  %v1282_v3 = vadd.f32 %v11912_v0, %v1281_v4  ;;  %v2894_v60 = vsel %vm1941_vm2, %v1497_v40, -inf }
 0x315   : > { %v10025_v43 = vunpack.i.h.bf16 %v10023_v16  ;;  %v10024_v20 = vunpack.i.l.bf16 %v10023_v16  ;;  %v2901_v6 = vsel %vm1941_vm2, %v1753_v63, -inf  ;;  %v3782_v25 = vand.u32 31, %v12065_v32 }
 0x316   : > { %v2893_v7 = vmax.f32 %v2891_v38, %v2892_v2  ;;  %v4179_v48 = vsel %vm4065_vm8, %v2886_v55, %v4178_v36  ;;  %v2902_v37 = vrot.slane %v2901_v6, 4  ;;  %v1498_v10 = vmax.f32 %v1282_v3, 0.0 }
 0x317   : > { %v5860_v13 = vsel %vm5859_vm12, %v5827_v22, %v10024_v20  ;;  %v5861_v30 = vsel %vm5859_vm12, %v5828_v19, %v10025_v43  ;;  %v14431_v8 = vunpack.i.l.bf16 %v11670_v46  ;;  %v14432_v40 = vunpack.i.h.bf16 %v11670_v46 }
 0x318   : > { %v12082_v57 = vsel %vm4067_vm9, %v2893_v7, %v4179_v48  ;;  %v2895_v63 = vrot.slane %v2894_v60, 4  ;;  %v1754_v4 = vrot.slane %v1498_v10, 4  ;;  %v2908_v32 = vsel %vm1941_vm2, %v1498_v10, -inf  ;;  %v14433_v10 = vld [vmem:[#allocation10_spill] sm:$0xff] }
 0x319   : > { %v5893_v15 = vsel %vm5892_vm15, %v5860_v13, %v14431_v8  ;;  %v5894_v38 = vsel %vm5892_vm15, %v5861_v30, %v14432_v40  ;;  %v2903_v16 = vmax.f32 %v2901_v6, %v2902_v37  ;;  %v2909_v55 = vrot.slane %v2908_v32, 4  ;;  %v14434_v8 = vld [vmem:[#allocation5_spill] sm:$0xff] }
 0x31a   : > { %v5925_v22 = vpack.c.bf16 %v5894_v38, %v5893_v15  ;;  %v14352_v2 = vrot.slane %v12082_v57, 2  ;;  %v2915_v46 = vsel %vm1941_vm2, %v1754_v4, -inf  ;;  %v5265_v20 = vadd.s32 2, %v3782_v25 }
 0x31b   : > { %v1284_v43 = vpop.f32.mrf.mxu0  ;;  %v2910_v7 = vmax.f32 %v2908_v32, %v2909_v55  ;;  %v2916_v48 = vrot.slane %v2915_v46, 4  ;;  %v5200_v30 = vrot.slane %v11976_v58, 2  ;;  %v2896_v37 = vmax.f32 %v2894_v60, %v2895_v63 }
 0x31c   : > { %6097 = vmatmul.bf16.vlgmr.msrb.gmra.mxu1 %v5925_v22  ;;  %v1285_v13 = vadd.f32 %v11912_v0, %v1284_v43  ;;  %v12102_v15 = vsel %vm4067_vm9, %v14434_v8, %v14433_v10  ;;  %v12105_v40 = vadd.s32 152, %v10710_v18  ;;  %v14435_v38 = vand.u32 31, %v11609_v28 }
 0x31d   : > { %v2904_v4 = vrot.slane %v2903_v16, 2  ;;  %v5233_v55 = vsel %vm14355_vm13, %v5200_v30, %v14352_v2  ;;  %v2917_v43 = vmax.f32 %v2915_v46, %v2916_v48  ;;  %v14436_v60 = vunpack.i.l.bf16 %v11751_v45 }
 0x31e   : > { %v4387_v22 = vadd.s32 4294967294, %v14435_v38  ;;  %v1499_v32 = vmax.f32 %v1285_v13, 0.0  ;;  %v14437_v10 = vunpack.i.h.bf16 %v11751_v45  ;;  %vm5329_vm1 = vcmp.lt.s32.totalorder %v5265_v20, 32 }
 0x31f   : > { %v5862_v63 = vsel %vm5859_vm12, %v12005_v62, %v14436_v60  ;;  %v2911_v38 = vrot.slane %v2910_v7, 2  ;;  %v14438_v3 = vrot.slane %v11792_v34, 2  ;;  %v2897_v48 = vrot.slane %v2896_v37, 2 }
 0x320   : > { %v5863_v8 = vsel %vm5859_vm12, %v12018_v17, %v14437_v10  ;;  %v1755_v26 = vrot.slane %v1499_v32, 4  ;;  %v2922_v13 = vsel %vm1941_vm2, %v1499_v32, -inf  ;;  %v5457_v2 = vsel %vm5329_vm1, %v5233_v55, 0.0 }
 0x321   : > { %v5234_v46 = vsel %vm14355_vm13, %v14438_v3, %v5200_v30  ;;  %v2923_v36 = vrot.slane %v2922_v13, 4  ;;  %v14356_v62 = vrot.slane %v12082_v57, 1  ;;  %v2905_v60 = vmax.f32 %v2903_v16, %v2904_v4 }
 0x322   : > { %v2929_v45 = vsel %vm1941_vm2, %v1755_v26, -inf  ;;  %v5940_v44 = vpack.c.bf16 %v5457_v2, %v5234_v46  ;;  %v4911_v17 = vrot.slane %v11976_v58, 1  ;;  %v2918_v20 = vrot.slane %v2917_v43, 2 }
 0x323   : > { %v2924_v10 = vmax.f32 %v2922_v13, %v2923_v36  ;;  %v2930_v19 = vrot.slane %v2929_v45, 4  ;;  %v4976_v32 = vadd.s32 1, %v3782_v25  ;;  %v2912_v6 = vmax.f32 %v2910_v7, %v2911_v38  ;;  %v1286_v36 = vpop.f32.mrf.mxu0 }
 0x324   : > { %v14439_v28 = vunpack.i.l.bf16 %v11989_v1  ;;  %v14440_v30 = vunpack.i.h.bf16 %v11989_v1  ;;  %9110 = vmatmul.msk.bf16.gmra.mxu3 %vm5826_vm14, %v5940_v44  ;;  %v2898_v16 = vmax.f32 %v2896_v37, %v2897_v48  ;;  %v4944_v25 = vsel %vm4928_vm10, %v4911_v17, %v14356_v62 }
 0x325   : > { %v2925_v2 = vrot.slane %v2924_v10, 2  ;;  %v2931_v4 = vmax.f32 %v2929_v45, %v2930_v19  ;;  %v14442_v1 = vrot.slane %v10801_v59, 6  ;;  %vm4419_vm1 = vcmp.ge.s32.totalorder %v4387_v22, 0 }
 0x326   : > { %v5895_v3 = vsel %vm5892_vm15, %v5862_v63, %v14439_v28  ;;  %v5896_v55 = vsel %vm5892_vm15, %v5863_v8, %v14440_v30  ;;  %v14441_v28 = vrot.slane %v10896_v51, 6  ;;  %v10048_v63 = vpop.permute.xlu0 %10047  ;;  %vm5040_vm13 = vcmp.lt.s32.totalorder %v4976_v32, 32 }
 0x327   : > { %v2906_v37 = vrot.slane %v2905_v60, 1  ;;  %v2919_v19 = vmax.f32 %v2917_v43, %v2918_v20  ;;  %v5927_v8 = vpack.c.bf16 %v5896_v55, %v5895_v3  ;;  %v14443_v38 = vrot.slane %v11792_v34, 1 }
 0x328   : > { %v4378_v44 = vsel %vm4350_vm0, %v14442_v1, %v14441_v28  ;;  %v2913_v46 = vrot.slane %v2912_v6, 1  ;;  %v2932_v48 = vrot.slane %v2931_v4, 2  ;;  %v5168_v45 = vsel %vm5040_vm13, %v4944_v25, 0.0 }
 0x329   : > { %v4945_v13 = vsel %vm4928_vm10, %v14443_v38, %v4911_v17  ;;  %v1287_v30 = vadd.f32 %v11912_v0, %v1286_v36  ;;  %v10049_v59 = vunpack.i.l.bf16 %v10048_v63  ;;  %v2899_v62 = vrot.slane %v2898_v16, 1 }
 0x32a   : > { %v2926_v7 = vmax.f32 %v2924_v10, %v2925_v2  ;;  %v10131_v28 = vpack.i.bf16 %v5168_v45, %v4945_v13  ;;  %v10050_v1 = vunpack.i.h.bf16 %v10048_v63  ;;  %v4914_v32 = vrot.slane %v12102_v15, 1 }
 0x32b   : > { %v1500_v26 = vmax.f32 %v1287_v30, 0.0  ;;  %v4915_v43 = vrot.slane %v11829_v5, 1  ;;  %v4579_v20 = vsel %vm4419_vm1, %v4378_v44, 0.0  ;;  %v2907_v3 = vmax.f32 %v2905_v60, %v2906_v37 }
 0x32c   : > { %v2920_v55 = vrot.slane %v2919_v19, 1  ;;  %6102 = vmatmul.bf16.gmra.mxu1 %v5927_v8  ;;  %10132 = vrot.lane.b32.xlu2 %v10131_v28, %s10295_s24  ;;  %v14444_v17 = vand.u32 31, %v12105_v40  ;;  %v2914_v25 = vmax.f32 %v2912_v6, %v2913_v46  ;;  %v2933_v36 = vmax.f32 %v2931_v4, %v2932_v48  ;;  %v12173_v46 = vpop.permute.xlu2 %10072 }
 0x32d   : > { %v1756_v10 = vrot.slane %v1500_v26, 4  ;;  %v2936_v2 = vsel %vm1941_vm2, %v1500_v26, -inf  ;;  %v14445_v63 = vrot.slane %v10980_v54, 6  ;;  %v14446_v38 = vrot.slane %v10896_v51, 6 }
 0x32e   : > { %v4980_v0 = vadd.s32 1, %v14444_v17  ;;  %v5831_v60 = vsel %vm5826_vm14, %v4579_v20, %v10049_v59  ;;  %v2900_v44 = vmax.f32 %v2898_v16, %v2899_v62  ;;  %v2927_v37 = vrot.slane %v2926_v7, 1 }
 0x32f   : > { %v4377_v22 = vsel %vm4350_vm0, %v14446_v38, %v14445_v63  ;;  %v2937_v13 = vrot.slane %v2936_v2, 4  ;;  %v2943_v6 = vsel %vm1941_vm2, %v1756_v10, -inf  ;;  %v14447_v4 = vrot.slane %v10515_v41, 1 }
 0x330   : > { %v5832_v8 = vsel %vm5826_vm14, %v4377_v22, %v10050_v1  ;;  %v4181_v51 = vsel %vm4055_vm3, %v2907_v3, %v2900_v44  ;;  %v2921_v48 = vmax.f32 %v2919_v19, %v2920_v55  ;;  %v2944_v45 = vrot.slane %v2943_v6, 4  ;;  %v10063_v22 = vpop.permute.xlu0 %10062 }
 0x331   : > { %v4940_v26 = vsel %vm4928_vm10, %v4915_v43, %v14447_v4  ;;  %vm5044_vm13 = vcmp.lt.s32.totalorder %v4980_v0, 32  ;;  %v4182_v62 = vsel %vm4057_vm4, %v2914_v25, %v4181_v51  ;;  %v2934_v16 = vrot.slane %v2933_v36, 1 }
 0x332   : > { %v2938_v30 = vmax.f32 %v2936_v2, %v2937_v13  ;;  %v14448_v59 = vunpack.i.l.bf16 %v12013_v29  ;;  %v2928_v1 = vmax.f32 %v2926_v7, %v2927_v37  ;;  %v2945_v20 = vmax.f32 %v2943_v6, %v2944_v45 }
 0x333   : > { %v14449_v17 = vunpack.i.h.bf16 %v12013_v29  ;;  %v12184_v63 = vadd.s32 128, %v10710_v18  ;;  %v10075_v19 = vunpack.i.h.bf16 %v12173_v46  ;;  %v10074_v3 = vunpack.i.l.bf16 %v12173_v46 }
 0x334   : > { %v5864_v28 = vsel %vm5859_vm12, %v5831_v60, %v14448_v59  ;;  %v2939_v55 = vrot.slane %v2938_v30, 2  ;;  %v5203_v25 = vrot.slane %v12102_v15, 2  ;;  %v4183_v2 = vsel %vm4059_vm5, %v2921_v48, %v4182_v62 }
 0x335   : > { %v5865_v10 = vsel %vm5859_vm12, %v5832_v8, %v14449_v17  ;;  %v2946_v38 = vrot.slane %v2945_v20, 2  ;;  %v12194_v29 = vsel %vm4928_vm10, %v4914_v32, %v4915_v43  ;;  %v12197_v7 = vsel %vm5044_vm13, %v4940_v26, 0.0 }
 0x336   : > { %v2935_v60 = vmax.f32 %v2933_v36, %v2934_v16  ;;  %v2940_v44 = vmax.f32 %v2938_v30, %v2939_v55  ;;  %v14450_v37 = vunpack.i.l.bf16 %v12069_v9  ;;  %v14451_v13 = vunpack.i.h.bf16 %v12069_v9 }
 0x337   : > { %v4184_v4 = vsel %vm4061_vm6, %v2928_v1, %v4183_v2  ;;  %v2947_v51 = vmax.f32 %v2945_v20, %v2946_v38  ;;  %v14357_v43 = vand.u32 31, %v12184_v63  ;;  %v5204_v0 = vrot.slane %v11829_v5, 2  ;;  %v14452_v20 = vld [vmem:[#allocation6_spill] sm:$0xff] }
 0x338   : > { %v5897_v8 = vsel %vm5892_vm15, %v5864_v28, %v14450_v37  ;;  %v5898_v6 = vsel %vm5892_vm15, %v5865_v10, %v14451_v13  ;;  %v4324_v26 = vrot.slane %v11098_v49, 6  ;;  %v4325_v36 = vrot.slane %v11201_v61, 6  ;;  %v10078_v46 = vpop.permute.xlu0 %10077 }
 0x339   : > { %v2941_v48 = vrot.slane %v2940_v44, 1  ;;  %v10161_v45 = vpack.i.bf16 %v12197_v7, %v12194_v29  ;;  %v10064_v62 = vunpack.i.l.bf16 %v10063_v22  ;;  %v2948_v16 = vrot.slane %v2947_v51, 1 }
 0x33a   : > { %v5929_v9 = vpack.c.bf16 %v5898_v6, %v5897_v8  ;;  %v4629_v30 = vrot.slane %v11901_v31, 7  ;;  %v4185_v59 = vsel %vm14359_vm7, %v2935_v60, %v4184_v4  ;;  %v4623_v1 = vrot.slane %v12082_v57, 7  ;;  %v14454_v6 = vld [vmem:[#allocation7_spill] sm:$0xff] }
 0x33b   : > { %v2942_v28 = vmax.f32 %v2940_v44, %v2941_v48  ;;  %v4228_v49 = vsel %vm4065_vm8, %v11329_v33, %v14452_v20  ;;  %v2949_v17 = vmax.f32 %v2947_v51, %v2948_v16  ;;  %v4688_v10 = vadd.s32 4294967295, %v14357_v43 }
 0x33c   : > { %v12222_v55 = vsel %vm4067_vm9, %v11535_v23, %v4228_v49  ;;  %v3758_v2 = vadd.s32 184, %v10710_v18  ;;  %v4375_v38 = vsel %vm4350_vm0, %v4324_v26, %v4325_v36  ;;  %v14453_v60 = vrot.slane %v10980_v54, 6  ;;  %6107 = vmatmul.bf16.gmra.mxu1 %v5929_v9 }
 0x33d   : > { %v10065_v44 = vunpack.i.h.bf16 %v10063_v22  ;;  %v4186_v37 = vsel %vm4065_vm8, %v2942_v28, %v4185_v59  ;;  %v4919_v13 = vrot.slane %v12222_v55, 1  ;;  %v14358_v4 = vrot.slane %v14454_v6, 1 }
 0x33e   : > { %v4376_v33 = vsel %vm4350_vm0, %v14453_v60, %v4324_v26  ;;  %v12235_v8 = vsel %vm4067_vm9, %v2949_v17, %v4186_v37  ;;  %v3790_v23 = vand.u32 31, %v3758_v2  ;;  %v14455_v16 = vrot.slane %v11976_v58, 7 }
 0x33f   : > { %v10141_v51 = vpack.i.bf16 %v12235_v8, %v12082_v57  ;;  %v5202_v54 = vrot.slane %v12235_v8, 2  ;;  %v4913_v48 = vrot.slane %v12235_v8, 1  ;;  %v4624_v22 = vrot.slane %v12235_v8, 7 }
 0x340   : > { %v5833_v26 = vsel %vm5826_vm14, %v4376_v33, %v10064_v62  ;;  %v4655_v9 = vsel %vm4639_vm11, %v14455_v16, %v4623_v1  ;;  %vm4720_vm2 = vcmp.ge.s32.totalorder %v4688_v10, 0  ;;  %v4936_v59 = vsel %vm4928_vm10, %v4919_v13, %v14358_v4 }
 0x341   : > { %10142 = vrot.lane.b32.xlu1 %v10141_v51, %s10296_s25  ;;  %vm14456_vm1 = vcmp.lt.s32.totalorder %v10710_v18, 6  ;;  %v14457_v62 = vrot.slane %v12082_v57, 2  ;;  %v4942_v49 = vsel %vm4928_vm10, %v4913_v48, %v4914_v32  ;;  %v14459_v17 = vrot.slane %v12082_v57, 1 }
 0x342   : > { %v5231_v28 = vsel %vm14456_vm1, %v5202_v54, %v5203_v25  ;;  %vm14458_vm13 = vmmov %vm14456_vm1  ;;  %v5834_v2 = vsel %vm5826_vm14, %v4375_v38, %v10065_v44  ;;  %v14460_v37 = vand.u32 31, %v12105_v40  ;;  %v4880_v16 = vsel %vm4720_vm2, %v4655_v9, 0.0 }
 0x343   : > { %v5232_v20 = vsel %vm14458_vm13, %v14457_v62, %v5202_v54  ;;  %v4943_v10 = vsel %vm4928_vm10, %v14459_v17, %v4913_v48  ;;  %v4654_v54 = vsel %vm4639_vm11, %v4623_v1, %v4624_v22  ;;  %v4984_v62 = vadd.s32 1, %v3790_v23 }
 0x344   : > { %v5942_v60 = vpack.c.bf16 %v5231_v28, %v5232_v20  ;;  %v10146_v33 = vpack.i.bf16 %v4942_v49, %v4943_v10  ;;  %v5269_v51 = vadd.s32 2, %v14460_v37  ;;  %v4630_v43 = vrot.slane %v12222_v55, 7 }
 0x345   : > { %v14461_v32 = vunpack.i.l.bf16 %v12079_v21  ;;  %v10136_v38 = vpack.i.bf16 %v4654_v54, %v4880_v16  ;;  %v14462_v44 = vrot.slane %v11782_v47, 7  ;;  %v12288_v1 = vadd.s32 192, %v10710_v18 }
 0x346   : > { %9111 = vmatmul.msk.bf16.gmra.mxu3 %vm5826_vm14, %v5942_v60  ;;  %10147 = vrot.lane.b32.xlu2 %v10146_v33, %s10295_s24  ;;  %v14463_v48 = vunpack.i.h.bf16 %v12079_v21  ;;  %vm5048_vm2 = vcmp.lt.s32.totalorder %v4984_v62, 32  ;;  %v12297_v28 = vsel %vm4639_vm11, %v4629_v30, %v4630_v43  ;;  %v4625_v20 = vrot.slane %v12102_v15, 7 }
 0x347   : > { %v5866_v4 = vsel %vm5859_vm12, %v5833_v26, %v14461_v32  ;;  %v12285_v40 = vsel %vm4639_vm11, %v14462_v44, %v4629_v30  ;;  %v10156_v26 = vpack.i.bf16 %v11829_v5, %v12102_v15  ;;  %10137 = vrot.lane.b32.xlu0 %v10136_v38, %s10297_s26  ;;  %v14464_v49 = vrot.slane %v11901_v31, 1 }
 0x348   : > { %v5867_v9 = vsel %vm5859_vm12, %v5834_v2, %v14463_v48  ;;  %v12307_v21 = vsel %vm5048_vm2, %v4936_v59, 0.0  ;;  %v10181_v10 = vpack.i.bf16 %v12297_v28, %v12285_v40  ;;  %v3791_v30 = vand.u32 31, %v12288_v1  ;;  %vm14467_vm2 = vmmov %vm14456_vm1 }
 0x349   : > { %v12305_v17 = vsel %vm4928_vm10, %v14464_v49, %v4919_v13  ;;  %v4631_v60 = vrot.slane %v14454_v6, 7  ;;  %v5208_v33 = vrot.slane %v12222_v55, 2  ;;  %v4326_v37 = vrot.slane %v11333_v39, 6  ;;  %10157 = vrot.lane.b32.xlu1 %v10156_v26, %s10296_s25  ;;  %vm14470_vm7 = vmmov %vm14467_vm2  ;;  %v10093_v49 = vpop.permute.xlu0 %10092 }
 0x34a   : > { %v10191_v2 = vpack.i.bf16 %v12307_v21, %v12305_v17  ;;  %v14465_v54 = vrot.slane %v10515_v41, 2  ;;  %v14361_v59 = vrot.slane %v14454_v6, 2  ;;  %v5273_v16 = vadd.s32 2, %v3790_v23 }
 0x34b   : > { %v5899_v62 = vsel %vm5892_vm15, %v5866_v4, %v10074_v3  ;;  %v5900_v32 = vsel %vm5892_vm15, %v5867_v9, %v10075_v19  ;;  %v4653_v39 = vsel %vm4639_vm11, %v4624_v22, %v4625_v20  ;;  %v4647_v38 = vsel %vm4639_vm11, %v4630_v43, %v4631_v60 }
 0x34c   : > { %v5229_v13 = vsel %vm14456_vm1, %v5204_v0, %v14465_v54  ;;  %v14466_v44 = vand.u32 31, %v11673_v14  ;;  %vm5333_vm13 = vcmp.lt.s32.totalorder %v5269_v51, 32  ;;  %v5225_v3 = vsel %vm14467_vm2, %v5208_v33, %v14361_v59 }
 0x34d   : > { %vm5337_vm1 = vcmp.lt.s32.totalorder %v5273_v16, 32  ;;  %v14468_v19 = vrot.slane %v11829_v5, 7  ;;  %v4696_v4 = vadd.s32 4294967295, %v3791_v30  ;;  %v14469_v43 = vrot.slane %v11901_v31, 2 }
 0x34e   : > { %v4391_v48 = vadd.s32 4294967294, %v14466_v44  ;;  %v12353_v22 = vsel %vm5337_vm1, %v5225_v3, 0.0  ;;  %v3618_v9 = vrot.slane %v12053_v56, 2  ;;  %v5931_v26 = vpack.c.bf16 %v5900_v32, %v5899_v62  ;;  %10162 = vrot.lane.b32.xlu2 %v10161_v45, %s10295_s24  ;;  %v14472_v45 = vld [vmem:[#allocation9_spill] sm:$0xff]  ;;  %v14473_v62 = vld [vmem:[#allocation19_spill] sm:$0xff] }
 0x34f   : > { %v4652_v23 = vsel %vm4639_vm11, %v4625_v20, %v14468_v19  ;;  %v12351_v14 = vsel %vm14470_vm7, %v14469_v43, %v5208_v33  ;;  %v4327_v54 = vrot.slane %v11416_v52, 6  ;;  %v4374_v33 = vsel %vm4350_vm0, %v4325_v36, %v4326_v37  ;;  %vm14471_vm7 = vmmov %vm14467_vm2 }
 0x350   : > { %v10151_v20 = vpack.i.bf16 %v4652_v23, %v4653_v39  ;;  %v5230_v16 = vsel %vm14471_vm7, %v5203_v25, %v5204_v0  ;;  %v5461_v29 = vsel %vm5333_vm13, %v5229_v13, 0.0  ;;  %vm4423_vm2 = vcmp.ge.s32.totalorder %v4391_v48, 0  ;;  %6112 = vmatmul.bf16.gmra.mxu1 %v5931_v26  ;;  %v14474_v39 = vld [vmem:[#allocation21_spill] sm:$0xff] }
 0x351   : > { %v10080_v7 = vunpack.i.h.bf16 %v10078_v46  ;;  %v4242_v61 = vsel %vm4065_vm8, %v14473_v62, %v14472_v45  ;;  %v12381_v36 = vsel %vm4067_vm9, %v11776_v53, %v11770_v42  ;;  %v10079_v32 = vunpack.i.l.bf16 %v10078_v46  ;;  %v10083_v46 = vpop.permute.xlu1 %10082  ;;  %v10088_v62 = vpop.permute.xlu2 %10087 }
 0x352   : > { %10152 = vrot.lane.b32.xlu0 %v10151_v20, %s10297_s26  ;;  %v12385_v25 = vsel %vm4067_vm9, %v14474_v39, %v4242_v61  ;;  %v14362_v0 = vrot.slane %v12381_v36, 1  ;;  %vm4728_vm13 = vcmp.ge.s32.totalorder %v4696_v4, 0  ;;  %v14475_v51 = vrot.slane %v12035_v35, 2  ;;  %v14480_v61 = vld [vmem:[#allocation30_spill] sm:$0xff]  ;;  %v14481_v39 = vld [vmem:[#allocation4_spill] sm:$0xff] }
 0x353   : > { %v10201_v44 = vpack.i.bf16 %v12385_v25, %v14454_v6  ;;  %v4921_v3 = vrot.slane %v12385_v25, 1  ;;  %v14360_v42 = vrot.slane %v12385_v25, 7  ;;  %v3619_v53 = vmax.f32 %v12053_v56, %v3618_v9 }
 0x354   : > { %v3612_v13 = vmax.f32 %v12035_v35, %v14475_v51  ;;  %v4373_v19 = vsel %vm4350_vm0, %v4326_v37, %v4327_v54  ;;  %v4583_v23 = vsel %vm4423_vm2, %v4374_v33, 0.0  ;;  %v14476_v35 = vpack.i.bf16 %v11782_v47, %v10515_v41 }
 0x355   : > { %v5944_v4 = vpack.c.bf16 %v5461_v29, %v5230_v16  ;;  %v12409_v43 = vsel %vm4928_vm10, %v4921_v3, %v14362_v0  ;;  %v14477_v56 = vrot.slane %v14454_v6, 1  ;;  %v12421_v37 = vsel %vm4639_vm11, %v4631_v60, %v14360_v42 }
 0x356   : > { %10172 = vrot.lane.b32.xlu1 %v14476_v35, %s10296_s25  ;;  %v12423_v41 = vsel %vm4728_vm13, %v4647_v38, 0.0  ;;  %v5836_v48 = vsel %vm5826_vm14, %v4373_v19, %v10080_v7  ;;  %v5835_v26 = vsel %vm5826_vm14, %v4583_v23, %v10079_v32  ;;  %v3501_v16 = vrot.slane %v11941_v24, 1  ;;  %v14479_v38 = vld [vmem:[#allocation12_spill] sm:$0xff]  ;;  %v14483_v35 = vld [vmem:[#allocation26_spill] sm:$0xff]  ;;  %vm14500_vm13 = vmmov %vm14471_vm7 }
 0x357   : > { %v12415_v9 = vsel %vm4928_vm10, %v14477_v56, %v4921_v3  ;;  %v10196_v33 = vpack.i.bf16 %v12421_v37, %v12423_v41  ;;  %v10085_v29 = vunpack.i.h.bf16 %v10083_v46  ;;  %v10084_v45 = vunpack.i.l.bf16 %v10083_v46  ;;  %9112 = vmatmul.msk.bf16.gmra.mxu3 %vm5826_vm14, %v5944_v4  ;;  %v14484_v4 = vld [vmem:[#allocation28_spill] sm:$0xff] }
 0x358   : > { %v10206_v20 = vpack.i.bf16 %v12409_v43, %v12415_v9  ;;  %v14478_v60 = vpack.i.bf16 %v11921_v12, %v11852_v50  ;;  %v3508_v7 = vrot.slane %v14479_v38, 1  ;;  %v3564_v32 = vrot.slane %v14480_v61, 1 }
 0x359   : > { %v14482_v51 = vrot.slane %v14481_v39, 1  ;;  %v3613_v19 = vrot.slane %v3612_v13, 1  ;;  %v5868_v23 = vsel %vm5859_vm12, %v5835_v26, %v10084_v45  ;;  %v5869_v46 = vsel %vm5859_vm12, %v5836_v48, %v10085_v29  ;;  %v10103_v40 = vpop.permute.xlu2 %10102 }
 0x35a   : > { %10177 = vrot.lane.b32.xlu2 %v14478_v60, %s10295_s24  ;;  %v14485_v43 = vpack.i.bf16 %v14483_v35, %v14484_v4  ;;  %v3620_v50 = vrot.slane %v3619_v53, 1  ;;  %v10090_v12 = vunpack.i.h.bf16 %v10088_v62  ;;  %v10089_v56 = vunpack.i.l.bf16 %v10088_v62  ;;  %v14486_v62 = vld [vmem:[#allocation14_spill] sm:$0xff] }
 0x35b   : > { %v3558_v3 = vmax.f32 %v14481_v39, %v14482_v51  ;;  %v10186_v9 = vpack.i.bf16 %v12222_v55, %v11901_v31  ;;  %v3502_v60 = vmax.f32 %v11941_v24, %v3501_v16  ;;  %v12452_v39 = vadd.s32 216, %v10710_v18  ;;  %v14487_v24 = vld [vmem:[#allocation18_spill] sm:$0xff] }
 0x35c   : > { %10167 = vrot.lane.b32.xlu0 %v14485_v43, %s10297_s26  ;;  %v3565_v26 = vmax.f32 %v14480_v61, %v3564_v32  ;;  %v5901_v48 = vsel %vm5892_vm15, %v5868_v23, %v10089_v56  ;;  %v5902_v29 = vsel %vm5892_vm15, %v5869_v46, %v10090_v12  ;;  %v3509_v45 = vmax.f32 %v14479_v38, %v3508_v7  ;;  %v14488_v43 = vld [vmem:[#allocation20_spill] sm:$0xff]  ;;  %v14489_v32 = vld [vmem:[#allocation11_spill] sm:$0xff] }
 0x35d   : > { %v4263_v51 = vsel %vm4065_vm8, %v3558_v3, %v14486_v62  ;;  %v3614_v35 = vmax.f32 %v3612_v13, %v3613_v19  ;;  %v3621_v4 = vmax.f32 %v3619_v53, %v3620_v50  ;;  %v4328_v16 = vrot.slane %v14487_v24, 6  ;;  %v10098_v53 = vpop.permute.xlu1 %10097  ;;  %v14494_v62 = vld [vmem:[#allocation24_spill] sm:$0xff] }
 0x35e   : > { %10187 = vrot.lane.b32.xlu1 %v10186_v9, %s10296_s25  ;;  %v4329_v42 = vrot.slane %v14488_v43, 6  ;;  %v10095_v59 = vunpack.i.h.bf16 %v10093_v49  ;;  %v10094_v0 = vunpack.i.l.bf16 %v10093_v49  ;;  %v5933_v61 = vpack.c.bf16 %v5902_v29, %v5901_v48  ;;  %v14490_v49 = vld [vmem:[#allocation16_spill] sm:$0xff]  ;;  %v14491_v9 = vld [vmem:[#allocation27_spill] sm:$0xff] }
 0x35f   : > { %v4256_v38 = vsel %vm4065_vm8, %v3502_v60, %v14489_v32  ;;  %v3794_v7 = vand.u32 31, %v12452_v39  ;;  %v12471_v13 = vsel %vm4067_vm9, %v3565_v26, %v4263_v51  ;;  %v4270_v3 = vsel %vm4065_vm8, %v3614_v35, %v14490_v49  ;;  %v14493_v29 = vld [vmem:[#allocation23_spill] sm:$0xff] }
 0x360   : > { %6117 = vmatmul.bf16.gmra.mxu1 %v5933_v61  ;;  %v4371_v17 = vsel %vm4350_vm0, %v4328_v16, %v4329_v42  ;;  %v4372_v21 = vsel %vm4350_vm0, %v4327_v54, %v4328_v16  ;;  %v12491_v19 = vsel %vm4067_vm9, %v3621_v4, %v4270_v3  ;;  %v4924_v23 = vrot.slane %v12471_v13, 1 }
 0x361   : > { %v5838_v28 = vsel %vm5826_vm14, %v4371_v17, %v10095_v59  ;;  %v4988_v46 = vadd.s32 1, %v3794_v7  ;;  %v10100_v52 = vunpack.i.h.bf16 %v10098_v53  ;;  %v10099_v50 = vunpack.i.l.bf16 %v10098_v53 }
 0x362   : > { %10192 = vrot.lane.b32.xlu2 %v10191_v2, %s10295_s24  ;;  %v12488_v2 = vsel %vm4067_vm9, %v3509_v45, %v4256_v38  ;;  %v10105_v12 = vunpack.i.h.bf16 %v10103_v40  ;;  %v10104_v56 = vunpack.i.l.bf16 %v10103_v40  ;;  %v14492_v60 = vpack.c.bf16 %v12032_v11, %v14491_v9 }
 0x363   : > { %v4923_v54 = vrot.slane %v12488_v2, 1  ;;  %vm5052_vm1 = vcmp.lt.s32.totalorder %v4988_v46, 32  ;;  %v4634_v26 = vrot.slane %v12488_v2, 7  ;;  %v12516_v48 = vadd.s32 224, %v10710_v18 }
 0x364   : > { %10182 = vrot.lane.b32.xlu0 %v10181_v10, %s10297_s26  ;;  %v5837_v10 = vsel %vm5826_vm14, %v4372_v21, %v10094_v0  ;;  %v5871_v0 = vsel %vm5859_vm12, %v5838_v28, %v10100_v52  ;;  %v4330_v45 = vrot.slane %v14493_v29, 6  ;;  %v14495_v51 = vand.u32 31, %v14494_v62  ;;  %v14501_v62 = vld [vmem:[#allocation25_spill] sm:$0xff] }
 0x365   : > { %v5870_v59 = vsel %vm5859_vm12, %v5837_v10, %v10099_v50  ;;  %v4633_v4 = vrot.slane %v12381_v36, 7  ;;  %v14365_v24 = vrot.slane %v12222_v55, 6  ;;  %v10216_v16 = vpack.i.bf16 %v12488_v2, %v12381_v36  ;;  %v14499_v50 = vld [vmem:[#allocation17_spill] sm:$0xff] }
 0x366   : > { %10202 = vrot.lane.b32.xlu1 %v10201_v44, %s10296_s25  ;;  %v4932_v44 = vsel %vm4928_vm10, %v4923_v54, %v4924_v23  ;;  %v4395_v11 = vadd.s32 4294967294, %v14495_v51  ;;  %v5903_v35 = vsel %vm5892_vm15, %v5870_v59, %v10104_v56  ;;  %v5210_v32 = vrot.slane %v12385_v25, 2 }
 0x367   : > { %9113 = vmatmul.msk.bf16.gmra.mxu3 %vm5826_vm14, %v14492_v60  ;;  %v5180_v61 = vsel %vm5052_vm1, %v4932_v44, 0.0  ;;  %v4342_v38 = vrot.slane %v14454_v6, 6  ;;  %v4644_v53 = vsel %vm4639_vm11, %v4633_v4, %v4634_v26  ;;  %v14363_v49 = vand.u32 31, %v12516_v48 }
 0x368   : > { %v12537_v37 = vadd.s32 248, %v10710_v18  ;;  %v4407_v41 = vadd.s32 4294967294, %v3791_v30  ;;  %v5211_v17 = vrot.slane %v12381_v36, 2  ;;  %v14497_v21 = vrot.slane %v14454_v6, 2 }
 0x369   : > { %v4358_v1 = vsel %vm4350_vm0, %v14365_v24, %v4342_v38  ;;  %v14498_v10 = vrot.slane %v12385_v25, 7  ;;  %v4635_v59 = vrot.slane %v12471_v13, 7  ;;  %v4925_v44 = vrot.slane %v12491_v19, 1 }
 0x36a   : > { %10207 = vrot.lane.b32.xlu2 %v10206_v20, %s10295_s24  ;;  %v5904_v20 = vsel %vm5892_vm15, %v5871_v0, %v10105_v12  ;;  %v12551_v40 = vsel %vm14471_vm7, %v14497_v21, %v5210_v32  ;;  %vm4439_vm2 = vcmp.ge.s32.totalorder %v4407_v41, 0  ;;  %v12568_v12 = vsel %vm14500_vm13, %v5210_v32, %v5211_v17  ;;  %v10113_v21 = vpop.permute.xlu1 %10112 }
 0x36b   : > { %v5935_v30 = vpack.c.bf16 %v5904_v20, %v5903_v35  ;;  %v4645_v46 = vsel %vm4639_vm11, %v14498_v10, %v4633_v4  ;;  %v12570_v56 = vsel %vm4439_vm2, %v4358_v1, 0.0  ;;  %v4700_v0 = vadd.s32 4294967295, %v14363_v49  ;;  %v10108_v35 = vpop.permute.xlu0 %10107  ;;  %v14503_v10 = vld [vmem:[#allocation3_spill] sm:$0xff] }
 0x36c   : > { %10197 = vrot.lane.b32.xlu0 %v10196_v33, %s10297_s26  ;;  %v14496_v33 = vrot.slane %v12381_v36, 1  ;;  %v10211_v52 = vpack.i.bf16 %v4644_v53, %v4645_v46  ;;  %v3798_v9 = vand.u32 31, %v12537_v37  ;;  %v5950_v60 = vpack.c.bf16 %v12568_v12, %v12551_v40 }
 0x36d   : > { %v4636_v29 = vrot.slane %v12491_v19, 7  ;;  %v4331_v51 = vrot.slane %v14501_v62, 6  ;;  %v4370_v20 = vsel %vm4350_vm0, %v4329_v42, %v4330_v45  ;;  %vm4427_vm1 = vcmp.ge.s32.totalorder %v4395_v11, 0 }
 0x36e   : > { %10217 = vrot.lane.b32.xlu1 %v10216_v16, %s10296_s25  ;;  %v4933_v3 = vsel %vm4928_vm10, %v14496_v33, %v4923_v54  ;;  %v4926_v54 = vrot.slane %v14499_v50, 1  ;;  %v10231_v4 = vpack.i.bf16 %v12491_v19, %v12471_v13  ;;  %vm4732_vm7 = vcmp.ge.s32.totalorder %v4700_v0, 0 }
 0x36f   : > { %v10221_v28 = vpack.i.bf16 %v5180_v61, %v4933_v3  ;;  %v4643_v61 = vsel %vm4639_vm11, %v4634_v26, %v4635_v59  ;;  %v4927_v32 = vrot.slane %v11569_v27, 1  ;;  %v4992_v53 = vadd.s32 1, %v3798_v9  ;;  %v10118_v3 = vpop.permute.xlu2 %10117 }
 0x370   : > { %6122 = vmatmul.bf16.gmra.mxu1 %v5935_v30  ;;  %v4930_v16 = vsel %vm4928_vm10, %v4925_v44, %v4926_v54  ;;  %v10110_v43 = vunpack.i.h.bf16 %v10108_v35  ;;  %v10109_v41 = vunpack.i.l.bf16 %v10108_v35  ;;  %v4931_v42 = vsel %vm4928_vm10, %v4924_v23, %v4925_v44 }
 0x371   : > { %v4642_v33 = vsel %vm4639_vm11, %v4635_v59, %v4636_v29  ;;  %v10236_v26 = vpack.i.bf16 %v4930_v16, %v4931_v42  ;;  %v4369_v40 = vsel %vm4350_vm0, %v4330_v45, %v4331_v51  ;;  %v4892_v1 = vsel %vm4732_vm7, %v4643_v61, 0.0  ;;  %vm14506_vm7 = vmmov %vm14500_vm13 }
 0x372   : > { %10222 = vrot.lane.b32.xlu2 %v10221_v28, %s10295_s24  ;;  %v4587_v30 = vsel %vm4427_vm1, %v4370_v20, 0.0  ;;  %v14502_v28 = vpack.c.bf16 %v12353_v22, %v12351_v14  ;;  %v10226_v23 = vpack.i.bf16 %v4642_v33, %v4892_v1  ;;  %v14504_v46 = vrot.slane %v14503_v10, 1  ;;  %v10128_v1 = vpop.permute.xlu1 %10127 }
 0x373   : > { %vm5056_vm2 = vcmp.lt.s32.totalorder %v4992_v53, 32  ;;  %v5840_v12 = vsel %vm5826_vm14, %v4369_v40, %v10110_v43  ;;  %v5839_v45 = vsel %vm5826_vm14, %v4587_v30, %v10109_v41  ;;  %v10120_v11 = vunpack.i.h.bf16 %v10118_v3  ;;  %v10123_v33 = vpop.permute.xlu0 %10122 }
 0x374   : > { %10212 = vrot.lane.b32.xlu0 %v10211_v52, %s10297_s26  ;;  %v4960_v52 = vsel %vm4928_vm10, %v4927_v32, %v14504_v46  ;;  %v10119_v59 = vunpack.i.l.bf16 %v10118_v3  ;;  %v10115_v0 = vunpack.i.h.bf16 %v10113_v21  ;;  %v10114_v44 = vunpack.i.l.bf16 %v10113_v21 }
 0x375   : > { %v10246_v14 = vpack.i.bf16 %v11569_v27, %v14499_v50  ;;  %v4929_v22 = vsel %vm4928_vm10, %v4926_v54, %v4927_v32  ;;  %v5184_v62 = vsel %vm5056_vm2, %v4960_v52, 0.0  ;;  %v4637_v35 = vrot.slane %v14499_v50, 7  ;;  %vm14507_vm2 = vmmov %vm14506_vm7 }
 0x376   : > { %10232 = vrot.lane.b32.xlu1 %v10231_v4, %s10296_s25  ;;  %v5872_v20 = vsel %vm5859_vm12, %v5839_v45, %v10114_v44  ;;  %v5873_v4 = vsel %vm5859_vm12, %v5840_v12, %v10115_v0  ;;  %v14505_v53 = vrot.slane %v11569_v27, 7  ;;  %v10251_v41 = vpack.i.bf16 %v5184_v62, %v4929_v22 }
 0x377   : > { %9114 = vmatmul.msk.bf16.gmra.mxu3 %vm5826_vm14, %v14502_v28  ;;  %v5905_v16 = vsel %vm5892_vm15, %v5872_v20, %v10119_v59  ;;  %v5906_v61 = vsel %vm5892_vm15, %v5873_v4, %v10120_v11  ;;  %v4641_v54 = vsel %vm4639_vm11, %v4636_v29, %v4637_v35  ;;  %v4332_v3 = vrot.slane %v11792_v34, 6 }
 0x378   : > { %v4640_v43 = vsel %vm4639_vm11, %v4637_v35, %v14505_v53  ;;  %v5937_v32 = vpack.c.bf16 %v5906_v61, %v5905_v16  ;;  %v10125_v21 = vunpack.i.h.bf16 %v10123_v33  ;;  %v10124_v40 = vunpack.i.l.bf16 %v10123_v33  ;;  %v12669_v35 = vld [vmem:[%s14290_s4] ss:$0 sm:$0xff]  ;;  %v6187_v16 = vpop.f32.mrf.mxu2 }
 0x379   : > { %v10241_v42 = vpack.i.bf16 %v4640_v43, %v4641_v54  ;;  %v4368_v30 = vsel %vm4350_vm0, %v4331_v51, %v4332_v3  ;;  %v14364_v34 = vrot.slane %v12385_v25, 6  ;;  %v10130_v46 = vunpack.i.h.bf16 %v10128_v1  ;;  %v6197_v43 = vpop.f32.mrf.mxu3 }
 0x37a   : > { %10237 = vrot.lane.b32.xlu2 %v10236_v26, %s10295_s24  ;;  %v4333_v26 = vrot.slane %v11976_v58, 6  ;;  %v10129_v52 = vunpack.i.l.bf16 %v10128_v1  ;;  %v5212_v22 = vrot.slane %v12488_v2, 2  ;;  %v5213_v62 = vrot.slane %v12471_v13, 2 }
 0x37b   : > { %v12654_v11 = vsel %vm4350_vm0, %v4342_v38, %v14364_v34  ;;  %v5277_v6 = vadd.s32 2, %v3794_v7 }
 0x37c   : > { %10227 = vrot.lane.b32.xlu0 %v10226_v23, %s10297_s26  ;;  %v4367_v29 = vsel %vm4350_vm0, %v4332_v3, %v4333_v26  ;;  %v5841_v23 = vsel %vm5826_vm14, %v4368_v30, %v10124_v40  ;;  %v5221_v38 = vsel %vm14500_vm13, %v5212_v22, %v5213_v62  ;;  %v5222_v20 = vsel %vm14506_vm7, %v5211_v17, %v5212_v22 }
 0x37d   : > { %v5842_v28 = vsel %vm5826_vm14, %v4367_v29, %v10125_v21  ;;  %v5874_v51 = vsel %vm5859_vm12, %v5841_v23, %v10129_v52  ;;  %vm5341_vm1 = vcmp.lt.s32.totalorder %v5277_v6, 32  ;;  %v5214_v3 = vrot.slane %v12491_v19, 2 }
 0x37e   : > { %10247 = vrot.lane.b32.xlu1 %v10246_v14, %s10296_s25  ;;  %v5875_v59 = vsel %vm5859_vm12, %v5842_v28, %v10130_v46  ;;  %v5469_v4 = vsel %vm5341_vm1, %v5221_v38, 0.0  ;;  %vm6395_vm13 = vcmask 519168   ;;  %vm14508_vm1 = vmmov %vm14507_vm2 }
 0x37f   : > { %v5952_v53 = vpack.c.bf16 %v5469_v4, %v5222_v20  ;;  %v5220_v1 = vsel %vm14508_vm1, %v5213_v62, %v5214_v3  ;;  %vm14510_vm7 = vmmov %vm14508_vm1 }
 0x380   : > { %6127 = vmatmul.bf16.gmra.mxu1 %v5937_v32  ;;  %v6189_v54 = vpop.f32.mrf.mxu2  ;;  %v5215_v32 = vrot.slane %v14499_v50, 2 }
 0x381   : > { %v12686_v46 = vpop.f32.mrf.mxu3 }
 0x382   : > { %10252 = vrot.lane.b32.xlu2 %v10251_v41, %s10295_s24  ;;  %v5219_v17 = vsel %vm14507_vm2, %v5214_v3, %v5215_v32  ;;  %vm14511_vm2 = vmmov %vm14508_vm1 }
 0x383   : > { %v5954_v30 = vpack.c.bf16 %v5219_v17, %v5220_v1  ;;  %v14509_v1 = vrot.slane %v14503_v10, 2 }
 0x384   : > { %10242 = vrot.lane.b32.xlu0 %v10241_v42, %s10297_s26 }
 0x386   : > { %v10133_v12 = vpop.permute.xlu2 %10132 }
 0x387   : > { %9115 = vmatmul.msk.bf16.gmra.mxu3 %vm5826_vm14, %v5950_v60  ;;  %v10135_v45 = vunpack.i.h.bf16 %v10133_v12  ;;  %v10134_v60 = vunpack.i.l.bf16 %v10133_v12 }
 0x389   : > { %v5907_v0 = vsel %vm5892_vm15, %v5874_v51, %v10134_v60  ;;  %v5908_v44 = vsel %vm5892_vm15, %v5875_v59, %v10135_v45  ;;  %v6192_v45 = vpop.f32.mrf.mxu2  ;;  %v12693_v4 = vpop.f32.mrf.mxu3 }
 0x38a   : > { %v5939_v14 = vpack.c.bf16 %v5908_v44, %v5907_v0 }
 0x390   : > { %6132 = vmatmul.bf16.gmra.mxu1 %v5939_v14 }
 0x397   : > { %9116 = vmatmul.msk.bf16.gmra.mxu3 %vm5826_vm14, %v5952_v53 }
 0x399   : > { %v6098_v61 = vpop.f32.mrf.mxu1 }
 0x39a   : > { %v6099_v39 = vadd.f32 %v12669_v35, %v6098_v61 }
 0x39c   : > { %v6188_v7 = vadd.f32 %v6187_v16, %v6099_v39 }
 0x39e   : > { %v6267_v42 = vmax.f32 %v6188_v7, 0.0  ;;  %v5216_v7 = vrot.slane %v11569_v27, 2 }
 0x3a0   : > { %v6331_v21 = vrot.slane %v6267_v42, 4  ;;  %v6396_v28 = vsel %vm6395_vm13, %v6267_v42, -inf  ;;  %v12690_v59 = vpop.permute.xlu2 %10147 }
 0x3a1   : > { %v6100_v41 = vpop.f32.mrf.mxu1  ;;  %v6397_v60 = vrot.slane %v6396_v28, 4  ;;  %v10150_v17 = vunpack.i.h.bf16 %v12690_v59 }
 0x3a2   : > { %v6101_v33 = vadd.f32 %v12669_v35, %v6100_v41  ;;  %v6403_v52 = vsel %vm6395_vm13, %v6331_v21, -inf  ;;  %v6194_v41 = vpop.f32.mrf.mxu2 }
 0x3a3   : > { %v6404_v0 = vrot.slane %v6403_v52, 4  ;;  %v6398_v14 = vmax.f32 %v6396_v28, %v6397_v60 }
 0x3a4   : > { %v6190_v40 = vadd.f32 %v6189_v54, %v6101_v33  ;;  %v5281_v33 = vadd.s32 2, %v3798_v9 }
 0x3a5   : > { %v6405_v38 = vmax.f32 %v6403_v52, %v6404_v0  ;;  %v6399_v61 = vrot.slane %v6398_v14, 2  ;;  %v5218_v52 = vsel %vm14511_vm2, %v5215_v32, %v5216_v7  ;;  %vm14514_vm2 = vcmask 1045509  }
 0x3a6   : > { %v6268_v12 = vmax.f32 %v6190_v40, 0.0  ;;  %vm5345_vm1 = vcmp.lt.s32.totalorder %v5281_v33, 32 }
 0x3a7   : > { %9117 = vmatmul.msk.bf16.gmra.mxu3 %vm5826_vm14, %v5954_v30  ;;  %v6406_v54 = vrot.slane %v6405_v38, 2  ;;  %v6400_v30 = vmax.f32 %v6398_v14, %v6399_v61 }
 0x3a8   : > { %v6410_v44 = vsel %vm6395_vm13, %v6268_v12, -inf  ;;  %v6332_v22 = vrot.slane %v6268_v12, 4  ;;  %v12701_v40 = vpop.permute.xlu2 %10162 }
 0x3a9   : > { %v6103_v29 = vpop.f32.mrf.mxu1  ;;  %v6411_v20 = vrot.slane %v6410_v44, 4  ;;  %v6407_v60 = vmax.f32 %v6405_v38, %v6406_v54  ;;  %v10165_v0 = vunpack.i.h.bf16 %v12701_v40  ;;  %v6401_v32 = vrot.slane %v6400_v30, 1 }
 0x3aa   : > { %v6104_v23 = vadd.f32 %v12669_v35, %v6103_v29  ;;  %v6417_v53 = vsel %vm6395_vm13, %v6332_v22, -inf  ;;  %v5249_v29 = vsel %vm14510_vm7, %v5216_v7, %v14509_v1  ;;  %v10164_v61 = vunpack.i.l.bf16 %v12701_v40 }
 0x3ab   : > { %v6412_v42 = vmax.f32 %v6410_v44, %v6411_v20  ;;  %v6418_v3 = vrot.slane %v6417_v53, 4  ;;  %v5473_v12 = vsel %vm5345_vm1, %v5249_v29, 0.0  ;;  %v4335_v38 = vrot.slane %v12235_v8, 6  ;;  %vm14515_vm1 = vmmov %vm14514_vm2 }
 0x3ac   : > { %v6193_v51 = vadd.f32 %v6192_v45, %v6104_v23  ;;  %v4334_v45 = vrot.slane %v12082_v57, 6  ;;  %v6408_v54 = vrot.slane %v6407_v60, 1 }
 0x3ad   : > { %v6413_v10 = vrot.slane %v6412_v42, 2  ;;  %v6419_v44 = vmax.f32 %v6417_v53, %v6418_v3  ;;  %v14512_v53 = vand.u32 31, %v12184_v63 }
 0x3ae   : > { %v6269_v6 = vmax.f32 %v6193_v51, 0.0  ;;  %v10149_v51 = vunpack.i.l.bf16 %v12690_v59  ;;  %v4365_v63 = vsel %vm4350_vm0, %v4334_v45, %v4335_v38 }
 0x3af   : > { %v6414_v33 = vmax.f32 %v6412_v42, %v6413_v10  ;;  %v6420_v1 = vrot.slane %v6419_v44, 2 }
 0x3b0   : > { %v6333_v39 = vrot.slane %v6269_v6, 4  ;;  %v6424_v28 = vsel %vm6395_vm13, %v6269_v6, -inf }
 0x3b1   : > { %v6105_v62 = vpop.f32.mrf.mxu1  ;;  %v6425_v20 = vrot.slane %v6424_v28, 4  ;;  %v6415_v34 = vrot.slane %v6414_v33, 1 }
 0x3b2   : > { %v6106_v16 = vadd.f32 %v12669_v35, %v6105_v62  ;;  %v6431_v37 = vsel %vm6395_vm13, %v6333_v39, -inf  ;;  %v5956_v62 = vpack.c.bf16 %v5473_v12, %v5218_v52  ;;  %v12716_v39 = vpop.f32.mrf.mxu3 }
 0x3b3   : > { %v10143_v57 = vpop.permute.xlu1 %10142  ;;  %v6426_v52 = vmax.f32 %v6424_v28, %v6425_v20 }
 0x3b4   : > { %v6195_v21 = vadd.f32 %v6194_v41, %v6106_v16  ;;  %v6432_v16 = vrot.slane %v6431_v37, 4  ;;  %v4399_v41 = vadd.s32 4294967294, %v14512_v53 }
 0x3b6   : > { %v6270_v14 = vmax.f32 %v6195_v21, 0.0  ;;  %vm4431_vm7 = vcmp.ge.s32.totalorder %v4399_v41, 0  ;;  %v6409_v41 = vmax.f32 %v6407_v60, %v6408_v54 }
 0x3b7   : > { %9118 = vmatmul.msk.bf16.gmra.mxu3 %vm5826_vm14, %v5956_v62 }
 0x3b8   : > { %v6438_v29 = vsel %vm6395_vm13, %v6270_v14, -inf  ;;  %v6334_v10 = vrot.slane %v6270_v14, 4 }
 0x3b9   : > { %v6108_v23 = vpop.f32.mrf.mxu1  ;;  %v10138_v6 = vpop.permute.xlu0 %10137 }
 0x3ba   : > { %v6109_v9 = vadd.f32 %v12669_v35, %v6108_v23  ;;  %v10140_v3 = vunpack.i.h.bf16 %v10138_v6  ;;  %v10139_v21 = vunpack.i.l.bf16 %v10138_v6  ;;  %v6439_v6 = vrot.slane %v6438_v29, 4  ;;  %v6207_v8 = vpop.f32.mrf.mxu3 }
 0x3bc   : > { %v6198_v22 = vadd.f32 %v6197_v43, %v6109_v9  ;;  %v4366_v43 = vsel %vm4350_vm0, %v4333_v26, %v4334_v45  ;;  %v6433_v9 = vmax.f32 %v6431_v37, %v6432_v16  ;;  %v5844_v28 = vsel %vm5826_vm14, %v4365_v63, %v10140_v3 }
 0x3bd   : > { %v4591_v58 = vsel %vm4431_vm7, %v4366_v43, 0.0  ;;  %v6402_v37 = vmax.f32 %v6400_v30, %v6401_v32  ;;  %v10145_v43 = vunpack.i.h.bf16 %v10143_v57  ;;  %vm14520_vm7 = vmmov %vm14515_vm1 }
 0x3be   : > { %v6271_v7 = vmax.f32 %v6198_v22, 0.0  ;;  %v10144_v22 = vunpack.i.l.bf16 %v10143_v57  ;;  %v5843_v42 = vsel %vm5826_vm14, %v4591_v58, %v10139_v21  ;;  %v6434_v45 = vrot.slane %v6433_v9, 2 }
 0x3bf   : > { %v5877_v14 = vsel %vm5859_vm12, %v5844_v28, %v10145_v43  ;;  %v6440_v21 = vmax.f32 %v6438_v29, %v6439_v6  ;;  %v6445_v58 = vsel %vm6395_vm13, %v6334_v10, -inf }
 0x3c0   : > { %v6335_v23 = vrot.slane %v6271_v7, 4  ;;  %v6452_v20 = vsel %vm6395_vm13, %v6271_v7, -inf  ;;  %v5876_v49 = vsel %vm5859_vm12, %v5843_v42, %v10144_v22  ;;  %v5910_v60 = vsel %vm5892_vm15, %v5877_v14, %v10150_v17 }
 0x3c1   : > { %v6110_v12 = vpop.f32.mrf.mxu1  ;;  %v6453_v3 = vrot.slane %v6452_v20, 4  ;;  %v12747_v29 = vmax.f32 %v6433_v9, %v6434_v45  ;;  %v6441_v42 = vrot.slane %v6440_v21, 2  ;;  %v12752_v17 = vsel %vm4055_vm3, %v6409_v41, %v6402_v37  ;;  %v10158_v45 = vpop.permute.xlu1 %10157 }
 0x3c2   : > { %v6459_v62 = vsel %vm6395_vm13, %v6335_v23, -inf  ;;  %v6111_v26 = vadd.f32 %v12669_v35, %v6110_v12  ;;  %v6421_v23 = vmax.f32 %v6419_v44, %v6420_v1  ;;  %v6427_v12 = vrot.slane %v6426_v52, 2 }
 0x3c3   : > { %v6460_v53 = vrot.slane %v6459_v62, 4  ;;  %v6436_v43 = vrot.slane %v12747_v29, 1  ;;  %v4336_v14 = vrot.slane %v12102_v15, 6  ;;  %v12762_v37 = vmax.f32 %v6440_v21, %v6441_v42 }
 0x3c4   : > { %v6200_v16 = vadd.f32 %v12686_v46, %v6111_v26  ;;  %v5909_v46 = vsel %vm5892_vm15, %v5876_v49, %v10149_v51  ;;  %v6422_v44 = vrot.slane %v6421_v23, 1  ;;  %v12745_v57 = vmax.f32 %v6426_v52, %v6427_v12 }
 0x3c5   : > { %v6461_v30 = vmax.f32 %v6459_v62, %v6460_v53  ;;  %v5941_v22 = vpack.c.bf16 %v5910_v60, %v5909_v46  ;;  %v6446_v26 = vrot.slane %v6445_v58, 4  ;;  %v6454_v49 = vmax.f32 %v6452_v20, %v6453_v3 }
 0x3c6   : > { %v6272_v24 = vmax.f32 %v6200_v16, 0.0  ;;  %v12754_v52 = vmax.f32 %v6414_v33, %v6415_v34  ;;  %v12757_v6 = vmax.f32 %v6421_v23, %v6422_v44  ;;  %v6429_v53 = vrot.slane %v12745_v57, 1 }
 0x3c7   : > { %6137 = vmatmul.bf16.gmra.mxu1 %v5941_v22  ;;  %v6462_v10 = vrot.slane %v6461_v30, 2  ;;  %v6447_v34 = vmax.f32 %v6445_v58, %v6446_v26  ;;  %v6455_v33 = vrot.slane %v6454_v49, 2  ;;  %v10159_v60 = vunpack.i.l.bf16 %v10158_v45 }
 0x3c8   : > { %v6336_v32 = vrot.slane %v6272_v24, 4  ;;  %v6466_v7 = vsel %vm6395_vm13, %v6272_v24, -inf  ;;  %v10153_v24 = vpop.permute.xlu0 %10152 }
 0x3c9   : > { %v6467_v54 = vrot.slane %v6466_v7, 4  ;;  %v10154_v16 = vunpack.i.l.bf16 %v10153_v24  ;;  %v10155_v41 = vunpack.i.h.bf16 %v10153_v24  ;;  %v6463_v3 = vmax.f32 %v6461_v30, %v6462_v10 }
 0x3ca   : > { %v6473_v62 = vsel %vm6395_vm13, %v6336_v32, -inf  ;;  %v4364_v32 = vsel %vm4350_vm0, %v4335_v38, %v4336_v14  ;;  %v6456_v22 = vmax.f32 %v6454_v49, %v6455_v33  ;;  %v10160_v24 = vunpack.i.h.bf16 %v10158_v45 }
 0x3cb   : > { %v6468_v51 = vmax.f32 %v6466_v7, %v6467_v54  ;;  %v6474_v59 = vrot.slane %v6473_v62, 4  ;;  %v5845_v44 = vsel %vm5826_vm14, %v4364_v32, %v10154_v16  ;;  %v14513_v54 = vrot.slane %v11829_v5, 6 }
 0x3cc   : > { %v6443_v45 = vrot.slane %v12762_v37, 1 }
 0x3cd   : > { %v6113_v1 = vpop.f32.mrf.mxu1  ;;  %v6475_v28 = vmax.f32 %v6473_v62, %v6474_v59  ;;  %v6469_v20 = vrot.slane %v6468_v51, 2  ;;  %v4363_v30 = vsel %vm4350_vm0, %v4336_v14, %v14513_v54  ;;  %v6448_v59 = vrot.slane %v6447_v34, 2 }
 0x3ce   : > { %v6114_v63 = vadd.f32 %v12669_v35, %v6113_v1  ;;  %v5846_v62 = vsel %vm5826_vm14, %v4363_v30, %v10155_v41  ;;  %v6457_v14 = vrot.slane %v6456_v22, 1 }
 0x3cf   : > { %v6476_v7 = vrot.slane %v6475_v28, 2  ;;  %v6470_v21 = vmax.f32 %v6468_v51, %v6469_v20  ;;  %v5878_v51 = vsel %vm5859_vm12, %v5845_v44, %v10159_v60 }
 0x3d0   : > { %v6203_v9 = vadd.f32 %v12693_v4, %v6114_v63  ;;  %v6464_v63 = vrot.slane %v6463_v3, 1  ;;  %v5911_v49 = vsel %vm5892_vm15, %v5878_v51, %v10164_v61  ;;  %v6458_v40 = vmax.f32 %v6456_v22, %v6457_v14  ;;  %v10168_v14 = vpop.permute.xlu0 %10167 }
 0x3d1   : > { %v6477_v10 = vmax.f32 %v6475_v28, %v6476_v7  ;;  %v6471_v16 = vrot.slane %v6470_v21, 1 }
 0x3d2   : > { %v6273_v12 = vmax.f32 %v6203_v9, 0.0  ;;  %v6465_v28 = vmax.f32 %v6463_v3, %v6464_v63  ;;  %v6917_v3 = vsel %vm4057_vm4, %v12754_v52, %v12752_v17 }
 0x3d3   : > { %v6478_v32 = vrot.slane %v6477_v10, 1 }
 0x3d4   : > { %v6337_v4 = vrot.slane %v6273_v12, 4  ;;  %v6480_v23 = vsel %vm6395_vm13, %v6273_v12, -inf  ;;  %v5879_v12 = vsel %vm5859_vm12, %v5846_v62, %v10160_v24  ;;  %v6209_v62 = vpop.f32.mrf.mxu3  ;;  %v6923_v63 = vsel %vm4055_vm3, %v6465_v28, %v6458_v40  ;;  %v12797_v24 = vpop.permute.xlu2 %10177 }
 0x3d5   : > { %v6481_v46 = vrot.slane %v6480_v23, 4  ;;  %v6115_v15 = vpop.f32.mrf.mxu1  ;;  %v6479_v22 = vmax.f32 %v6477_v10, %v6478_v32  ;;  %v6918_v10 = vsel %vm4059_vm5, %v12757_v6, %v6917_v3  ;;  %v4340_v3 = vrot.slane %v11901_v31, 6  ;;  %v14517_v31 = vld [vmem:[#allocation13_spill] sm:$0xff] }
 0x3d6   : > { %v6487_v58 = vsel %vm6395_vm13, %v6337_v4, -inf  ;;  %v6116_v1 = vadd.f32 %v12669_v35, %v6115_v15  ;;  %v6472_v15 = vmax.f32 %v6470_v21, %v6471_v16 }
 0x3d7   : > { %v6482_v26 = vmax.f32 %v6480_v23, %v6481_v46  ;;  %v6488_v38 = vrot.slane %v6487_v58, 4 }
 0x3d8   : > { %v6205_v42 = vadd.f32 %v12716_v39, %v6116_v1  ;;  %v5912_v39 = vsel %vm5892_vm15, %v5879_v12, %v10165_v0  ;;  %v6924_v17 = vsel %vm4057_vm4, %v6472_v15, %v6923_v63 }
 0x3d9   : > { %v6483_v5 = vrot.slane %v6482_v26, 2  ;;  %v6489_v9 = vmax.f32 %v6487_v58, %v6488_v38  ;;  %v5943_v44 = vpack.c.bf16 %v5912_v39, %v5911_v49  ;;  %v6449_v38 = vmax.f32 %v6447_v34, %v6448_v59 }
 0x3da   : > { %v6274_v20 = vmax.f32 %v6205_v42, 0.0 }
 0x3db   : > { %v6484_v33 = vmax.f32 %v6482_v26, %v6483_v5  ;;  %v6490_v41 = vrot.slane %v6489_v9, 2  ;;  %6142 = vmatmul.bf16.gmra.mxu1 %v5943_v44  ;;  %v6430_v26 = vmax.f32 %v12745_v57, %v6429_v53  ;;  %v6437_v5 = vmax.f32 %v12747_v29, %v6436_v43 }
 0x3dc   : > { %v6338_v4 = vrot.slane %v6274_v20, 4  ;;  %v6494_v23 = vsel %vm6395_vm13, %v6274_v20, -inf  ;;  %v6444_v57 = vmax.f32 %v12762_v37, %v6443_v45  ;;  %v6450_v20 = vrot.slane %v6449_v38, 1 }
 0x3dd   : > { %v6491_v7 = vmax.f32 %v6489_v9, %v6490_v41  ;;  %v6495_v46 = vrot.slane %v6494_v23, 4  ;;  %v6118_v60 = vpop.f32.mrf.mxu1  ;;  %v6485_v61 = vrot.slane %v6484_v33, 1  ;;  %v6919_v43 = vsel %vm4061_vm6, %v6430_v26, %v6918_v10 }
 0x3de   : > { %v6501_v58 = vsel %vm6395_vm13, %v6338_v4, -inf  ;;  %v6119_v54 = vadd.f32 %v12669_v35, %v6118_v60  ;;  %v6451_v6 = vmax.f32 %v6449_v38, %v6450_v20  ;;  %v10173_v60 = vpop.permute.xlu1 %10172  ;;  %v10169_v44 = vunpack.i.l.bf16 %v10168_v14 }
 0x3df   : > { %v6492_v30 = vrot.slane %v6491_v7, 1  ;;  %v6496_v0 = vmax.f32 %v6494_v23, %v6495_v46  ;;  %v6502_v1 = vrot.slane %v6501_v58, 4  ;;  %v6486_v52 = vmax.f32 %v6484_v33, %v6485_v61  ;;  %v6212_v46 = vpop.f32.mrf.mxu3 }
 0x3e0   : > { %v6208_v21 = vadd.f32 %v6207_v8, %v6119_v54  ;;  %v6925_v33 = vsel %vm4059_vm5, %v6479_v22, %v6924_v17  ;;  %v10170_v54 = vunpack.i.h.bf16 %v10168_v14  ;;  %v10174_v22 = vunpack.i.l.bf16 %v10173_v60 }
 0x3e1   : > { %v6497_v42 = vrot.slane %v6496_v0, 2  ;;  %v6503_v51 = vmax.f32 %v6501_v58, %v6502_v1  ;;  %v6493_v53 = vmax.f32 %v6491_v7, %v6492_v30  ;;  %v6926_v39 = vsel %vm4061_vm6, %v6486_v52, %v6925_v33  ;;  %v12816_v1 = vpop.permute.xlu2 %10192 }
 0x3e2   : > { %v6275_v9 = vmax.f32 %v6208_v21, 0.0  ;;  %v6920_v7 = vsel %vm14514_vm2, %v6437_v5, %v6919_v43 }
 0x3e3   : > { %v6498_v34 = vmax.f32 %v6496_v0, %v6497_v42  ;;  %v6504_v8 = vrot.slane %v6503_v51, 2  ;;  %v6921_v61 = vsel %vm4065_vm8, %v6444_v57, %v6920_v7  ;;  %v6927_v58 = vsel %vm14515_vm1, %v6493_v53, %v6926_v39  ;;  %v14516_v42 = vld [vmem:[#allocation29_spill] sm:$0xff] }
 0x3e4   : > { %v6339_v59 = vrot.slane %v6275_v9, 4  ;;  %v6508_v16 = vsel %vm6395_vm13, %v6275_v9, -inf  ;;  %v12824_v63 = vsel %vm4067_vm9, %v6451_v6, %v6921_v61  ;;  %v5848_v9 = vsel %vm5826_vm14, %v14517_v31, %v10170_v54  ;;  %v9852_v7 = vld [vmem:[%s14291_s5 + $0x58] sm:$0xff] }
 0x3e5   : > { %v6499_v12 = vrot.slane %v6498_v34, 1  ;;  %v6505_v49 = vmax.f32 %v6503_v51, %v6504_v8  ;;  %v6120_v29 = vpop.f32.mrf.mxu1  ;;  %v6509_v23 = vrot.slane %v6508_v16, 4  ;;  %v5847_v51 = vsel %vm5826_vm14, %v14516_v42, %v10169_v44  ;;  %7309 = vmatpush.bf16.msrb.mxu3 %v9852_v7 }
 0x3e6   : > { %v6515_v37 = vsel %vm6395_vm13, %v6339_v59, -inf  ;;  %v6121_v41 = vadd.f32 %v12669_v35, %v6120_v29  ;;  %v10180_v8 = vunpack.i.h.bf16 %v12797_v24  ;;  %v10175_v59 = vunpack.i.h.bf16 %v10173_v60 }
 0x3e7   : > { %v6500_v45 = vmax.f32 %v6498_v34, %v6499_v12  ;;  %v6516_v28 = vrot.slane %v6515_v37, 4  ;;  %v6506_v4 = vrot.slane %v6505_v49, 1  ;;  %v6510_v38 = vmax.f32 %v6508_v16, %v6509_v23  ;;  %v12835_v16 = vpop.permute.xlu0 %10182  ;;  %v12843_v23 = vpop.permute.xlu1 %10187 }
 0x3e8   : > { %v6210_v32 = vadd.f32 %v6209_v62, %v6121_v41  ;;  %v10179_v12 = vunpack.i.l.bf16 %v12797_v24  ;;  %v5880_v29 = vsel %vm5859_vm12, %v5847_v51, %v10174_v22  ;;  %v14518_v60 = vrot.slane %v11782_v47, 6 }
 0x3e9   : > { %v6507_v15 = vmax.f32 %v6505_v49, %v6506_v4  ;;  %v6517_v40 = vmax.f32 %v6515_v37, %v6516_v28  ;;  %v6928_v0 = vsel %vm4065_vm8, %v6500_v45, %v6927_v58  ;;  %v6511_v49 = vrot.slane %v6510_v38, 2  ;;  %v6214_v4 = vpop.f32.mrf.mxu3 }
 0x3ea   : > { %v6276_v30 = vmax.f32 %v6210_v32, 0.0  ;;  %v5881_v37 = vsel %vm5859_vm12, %v5848_v9, %v10175_v59  ;;  %v5913_v45 = vsel %vm5892_vm15, %v5880_v29, %v10179_v12  ;;  %v4360_v44 = vsel %vm4350_vm0, %v14518_v60, %v4340_v3 }
 0x3eb   : > { %v12820_v26 = vsel %vm4067_vm9, %v6507_v15, %v6928_v0  ;;  %v6518_v57 = vrot.slane %v6517_v40, 2  ;;  %v5914_v28 = vsel %vm5892_vm15, %v5881_v37, %v10180_v8  ;;  %v10195_v58 = vunpack.i.h.bf16 %v12816_v1 }
 0x3ec   : > { %v6340_v21 = vrot.slane %v6276_v30, 4  ;;  %v6522_v62 = vsel %vm6395_vm13, %v6276_v30, -inf  ;;  %v10256_v52 = vpack.i.bf16 %v12820_v26, %v12824_v63  ;;  %v5945_v24 = vpack.c.bf16 %v5914_v28, %v5913_v45  ;;  %v9850_v45 = vld [vmem:[%s14291_s5 + $0x48] sm:$0xff] }
 0x3ed   : > { %v6523_v5 = vrot.slane %v6522_v62, 4  ;;  %v6123_v17 = vpop.f32.mrf.mxu1  ;;  %v6519_v41 = vmax.f32 %v6517_v40, %v6518_v57  ;;  %v10194_v54 = vunpack.i.l.bf16 %v12816_v1  ;;  %v12855_v40 = vpop.permute.xlu2 %10207  ;;  %v14519_v30 = vrot.slane %v12222_v55, 6 }
 0x3ee   : > { %v6529_v53 = vsel %vm6395_vm13, %v6340_v21, -inf  ;;  %v6124_v34 = vadd.f32 %v12669_v35, %v6123_v17  ;;  %10257 = vrot.lane.b32.xlu0 %v10256_v52, %s10296_s25  ;;  %6147 = vmatmul.bf16.gmra.mxu1 %v5945_v24  ;;  %v10184_v51 = vunpack.i.l.bf16 %v12835_v16  ;;  %v10210_v55 = vunpack.i.h.bf16 %v12855_v40 }
 0x3ef   : > { %v6524_v20 = vmax.f32 %v6522_v62, %v6523_v5  ;;  %v6530_v10 = vrot.slane %v6529_v53, 4  ;;  %v4359_v0 = vsel %vm4350_vm0, %v4340_v3, %v14519_v30  ;;  %v6520_v21 = vrot.slane %v6519_v41, 1 }
 0x3f0   : > { %v6213_v14 = vadd.f32 %v6212_v46, %v6124_v34  ;;  %v6512_v46 = vmax.f32 %v6510_v38, %v6511_v49  ;;  %v10209_v31 = vunpack.i.l.bf16 %v12855_v40  ;;  %v10190_v57 = vunpack.i.h.bf16 %v12843_v23  ;;  %v10198_v34 = vpop.permute.xlu0 %10197 }
 0x3f1   : > { %v6525_v43 = vrot.slane %v6524_v20, 2  ;;  %v6531_v33 = vmax.f32 %v6529_v53, %v6530_v10  ;;  %v10189_v53 = vunpack.i.l.bf16 %v12843_v23  ;;  %v6521_v10 = vmax.f32 %v6519_v41, %v6520_v21  ;;  %v6217_v29 = vpop.f32.mrf.mxu3 }
 0x3f2   : > { %v6277_v39 = vmax.f32 %v6213_v14, 0.0  ;;  %v6513_v3 = vrot.slane %v6512_v46, 1  ;;  %v10185_v12 = vunpack.i.h.bf16 %v12835_v16  ;;  %v10199_v16 = vunpack.i.l.bf16 %v10198_v34 }
 0x3f3   : > { %v6526_v32 = vmax.f32 %v6524_v20, %v6525_v43  ;;  %v6532_v6 = vrot.slane %v6531_v33, 2  ;;  %v9851_v20 = vld [vmem:[%s14291_s5 + $0x50] sm:$0xff]  ;;  %v5849_v43 = vsel %vm5826_vm14, %v4360_v44, %v10184_v51 }
 0x3f4   : > { %v6341_v15 = vrot.slane %v6277_v39, 4  ;;  %v6536_v61 = vsel %vm6395_vm13, %v6277_v39, -inf  ;;  %7310 = vmatpush.bf16.msrb.mxu3 %v9851_v20  ;;  %v6514_v28 = vmax.f32 %v6512_v46, %v6513_v3  ;;  %v5882_v20 = vsel %vm5859_vm12, %v5849_v43, %v10189_v53 }
 0x3f5   : > { %v6537_v38 = vrot.slane %v6536_v61, 4  ;;  %v6125_v47 = vpop.f32.mrf.mxu1  ;;  %v6533_v62 = vmax.f32 %v6531_v33, %v6532_v6  ;;  %v6527_v5 = vrot.slane %v6526_v32, 1  ;;  %v10203_v6 = vpop.permute.xlu1 %10202 }
 0x3f6   : > { %v6543_v22 = vsel %vm6395_vm13, %v6341_v15, -inf  ;;  %v6126_v42 = vadd.f32 %v12669_v35, %v6125_v47  ;;  %v10205_v51 = vunpack.i.h.bf16 %v10203_v6 }
 0x3f7   : > { %v6538_v17 = vmax.f32 %v6536_v61, %v6537_v38  ;;  %v6544_v52 = vrot.slane %v6543_v22, 4  ;;  %v6534_v49 = vrot.slane %v6533_v62, 1  ;;  %v6528_v33 = vmax.f32 %v6526_v32, %v6527_v5 }
 0x3f8   : > { %v6215_v9 = vadd.f32 %v6214_v4, %v6126_v42  ;;  %v10200_v4 = vunpack.i.h.bf16 %v10198_v34  ;;  %v6930_v32 = vsel %vm4055_vm3, %v6521_v10, %v6514_v28  ;;  %7311 = vmatpush.bf16.msrb.mxu3 %v9850_v45  ;;  %v5850_v42 = vsel %vm5826_vm14, %v4359_v0, %v10185_v12 }
 0x3f9   : > { %v6539_v8 = vrot.slane %v6538_v17, 2  ;;  %v6545_v59 = vmax.f32 %v6543_v22, %v6544_v52  ;;  %v6535_v44 = vmax.f32 %v6533_v62, %v6534_v49  ;;  %v6931_v38 = vsel %vm4057_vm4, %v6528_v33, %v6930_v32  ;;  %v9849_v22 = vld [vmem:[%s14291_s5 + $0x40] sm:$0xff]  ;;  %v6219_v33 = vpop.f32.mrf.mxu3 }
 0x3fa   : > { %v6278_v14 = vmax.f32 %v6215_v9, 0.0  ;;  %v10204_v62 = vunpack.i.l.bf16 %v10203_v6  ;;  %v5852_v52 = vsel %vm5826_vm14, %v12654_v11, %v10200_v4  ;;  %v5851_v34 = vsel %vm5826_vm14, %v12570_v56, %v10199_v16 }
 0x3fb   : > { %v6540_v37 = vmax.f32 %v6538_v17, %v6539_v8  ;;  %v6546_v39 = vrot.slane %v6545_v59, 2  ;;  %v6932_v8 = vsel %vm4059_vm5, %v6535_v44, %v6931_v38  ;;  %v5883_v12 = vsel %vm5859_vm12, %v5850_v42, %v10190_v57 }
 0x3fc   : > { %v6342_v23 = vrot.slane %v6278_v14, 4  ;;  %v6550_v41 = vsel %vm6395_vm13, %v6278_v14, -inf  ;;  %7312 = vmatpush.bf16.msrb.mxu3 %v9849_v22  ;;  %v5915_v11 = vsel %vm5892_vm15, %v5882_v20, %v10194_v54  ;;  %v5916_v56 = vsel %vm5892_vm15, %v5883_v12, %v10195_v58 }
 0x3fd   : > { %v6541_v24 = vrot.slane %v6540_v37, 1  ;;  %v6547_v7 = vmax.f32 %v6545_v59, %v6546_v39  ;;  %v6551_v60 = vrot.slane %v6550_v41, 4  ;;  %v6128_v15 = vpop.f32.mrf.mxu1  ;;  %v5947_v39 = vpack.c.bf16 %v5916_v56, %v5915_v11 }
 0x3fe   : > { %v6557_v61 = vsel %vm6395_vm13, %v6342_v23, -inf  ;;  %v6129_v30 = vadd.f32 %v12669_v35, %v6128_v15  ;;  %v5884_v4 = vsel %vm5859_vm12, %v5851_v34, %v10204_v62  ;;  %v5885_v23 = vsel %vm5859_vm12, %v5852_v52, %v10205_v51 }
 0x3ff   : > { %v6548_v46 = vrot.slane %v6547_v7, 1  ;;  %v6552_v47 = vmax.f32 %v6550_v41, %v6551_v60  ;;  %v6558_v21 = vrot.slane %v6557_v61, 4  ;;  %v6542_v5 = vmax.f32 %v6540_v37, %v6541_v24  ;;  %6152 = vmatmul.bf16.gmra.mxu1 %v5947_v39 }
 0x400   : > { %v6218_v17 = vadd.f32 %v6217_v29, %v6129_v30  ;;  %v5917_v16 = vsel %vm5892_vm15, %v5884_v4, %v10209_v31  ;;  %v5918_v24 = vsel %vm5892_vm15, %v5885_v23, %v10210_v55  ;;  %v7053_v60 = vrot.slane %v12820_v26, 1 }
 0x401   : > { %v6553_v3 = vrot.slane %v6552_v47, 2  ;;  %v6559_v9 = vmax.f32 %v6557_v61, %v6558_v21  ;;  %v6549_v10 = vmax.f32 %v6547_v7, %v6548_v46  ;;  %v6933_v14 = vsel %vm4061_vm6, %v6542_v5, %v6932_v8  ;;  %v6222_v51 = vpop.f32.mrf.mxu3 }
 0x402   : > { %v6279_v59 = vmax.f32 %v6218_v17, 0.0  ;;  %v12912_v7 = vadd.s32 8, %v10710_v18  ;;  %v5949_v30 = vpack.c.bf16 %v5918_v24, %v5917_v16  ;;  %v6844_v38 = vand.u32 7, %v10710_v18 }
 0x403   : > { %v6554_v49 = vmax.f32 %v6552_v47, %v6553_v3  ;;  %v6560_v0 = vrot.slane %v6559_v9, 2  ;;  %v6934_v54 = vsel %vm14520_vm7, %v6549_v10, %v6933_v14  ;;  %v7052_v46 = vrot.slane %v12824_v63, 1 }
 0x404   : > { %v6343_v29 = vrot.slane %v6279_v59, 4  ;;  %v6564_v43 = vsel %vm6395_vm13, %v6279_v59, -inf  ;;  %v6845_v55 = vand.u32 7, %v12912_v7  ;;  %v7068_v42 = vadd.s32 1, %v6844_v38 }
 0x405   : > { %v6555_v37 = vrot.slane %v6554_v49, 1  ;;  %v6561_v53 = vmax.f32 %v6559_v9, %v6560_v0  ;;  %v6130_v45 = vpop.f32.mrf.mxu1  ;;  %v6565_v44 = vrot.slane %v6564_v43, 4  ;;  %v7066_v5 = vsel %vm4928_vm10, %v7052_v46, %v7053_v60 }
 0x406   : > { %v6571_v57 = vsel %vm6395_vm13, %v6343_v29, -inf  ;;  %v6131_v28 = vadd.f32 %v12669_v35, %v6130_v45  ;;  %v7069_v52 = vadd.s32 1, %v6845_v55  ;;  %vm7084_vm2 = vcmp.lt.s32.totalorder %v7068_v42, 8 }
 0x407   : > { %v6556_v1 = vmax.f32 %v6554_v49, %v6555_v37  ;;  %v6562_v41 = vrot.slane %v6561_v53, 1  ;;  %v6572_v58 = vrot.slane %v6571_v57, 4  ;;  %v6566_v17 = vmax.f32 %v6564_v43, %v6565_v44 }
 0x408   : > { %v6220_v6 = vadd.f32 %v6219_v33, %v6131_v28  ;;  %vm7085_vm1 = vcmp.lt.s32.totalorder %v7069_v52, 8  ;;  %v7116_v14 = vsel %vm7084_vm2, %v7066_v5, 0.0  ;;  %v4344_v37 = vrot.slane %v12381_v36, 6  ;;  %v10218_v36 = vpop.permute.xlu1 %10217  ;;  %v10223_v52 = vpop.permute.xlu2 %10222 }
 0x409   : > { %v6563_v15 = vmax.f32 %v6561_v53, %v6562_v41  ;;  %v6935_v32 = vsel %vm4065_vm8, %v6556_v1, %v6934_v54  ;;  %v6573_v40 = vmax.f32 %v6571_v57, %v6572_v58  ;;  %v6567_v11 = vrot.slane %v6566_v17, 2  ;;  %v10213_v53 = vpop.permute.xlu0 %10212 }
 0x40a   : > { %v6280_v61 = vmax.f32 %v6220_v6, 0.0  ;;  %v4345_v28 = vrot.slane %v12488_v2, 6  ;;  %v6224_v6 = vpop.f32.mrf.mxu3  ;;  %v10215_v16 = vunpack.i.h.bf16 %v10213_v53  ;;  %v10214_v24 = vunpack.i.l.bf16 %v10213_v53 }
 0x40b   : > { %v12919_v31 = vsel %vm4067_vm9, %v6563_v15, %v6935_v32  ;;  %v6574_v10 = vrot.slane %v6573_v40, 2  ;;  %v6568_v1 = vmax.f32 %v6566_v17, %v6567_v11  ;;  %v14521_v32 = vrot.slane %v12385_v25, 6 }
 0x40c   : > { %v6344_v47 = vrot.slane %v6280_v61, 4  ;;  %v6578_v21 = vsel %vm6395_vm13, %v6280_v61, -inf  ;;  %v7054_v22 = vrot.slane %v12919_v31, 1  ;;  %v10220_v5 = vunpack.i.h.bf16 %v10218_v36 }
 0x40d   : > { %v6579_v62 = vrot.slane %v6578_v21, 4  ;;  %v6133_v3 = vpop.f32.mrf.mxu1  ;;  %v6575_v43 = vmax.f32 %v6573_v40, %v6574_v10  ;;  %v4356_v44 = vsel %vm4350_vm0, %v14521_v32, %v4344_v37  ;;  %v6569_v17 = vrot.slane %v6568_v1, 1 }
 0x40e   : > { %v6585_v9 = vsel %vm6395_vm13, %v6344_v47, -inf  ;;  %v7065_v34 = vsel %vm4928_vm10, %v7053_v60, %v7054_v22  ;;  %v6134_v8 = vadd.f32 %v12669_v35, %v6133_v3  ;;  %v5853_v3 = vsel %vm5826_vm14, %v4356_v44, %v10214_v24 }
 0x40f   : > { %v6580_v59 = vmax.f32 %v6578_v21, %v6579_v62  ;;  %v6586_v20 = vrot.slane %v6585_v9, 4  ;;  %v7117_v29 = vsel %vm7085_vm1, %v7065_v34, 0.0  ;;  %6157 = vmatmul.bf16.gmra.mxu1 %v5949_v30  ;;  %v6576_v61 = vrot.slane %v6575_v43, 1 }
 0x410   : > { %v6223_v49 = vadd.f32 %v6222_v51, %v6134_v8  ;;  %v7157_v56 = vpack.c.bf16 %v7117_v29, %v7116_v14  ;;  %v10219_v30 = vunpack.i.l.bf16 %v10218_v36  ;;  %v10225_v29 = vunpack.i.h.bf16 %v10223_v52 }
 0x411   : > { %v6581_v0 = vrot.slane %v6580_v59, 2  ;;  %v6587_v12 = vmax.f32 %v6585_v9, %v6586_v20  ;;  %v6577_v8 = vmax.f32 %v6575_v43, %v6576_v61  ;;  %v6570_v11 = vmax.f32 %v6568_v1, %v6569_v17  ;;  %v10228_v61 = vpop.permute.xlu0 %10227 }
 0x412   : > { %v6281_v33 = vmax.f32 %v6223_v49, 0.0  ;;  %9167 = vmatmul.msk.bf16.vlgmr.msrb.gmra.mxu3 %vm5859_vm12, %v7157_v56  ;;  %v5886_v53 = vsel %vm5859_vm12, %v5853_v3, %v10219_v30  ;;  %v4346_v36 = vrot.slane %v12471_v13, 6  ;;  %v10229_v30 = vunpack.i.l.bf16 %v10228_v61 }
 0x413   : > { %v6588_v39 = vrot.slane %v6587_v12, 2  ;;  %v6582_v4 = vmax.f32 %v6580_v59, %v6581_v0  ;;  %v6937_v43 = vsel %vm4055_vm3, %v6577_v8, %v6570_v11  ;;  %vm14523_vm2 = vcmask 1045509   ;;  %v10238_v8 = vpop.permute.xlu2 %10237 }
 0x414   : > { %v6345_v45 = vrot.slane %v6281_v33, 4  ;;  %v6592_v57 = vsel %vm6395_vm13, %v6281_v33, -inf  ;;  %v4354_v13 = vsel %vm4350_vm0, %v4345_v28, %v4346_v36  ;;  %vm14527_vm1 = vmmov %vm14523_vm2 }
 0x415   : > { %v6593_v23 = vrot.slane %v6592_v57, 4  ;;  %v6135_v54 = vpop.f32.mrf.mxu1  ;;  %v6589_v40 = vmax.f32 %v6587_v12, %v6588_v39  ;;  %v6583_v21 = vrot.slane %v6582_v4, 1 }
 0x416   : > { %v6599_v41 = vsel %vm6395_vm13, %v6345_v45, -inf  ;;  %v6136_v58 = vadd.f32 %v12669_v35, %v6135_v54  ;;  %v4355_v35 = vsel %vm4350_vm0, %v4344_v37, %v4345_v28  ;;  %v10224_v45 = vunpack.i.l.bf16 %v10223_v52 }
 0x417   : > { %v6594_v60 = vmax.f32 %v6592_v57, %v6593_v23  ;;  %v6600_v15 = vrot.slane %v6599_v41, 4  ;;  %v5854_v25 = vsel %vm5826_vm14, %v4355_v35, %v10215_v16  ;;  %v6590_v59 = vrot.slane %v6589_v40, 1 }
 0x418   : > { %v6225_v47 = vadd.f32 %v6224_v6, %v6136_v58  ;;  %v6584_v49 = vmax.f32 %v6582_v4, %v6583_v21  ;;  %v5887_v39 = vsel %vm5859_vm12, %v5854_v25, %v10220_v5  ;;  %v5919_v1 = vsel %vm5892_vm15, %v5886_v53, %v10224_v45  ;;  %v10233_v25 = vpop.permute.xlu1 %10232 }
 0x419   : > { %v6595_v42 = vrot.slane %v6594_v60, 2  ;;  %v6601_v51 = vmax.f32 %v6599_v41, %v6600_v15  ;;  %v6591_v57 = vmax.f32 %v6589_v40, %v6590_v59  ;;  %v5920_v6 = vsel %vm5892_vm15, %v5887_v39, %v10225_v29  ;;  %v10243_v11 = vpop.permute.xlu0 %10242 }
 0x41a   : > { %v6282_v62 = vmax.f32 %v6225_v47, 0.0  ;;  %v6938_v4 = vsel %vm4057_vm4, %v6584_v49, %v6937_v43  ;;  %v5951_v35 = vpack.c.bf16 %v5920_v6, %v5919_v1  ;;  %v10230_v5 = vunpack.i.h.bf16 %v10228_v61  ;;  %v13004_v61 = vld [vmem:[%s14290_s4] ss:$0 sm:$0xff] }
 0x41b   : > { %v6596_v9 = vmax.f32 %v6594_v60, %v6595_v42  ;;  %v6602_v34 = vrot.slane %v6601_v51, 2  ;;  %v14522_v60 = vand.u32 31, %v12516_v48  ;;  %v6939_v44 = vsel %vm4059_vm5, %v6591_v57, %v6938_v4 }
 0x41c   : > { %v6346_v20 = vrot.slane %v6282_v62, 4  ;;  %v6606_v10 = vsel %vm6395_vm13, %v6282_v62, -inf  ;;  %v4347_v42 = vrot.slane %v12491_v19, 6  ;;  %v10235_v59 = vunpack.i.h.bf16 %v10233_v25 }
 0x41d   : > { %v6597_v0 = vrot.slane %v6596_v9, 1  ;;  %v6603_v12 = vmax.f32 %v6601_v51, %v6602_v34  ;;  %v6607_v14 = vrot.slane %v6606_v10, 4  ;;  %v4411_v15 = vadd.s32 4294967294, %v14522_v60 }
 0x41e   : > { %v6613_v56 = vsel %vm6395_vm13, %v6346_v20, -inf  ;;  %v4353_v19 = vsel %vm4350_vm0, %v4346_v36, %v4347_v42  ;;  %v10234_v20 = vunpack.i.l.bf16 %v10233_v25  ;;  %v10245_v53 = vunpack.i.h.bf16 %v10243_v11 }
 0x41f   : > { %v6608_v33 = vmax.f32 %v6606_v10, %v6607_v14  ;;  %v6614_v37 = vrot.slane %v6613_v56, 4  ;;  %v6604_v23 = vrot.slane %v6603_v12, 1  ;;  %v6598_v54 = vmax.f32 %v6596_v9, %v6597_v0  ;;  %6162 = vmatmul.bf16.gmra.mxu1 %v5951_v35 }
 0x420   : > { %vm4443_vm7 = vcmp.ge.s32.totalorder %v4411_v15, 0  ;;  %v5856_v28 = vsel %vm5826_vm14, %v4353_v19, %v10230_v5  ;;  %v10240_v0 = vunpack.i.h.bf16 %v10238_v8  ;;  %v10244_v39 = vunpack.i.l.bf16 %v10243_v11  ;;  %v10248_v45 = vpop.permute.xlu1 %10247  ;;  %v9848_v19 = vld [vmem:[%s14291_s5 + $0x38] sm:$0xff] }
 0x421   : > { %v6609_v41 = vrot.slane %v6608_v33, 2  ;;  %v6615_v58 = vmax.f32 %v6613_v56, %v6614_v37  ;;  %v6605_v32 = vmax.f32 %v6603_v12, %v6604_v23  ;;  %v6940_v21 = vsel %vm4061_vm6, %v6598_v54, %v6939_v44  ;;  %v6227_v37 = vpop.f32.mrf.mxu3  ;;  %7276 = vmatpush.bf16.msra.mxu1 %v9848_v19 }
 0x422   : > { %v4603_v3 = vsel %vm4443_vm7, %v4354_v13, 0.0  ;;  %v5889_v49 = vsel %vm5859_vm12, %v5856_v28, %v10235_v59  ;;  %v10239_v12 = vunpack.i.l.bf16 %v10238_v8  ;;  %v14524_v43 = vrot.slane %v11569_v27, 6  ;;  %vm14529_vm7 = vmmov %vm14527_vm1 }
 0x423   : > { %v6610_v16 = vmax.f32 %v6608_v33, %v6609_v41  ;;  %v6616_v24 = vrot.slane %v6615_v58, 2  ;;  %v6941_v17 = vsel %vm14523_vm2, %v6605_v32, %v6940_v21  ;;  %v5855_v9 = vsel %vm5826_vm14, %v4603_v3, %v10229_v30  ;;  %v10253_v41 = vpop.permute.xlu2 %10252 }
 0x424   : > { %v5888_v10 = vsel %vm5859_vm12, %v5855_v9, %v10234_v20  ;;  %v5922_v29 = vsel %vm5892_vm15, %v5889_v49, %v10240_v0  ;;  %v4348_v33 = vrot.slane %v14499_v50, 6  ;;  %v10249_v50 = vunpack.i.l.bf16 %v10248_v45 }
 0x425   : > { %v6611_v40 = vrot.slane %v6610_v16, 1  ;;  %v6617_v47 = vmax.f32 %v6615_v58, %v6616_v24  ;;  %v5921_v14 = vsel %vm5892_vm15, %v5888_v10, %v10239_v12  ;;  %v10250_v58 = vunpack.i.h.bf16 %v10248_v45 }
 0x426   : > { %v5953_v56 = vpack.c.bf16 %v5922_v29, %v5921_v14  ;;  %v4351_v57 = vsel %vm4350_vm0, %v4348_v33, %v14524_v43  ;;  %v4352_v23 = vsel %vm4350_vm0, %v4347_v42, %v4348_v33  ;;  %v10255_v36 = vunpack.i.h.bf16 %v10253_v41 }
 0x427   : > { %v6612_v51 = vmax.f32 %v6610_v16, %v6611_v40  ;;  %v6618_v48 = vrot.slane %v6617_v47, 1  ;;  %v5858_v4 = vsel %vm5826_vm14, %v4351_v57, %v10245_v53  ;;  %v5857_v54 = vsel %vm5826_vm14, %v4352_v23, %v10244_v39  ;;  %vm14525_vm14 = vmmov %vm14523_vm2 }
 0x428   : > { %v5890_v1 = vsel %vm5859_vm12, %v5857_v54, %v10249_v50  ;;  %v5891_v6 = vsel %vm5859_vm12, %v5858_v4, %v10250_v58  ;;  %v10254_v16 = vunpack.i.l.bf16 %v10253_v41  ;;  %v6980_v21 = vrot.slane %v12824_v63, 7 }
 0x429   : > { %v6619_v62 = vmax.f32 %v6617_v47, %v6618_v48  ;;  %v6942_v52 = vsel %vm4065_vm8, %v6612_v51, %v6941_v17  ;;  %v6229_v27 = vpop.f32.mrf.mxu3  ;;  %v5924_v60 = vsel %vm5892_vm15, %v5891_v6, %v10255_v36  ;;  %v6981_v47 = vrot.slane %v12820_v26, 7 }
 0x42a   : > { %v5923_v24 = vsel %vm5892_vm15, %v5890_v1, %v10254_v16 }
 0x42b   : > { %v12977_v2 = vsel %vm4067_vm9, %v6619_v62, %v6942_v52  ;;  %v5955_v15 = vpack.c.bf16 %v5924_v60, %v5923_v24  ;;  %v13015_v13 = vsel %vm4639_vm11, %v6980_v21, %v6981_v47 }
 0x42c   : > { %v10261_v34 = vpack.i.bf16 %v12977_v2, %v12919_v31 }
 0x42e   : > { %10262 = vrot.lane.b32.xlu1 %v10261_v34, %s10296_s25 }
 0x42f   : > { %6167 = vmatmul.bf16.gmra.mxu1 %v5953_v56 }
 0x431   : > { %v6232_v32 = vpop.f32.mrf.mxu3 }
 0x439   : > { %v6234_v17 = vpop.f32.mrf.mxu3 }
 0x43f   : > { %6172 = vmatmul.bf16.gmra.mxu1 %v5955_v15 }
 0x441   : > { %v6237_v56 = vpop.f32.mrf.mxu3 }
 0x444   : > { %v6138_v44 = vpop.f32.mrf.mxu1 }
 0x445   : > { %v6139_v40 = vadd.f32 %v13004_v61, %v6138_v44 }
 0x447   : > { %v6228_v35 = vadd.f32 %v6227_v37, %v6139_v40 }
 0x449   : > { %v6283_v42 = vmax.f32 %v6228_v35, 0.0  ;;  %v6239_v35 = vpop.f32.mrf.mxu3 }
 0x44b   : > { %v6347_v51 = vrot.slane %v6283_v42, 4  ;;  %v6620_v62 = vsel %vm6395_vm13, %v6283_v42, -inf }
 0x44c   : > { %v6140_v48 = vpop.f32.mrf.mxu1  ;;  %v6621_v3 = vrot.slane %v6620_v62, 4 }
 0x44d   : > { %v6627_v5 = vsel %vm6395_vm13, %v6347_v51, -inf  ;;  %v6141_v30 = vadd.f32 %v13004_v61, %v6140_v48 }
 0x44e   : > { %v6628_v52 = vrot.slane %v6627_v5, 4  ;;  %v6622_v10 = vmax.f32 %v6620_v62, %v6621_v3 }
 0x44f   : > { %v6230_v25 = vadd.f32 %v6229_v27, %v6141_v30 }
 0x450   : > { %v6629_v9 = vmax.f32 %v6627_v5, %v6628_v52  ;;  %v6623_v53 = vrot.slane %v6622_v10, 2 }
 0x451   : > { %v6284_v28 = vmax.f32 %v6230_v25, 0.0 }
 0x452   : > { %v6630_v29 = vrot.slane %v6629_v9, 2  ;;  %v6624_v58 = vmax.f32 %v6622_v10, %v6623_v53 }
 0x453   : > { %v6348_v34 = vrot.slane %v6284_v28, 4  ;;  %v6634_v8 = vsel %vm6395_vm13, %v6284_v28, -inf }
 0x454   : > { %v6635_v59 = vrot.slane %v6634_v8, 4  ;;  %v6631_v45 = vmax.f32 %v6629_v9, %v6630_v29  ;;  %v6625_v44 = vrot.slane %v6624_v58, 1 }
 0x455   : > { %v6641_v49 = vsel %vm6395_vm13, %v6348_v34, -inf }
 0x456   : > { %v6636_v12 = vmax.f32 %v6634_v8, %v6635_v59  ;;  %v6642_v14 = vrot.slane %v6641_v49, 4  ;;  %v6632_v16 = vrot.slane %v6631_v45, 1  ;;  %v6626_v28 = vmax.f32 %v6624_v58, %v6625_v44 }
 0x458   : > { %v6143_v20 = vpop.f32.mrf.mxu1  ;;  %v6637_v33 = vrot.slane %v6636_v12, 2  ;;  %v6643_v37 = vmax.f32 %v6641_v49, %v6642_v14  ;;  %v6633_v48 = vmax.f32 %v6631_v45, %v6632_v16  ;;  %v14526_v16 = vld [vmem:[#allocation8_spill] sm:$0xff] }
 0x459   : > { %v6144_v0 = vadd.f32 %v13004_v61, %v6143_v20 }
 0x45a   : > { %v6644_v43 = vrot.slane %v6643_v37, 2  ;;  %v6638_v4 = vmax.f32 %v6636_v12, %v6637_v33  ;;  %v6944_v8 = vsel %vm4055_vm3, %v6633_v48, %v6626_v28 }
 0x45b   : > { %v6233_v11 = vadd.f32 %v6232_v32, %v6144_v0 }
 0x45c   : > { %v6645_v27 = vmax.f32 %v6643_v37, %v6644_v43  ;;  %v6639_v60 = vrot.slane %v6638_v4, 1 }
 0x45d   : > { %v6285_v39 = vmax.f32 %v6233_v11, 0.0 }
 0x45e   : > { %v6646_v5 = vrot.slane %v6645_v27, 1  ;;  %v6640_v52 = vmax.f32 %v6638_v4, %v6639_v60 }
 0x45f   : > { %v6349_v57 = vrot.slane %v6285_v39, 4  ;;  %v6648_v23 = vsel %vm6395_vm13, %v6285_v39, -inf  ;;  %v6242_v39 = vpop.f32.mrf.mxu3 }
 0x460   : > { %v6649_v54 = vrot.slane %v6648_v23, 4  ;;  %v6145_v41 = vpop.f32.mrf.mxu1  ;;  %v6647_v59 = vmax.f32 %v6645_v27, %v6646_v5  ;;  %v6945_v10 = vsel %vm4057_vm4, %v6640_v52, %v6944_v8  ;;  %v6847_v27 = vand.u32 7, %v14526_v16 }
 0x461   : > { %v6655_v50 = vsel %vm6395_vm13, %v6349_v57, -inf  ;;  %v6146_v1 = vadd.f32 %v13004_v61, %v6145_v41  ;;  %v7055_v41 = vrot.slane %v12977_v2, 1 }
 0x462   : > { %v6650_v6 = vmax.f32 %v6648_v23, %v6649_v54  ;;  %v6656_v36 = vrot.slane %v6655_v50, 4  ;;  %v6946_v37 = vsel %vm4059_vm5, %v6647_v59, %v6945_v10 }
 0x463   : > { %v6235_v24 = vadd.f32 %v6234_v17, %v6146_v1 }
 0x464   : > { %v6651_v15 = vrot.slane %v6650_v6, 2  ;;  %v6657_v32 = vmax.f32 %v6655_v50, %v6656_v36  ;;  %v13040_v36 = vadd.s32 16, %v10710_v18 }
 0x465   : > { %v6286_v40 = vmax.f32 %v6235_v24, 0.0 }
 0x466   : > { %v6652_v42 = vmax.f32 %v6650_v6, %v6651_v15  ;;  %v6658_v51 = vrot.slane %v6657_v32, 2  ;;  %v6846_v15 = vand.u32 7, %v13040_v36 }
 0x467   : > { %v6350_v30 = vrot.slane %v6286_v40, 4  ;;  %v6662_v62 = vsel %vm6395_vm13, %v6286_v40, -inf }
 0x468   : > { %v6653_v25 = vrot.slane %v6652_v42, 1  ;;  %v6659_v19 = vmax.f32 %v6657_v32, %v6658_v51  ;;  %v6663_v3 = vrot.slane %v6662_v62, 4  ;;  %v7071_v32 = vadd.s32 1, %v6847_v27 }
 0x469   : > { %v6669_v17 = vsel %vm6395_vm13, %v6350_v30, -inf  ;;  %v7064_v51 = vsel %vm4928_vm10, %v7054_v22, %v7055_v41  ;;  %v7070_v48 = vadd.s32 1, %v6846_v15 }
 0x46a   : > { %v6664_v9 = vmax.f32 %v6662_v62, %v6663_v3  ;;  %v6670_v34 = vrot.slane %v6669_v17, 4  ;;  %v6660_v20 = vrot.slane %v6659_v19, 1  ;;  %v6654_v49 = vmax.f32 %v6652_v42, %v6653_v25  ;;  %v6244_v62 = vpop.f32.mrf.mxu3 }
 0x46b   : > { %v6148_v11 = vpop.f32.mrf.mxu1  ;;  %vm7087_vm0 = vcmp.lt.s32.totalorder %v7071_v32, 8  ;;  %vm7086_vm15 = vcmp.lt.s32.totalorder %v7070_v48, 8 }
 0x46c   : > { %v6665_v0 = vrot.slane %v6664_v9, 2  ;;  %v6671_v12 = vmax.f32 %v6669_v17, %v6670_v34  ;;  %v6661_v33 = vmax.f32 %v6659_v19, %v6660_v20  ;;  %v6149_v53 = vadd.f32 %v13004_v61, %v6148_v11  ;;  %v9847_v19 = vld [vmem:[%s14291_s5 + $0x30] sm:$0xff] }
 0x46d   : > { %v6947_v45 = vsel %vm4061_vm6, %v6654_v49, %v6946_v37  ;;  %v7118_v28 = vsel %vm7086_vm15, %v7064_v51, 0.0  ;;  %7277 = vmatpush.bf16.msra.mxu1 %v9847_v19 }
 0x46e   : > { %v6666_v14 = vmax.f32 %v6664_v9, %v6665_v0  ;;  %v6672_v29 = vrot.slane %v6671_v12, 2  ;;  %v6238_v23 = vadd.f32 %v6237_v56, %v6149_v53  ;;  %v6948_v58 = vsel %vm14525_vm14, %v6661_v33, %v6947_v45 }
 0x470   : > { %v6667_v43 = vrot.slane %v6666_v14, 1  ;;  %v6673_v57 = vmax.f32 %v6671_v12, %v6672_v29  ;;  %v6287_v50 = vmax.f32 %v6238_v23, 0.0 }
 0x472   : > { %v6668_v4 = vmax.f32 %v6666_v14, %v6667_v43  ;;  %v6674_v54 = vrot.slane %v6673_v57, 1  ;;  %v6351_v24 = vrot.slane %v6287_v50, 4  ;;  %v6676_v52 = vsel %vm6395_vm13, %v6287_v50, -inf  ;;  %v6247_v37 = vpop.f32.mrf.mxu3 }
 0x473   : > { %v6150_v60 = vpop.f32.mrf.mxu1 }
 0x474   : > { %v6675_v1 = vmax.f32 %v6673_v57, %v6674_v54  ;;  %v6949_v6 = vsel %vm4065_vm8, %v6668_v4, %v6948_v58  ;;  %v6151_v44 = vadd.f32 %v13004_v61, %v6150_v60  ;;  %v6683_v42 = vsel %vm6395_vm13, %v6351_v24, -inf }
 0x475   : > { %v6684_v22 = vrot.slane %v6683_v42, 4 }
 0x476   : > { %v13045_v56 = vsel %vm4067_vm9, %v6675_v1, %v6949_v6  ;;  %v6240_v5 = vadd.f32 %v6239_v35, %v6151_v44  ;;  %v6677_v35 = vrot.slane %v6676_v52, 4 }
 0x477   : > { %v7056_v40 = vrot.slane %v13045_v56, 1  ;;  %v6685_v59 = vmax.f32 %v6683_v42, %v6684_v22 }
 0x478   : > { %v6288_v3 = vmax.f32 %v6240_v5, 0.0  ;;  %v6678_v12 = vmax.f32 %v6676_v52, %v6677_v35 }
 0x479   : > { %v7063_v30 = vsel %vm4928_vm10, %v7055_v41, %v7056_v40  ;;  %v6686_v29 = vrot.slane %v6685_v59, 2 }
 0x47a   : > { %v7119_v25 = vsel %vm7087_vm0, %v7063_v30, 0.0  ;;  %v6352_v9 = vrot.slane %v6288_v3, 4  ;;  %v6690_v34 = vsel %vm6395_vm13, %v6288_v3, -inf  ;;  %v6679_v45 = vrot.slane %v6678_v12, 2 }
 0x47b   : > { %v7159_v17 = vpack.c.bf16 %v7119_v25, %v7118_v28  ;;  %v6691_v8 = vrot.slane %v6690_v34, 4  ;;  %v6687_v57 = vmax.f32 %v6685_v59, %v6686_v29  ;;  %v6249_v25 = vpop.f32.mrf.mxu3 }
 0x47c   : > { %v6697_v20 = vsel %vm6395_vm13, %v6352_v9, -inf  ;;  %v6153_v0 = vpop.f32.mrf.mxu1  ;;  %v6680_v1 = vmax.f32 %v6678_v12, %v6679_v45 }
 0x47d   : > { %9168 = vmatmul.msk.bf16.gmra.mxu3 %vm5859_vm12, %v7159_v17  ;;  %v6692_v10 = vmax.f32 %v6690_v34, %v6691_v8  ;;  %v6698_v49 = vrot.slane %v6697_v20, 4  ;;  %v6154_v14 = vadd.f32 %v13004_v61, %v6153_v0 }
 0x47e   : > { %v6681_v30 = vrot.slane %v6680_v1, 1 }
 0x47f   : > { %v6699_v11 = vmax.f32 %v6697_v20, %v6698_v49  ;;  %v6243_v33 = vadd.f32 %v6242_v39, %v6154_v14  ;;  %v6693_v53 = vrot.slane %v6692_v10, 2  ;;  %v6688_v39 = vrot.slane %v6687_v57, 1 }
 0x481   : > { %v6289_v43 = vmax.f32 %v6243_v33, 0.0  ;;  %v6700_v23 = vrot.slane %v6699_v11, 2  ;;  %v6694_v41 = vmax.f32 %v6692_v10, %v6693_v53  ;;  %v6689_v3 = vmax.f32 %v6687_v57, %v6688_v39 }
 0x482   : > { %v6682_v10 = vmax.f32 %v6680_v1, %v6681_v30 }
 0x483   : > { %v6353_v4 = vrot.slane %v6289_v43, 4  ;;  %v6704_v54 = vsel %vm6395_vm13, %v6289_v43, -inf  ;;  %v6701_v44 = vmax.f32 %v6699_v11, %v6700_v23  ;;  %v6695_v51 = vrot.slane %v6694_v41, 1  ;;  %v6252_v1 = vpop.f32.mrf.mxu3 }
 0x484   : > { %v6705_v58 = vrot.slane %v6704_v54, 4  ;;  %v6155_v50 = vpop.f32.mrf.mxu1  ;;  %v6951_v14 = vsel %vm4055_vm3, %v6689_v3, %v6682_v10 }
 0x485   : > { %v6711_v6 = vsel %vm6395_vm13, %v6353_v4, -inf  ;;  %v6156_v24 = vadd.f32 %v13004_v61, %v6155_v50  ;;  %v6702_v28 = vrot.slane %v6701_v44, 1  ;;  %v6696_v9 = vmax.f32 %v6694_v41, %v6695_v51 }
 0x486   : > { %v6706_v60 = vmax.f32 %v6704_v54, %v6705_v58  ;;  %v6712_v32 = vrot.slane %v6711_v6, 4 }
 0x487   : > { %v6245_v42 = vadd.f32 %v6244_v62, %v6156_v24  ;;  %v6703_v29 = vmax.f32 %v6701_v44, %v6702_v28  ;;  %v6952_v53 = vsel %vm4057_vm4, %v6696_v9, %v6951_v14 }
 0x488   : > { %v6707_v48 = vrot.slane %v6706_v60, 2  ;;  %v6713_v5 = vmax.f32 %v6711_v6, %v6712_v32 }
 0x489   : > { %v6290_v52 = vmax.f32 %v6245_v42, 0.0  ;;  %v6953_v50 = vsel %vm4059_vm5, %v6703_v29, %v6952_v53 }
 0x48a   : > { %v6708_v19 = vmax.f32 %v6706_v60, %v6707_v48  ;;  %v6714_v22 = vrot.slane %v6713_v5, 2 }
 0x48b   : > { %v6354_v17 = vrot.slane %v6290_v52, 4  ;;  %v6718_v35 = vsel %vm6395_vm13, %v6290_v52, -inf }
 0x48c   : > { %v6709_v34 = vrot.slane %v6708_v19, 1  ;;  %v6715_v8 = vmax.f32 %v6713_v5, %v6714_v22  ;;  %v6719_v59 = vrot.slane %v6718_v35, 4  ;;  %v6158_v20 = vpop.f32.mrf.mxu1  ;;  %v9846_v22 = vld [vmem:[%s14291_s5 + $0x28] sm:$0xff] }
 0x48d   : > { %v6725_v62 = vsel %vm6395_vm13, %v6354_v17, -inf  ;;  %v6159_v49 = vadd.f32 %v13004_v61, %v6158_v20  ;;  %7278 = vmatpush.bf16.msra.mxu1 %v9846_v22 }
 0x48e   : > { %v6720_v0 = vmax.f32 %v6718_v35, %v6719_v59  ;;  %v6726_v12 = vrot.slane %v6725_v62, 4  ;;  %v6716_v11 = vrot.slane %v6715_v8, 1  ;;  %v6710_v45 = vmax.f32 %v6708_v19, %v6709_v34 }
 0x48f   : > { %v6248_v33 = vadd.f32 %v6247_v37, %v6159_v49  ;;  %v6254_v49 = vpop.f32.mrf.mxu3 }
 0x490   : > { %v6721_v43 = vrot.slane %v6720_v0, 2  ;;  %v6727_v57 = vmax.f32 %v6725_v62, %v6726_v12  ;;  %v6717_v41 = vmax.f32 %v6715_v8, %v6716_v11  ;;  %v6954_v32 = vsel %vm4061_vm6, %v6710_v45, %v6953_v50 }
 0x491   : > { %v6291_v23 = vmax.f32 %v6248_v33, 0.0 }
 0x492   : > { %v6722_v4 = vmax.f32 %v6720_v0, %v6721_v43  ;;  %v6728_v54 = vrot.slane %v6727_v57, 2  ;;  %v6955_v30 = vsel %vm14527_vm1, %v6717_v41, %v6954_v32 }
 0x493   : > { %v6355_v58 = vrot.slane %v6291_v23, 4  ;;  %v6732_v42 = vsel %vm6395_vm13, %v6291_v23, -inf }
 0x494   : > { %v6723_v6 = vrot.slane %v6722_v4, 1  ;;  %v6729_v24 = vmax.f32 %v6727_v57, %v6728_v54  ;;  %v6160_v60 = vpop.f32.mrf.mxu1  ;;  %v6733_v3 = vrot.slane %v6732_v42, 4 }
 0x495   : > { %v6739_v37 = vsel %vm6395_vm13, %v6355_v58, -inf  ;;  %v6161_v39 = vadd.f32 %v13004_v61, %v6160_v60 }
 0x496   : > { %v6724_v44 = vmax.f32 %v6722_v4, %v6723_v6  ;;  %v6730_v51 = vrot.slane %v6729_v24, 1  ;;  %v6740_v48 = vrot.slane %v6739_v37, 4  ;;  %v6734_v20 = vmax.f32 %v6732_v42, %v6733_v3 }
 0x497   : > { %v6250_v5 = vadd.f32 %v6249_v25, %v6161_v39 }
 0x498   : > { %v6731_v52 = vmax.f32 %v6729_v24, %v6730_v51  ;;  %v6956_v19 = vsel %vm4065_vm8, %v6724_v44, %v6955_v30  ;;  %v6741_v35 = vmax.f32 %v6739_v37, %v6740_v48  ;;  %v6735_v53 = vrot.slane %v6734_v20, 2  ;;  %v6257_v44 = vpop.f32.mrf.mxu3 }
 0x499   : > { %v6292_v28 = vmax.f32 %v6250_v5, 0.0 }
 0x49a   : > { %v13089_v17 = vsel %vm4067_vm9, %v6731_v52, %v6956_v19  ;;  %v6742_v14 = vrot.slane %v6741_v35, 2  ;;  %v6736_v50 = vmax.f32 %v6734_v20, %v6735_v53 }
 0x49b   : > { %v6356_v9 = vrot.slane %v6292_v28, 4  ;;  %v6746_v34 = vsel %vm6395_vm13, %v6292_v28, -inf  ;;  %v10266_v59 = vpack.i.bf16 %v13089_v17, %v13045_v56  ;;  %v6985_v63 = vrot.slane %v13089_v17, 7 }
 0x49c   : > { %v6747_v25 = vrot.slane %v6746_v34, 4  ;;  %v6163_v8 = vpop.f32.mrf.mxu1  ;;  %v6743_v43 = vmax.f32 %v6741_v35, %v6742_v14  ;;  %v6737_v5 = vrot.slane %v6736_v50, 1 }
 0x49d   : > { %v6753_v10 = vsel %vm6395_vm13, %v6356_v9, -inf  ;;  %v6164_v62 = vadd.f32 %v13004_v61, %v6163_v8  ;;  %10267 = vrot.lane.b32.xlu2 %v10266_v59, %s10296_s25 }
 0x49e   : > { %v6748_v0 = vmax.f32 %v6746_v34, %v6747_v25  ;;  %v6754_v12 = vrot.slane %v6753_v10, 4  ;;  %v6738_v20 = vmax.f32 %v6736_v50, %v6737_v5 }
 0x49f   : > { %v6253_v29 = vadd.f32 %v6252_v1, %v6164_v62  ;;  %v6744_v1 = vrot.slane %v6743_v43, 1 }
 0x4a0   : > { %v6749_v11 = vrot.slane %v6748_v0, 2  ;;  %v6755_v33 = vmax.f32 %v6753_v10, %v6754_v12 }
 0x4a1   : > { %v6293_v45 = vmax.f32 %v6253_v29, 0.0  ;;  %v6745_v22 = vmax.f32 %v6743_v43, %v6744_v1 }
 0x4a2   : > { %v6756_v57 = vrot.slane %v6755_v33, 2  ;;  %v6750_v54 = vmax.f32 %v6748_v0, %v6749_v11 }
 0x4a3   : > { %v6357_v23 = vrot.slane %v6293_v45, 4  ;;  %v6760_v4 = vsel %vm6395_vm13, %v6293_v45, -inf  ;;  %v6958_v12 = vsel %vm4055_vm3, %v6745_v22, %v6738_v20  ;;  %v9845_v22 = vld [vmem:[%s14291_s5 + $0x20] sm:$0xff]  ;;  %v9844_v20 = vld [vmem:[%s14291_s5 + $0x18] sm:$0xff] }
 0x4a4   : > { %v6761_v41 = vrot.slane %v6760_v4, 4  ;;  %v6165_v58 = vpop.f32.mrf.mxu1  ;;  %v6757_v37 = vmax.f32 %v6755_v33, %v6756_v57  ;;  %v6751_v42 = vrot.slane %v6750_v54, 1  ;;  %7279 = vmatpush.bf16.msra.mxu1 %v9845_v22 }
 0x4a5   : > { %v6767_v6 = vsel %vm6395_vm13, %v6357_v23, -inf  ;;  %v6166_v24 = vadd.f32 %v13004_v61, %v6165_v58  ;;  %v13106_v23 = vadd.s32 40, %v10710_v18 }
 0x4a6   : > { %v6762_v60 = vmax.f32 %v6760_v4, %v6761_v41  ;;  %v6768_v32 = vrot.slane %v6767_v6, 4  ;;  %v6758_v3 = vrot.slane %v6757_v37, 1  ;;  %v6752_v9 = vmax.f32 %v6750_v54, %v6751_v42  ;;  %v6259_v4 = vpop.f32.mrf.mxu3  ;;  %v14528_v42 = vld [vmem:[#allocation22_spill] sm:$0xff] }
 0x4a7   : > { %v6255_v39 = vadd.f32 %v6254_v49, %v6166_v24 }
 0x4a8   : > { %v6763_v51 = vrot.slane %v6762_v60, 2  ;;  %v6769_v48 = vmax.f32 %v6767_v6, %v6768_v32  ;;  %v6759_v14 = vmax.f32 %v6757_v37, %v6758_v3  ;;  %v6959_v33 = vsel %vm4057_vm4, %v6752_v9, %v6958_v12  ;;  %7280 = vmatpush.bf16.msra.mxu1 %v9844_v20 }
 0x4a9   : > { %v6294_v30 = vmax.f32 %v6255_v39, 0.0 }
 0x4aa   : > { %v6764_v52 = vmax.f32 %v6762_v60, %v6763_v51  ;;  %v6770_v19 = vrot.slane %v6769_v48, 2  ;;  %v6960_v50 = vsel %vm4059_vm5, %v6759_v14, %v6959_v33  ;;  %v6848_v51 = vand.u32 7, %v14528_v42 }
 0x4ab   : > { %v6358_v28 = vrot.slane %v6294_v30, 4  ;;  %v6774_v35 = vsel %vm6395_vm13, %v6294_v30, -inf }
 0x4ac   : > { %v6765_v34 = vrot.slane %v6764_v52, 1  ;;  %v6771_v25 = vmax.f32 %v6769_v48, %v6770_v19  ;;  %v6775_v8 = vrot.slane %v6774_v35, 4  ;;  %v6168_v59 = vpop.f32.mrf.mxu1  ;;  %v6849_v48 = vand.u32 7, %v13106_v23 }
 0x4ad   : > { %v6781_v10 = vsel %vm6395_vm13, %v6358_v28, -inf  ;;  %v6169_v62 = vadd.f32 %v13004_v61, %v6168_v59  ;;  %v7057_v28 = vrot.slane %v13089_v17, 1  ;;  %v7072_v9 = vadd.s32 1, %v6848_v51 }
 0x4ae   : > { %v6776_v49 = vmax.f32 %v6774_v35, %v6775_v8  ;;  %v6782_v0 = vrot.slane %v6781_v10, 4  ;;  %v6772_v29 = vrot.slane %v6771_v25, 1  ;;  %v6766_v53 = vmax.f32 %v6764_v52, %v6765_v34 }
 0x4af   : > { %v6258_v11 = vadd.f32 %v6257_v44, %v6169_v62  ;;  %v7073_v59 = vadd.s32 1, %v6849_v48  ;;  %vm7088_vm2 = vcmp.lt.s32.totalorder %v7072_v9, 8  ;;  %v7000_v7 = vadd.s32 4294967295, %v6848_v51 }
 0x4b0   : > { %v6777_v45 = vrot.slane %v6776_v49, 2  ;;  %v6783_v43 = vmax.f32 %v6781_v10, %v6782_v0  ;;  %v6773_v58 = vmax.f32 %v6771_v25, %v6772_v29  ;;  %v6961_v60 = vsel %vm4061_vm6, %v6766_v53, %v6960_v50 }
 0x4b1   : > { %v6295_v57 = vmax.f32 %v6258_v11, 0.0  ;;  %v7062_v29 = vsel %vm4928_vm10, %v7056_v40, %v7057_v28  ;;  %v6262_v11 = vpop.f32.mrf.mxu3  ;;  %vm7089_vm14 = vcmp.lt.s32.totalorder %v7073_v59, 8  ;;  %v9841_v59 = vld [vmem:[%s14291_s5] sm:$0xff] }
 0x4b2   : > { %v6778_v54 = vmax.f32 %v6776_v49, %v6777_v45  ;;  %v6784_v41 = vrot.slane %v6783_v43, 2  ;;  %v6962_v3 = vsel %vm14529_vm7, %v6773_v58, %v6961_v60 }
 0x4b3   : > { %v6359_v6 = vrot.slane %v6295_v57, 4  ;;  %v6788_v24 = vsel %vm6395_vm13, %v6295_v57, -inf }
 0x4b4   : > { %v6779_v32 = vrot.slane %v6778_v54, 1  ;;  %v6785_v1 = vmax.f32 %v6783_v43, %v6784_v41  ;;  %v6170_v37 = vpop.f32.mrf.mxu1  ;;  %v6789_v52 = vrot.slane %v6788_v24, 4  ;;  %v9843_v43 = vld [vmem:[%s14291_s5 + $0x10] sm:$0xff] }
 0x4b5   : > { %v6795_v39 = vsel %vm6395_vm13, %v6359_v6, -inf  ;;  %v6171_v44 = vadd.f32 %v13004_v61, %v6170_v37  ;;  %v7120_v6 = vsel %vm7088_vm2, %v7062_v29, 0.0  ;;  %7281 = vmatpush.bf16.msra.mxu1 %v9843_v43  ;;  %v6998_v43 = vadd.s32 4294967295, %v6846_v15 }
 0x4b6   : > { %v6780_v5 = vmax.f32 %v6778_v54, %v6779_v32  ;;  %v6786_v30 = vrot.slane %v6785_v1, 1  ;;  %v6796_v19 = vrot.slane %v6795_v39, 4  ;;  %v6790_v62 = vmax.f32 %v6788_v24, %v6789_v52 }
 0x4b7   : > { %v6260_v35 = vadd.f32 %v6259_v4, %v6171_v44  ;;  %v10263_v44 = vpop.permute.xlu1 %10262  ;;  %vm7006_vm0 = vcmp.ge.s32.totalorder %v6998_v43, 0  ;;  %v6996_v43 = vadd.s32 4294967295, %v6844_v38 }
 0x4b8   : > { %v6787_v34 = vmax.f32 %v6785_v1, %v6786_v30  ;;  %v6963_v25 = vsel %vm4065_vm8, %v6780_v5, %v6962_v3  ;;  %v6797_v8 = vmax.f32 %v6795_v39, %v6796_v19  ;;  %v6791_v54 = vrot.slane %v6790_v62, 2  ;;  %v9842_v39 = vld [vmem:[%s14291_s5 + $0x8] sm:$0xff] }
 0x4b9   : > { %v6296_v10 = vmax.f32 %v6260_v35, 0.0  ;;  %v6983_v35 = vrot.slane %v12977_v2, 7  ;;  %v10265_v9 = vunpack.i.h.bf16 %v10263_v44  ;;  %7282 = vmatpush.bf16.msra.mxu1 %v9842_v39  ;;  %v10264_v20 = vunpack.i.l.bf16 %v10263_v44 }
 0x4ba   : > { %v13129_v49 = vsel %vm4067_vm9, %v6787_v34, %v6963_v25  ;;  %v6798_v33 = vrot.slane %v6797_v8, 2  ;;  %v6792_v30 = vmax.f32 %v6790_v62, %v6791_v54  ;;  %vm7004_vm7 = vcmp.ge.s32.totalorder %v6996_v43, 0  ;;  %v9930_v43 = vld [vmem:[%s14293_s7 + $0x264] sm:$0xf0] }
 0x4bb   : > { %v6360_v0 = vrot.slane %v6296_v10, 4  ;;  %v6802_v12 = vsel %vm6395_vm13, %v6296_v10, -inf  ;;  %v7058_v14 = vrot.slane %v13129_v49, 1 }
 0x4bc   : > { %v6803_v53 = vrot.slane %v6802_v12, 4  ;;  %v6173_v45 = vpop.f32.mrf.mxu1  ;;  %v6799_v60 = vmax.f32 %v6797_v8, %v6798_v33  ;;  %v6793_v29 = vrot.slane %v6792_v30, 1 }
 0x4bd   : > { %v6809_v57 = vsel %vm6395_vm13, %v6360_v0, -inf  ;;  %v6174_v4 = vadd.f32 %v13004_v61, %v6173_v45  ;;  %v7061_v40 = vsel %vm4928_vm10, %v7057_v28, %v7058_v14  ;;  %v6982_v28 = vrot.slane %v12919_v31, 7  ;;  %7283 = vmatpush.bf16.msra.mxu1 %v9841_v59 }
 0x4be   : > { %v6804_v41 = vmax.f32 %v6802_v12, %v6803_v53  ;;  %v6810_v58 = vrot.slane %v6809_v57, 4  ;;  %v7121_v24 = vsel %vm7089_vm14, %v7061_v40, 0.0  ;;  %v6800_v34 = vrot.slane %v6799_v60, 1  ;;  %v6264_v12 = vpop.f32.mrf.mxu3 }
 0x4bf   : > { %v6263_v50 = vadd.f32 %v6262_v11, %v6174_v4  ;;  %v7161_v37 = vpack.c.bf16 %v7121_v24, %v7120_v6  ;;  %v6993_v45 = vsel %vm4639_vm11, %v6981_v47, %v6982_v28  ;;  %v6992_v54 = vsel %vm4639_vm11, %v6982_v28, %v6983_v35 }
 0x4c0   : > { %v6805_v32 = vrot.slane %v6804_v41, 2  ;;  %v6811_v1 = vmax.f32 %v6809_v57, %v6810_v58  ;;  %v6999_v57 = vadd.s32 4294967295, %v6847_v27  ;;  %v6801_v4 = vmax.f32 %v6799_v60, %v6800_v34 }
 0x4c1   : > { %v6297_v5 = vmax.f32 %v6263_v50, 0.0  ;;  %9169 = vmatmul.msk.bf16.gmra.mxu3 %vm5859_vm12, %v7161_v37  ;;  %v7046_v15 = vsel %vm7006_vm0, %v6993_v45, 0.0  ;;  %v6794_v37 = vmax.f32 %v6792_v30, %v6793_v29  ;;  %v13180_v59 = vadd.s32 48, %v10710_v18  ;;  %v9868_v18 = vld [vmem:[%s14293_s7 + $0x74] sm:$0xf0] }
 0x4c2   : > { %v6806_v52 = vmax.f32 %v6804_v41, %v6805_v32  ;;  %v6812_v19 = vrot.slane %v6811_v1, 2  ;;  %vm7007_vm15 = vcmp.ge.s32.totalorder %v6999_v57, 0  ;;  %v13172_v6 = vsel %vm5859_vm12, %v7046_v15, %v10264_v20  ;;  %v14530_v20 = vld [vmem:[#allocation15_spill] sm:$0xff] }
 0x4c3   : > { %v6361_v22 = vrot.slane %v6297_v5, 4  ;;  %v6816_v3 = vsel %vm6395_vm13, %v6297_v5, -inf  ;;  %v7047_v27 = vsel %vm7007_vm15, %v6992_v54, 0.0  ;;  %vm7008_vm0 = vcmp.ge.s32.totalorder %v7000_v7, 0  ;;  %v9928_v7 = vld [vmem:[%s14293_s7 + $0x254] sm:$0xf0] }
 0x4c4   : > { %v6817_v25 = vrot.slane %v6816_v3, 4  ;;  %v6175_v8 = vpop.f32.mrf.mxu1  ;;  %v6807_v10 = vrot.slane %v6806_v52, 1  ;;  %v6813_v31 = vmax.f32 %v6811_v1, %v6812_v19  ;;  %v7151_v1 = vsel %vm5859_vm12, %v7047_v27, %v10265_v9 }
 0x4c5   : > { %v6823_v62 = vsel %vm6395_vm13, %v6361_v22, -inf  ;;  %v6176_v0 = vadd.f32 %v13004_v61, %v6175_v8  ;;  %v7158_v44 = vpack.c.bf16 %v7151_v1, %v13172_v6  ;;  %v6965_v19 = vsel %vm4055_vm3, %v6801_v4, %v6794_v37  ;;  %v10258_v4 = vpop.permute.xlu0 %10257 }
 0x4c6   : > { %v6818_v11 = vmax.f32 %v6816_v3, %v6817_v25  ;;  %v6824_v33 = vrot.slane %v6823_v62, 4  ;;  %v6808_v41 = vmax.f32 %v6806_v52, %v6807_v10  ;;  %v6814_v47 = vrot.slane %v6813_v31, 1 }
 0x4c7   : > { %v6265_v53 = vadd.f32 %v6264_v12, %v6176_v0  ;;  %v6851_v10 = vand.u32 7, %v14530_v20  ;;  %v10259_v15 = vunpack.i.l.bf16 %v10258_v4 }
 0x4c8   : > { %v6819_v40 = vrot.slane %v6818_v11, 2  ;;  %v6825_v61 = vmax.f32 %v6823_v62, %v6824_v33  ;;  %v6815_v22 = vmax.f32 %v6813_v31, %v6814_v47  ;;  %v6966_v28 = vsel %vm4057_vm4, %v6808_v41, %v6965_v19 }
 0x4c9   : > { %v6298_v26 = vmax.f32 %v6265_v53, 0.0  ;;  %v6850_v33 = vand.u32 7, %v13180_v59  ;;  %v7075_v57 = vadd.s32 1, %v6851_v10 }
 0x4ca   : > { %v6820_v58 = vmax.f32 %v6818_v11, %v6819_v40  ;;  %v6826_v36 = vrot.slane %v6825_v61, 2  ;;  %v6967_v0 = vsel %vm4059_vm5, %v6815_v22, %v6966_v28  ;;  %v6997_v11 = vadd.s32 4294967295, %v6845_v55 }
 0x4cb   : > { %v6362_v50 = vrot.slane %v6298_v26, 4  ;;  %v6830_v16 = vsel %vm6395_vm13, %v6298_v26, -inf  ;;  %v6984_v26 = vrot.slane %v13045_v56, 7  ;;  %v10260_v55 = vunpack.i.h.bf16 %v10258_v4 }
 0x4cc   : > { %v6821_v24 = vrot.slane %v6820_v58, 1  ;;  %v6827_v60 = vmax.f32 %v6825_v61, %v6826_v36  ;;  %v6831_v32 = vrot.slane %v6830_v16, 4  ;;  %v7074_v61 = vadd.s32 1, %v6850_v33 }
 0x4cd   : > { %v6837_v39 = vsel %vm6395_vm13, %v6362_v50, -inf  ;;  %vm14531_vm13 = vmmov %vm14527_vm1  ;;  %vm7005_vm1 = vcmp.ge.s32.totalorder %v6997_v11, 0  ;;  %vm7091_vm2 = vcmp.lt.s32.totalorder %v7075_v57, 8  ;;  %v6991_v50 = vsel %vm4639_vm11, %v6983_v35, %v6984_v26  ;;  %v9866_v11 = vld [vmem:[%s14293_s7 + $0x64] sm:$0xf0] }
 0x4ce   : > { %v6832_v5 = vmax.f32 %v6830_v16, %v6831_v32  ;;  %v6838_v52 = vrot.slane %v6837_v39, 4  ;;  %v6828_v3 = vrot.slane %v6827_v60, 1  ;;  %v6822_v34 = vmax.f32 %v6820_v58, %v6821_v24  ;;  %v9541_v57 = vld [vmem:[%s14293_s7 + $0x2e0] sm:$0xf] }
 0x4cf   : > { %vm7090_vm14 = vcmp.lt.s32.totalorder %v7074_v61, 8  ;;  %v7048_v51 = vsel %vm7008_vm0, %v6991_v50, 0.0  ;;  %v7045_v35 = vsel %vm7005_vm1, %v13015_v13, 0.0  ;;  %v6990_v13 = vsel %vm4639_vm11, %v6984_v26, %v6985_v63  ;;  %v9213_v61 = vld [vmem:[%s14293_s7 + $0x50] sm:$0xf] }
 0x4d0   : > { %v6833_v25 = vrot.slane %v6832_v5, 2  ;;  %v6839_v8 = vmax.f32 %v6837_v39, %v6838_v52  ;;  %v6829_v62 = vmax.f32 %v6827_v60, %v6828_v3  ;;  %v6968_v31 = vsel %vm4061_vm6, %v6822_v34, %v6967_v0  ;;  %v9549_v0 = vld [vmem:[%s14293_s7 + $0x2f0] sm:$0xf] }
 0x4d1   : > { %v7002_v17 = vadd.s32 4294967295, %v6850_v33  ;;  %v7003_v22 = vadd.s32 4294967295, %v6851_v10  ;;  %v9485_v10 = vld [vmem:[%s14293_s7 + $0x270] sm:$0xf] }
 0x4d2   : > { %v6834_v9 = vmax.f32 %v6832_v5, %v6833_v25  ;;  %v6840_v30 = vrot.slane %v6839_v8, 2  ;;  %v6969_v40 = vsel %vm14531_vm13, %v6829_v62, %v6968_v31  ;;  %v9932_v62 = vld [vmem:[%s14293_s7 + $0x274] sm:$0xf0]  ;;  %v9221_v31 = vld [vmem:[%s14293_s7 + $0x60] sm:$0xf] }
 0x4d3   : > { %vm7010_vm15 = vcmp.ge.s32.totalorder %v7002_v17, 0  ;;  %vm7011_vm13 = vcmp.ge.s32.totalorder %v7003_v22, 0  ;;  %v9469_v26 = vld [vmem:[%s14293_s7 + $0x250] sm:$0xf] }
 0x4d4   : > { %v6835_v12 = vrot.slane %v6834_v9, 1  ;;  %v6841_v29 = vmax.f32 %v6839_v8, %v6840_v30  ;;  %v9229_v30 = vld [vmem:[%s14293_s7 + $0x70] sm:$0xf] }
 0x4d5   : > { %v9230_v20 = vor.u32 %v9868_v18, %v9229_v30  ;;  %v9181_v22 = vld [vmem:[%s14293_s7 + $0x10] sm:$0xf]  ;;  %v9429_v30 = vld [vmem:[%s14293_s7 + $0x200] sm:$0xf]  ;;  %v9918_v18 = vld [vmem:[%s14293_s7 + $0x204] sm:$0xf0] }
 0x4d6   : > { %v6836_v53 = vmax.f32 %v6834_v9, %v6835_v12  ;;  %v6842_v45 = vrot.slane %v6841_v29, 1  ;;  %v9486_v12 = vor.u32 %v9932_v62, %v9485_v10  ;;  %v9493_v10 = vld [vmem:[%s14293_s7 + $0x280] sm:$0xf]  ;;  %v9293_v62 = vld [vmem:[%s14293_s7 + $0xf0] sm:$0xf] }
 0x4d7   : > { %8252 = vmatpush.bf16.msra.mxu3 %v9230_v20 }
 0x4d8   : > { %v6843_v54 = vmax.f32 %v6841_v29, %v6842_v45  ;;  %v6970_v41 = vsel %vm4065_vm8, %v6836_v53, %v6969_v40  ;;  %v9948_v29 = vld [vmem:[%s14293_s7 + $0x2f4] sm:$0xf0]  ;;  %v9222_v53 = vor.u32 %v9866_v11, %v9221_v31  ;;  %v9477_v45 = vld [vmem:[%s14293_s7 + $0x260] sm:$0xf]  ;;  %8304 = vmatpush.bf16.msra.mxu2 %v9486_v12  ;;  %v9946_v40 = vld [vmem:[%s14293_s7 + $0x2e4] sm:$0xf0] }
 0x4d9   : > { %v9550_v33 = vor.u32 %v9948_v29, %v9549_v0  ;;  %v9478_v4 = vor.u32 %v9930_v43, %v9477_v45  ;;  %v9884_v0 = vld [vmem:[%s14293_s7 + $0xf4] sm:$0xf0]  ;;  %v9934_v12 = vld [vmem:[%s14293_s7 + $0x284] sm:$0xf0]  ;;  %v9677_v29 = vld [vmem:[%s14293_s7 + $0x3f0] sm:$0xf]  ;;  %v9430_v45 = vor.u32 %v9918_v18, %v9429_v30 }
 0x4da   : > { %v6971_v47 = vsel %vm4067_vm9, %v6843_v54, %v6970_v41  ;;  %v9864_v54 = vld [vmem:[%s14293_s7 + $0x54] sm:$0xf0]  ;;  %v9542_v41 = vor.u32 %v9946_v40, %v9541_v57  ;;  %v9294_v43 = vor.u32 %v9884_v0, %v9293_v62  ;;  %v9494_v57 = vor.u32 %v9934_v12, %v9493_v10  ;;  %v9285_v40 = vld [vmem:[%s14293_s7 + $0xe0] sm:$0xf]  ;;  %v9970_v10 = vld [vmem:[%s14293_s7 + $0x3a4] sm:$0xf0] }
 0x4db   : > { %v6987_v38 = vrot.slane %v6971_v47, 7  ;;  %v7059_v58 = vrot.slane %v6971_v47, 1  ;;  %v10271_v36 = vpack.i.bf16 %v6971_v47, %v13129_v49  ;;  %8317 = vmatpush.bf16.msrb.mxu1 %v9550_v33  ;;  %v9944_v47 = vld [vmem:[%s14293_s7 + $0x2d4] sm:$0xf0]  ;;  %8253 = vmatpush.bf16.msra.mxu3 %v9222_v53  ;;  %v9867_v33 = vld [vmem:[%s14293_s7 + $0x74] sm:$0xf] }
 0x4dc   : > { %8305 = vmatpush.bf16.msra.mxu2 %v9478_v4  ;;  %v9980_v31 = vld [vmem:[%s14293_s7 + $0x3f4] sm:$0xf0]  ;;  %v9231_v53 = vld [vmem:[%s14293_s7 + $0x78] sm:$0xf0]  ;;  %v9857_v62 = vld [vmem:[%s14293_s7 + $0x24] sm:$0xf] }
 0x4dd   : > { %10272 = vrot.lane.b32.xlu0 %v10271_v36, %s10296_s25  ;;  %v6995_v56 = vsel %vm4639_vm11, %v6987_v38, %v6980_v21  ;;  %v7060_v42 = vsel %vm4928_vm10, %v7058_v14, %v7059_v58  ;;  %v7067_v2 = vsel %vm4928_vm10, %v7059_v58, %v7052_v46  ;;  %v7149_v21 = vsel %vm5859_vm12, %v7045_v35, %v10260_v55  ;;  %v9533_v55 = vld [vmem:[%s14293_s7 + $0x2d0] sm:$0xf]  ;;  %v9205_v36 = vld [vmem:[%s14293_s7 + $0x40] sm:$0xf]  ;;  %v9191_v0 = vld [vmem:[%s14293_s7 + $0x28] sm:$0xf0] }
 0x4de   : > { %v7044_v16 = vsel %vm7004_vm7, %v6995_v56, 0.0  ;;  %v7122_v27 = vsel %vm7090_vm14, %v7060_v42, 0.0  ;;  %v7123_v6 = vsel %vm7091_vm2, %v7067_v2, 0.0  ;;  %v7001_v46 = vadd.s32 4294967295, %v6849_v48  ;;  %v9461_v56 = vld [vmem:[%s14293_s7 + $0x240] sm:$0xf] }
 0x4df   : > { %v7163_v24 = vpack.c.bf16 %v7123_v6, %v7122_v27  ;;  %v7148_v60 = vsel %vm5859_vm12, %v7044_v16, %v10259_v15  ;;  %v9470_v58 = vor.u32 %v9928_v7, %v9469_v26  ;;  %v9862_v15 = vld [vmem:[%s14293_s7 + $0x44] sm:$0xf0]  ;;  %8318 = vmatpush.bf16.msrb.mxu1 %v9542_v41  ;;  %v9534_v50 = vor.u32 %v9944_v47, %v9533_v55  ;;  %v9525_v2 = vld [vmem:[%s14293_s7 + $0x2c0] sm:$0xf]  ;;  %v9197_v27 = vld [vmem:[%s14293_s7 + $0x30] sm:$0xf] }
 0x4e0   : > { %v7156_v32 = vpack.c.bf16 %v7149_v21, %v7148_v60  ;;  %vm7009_vm10 = vcmp.ge.s32.totalorder %v7001_v46, 0  ;;  %v9926_v42 = vld [vmem:[%s14293_s7 + $0x244] sm:$0xf0]  ;;  %v9206_v35 = vor.u32 %v9862_v15, %v9205_v36  ;;  %v9860_v6 = vld [vmem:[%s14293_s7 + $0x34] sm:$0xf0]  ;;  %v9678_v4 = vor.u32 %v9980_v31, %v9677_v29 }
 0x4e1   : > { %9170 = vmatmul.msk.bf16.gmra.mxu3 %vm5859_vm12, %v7163_v24  ;;  %v7049_v39 = vsel %vm7009_vm10, %v6990_v13, 0.0  ;;  %8306 = vmatpush.bf16.msra.mxu2 %v9470_v58  ;;  %v9462_v16 = vor.u32 %v9926_v42, %v9461_v56  ;;  %v9453_v24 = vld [vmem:[%s14293_s7 + $0x230] sm:$0xf]  ;;  %v9924_v60 = vld [vmem:[%s14293_s7 + $0x234] sm:$0xf0]  ;;  %v9198_v46 = vor.u32 %v9860_v6, %v9197_v27  ;;  %v13434_v6 = vpop.f32.mrf.mxu3  ;;  %v9194_v29 = vor.u32 %v9857_v62, %v9191_v0 }
 0x4e2   : > { %7284 = vmatmul.bf16.vlgmr.msra.gmra.mxu1 %v7156_v32  ;;  %v9517_v32 = vld [vmem:[%s14293_s7 + $0x2b0] sm:$0xf]  ;;  %v9454_v13 = vor.u32 %v9924_v60, %v9453_v24  ;;  %v9669_v41 = vld [vmem:[%s14293_s7 + $0x3e0] sm:$0xf]  ;;  %v9978_v26 = vld [vmem:[%s14293_s7 + $0x3e4] sm:$0xf0] }
 0x4e3   : > { %8319 = vmatpush.bf16.msrb.mxu1 %v9534_v50  ;;  %v9865_v7 = vld [vmem:[%s14293_s7 + $0x64] sm:$0xf]  ;;  %v9223_v55 = vld [vmem:[%s14293_s7 + $0x68] sm:$0xf0]  ;;  %v9277_v58 = vld [vmem:[%s14293_s7 + $0xd0] sm:$0xf] }
 0x4e4   : > { %v9880_v36 = vld [vmem:[%s14293_s7 + $0xd4] sm:$0xf0]  ;;  %v9226_v15 = vor.u32 %v9865_v7, %v9223_v55  ;;  %v9661_v50 = vld [vmem:[%s14293_s7 + $0x3d0] sm:$0xf]  ;;  %v9863_v42 = vld [vmem:[%s14293_s7 + $0x54] sm:$0xf] }
 0x4e5   : > { %8307 = vmatpush.bf16.msra.mxu2 %v9462_v16  ;;  %v9976_v56 = vld [vmem:[%s14293_s7 + $0x3d4] sm:$0xf0]  ;;  %v9245_v31 = vld [vmem:[%s14293_s7 + $0x90] sm:$0xf]  ;;  %v9853_v7 = vld [vmem:[%s14293_s7 + $0x4] sm:$0xf] }
 0x4e6   : > { %v9175_v55 = vld [vmem:[%s14293_s7 + $0x8] sm:$0xf0] }
 0x4e9   : > { %8308 = vmatpush.bf16.msra.mxu2 %v9454_v13  ;;  %v13438_v24 = vpop.f32.mrf.mxu3  ;;  %v9878_v13 = vld [vmem:[%s14293_s7 + $0xc4] sm:$0xf0] }
 0x4f2   : > { %7289 = vmatmul.bf16.gmra.mxu1 %v7158_v44  ;;  %v6986_v44 = vrot.slane %v13129_v49, 7 }
 0x4f4   : > { %v6988_v23 = vsel %vm4639_vm11, %v6986_v44, %v6987_v38  ;;  %v6989_v48 = vsel %vm4639_vm11, %v6985_v63, %v6986_v44  ;;  %v9214_v38 = vor.u32 %v9864_v54, %v9213_v61  ;;  %v9940_v63 = vld [vmem:[%s14293_s7 + $0x2b4] sm:$0xf0]  ;;  %v9882_v61 = vld [vmem:[%s14293_s7 + $0xe4] sm:$0xf0]  ;;  %v9234_v54 = vor.u32 %v9867_v33, %v9231_v53  ;;  %v9629_v33 = vld [vmem:[%s14293_s7 + $0x390] sm:$0xf] }
 0x4f5   : > { %v7050_v25 = vsel %vm7010_vm15, %v6989_v48, 0.0  ;;  %v7051_v8 = vsel %vm7011_vm13, %v6988_v23, 0.0  ;;  %v9856_v23 = vld [vmem:[%s14293_s7 + $0x14] sm:$0xf0]  ;;  %v9286_v47 = vor.u32 %v9882_v61, %v9285_v40  ;;  %v9237_v61 = vld [vmem:[%s14293_s7 + $0x80] sm:$0xf] }
 0x4f6   : > { %8254 = vmatpush.bf16.msra.mxu3 %v9214_v38  ;;  %v9670_v38 = vor.u32 %v9978_v26, %v9669_v41  ;;  %v9621_v41 = vld [vmem:[%s14293_s7 + $0x380] sm:$0xf]  ;;  %v9966_v26 = vld [vmem:[%s14293_s7 + $0x384] sm:$0xf0]  ;;  %vm14532_vm11 = vcmask 1045509  }
 0x4f7   : > { %v10268_v14 = vpop.permute.xlu2 %10267  ;;  %vm14533_vm1 = vmmov %vm14532_vm11 }
 0x4f8   : > { %v10270_v1 = vunpack.i.h.bf16 %v10268_v14  ;;  %v10269_v37 = vunpack.i.l.bf16 %v10268_v14  ;;  %v9189_v14 = vld [vmem:[%s14293_s7 + $0x20] sm:$0xf]  ;;  %vm14534_vm7 = vmmov %vm14533_vm1 }
 0x4f9   : > { %vm14535_vm2 = vmmov %vm14533_vm1 }
 0x4fa   : > { %v7152_v5 = vsel %vm5859_vm12, %v7048_v51, %v10269_v37  ;;  %v7153_v52 = vsel %vm5859_vm12, %v7049_v39, %v10270_v1  ;;  %v9942_v51 = vld [vmem:[%s14293_s7 + $0x2c4] sm:$0xf0]  ;;  %8255 = vmatpush.bf16.msra.mxu3 %v9206_v35  ;;  %v9518_v37 = vor.u32 %v9940_v63, %v9517_v32  ;;  %v9445_v39 = vld [vmem:[%s14293_s7 + $0x220] sm:$0xf]  ;;  %v9662_v35 = vor.u32 %v9976_v56, %v9661_v50  ;;  %vm14536_vm14 = vmmov %vm14533_vm1 }
 0x4fb   : > { %v7160_v19 = vpack.c.bf16 %v7153_v52, %v7152_v5  ;;  %v9526_v21 = vor.u32 %v9942_v51, %v9525_v2  ;;  %v9858_v1 = vld [vmem:[%s14293_s7 + $0x24] sm:$0xf0]  ;;  %v9509_v52 = vld [vmem:[%s14293_s7 + $0x2a0] sm:$0xf]  ;;  %v9215_v2 = vld [vmem:[%s14293_s7 + $0x58] sm:$0xf0]  ;;  %v9278_v51 = vor.u32 %v9880_v36, %v9277_v58  ;;  %v9178_v58 = vor.u32 %v9853_v7, %v9175_v55 }
 0x4fc   : > { %v9922_v5 = vld [vmem:[%s14293_s7 + $0x224] sm:$0xf0]  ;;  %v9190_v44 = vor.u32 %v9858_v1, %v9189_v14  ;;  %v9218_v16 = vor.u32 %v9863_v42, %v9215_v2  ;;  %v9653_v14 = vld [vmem:[%s14293_s7 + $0x3c0] sm:$0xf]  ;;  %v9900_v7 = vld [vmem:[%s14293_s7 + $0x174] sm:$0xf0] }
 0x4fd   : > { %8320 = vmatpush.bf16.msrb.mxu1 %v9526_v21  ;;  %v9446_v17 = vor.u32 %v9922_v5, %v9445_v39  ;;  %v9974_v39 = vld [vmem:[%s14293_s7 + $0x3c4] sm:$0xf0]  ;;  %v9861_v5 = vld [vmem:[%s14293_s7 + $0x44] sm:$0xf]  ;;  %v10278_v36 = vld [vmem:[%s14292_s6] ss:$0 sm:$0xff] }
 0x4fe   : > { %8256 = vmatpush.bf16.msra.mxu3 %v9198_v46  ;;  %v9269_v46 = vld [vmem:[%s14293_s7 + $0xc0] sm:$0xf]  ;;  %vm14537_vm0 = vmmov %vm14533_vm1 }
 0x4ff   : > { %8309 = vmatpush.bf16.msra.mxu2 %v9446_v17  ;;  %v9261_v17 = vld [vmem:[%s14293_s7 + $0xb0] sm:$0xf]  ;;  %vm14538_vm10 = vmmov %vm14537_vm0 }
 0x500   : > { %v13442_v32 = vpop.f32.mrf.mxu3 }
 0x501   : > { %8321 = vmatpush.bf16.msrb.mxu1 %v9518_v37  ;;  %v9270_v37 = vor.u32 %v9878_v13, %v9269_v46 }
 0x502   : > { %7294 = vmatmul.bf16.gmra.mxu1 %v7160_v19  ;;  %v9938_v19 = vld [vmem:[%s14293_s7 + $0x2a4] sm:$0xf0]  ;;  %8257 = vmatpush.bf16.msra.mxu3 %v9190_v44 }
 0x503   : > { %v9510_v48 = vor.u32 %v9938_v19, %v9509_v52  ;;  %v9207_v52 = vld [vmem:[%s14293_s7 + $0x48] sm:$0xf0]  ;;  %v9654_v19 = vor.u32 %v9974_v39, %v9653_v14 }
 0x504   : > { %v9210_v44 = vor.u32 %v9861_v5, %v9207_v52 }
 0x505   : > { %8322 = vmatpush.bf16.msrb.mxu1 %v9510_v48 }
 0x508   : > { %v13455_v1 = vpop.f32.mrf.mxu3 }
 0x544   : > { %v7324_v30 = vpop.f32.mrf.mxu3 }
 0x54f   : > { %v10273_v3 = vpop.permute.xlu0 %10272 }
 0x550   : > { %v10275_v28 = vunpack.i.h.bf16 %v10273_v3  ;;  %v10274_v34 = vunpack.i.l.bf16 %v10273_v3  ;;  %v9437_v3 = vld [vmem:[%s14293_s7 + $0x210] sm:$0xf] }
 0x552   : > { %v7154_v59 = vsel %vm5859_vm12, %v7050_v25, %v10274_v34  ;;  %v7155_v9 = vsel %vm5859_vm12, %v7051_v8, %v10275_v28  ;;  %v9920_v28 = vld [vmem:[%s14293_s7 + $0x214] sm:$0xf0]  ;;  %v9501_v34 = vld [vmem:[%s14293_s7 + $0x290] sm:$0xf]  ;;  %v9182_v8 = vor.u32 %v9856_v23, %v9181_v22 }
 0x553   : > { %v7162_v49 = vpack.c.bf16 %v7155_v9, %v7154_v59  ;;  %v9936_v25 = vld [vmem:[%s14293_s7 + $0x294] sm:$0xf0]  ;;  %v9173_v59 = vld [vmem:[%s14293_s7] sm:$0xf]  ;;  %v9438_v9 = vor.u32 %v9920_v28, %v9437_v3  ;;  %v9645_v23 = vld [vmem:[%s14293_s7 + $0x3b0] sm:$0xf] }
 0x554   : > { %v9502_v20 = vor.u32 %v9936_v25, %v9501_v34  ;;  %8258 = vmatpush.bf16.msra.mxu3 %v9182_v8  ;;  %v9876_v22 = vld [vmem:[%s14293_s7 + $0xb4] sm:$0xf0]  ;;  %v9859_v28 = vld [vmem:[%s14293_s7 + $0x34] sm:$0xf]  ;;  %v9199_v34 = vld [vmem:[%s14293_s7 + $0x38] sm:$0xf0] }
 0x555   : > { %7299 = vmatmul.bf16.gmra.mxu1 %v7162_v49  ;;  %v9854_v49 = vld [vmem:[%s14293_s7 + $0x4] sm:$0xf0]  ;;  %8310 = vmatpush.bf16.msra.mxu2 %v9438_v9  ;;  %v9262_v48 = vor.u32 %v9876_v22, %v9261_v17  ;;  %v9972_v3 = vld [vmem:[%s14293_s7 + $0x3b4] sm:$0xf0]  ;;  %v9202_v8 = vor.u32 %v9859_v28, %v9199_v34 }
 0x556   : > { %v9174_v11 = vor.u32 %v9854_v49, %v9173_v59  ;;  %8323 = vmatpush.bf16.msrb.mxu1 %v9502_v20  ;;  %v9646_v25 = vor.u32 %v9972_v3, %v9645_v23  ;;  %v9253_v59 = vld [vmem:[%s14293_s7 + $0xa0] sm:$0xf]  ;;  %v9874_v9 = vld [vmem:[%s14293_s7 + $0xa4] sm:$0xf0] }
 0x557   : > { %v9637_v49 = vld [vmem:[%s14293_s7 + $0x3a0] sm:$0xf]  ;;  %v9254_v20 = vor.u32 %v9874_v9, %v9253_v59 }
 0x558   : > { %8259 = vmatpush.bf16.msra.mxu3 %v9174_v11  ;;  %v9638_v12 = vor.u32 %v9970_v10, %v9637_v49  ;;  %v9872_v11 = vld [vmem:[%s14293_s7 + $0x94] sm:$0xf0] }
 0x559   : > { %8311 = vmatpush.bf16.msra.mxu2 %v9430_v45  ;;  %v9246_v53 = vor.u32 %v9872_v11, %v9245_v31  ;;  %v9968_v45 = vld [vmem:[%s14293_s7 + $0x394] sm:$0xf0] }
 0x55a   : > { %8324 = vmatpush.bf16.msrb.mxu1 %v9494_v57  ;;  %v9183_v57 = vld [vmem:[%s14293_s7 + $0x18] sm:$0xf0] }
 0x55c   : > { %8265 = vmatpush.bf16.msrb.mxu3 %v9294_v43  ;;  %v9855_v43 = vld [vmem:[%s14293_s7 + $0x14] sm:$0xf] }
 0x55d   : > { %8343 = vmatpush.bf16.msrb.mxu2 %v9678_v4  ;;  %v9630_v4 = vor.u32 %v9968_v45, %v9629_v33  ;;  %v9186_v40 = vor.u32 %v9855_v43, %v9183_v57 }
 0x55e   : > { %8356 = vmatpush.bf16.msra.mxu1 %v9234_v54  ;;  %v9870_v54 = vld [vmem:[%s14293_s7 + $0x84] sm:$0xf0] }
 0x55f   : > { %v13432_v27 = vpop.f32.mrf.mxu1 }
 0x560   : > { %8266 = vmatpush.bf16.msrb.mxu3 %v9286_v47  ;;  %v9238_v47 = vor.u32 %v9870_v54, %v9237_v61 }
 0x561   : > { %8344 = vmatpush.bf16.msrb.mxu2 %v9670_v38  ;;  %v9622_v38 = vor.u32 %v9966_v26, %v9621_v41  ;;  %v9357_v26 = vld [vmem:[%s14293_s7 + $0x170] sm:$0xf] }
 0x562   : > { %8357 = vmatpush.bf16.msra.mxu1 %v9226_v15  ;;  %v7326_v15 = vpop.f32.mrf.mxu3 }
 0x564   : > { %8267 = vmatpush.bf16.msrb.mxu3 %v9278_v51  ;;  %v7286_v51 = vadd.f32 %v10278_v36, %v13432_v27 }
 0x565   : > { %8345 = vmatpush.bf16.msrb.mxu2 %v9662_v35 }
 0x566   : > { %8358 = vmatpush.bf16.msra.mxu1 %v9218_v16 }
 0x567   : > { %v13436_v21 = vpop.f32.mrf.mxu1 }
 0x568   : > { %8268 = vmatpush.bf16.msrb.mxu3 %v9270_v37  ;;  %v7288_v50 = vadd.f32 %v10278_v36, %v13436_v21  ;;  %v7315_v21 = vadd.f32 %v13434_v6, %v7286_v51 }
 0x569   : > { %8346 = vmatpush.bf16.msrb.mxu2 %v9654_v19 }
 0x56a   : > { %8359 = vmatpush.bf16.msra.mxu1 %v9210_v44  ;;  %v7317_v16 = vadd.f32 %v13438_v24, %v7288_v50  ;;  %v7329_v39 = vpop.f32.mrf.mxu3  ;;  %v13555_v44 = vmax.f32 %v7315_v21, 0.0  ;;  %v9359_v50 = vld [vmem:[%s14293_s7 + $0x178] sm:$0xf0] }
 0x56c   : > { %8269 = vmatpush.bf16.msrb.mxu3 %v9262_v48  ;;  %v13549_v5 = vmax.f32 %v7317_v16, 0.0  ;;  %v7410_v28 = vrot.slane %v13555_v44, 4  ;;  %v7425_v10 = vrot.slane %v13555_v44, 5  ;;  %v9423_v16 = vld [vmem:[%s14293_s7 + $0x1f8] sm:$0xf0] }
 0x56d   : > { %8347 = vmatpush.bf16.msrb.mxu2 %v9646_v25 }
 0x56e   : > { %8360 = vmatpush.bf16.msra.mxu1 %v9202_v8  ;;  %v7350_v6 = vrot.slane %v13549_v5, 7  ;;  %v7411_v17 = vrot.slane %v13549_v5, 3  ;;  %v7426_v25 = vrot.slane %v13549_v5, 4 }
 0x56f   : > { %v13440_v60 = vpop.f32.mrf.mxu1 }
 0x570   : > { %8270 = vmatpush.bf16.msrb.mxu3 %v9254_v20  ;;  %v7291_v42 = vadd.f32 %v10278_v36, %v13440_v60  ;;  %v7351_v9 = vsel %vm4055_vm3, %v7350_v6, %v13555_v44  ;;  %v7412_v20 = vsel %vm4055_vm3, %v7411_v17, %v7410_v28  ;;  %v7427_v43 = vsel %vm4055_vm3, %v7426_v25, %v7425_v10  ;;  %v9913_v28 = vld [vmem:[%s14293_s7 + $0x1e4] sm:$0xf]  ;;  %v9341_v25 = vld [vmem:[%s14293_s7 + $0x150] sm:$0xf]  ;;  %v9407_v10 = vld [vmem:[%s14293_s7 + $0x1d8] sm:$0xf0] }
 0x571   : > { %8348 = vmatpush.bf16.msrb.mxu2 %v9638_v12 }
 0x572   : > { %8361 = vmatpush.bf16.msra.mxu1 %v9194_v29  ;;  %v7320_v13 = vadd.f32 %v13442_v32, %v7291_v42  ;;  %v7331_v0 = vpop.f32.mrf.mxu3 }
 0x574   : > { %8271 = vmatpush.bf16.msrb.mxu3 %v9246_v53 }
 0x575   : > { %8349 = vmatpush.bf16.msrb.mxu2 %v9630_v4 }
 0x576   : > { %8362 = vmatpush.bf16.msra.mxu1 %v9186_v40 }
 0x577   : > { %v13444_v63 = vpop.f32.mrf.mxu1 }
 0x578   : > { %8272 = vmatpush.bf16.msrb.mxu3 %v9238_v47  ;;  %v7293_v2 = vadd.f32 %v10278_v36, %v13444_v63  ;;  %v13551_v63 = vmax.f32 %v7320_v13, 0.0  ;;  %v9358_v13 = vor.u32 %v9900_v7, %v9357_v26 }
 0x579   : > { %8350 = vmatpush.bf16.msrb.mxu2 %v9622_v38 }
 0x57a   : > { %8363 = vmatpush.bf16.msra.mxu1 %v9178_v58  ;;  %v7322_v14 = vadd.f32 %v13455_v1, %v7293_v2  ;;  %v7352_v22 = vrot.slane %v13551_v63, 6  ;;  %v7413_v48 = vrot.slane %v13551_v63, 2 }
 0x57c   : > { %v13553_v27 = vmax.f32 %v7322_v14, 0.0  ;;  %v7353_v12 = vsel %vm4057_vm4, %v7352_v22, %v7351_v9  ;;  %v7414_v29 = vsel %vm4057_vm4, %v7413_v48, %v7412_v20  ;;  %v9897_v48 = vld [vmem:[%s14293_s7 + $0x164] sm:$0xf]  ;;  %v9895_v9 = vld [vmem:[%s14293_s7 + $0x154] sm:$0xf] }
 0x57d   : > { %v9911_v20 = vld [vmem:[%s14293_s7 + $0x1d4] sm:$0xf] }
 0x57e   : > { %v7354_v23 = vrot.slane %v13553_v27, 5  ;;  %v7415_v34 = vrot.slane %v13553_v27, 1  ;;  %v7430_v62 = vrot.slane %v13553_v27, 2 }
 0x57f   : > { %v7295_v18 = vpop.f32.mrf.mxu1 }
 0x580   : > { %v7296_v35 = vadd.f32 %v10278_v36, %v7295_v18  ;;  %v7355_v53 = vsel %vm4059_vm5, %v7354_v23, %v7353_v12  ;;  %v7416_v45 = vsel %vm4059_vm5, %v7415_v34, %v7414_v29  ;;  %v9415_v34 = vld [vmem:[%s14293_s7 + $0x1e8] sm:$0xf0]  ;;  %v7367_v29 = vrot.slane %v13551_v63, 7 }
 0x582   : > { %v7325_v37 = vadd.f32 %v7324_v30, %v7296_v35  ;;  %v7428_v30 = vrot.slane %v13551_v63, 3 }
 0x584   : > { %v13557_v24 = vmax.f32 %v7325_v37, 0.0  ;;  %v7429_v40 = vsel %vm4057_vm4, %v7428_v30, %v7427_v43 }
 0x585   : > { %v7431_v47 = vsel %vm4059_vm5, %v7430_v62, %v7429_v40  ;;  %v7456_v62 = vrot.slane %v13549_v5, 6 }
 0x586   : > { %v7356_v3 = vrot.slane %v13557_v24, 4  ;;  %v7432_v11 = vrot.slane %v13557_v24, 1  ;;  %v7417_v55 = vsel %vm4061_vm6, %v13557_v24, %v7416_v45  ;;  %v7460_v45 = vrot.slane %v13553_v27, 4 }
 0x587   : > { %v7297_v56 = vpop.f32.mrf.mxu1  ;;  %v7462_v40 = vrot.slane %v13557_v24, 3 }
 0x588   : > { %v7298_v46 = vadd.f32 %v10278_v36, %v7297_v56  ;;  %v7357_v41 = vsel %vm4061_vm6, %v7356_v3, %v7355_v53  ;;  %v9915_v56 = vld [vmem:[%s14293_s7 + $0x1f4] sm:$0xf]  ;;  %v9351_v3 = vld [vmem:[%s14293_s7 + $0x168] sm:$0xf0]  ;;  %v7455_v53 = vrot.slane %v13555_v44, 7 }
 0x589   : > { %v9426_v23 = vor.u32 %v9915_v56, %v9423_v16 }
 0x58a   : > { %v7327_v52 = vadd.f32 %v7326_v15, %v7298_v46  ;;  %v9899_v15 = vld [vmem:[%s14293_s7 + $0x174] sm:$0xf] }
 0x58c   : > { %v13559_v32 = vmax.f32 %v7327_v52, 0.0 }
 0x58e   : > { %v7358_v49 = vrot.slane %v13559_v32, 3  ;;  %v7418_v31 = vrot.slane %v13559_v32, 7  ;;  %v7373_v7 = vrot.slane %v13559_v32, 4 }
 0x590   : > { %v7359_v38 = vsel %vm14532_vm11, %v7358_v49, %v7357_v41  ;;  %v7419_v58 = vsel %vm14533_vm1, %v7418_v31, %v7417_v55  ;;  %v9343_v49 = vld [vmem:[%s14293_s7 + $0x158] sm:$0xf0]  ;;  %v7458_v31 = vrot.slane %v13551_v63, 5  ;;  %v9894_v41 = vld [vmem:[%s14293_s7 + $0x144] sm:$0xf0]  ;;  %v7457_v55 = vsel %vm4055_vm3, %v7456_v62, %v7455_v53 }
 0x591   : > { %v9346_v43 = vor.u32 %v9895_v9, %v9343_v49  ;;  %v9890_v62 = vld [vmem:[%s14293_s7 + $0x124] sm:$0xf0]  ;;  %v7381_v53 = vrot.slane %v13549_v5, 1 }
 0x5d2   : > { %v7300_v60 = vpop.f32.mrf.mxu1 }
 0x5d3   : > { %v7301_v19 = vadd.f32 %v10278_v36, %v7300_v60  ;;  %v9362_v60 = vor.u32 %v9899_v15, %v9359_v50  ;;  %v7459_v50 = vsel %vm4057_vm4, %v7458_v31, %v7457_v55  ;;  %v9383_v31 = vld [vmem:[%s14293_s7 + $0x1a8] sm:$0xf0] }
 0x5d4   : > { %v7461_v16 = vsel %vm4059_vm5, %v7460_v45, %v7459_v50 }
 0x5d5   : > { %v7330_v1 = vadd.f32 %v7329_v39, %v7301_v19  ;;  %v9349_v19 = vld [vmem:[%s14293_s7 + $0x160] sm:$0xf] }
 0x5d7   : > { %v13570_v8 = vmax.f32 %v7330_v1, 0.0  ;;  %v9898_v1 = vld [vmem:[%s14293_s7 + $0x164] sm:$0xf0] }
 0x5d8   : > { %v9350_v30 = vor.u32 %v9898_v1, %v9349_v19  ;;  %v9892_v1 = vld [vmem:[%s14293_s7 + $0x134] sm:$0xf0] }
 0x5d9   : > { %v7360_v57 = vrot.slane %v13570_v8, 2  ;;  %v7420_v4 = vrot.slane %v13570_v8, 6  ;;  %v7435_v61 = vrot.slane %v13570_v8, 7  ;;  %v7375_v15 = vrot.slane %v13570_v8, 3 }
 0x5da   : > { %v7302_v59 = vpop.f32.mrf.mxu1  ;;  %v7466_v56 = vrot.slane %v13570_v8, 1 }
 0x5db   : > { %v7303_v18 = vadd.f32 %v10278_v36, %v7302_v59  ;;  %v7433_v36 = vsel %vm4061_vm6, %v7432_v11, %v7431_v47  ;;  %v7361_v46 = vsel %vm4065_vm8, %v7360_v57, %v7359_v38  ;;  %v7421_v14 = vsel %vm4065_vm8, %v7420_v4, %v7419_v58  ;;  %v9896_v59 = vld [vmem:[%s14293_s7 + $0x154] sm:$0xf0]  ;;  %v9893_v38 = vld [vmem:[%s14293_s7 + $0x144] sm:$0xf]  ;;  %v9335_v58 = vld [vmem:[%s14293_s7 + $0x148] sm:$0xf0] }
 0x5dc   : > { %v7434_v51 = vsel %vm14534_vm7, %v13559_v32, %v7433_v36  ;;  %v9342_v12 = vor.u32 %v9896_v59, %v9341_v25  ;;  %v7365_v11 = vrot.slane %v13555_v44, 1  ;;  %v9410_v57 = vor.u32 %v9911_v20, %v9407_v10  ;;  %v9907_v25 = vld [vmem:[%s14293_s7 + $0x1b4] sm:$0xf]  ;;  %v9391_v59 = vld [vmem:[%s14293_s7 + $0x1b8] sm:$0xf0] }
 0x5dd   : > { %v7332_v33 = vadd.f32 %v7331_v0, %v7303_v18  ;;  %v7436_v21 = vsel %vm4065_vm8, %v7435_v61, %v7434_v51  ;;  %v9354_v18 = vor.u32 %v9897_v48, %v9351_v3  ;;  %v9418_v0 = vor.u32 %v9913_v28, %v9415_v34  ;;  %v9333_v61 = vld [vmem:[%s14293_s7 + $0x140] sm:$0xf]  ;;  %v9891_v48 = vld [vmem:[%s14293_s7 + $0x134] sm:$0xf]  ;;  %v9327_v3 = vld [vmem:[%s14293_s7 + $0x138] sm:$0xf0] }
 0x5de   : > { %v7371_v4 = vrot.slane %v13557_v24, 5  ;;  %v7366_v26 = vsel %vm4055_vm3, %v13549_v5, %v7365_v11  ;;  %v7464_v47 = vrot.slane %v13559_v32, 2  ;;  %v9330_v49 = vor.u32 %v9891_v48, %v9327_v3  ;;  %v9309_v11 = vld [vmem:[%s14293_s7 + $0x110] sm:$0xf] }
 0x5df   : > { %v13590_v54 = vmax.f32 %v7332_v33, 0.0  ;;  %v7369_v33 = vrot.slane %v13553_v27, 6  ;;  %v7368_v36 = vsel %vm4057_vm4, %v7367_v29, %v7366_v26  ;;  %v9394_v10 = vor.u32 %v9907_v25, %v9391_v59  ;;  %v9905_v29 = vld [vmem:[%s14293_s7 + $0x1a4] sm:$0xf] }
 0x5e0   : > { %v7384_v26 = vrot.slane %v13553_v27, 7  ;;  %v7405_v3 = vrot.slane %v13570_v8, 5 }
 0x5e1   : > { %v7362_v42 = vrot.slane %v13590_v54, 1  ;;  %v7422_v2 = vrot.slane %v13590_v54, 5  ;;  %v7437_v35 = vrot.slane %v13590_v54, 6  ;;  %v7370_v51 = vsel %vm4059_vm5, %v7369_v33, %v7368_v36  ;;  %v9888_v33 = vld [vmem:[%s14293_s7 + $0x114] sm:$0xf0] }
 0x5e2   : > { %v9310_v55 = vor.u32 %v9888_v33, %v9309_v11  ;;  %v9301_v36 = vld [vmem:[%s14293_s7 + $0x100] sm:$0xf] }
 0x5e3   : > { %v7363_v37 = vsel %vm4067_vm9, %v7362_v42, %v7361_v46  ;;  %v7423_v39 = vsel %vm4067_vm9, %v7422_v2, %v7421_v14  ;;  %v7438_v52 = vsel %vm4067_vm9, %v7437_v35, %v7436_v21  ;;  %v9909_v42 = vld [vmem:[%s14293_s7 + $0x1c4] sm:$0xf]  ;;  %v9399_v2 = vld [vmem:[%s14293_s7 + $0x1c8] sm:$0xf0]  ;;  %v7377_v35 = vrot.slane %v13590_v54, 2 }
 0x5e4   : > { %v13634_v6 = vpack.c.bf16 %v7363_v37, %v7363_v37  ;;  %v13636_v17 = vpack.c.bf16 %v7423_v39, %v7423_v39  ;;  %v13638_v22 = vpack.c.bf16 %v7438_v52, %v7438_v52  ;;  %v7372_v46 = vsel %vm4061_vm6, %v7371_v4, %v7370_v51  ;;  %v9325_v39 = vld [vmem:[%s14293_s7 + $0x130] sm:$0xf]  ;;  %v9311_v4 = vld [vmem:[%s14293_s7 + $0x118] sm:$0xf0]  ;;  %v9885_v51 = vld [vmem:[%s14293_s7 + $0x104] sm:$0xf] }
 0x5e5   : > { %v9334_v14 = vor.u32 %v9894_v41, %v9333_v61  ;;  %v9338_v21 = vor.u32 %v9893_v38, %v9335_v58  ;;  %v7374_v37 = vsel %vm14535_vm2, %v7373_v7, %v7372_v46  ;;  %v9326_v9 = vor.u32 %v9892_v1, %v9325_v39  ;;  %v9916_v1 = vld [vmem:[%s14293_s7 + $0x1f4] sm:$0xf0] }
 0x5e6   : > { %8260 = vmatmul.bf16.vlgmr.msra.gmra.mxu3 %v13634_v6  ;;  %8312 = vmatmul.bf16.vlgmr.msra.gmra.mxu2 %v13636_v17  ;;  %v7376_v19 = vsel %vm4065_vm8, %v7375_v15, %v7374_v37  ;;  %v9386_v61 = vor.u32 %v9905_v29, %v9383_v31  ;;  %v7380_v41 = vrot.slane %v13555_v44, 2  ;;  %v7396_v7 = vrot.slane %v13549_v5, 2  ;;  %v9886_v15 = vld [vmem:[%s14293_s7 + $0x104] sm:$0xf0] }
 0x5e7   : > { %8278 = vmatpush.bf16.msra.mxu3 %v9358_v13  ;;  %8325 = vmatmul.bf16.vlgmr.msrb.gmra.mxu1 %v13638_v22  ;;  %v7463_v13 = vsel %vm4061_vm6, %v7462_v40, %v7461_v16  ;;  %v7378_v28 = vsel %vm4067_vm9, %v7377_v35, %v7376_v19  ;;  %v9903_v40 = vld [vmem:[%s14293_s7 + $0x194] sm:$0xf]  ;;  %v7398_v38 = vrot.slane %v13551_v63, 1  ;;  %v9303_v35 = vld [vmem:[%s14293_s7 + $0x108] sm:$0xf0]  ;;  %v7390_v46 = vrot.slane %v13570_v8, 4 }
 0x5e8   : > { %8382 = vmatpush.bf16.msra.mxu2 %v9362_v60  ;;  %8395 = vmatpush.bf16.msrb.mxu1 %v9426_v23  ;;  %v7465_v52 = vsel %vm14536_vm14, %v7464_v47, %v7463_v13  ;;  %v9402_v60 = vor.u32 %v9909_v42, %v9399_v2  ;;  %v7386_v47 = vrot.slane %v13557_v24, 6  ;;  %v7382_v50 = vsel %vm4055_vm3, %v7381_v53, %v7380_v41  ;;  %v9421_v19 = vld [vmem:[%s14293_s7 + $0x1f0] sm:$0xf] }
 0x5e9   : > { %v7467_v23 = vsel %vm4065_vm8, %v7466_v56, %v7465_v52  ;;  %v7388_v56 = vrot.slane %v13559_v32, 5  ;;  %v7395_v42 = vrot.slane %v13555_v44, 3  ;;  %v7383_v16 = vsel %vm4057_vm4, %v13551_v63, %v7382_v50 }
 0x5ea   : > { %v7468_v34 = vsel %vm4067_vm9, %v13590_v54, %v7467_v23  ;;  %v7401_v13 = vrot.slane %v13557_v24, 7  ;;  %v7385_v37 = vsel %vm4059_vm5, %v7384_v26, %v7383_v16  ;;  %v7392_v39 = vrot.slane %v13590_v54, 3  ;;  %v9961_v26 = vld [vmem:[%s14293_s7 + $0x364] sm:$0xf] }
 0x5eb   : > { %8279 = vmatpush.bf16.msra.mxu3 %v9350_v30  ;;  %v9317_v30 = vld [vmem:[%s14293_s7 + $0x120] sm:$0xf]  ;;  %v13744_v20 = vpack.c.bf16 %v7468_v34, %v7468_v34  ;;  %v7397_v52 = vsel %vm4055_vm3, %v7396_v7, %v7395_v42  ;;  %v7387_v23 = vsel %vm4061_vm6, %v7386_v47, %v7385_v37  ;;  %v9551_v34 = vld [vmem:[%s14293_s7 + $0x2f8] sm:$0xf0]  ;;  %v9422_v33 = vor.u32 %v9916_v1, %v9421_v19  ;;  %v9607_v7 = vld [vmem:[%s14293_s7 + $0x368] sm:$0xf0] }
 0x5ec   : > { %8383 = vmatpush.bf16.msra.mxu2 %v9354_v18  ;;  %8396 = vmatpush.bf16.msrb.mxu1 %v9418_v0  ;;  %v13742_v18 = vpack.c.bf16 %v7378_v28, %v7378_v28  ;;  %v9889_v0 = vld [vmem:[%s14293_s7 + $0x124] sm:$0xf]  ;;  %v9318_v45 = vor.u32 %v9890_v62, %v9317_v30  ;;  %v7399_v48 = vsel %vm4057_vm4, %v7398_v38, %v7397_v52  ;;  %v9947_v28 = vld [vmem:[%s14293_s7 + $0x2f4] sm:$0xf]  ;;  %v9615_v62 = vld [vmem:[%s14293_s7 + $0x378] sm:$0xf0] }
 0x5ed   : > { %v7389_v25 = vsel %vm14537_vm0, %v7388_v56, %v7387_v23  ;;  %v7400_v59 = vsel %vm4059_vm5, %v13553_v27, %v7399_v48  ;;  %v9306_v30 = vor.u32 %v9885_v51, %v9303_v35  ;;  %v9554_v53 = vor.u32 %v9947_v28, %v9551_v34  ;;  %v9405_v56 = vld [vmem:[%s14293_s7 + $0x1d0] sm:$0xf]  ;;  %v9535_v42 = vld [vmem:[%s14293_s7 + $0x2d8] sm:$0xf0]  ;;  %v9910_v52 = vld [vmem:[%s14293_s7 + $0x1c4] sm:$0xf0] }
 0x5ee   : > { %v7441_v47 = vrot.slane %v13549_v5, 5  ;;  %v7443_v38 = vrot.slane %v13551_v63, 4  ;;  %v7447_v5 = vrot.slane %v13557_v24, 2  ;;  %v9610_v63 = vor.u32 %v9961_v26, %v9607_v7  ;;  %v9959_v24 = vld [vmem:[%s14293_s7 + $0x354] sm:$0xf] }
 0x5ef   : > { %8280 = vmatpush.bf16.msra.mxu3 %v9342_v12  ;;  %v9319_v12 = vld [vmem:[%s14293_s7 + $0x128] sm:$0xf0]  ;;  %v7449_v51 = vrot.slane %v13559_v32, 1  ;;  %v9599_v35 = vld [vmem:[%s14293_s7 + $0x358] sm:$0xf0] }
 0x5f0   : > { %8384 = vmatpush.bf16.msra.mxu2 %v9346_v43  ;;  %8397 = vmatpush.bf16.msrb.mxu1 %v9410_v57  ;;  %v9322_v43 = vor.u32 %v9889_v0, %v9319_v12  ;;  %v9887_v57 = vld [vmem:[%s14293_s7 + $0x114] sm:$0xf]  ;;  %v7391_v0 = vsel %vm4065_vm8, %v7390_v46, %v7389_v25  ;;  %v7402_v12 = vsel %vm4061_vm6, %v7401_v13, %v7400_v59  ;;  %v7452_v13 = vrot.slane %v13590_v54, 7  ;;  %v9957_v1 = vld [vmem:[%s14293_s7 + $0x344] sm:$0xf] }
 0x5f1   : > { %v9314_v58 = vor.u32 %v9887_v57, %v9311_v4  ;;  %v7393_v31 = vsel %vm4067_vm9, %v7392_v39, %v7391_v0  ;;  %v9602_v39 = vor.u32 %v9959_v24, %v9599_v35  ;;  %v9591_v23 = vld [vmem:[%s14293_s7 + $0x348] sm:$0xf0]  ;;  %v9389_v25 = vld [vmem:[%s14293_s7 + $0x1b0] sm:$0xf]  ;;  %v9951_v26 = vld [vmem:[%s14293_s7 + $0x314] sm:$0xf] }
 0x5f2   : > { %v7472_v41 = vpack.c.bf16 %v7393_v31, %v7393_v31  ;;  %v9594_v59 = vor.u32 %v9957_v1, %v9591_v23  ;;  %v9906_v31 = vld [vmem:[%s14293_s7 + $0x1a4] sm:$0xf0]  ;;  %v9567_v7 = vld [vmem:[%s14293_s7 + $0x318] sm:$0xf0]  ;;  %v9605_v35 = vld [vmem:[%s14293_s7 + $0x360] sm:$0xf] }
 0x5f3   : > { %8281 = vmatpush.bf16.msra.mxu3 %v9334_v14  ;;  %v9901_v14 = vld [vmem:[%s14293_s7 + $0x184] sm:$0xf]  ;;  %v9565_v23 = vld [vmem:[%s14293_s7 + $0x310] sm:$0xf] }
 0x5f4   : > { %8385 = vmatpush.bf16.msra.mxu2 %v9338_v21  ;;  %8398 = vmatpush.bf16.msrb.mxu1 %v9402_v60  ;;  %v9367_v21 = vld [vmem:[%s14293_s7 + $0x188] sm:$0xf0]  ;;  %v7403_v60 = vrot.slane %v13559_v32, 6 }
 0x5f5   : > { %v9370_v29 = vor.u32 %v9901_v14, %v9367_v21  ;;  %v9397_v21 = vld [vmem:[%s14293_s7 + $0x1c0] sm:$0xf] }
 0x5f6   : > { %8273 = vmatmul.bf16.vlgmr.msrb.gmra.mxu3 %v13742_v18  ;;  %8351 = vmatmul.bf16.vlgmr.msrb.gmra.mxu2 %v13744_v20  ;;  %v7404_v11 = vsel %vm14538_vm10, %v7403_v60, %v7402_v12  ;;  %v9527_v60 = vld [vmem:[%s14293_s7 + $0x2c8] sm:$0xf0]  ;;  %v9398_v28 = vor.u32 %v9910_v52, %v9397_v21  ;;  %v9381_v12 = vld [vmem:[%s14293_s7 + $0x1a0] sm:$0xf] }
 0x5f7   : > { %8282 = vmatpush.bf16.msra.mxu3 %v9326_v9  ;;  %8364 = vmatmul.bf16.vlgmr.msra.gmra.mxu1 %v13634_v6  ;;  %v9375_v6 = vld [vmem:[%s14293_s7 + $0x198] sm:$0xf0]  ;;  %v7407_v9 = vrot.slane %v13590_v54, 4  ;;  %v9941_v54 = vld [vmem:[%s14293_s7 + $0x2c4] sm:$0xf] }
 0x5f8   : > { %8386 = vmatpush.bf16.msra.mxu2 %v9330_v49  ;;  %8399 = vmatpush.bf16.msrb.mxu1 %v9394_v10  ;;  %v9378_v2 = vor.u32 %v9903_v40, %v9375_v6  ;;  %v9302_v49 = vor.u32 %v9886_v15, %v9301_v36  ;;  %v9963_v10 = vld [vmem:[%s14293_s7 + $0x374] sm:$0xf]  ;;  %v9914_v40 = vld [vmem:[%s14293_s7 + $0x1e4] sm:$0xf0]  ;;  %v9543_v6 = vld [vmem:[%s14293_s7 + $0x2e8] sm:$0xf0]  ;;  %v9530_v34 = vor.u32 %v9941_v54, %v9527_v60 }
 0x5f9   : > { %v9618_v57 = vor.u32 %v9963_v10, %v9615_v62  ;;  %v9583_v10 = vld [vmem:[%s14293_s7 + $0x338] sm:$0xf0]  ;;  %v9581_v54 = vld [vmem:[%s14293_s7 + $0x330] sm:$0xf]  ;;  %v9573_v60 = vld [vmem:[%s14293_s7 + $0x320] sm:$0xf] }
 0x5fb   : > { %8283 = vmatpush.bf16.msra.mxu3 %v9318_v45  ;;  %v7406_v45 = vsel %vm4065_vm8, %v7405_v3, %v7404_v11  ;;  %v9937_v11 = vld [vmem:[%s14293_s7 + $0x2a4] sm:$0xf] }
 0x5fc   : > { %8387 = vmatpush.bf16.msra.mxu2 %v9322_v43  ;;  %8400 = vmatpush.bf16.msrb.mxu1 %v9386_v61  ;;  %v9413_v43 = vld [vmem:[%s14293_s7 + $0x1e0] sm:$0xf]  ;;  %v7408_v4 = vsel %vm4067_vm9, %v7407_v9, %v7406_v45  ;;  %v9945_v61 = vld [vmem:[%s14293_s7 + $0x2e4] sm:$0xf]  ;;  %v9908_v9 = vld [vmem:[%s14293_s7 + $0x1b4] sm:$0xf0] }
 0x5fd   : > { %v13870_v36 = vpack.c.bf16 %v7408_v4, %v7408_v4  ;;  %v9414_v15 = vor.u32 %v9914_v40, %v9413_v43  ;;  %v9546_v50 = vor.u32 %v9945_v61, %v9543_v6  ;;  %v9390_v62 = vor.u32 %v9908_v9, %v9389_v25  ;;  %v9575_v45 = vld [vmem:[%s14293_s7 + $0x328] sm:$0xf0]  ;;  %v9373_v4 = vld [vmem:[%s14293_s7 + $0x190] sm:$0xf]  ;;  %v9904_v61 = vld [vmem:[%s14293_s7 + $0x194] sm:$0xf0] }
 0x5fe   : > { %v9382_v43 = vor.u32 %v9906_v31, %v9381_v12  ;;  %v9935_v6 = vld [vmem:[%s14293_s7 + $0x294] sm:$0xf]  ;;  %v9271_v31 = vld [vmem:[%s14293_s7 + $0xc8] sm:$0xf0] }
 0x5ff   : > { %8284 = vmatpush.bf16.msra.mxu3 %v9310_v55  ;;  %v7440_v55 = vrot.slane %v13555_v44, 6  ;;  %v9912_v44 = vld [vmem:[%s14293_s7 + $0x1d4] sm:$0xf0]  ;;  %v9883_v25 = vld [vmem:[%s14293_s7 + $0xf4] sm:$0xf] }
 0x600   : > { %8388 = vmatpush.bf16.msra.mxu2 %v9314_v58  ;;  %8401 = vmatpush.bf16.msrb.mxu1 %v9378_v2  ;;  %v7445_v58 = vrot.slane %v13553_v27, 3  ;;  %v9943_v27 = vld [vmem:[%s14293_s7 + $0x2d4] sm:$0xf]  ;;  %v9406_v32 = vor.u32 %v9912_v44, %v9405_v56  ;;  %v9495_v56 = vld [vmem:[%s14293_s7 + $0x288] sm:$0xf0] }
 0x601   : > { %v7442_v2 = vsel %vm4055_vm3, %v7441_v47, %v7440_v55  ;;  %v9538_v14 = vor.u32 %v9943_v27, %v9535_v42  ;;  %vm14539_vm3 = vmmov %vm14537_vm0  ;;  %v9374_v55 = vor.u32 %v9904_v61, %v9373_v4  ;;  %v9949_v44 = vld [vmem:[%s14293_s7 + $0x304] sm:$0xf]  ;;  %v9964_v27 = vld [vmem:[%s14293_s7 + $0x374] sm:$0xf0] }
 0x602   : > { %v7444_v16 = vsel %vm4057_vm4, %v7443_v38, %v7442_v2  ;;  %v9365_v38 = vld [vmem:[%s14293_s7 + $0x180] sm:$0xf]  ;;  %v9247_v61 = vld [vmem:[%s14293_s7 + $0x98] sm:$0xf0]  ;;  %vm8676_vm4 = vcmask 7168  }
 0x603   : > { %8285 = vmatpush.bf16.msra.mxu3 %v9302_v49  ;;  %v7446_v46 = vsel %vm4059_vm5, %v7445_v58, %v7444_v16  ;;  %v9519_v49 = vld [vmem:[%s14293_s7 + $0x2b8] sm:$0xf0]  ;;  %v9902_v58 = vld [vmem:[%s14293_s7 + $0x184] sm:$0xf0] }
 0x604   : > { %8389 = vmatpush.bf16.msra.mxu2 %v9306_v30  ;;  %8402 = vmatpush.bf16.msrb.mxu1 %v9370_v29  ;;  %v7448_v37 = vsel %vm4061_vm6, %v7447_v5, %v7446_v46  ;;  %v9955_v30 = vld [vmem:[%s14293_s7 + $0x334] sm:$0xf]  ;;  %v9559_v5 = vld [vmem:[%s14293_s7 + $0x308] sm:$0xf0]  ;;  %v9366_v42 = vor.u32 %v9902_v58, %v9365_v38  ;;  %v9962_v16 = vld [vmem:[%s14293_s7 + $0x364] sm:$0xf0] }
 0x605   : > { %v7450_v19 = vsel %vm14539_vm3, %v7449_v51, %v7448_v37  ;;  %v9586_v29 = vor.u32 %v9955_v30, %v9583_v10  ;;  %v9562_v51 = vor.u32 %v9949_v44, %v9559_v5  ;;  %v9606_v46 = vor.u32 %v9962_v16, %v9605_v35  ;;  %v9589_v37 = vld [vmem:[%s14293_s7 + $0x340] sm:$0xf]  ;;  %v9287_v30 = vld [vmem:[%s14293_s7 + $0xe8] sm:$0xf0]  ;;  %v9929_v58 = vld [vmem:[%s14293_s7 + $0x264] sm:$0xf] }
 0x606   : > { %8286 = vmatmul.bf16.vlgmr.msra.gmra.mxu3 %v7472_v41  ;;  %v7451_v48 = vsel %vm4065_vm8, %v13570_v8, %v7450_v19  ;;  %v9939_v8 = vld [vmem:[%s14293_s7 + $0x2b4] sm:$0xf]  ;;  %v9954_v19 = vld [vmem:[%s14293_s7 + $0x324] sm:$0xf0]  ;;  %v9471_v44 = vld [vmem:[%s14293_s7 + $0x258] sm:$0xf0] }
 0x607   : > { %8291 = vmatpush.bf16.msrb.mxu3 %v9422_v33  ;;  %8390 = vmatmul.bf16.vlgmr.msra.gmra.mxu2 %v7472_v41  ;;  %v13920_v3 = vsel %vm4067_vm9, %v7452_v13, %v7451_v48  ;;  %v9522_v0 = vor.u32 %v9939_v8, %v9519_v49  ;;  %v9511_v33 = vld [vmem:[%s14293_s7 + $0x2a8] sm:$0xf0]  ;;  %v9503_v41 = vld [vmem:[%s14293_s7 + $0x298] sm:$0xf0]  ;;  %v9574_v1 = vor.u32 %v9954_v19, %v9573_v60  ;;  %v9952_v48 = vld [vmem:[%s14293_s7 + $0x314] sm:$0xf0] }
 0x608   : > { %8421 = vmatpush.bf16.msrb.mxu2 %v9554_v53  ;;  %8434 = vmatpush.bf16.msra.mxu1 %v9618_v57  ;;  %v9953_v53 = vld [vmem:[%s14293_s7 + $0x324] sm:$0xf]  ;;  %v9514_v57 = vor.u32 %v9937_v11, %v9511_v33  ;;  %v9506_v47 = vor.u32 %v9935_v6, %v9503_v41  ;;  %v7476_v13 = vpack.c.bf16 %v13920_v3, %v13920_v3  ;;  %v9875_v33 = vld [vmem:[%s14293_s7 + $0xb4] sm:$0xf]  ;;  %v9431_v19 = vld [vmem:[%s14293_s7 + $0x208] sm:$0xf0] }
 0x609   : > { %8403 = vmatmul.bf16.vlgmr.msrb.gmra.mxu1 %v13870_v36  ;;  %v9578_v40 = vor.u32 %v9953_v53, %v9575_v45  ;;  %v9566_v3 = vor.u32 %v9952_v48, %v9565_v23  ;;  %v9881_v49 = vld [vmem:[%s14293_s7 + $0xe4] sm:$0xf]  ;;  %v9263_v53 = vld [vmem:[%s14293_s7 + $0xb8] sm:$0xf0] }
 0x60a   : > { %v9290_v10 = vor.u32 %v9881_v49, %v9287_v30  ;;  %v9266_v45 = vor.u32 %v9875_v33, %v9263_v53  ;;  %v9869_v41 = vld [vmem:[%s14293_s7 + $0x84] sm:$0xf]  ;;  %v9679_v23 = vld [vmem:[%s14293_s7 + $0x3f8] sm:$0xf0]  ;;  %v9655_v33 = vld [vmem:[%s14293_s7 + $0x3c8] sm:$0xf0] }
 0x60b   : > { %8292 = vmatpush.bf16.msrb.mxu3 %v9414_v15  ;;  %v9570_v15 = vor.u32 %v9951_v26, %v9567_v7  ;;  %v9239_v26 = vld [vmem:[%s14293_s7 + $0x88] sm:$0xf0]  ;;  %v9931_v7 = vld [vmem:[%s14293_s7 + $0x274] sm:$0xf]  ;;  %v9917_v60 = vld [vmem:[%s14293_s7 + $0x204] sm:$0xf] }
 0x60c   : > { %8422 = vmatpush.bf16.msrb.mxu2 %v9546_v50  ;;  %8435 = vmatpush.bf16.msra.mxu1 %v9610_v63  ;;  %v9933_v50 = vld [vmem:[%s14293_s7 + $0x284] sm:$0xf]  ;;  %v9613_v63 = vld [vmem:[%s14293_s7 + $0x370] sm:$0xf] }
 0x60d   : > { %v9498_v2 = vor.u32 %v9933_v50, %v9495_v56  ;;  %v9614_v24 = vor.u32 %v9964_v27, %v9613_v63  ;;  %v9927_v56 = vld [vmem:[%s14293_s7 + $0x254] sm:$0xf]  ;;  %v9925_v63 = vld [vmem:[%s14293_s7 + $0x244] sm:$0xf]  ;;  %v9463_v27 = vld [vmem:[%s14293_s7 + $0x248] sm:$0xf0] }
 0x60e   : > { %v9474_v5 = vor.u32 %v9927_v56, %v9471_v44  ;;  %v9623_v56 = vld [vmem:[%s14293_s7 + $0x388] sm:$0xf0]  ;;  %v9987_v44 = vld [vmem:[%s14295_s9 + $0x30] sm:$0xff] }
 0x60f   : > { %8293 = vmatpush.bf16.msrb.mxu3 %v9406_v32  ;;  %v9597_v32 = vld [vmem:[%s14293_s7 + $0x350] sm:$0xf] }
 0x610   : > { %8423 = vmatpush.bf16.msrb.mxu2 %v9538_v14  ;;  %8436 = vmatpush.bf16.msra.mxu1 %v9602_v39  ;;  %v9960_v14 = vld [vmem:[%s14293_s7 + $0x354] sm:$0xf0]  ;;  %v9958_v39 = vld [vmem:[%s14293_s7 + $0x344] sm:$0xf0] }
 0x611   : > { %v9598_v21 = vor.u32 %v9960_v14, %v9597_v32  ;;  %v9590_v52 = vor.u32 %v9958_v39, %v9589_v37  ;;  %v9439_v37 = vld [vmem:[%s14293_s7 + $0x218] sm:$0xf0]  ;;  %v7606_v39 = vld [vmem:[%s14294_s8] sm:$0x3] }
 0x612   : > { %v7608_v48 = vperm.slane %v7606_v39, 0 }
 0x613   : > { %8294 = vmatpush.bf16.msrb.mxu3 %v9398_v28  ;;  %v9557_v28 = vld [vmem:[%s14293_s7 + $0x300] sm:$0xf] }
 0x614   : > { %8424 = vmatpush.bf16.msrb.mxu2 %v9530_v34  ;;  %8437 = vmatpush.bf16.msra.mxu1 %v9594_v59  ;;  %v9950_v34 = vld [vmem:[%s14293_s7 + $0x304] sm:$0xf0]  ;;  %v9295_v59 = vld [vmem:[%s14293_s7 + $0xf8] sm:$0xf0] }
 0x615   : > { %v9558_v9 = vor.u32 %v9950_v34, %v9557_v28  ;;  %v9298_v8 = vor.u32 %v9883_v25, %v9295_v59  ;;  %v9434_v28 = vor.u32 %v9917_v60, %v9431_v19  ;;  %v9977_v59 = vld [vmem:[%s14293_s7 + $0x3e4] sm:$0xf] }
 0x617   : > { %8295 = vmatpush.bf16.msrb.mxu3 %v9390_v62  ;;  %v9879_v62 = vld [vmem:[%s14293_s7 + $0xd4] sm:$0xf] }
 0x618   : > { %8425 = vmatpush.bf16.msrb.mxu2 %v9522_v0  ;;  %8438 = vmatpush.bf16.msra.mxu1 %v9586_v29  ;;  %v9279_v0 = vld [vmem:[%s14293_s7 + $0xd8] sm:$0xf0]  ;;  %v9877_v29 = vld [vmem:[%s14293_s7 + $0xc4] sm:$0xf] }
 0x619   : > { %v9282_v12 = vor.u32 %v9879_v62, %v9279_v0  ;;  %v9274_v11 = vor.u32 %v9877_v29, %v9271_v31  ;;  %v9975_v0 = vld [vmem:[%s14293_s7 + $0x3d4] sm:$0xf] }
 0x61b   : > { %8296 = vmatpush.bf16.msrb.mxu3 %v9382_v43  ;;  %v9873_v43 = vld [vmem:[%s14293_s7 + $0xa4] sm:$0xf] }
 0x61c   : > { %8426 = vmatpush.bf16.msrb.mxu2 %v9514_v57  ;;  %8439 = vmatpush.bf16.msra.mxu1 %v9578_v40  ;;  %v9255_v57 = vld [vmem:[%s14293_s7 + $0xa8] sm:$0xf0]  ;;  %v9871_v40 = vld [vmem:[%s14293_s7 + $0x94] sm:$0xf] }
 0x61d   : > { %v9258_v4 = vor.u32 %v9873_v43, %v9255_v57  ;;  %v9250_v6 = vor.u32 %v9871_v40, %v9247_v61  ;;  %v9971_v57 = vld [vmem:[%s14293_s7 + $0x3b4] sm:$0xf]  ;;  %v9969_v61 = vld [vmem:[%s14293_s7 + $0x3a4] sm:$0xf] }
 0x61f   : > { %8297 = vmatpush.bf16.msrb.mxu3 %v9374_v55  ;;  %v9487_v55 = vld [vmem:[%s14293_s7 + $0x278] sm:$0xf0] }
 0x620   : > { %8427 = vmatpush.bf16.msrb.mxu2 %v9506_v47  ;;  %8440 = vmatpush.bf16.msra.mxu1 %v9570_v15  ;;  %v9242_v47 = vor.u32 %v9869_v41, %v9239_v26  ;;  %v9490_v38 = vor.u32 %v9931_v7, %v9487_v55  ;;  %v9479_v15 = vld [vmem:[%s14293_s7 + $0x268] sm:$0xf0]  ;;  %v9967_v55 = vld [vmem:[%s14293_s7 + $0x394] sm:$0xf] }
 0x621   : > { %v9482_v50 = vor.u32 %v9929_v58, %v9479_v15 }
 0x623   : > { %8298 = vmatpush.bf16.msrb.mxu3 %v9366_v42 }
 0x624   : > { %8428 = vmatpush.bf16.msrb.mxu2 %v9498_v2  ;;  %8441 = vmatpush.bf16.msra.mxu1 %v9562_v51  ;;  %v9466_v2 = vor.u32 %v9925_v63, %v9463_v27  ;;  %v9923_v51 = vld [vmem:[%s14293_s7 + $0x234] sm:$0xf]  ;;  %v9986_v27 = vld [vmem:[%s14295_s9 + $0x28] sm:$0xff] }
 0x626   : > { %8299 = vmatmul.bf16.vlgmr.msrb.gmra.mxu3 %v13870_v36 }
 0x627   : > { %8330 = vmatpush.bf16.msra.mxu3 %v9614_v24  ;;  %8429 = vmatmul.bf16.vlgmr.msrb.gmra.mxu2 %v13638_v22  ;;  %v9956_v22 = vld [vmem:[%s14293_s7 + $0x334] sm:$0xf0] }
 0x628   : > { %8442 = vmatmul.bf16.vlgmr.msra.gmra.mxu1 %v7476_v13  ;;  %v9582_v36 = vor.u32 %v9956_v22, %v9581_v54 }
 0x62b   : > { %8331 = vmatpush.bf16.msra.mxu3 %v9606_v46  ;;  %v9921_v46 = vld [vmem:[%s14293_s7 + $0x224] sm:$0xf] }
 0x62f   : > { %8332 = vmatpush.bf16.msra.mxu3 %v9598_v21  ;;  %v9919_v21 = vld [vmem:[%s14293_s7 + $0x214] sm:$0xf] }
 0x633   : > { %8333 = vmatpush.bf16.msra.mxu3 %v9590_v52  ;;  %v9442_v52 = vor.u32 %v9919_v21, %v9439_v37 }
 0x637   : > { %8334 = vmatpush.bf16.msra.mxu3 %v9582_v36  ;;  %v7609_v36 = vperm.slane %v7606_v39, 1 }
 0x63b   : > { %8335 = vmatpush.bf16.msra.mxu3 %v9574_v1  ;;  %v9979_v1 = vld [vmem:[%s14293_s7 + $0x3f4] sm:$0xf] }
 0x63c   : > { %v9682_v25 = vor.u32 %v9979_v1, %v9679_v23 }
 0x63f   : > { %8336 = vmatpush.bf16.msra.mxu3 %v9566_v3 }
 0x643   : > { %8337 = vmatpush.bf16.msra.mxu3 %v9558_v9  ;;  %v9671_v9 = vld [vmem:[%s14293_s7 + $0x3e8] sm:$0xf0] }
 0x646   : > { %8338 = vmatmul.bf16.vlgmr.msra.gmra.mxu3 %v7476_v13  ;;  %v9447_v13 = vld [vmem:[%s14293_s7 + $0x228] sm:$0xf0] }
 0x647   : > { %8369 = vmatpush.bf16.msrb.mxu3 %v9298_v8  ;;  %v9450_v14 = vor.u32 %v9921_v46, %v9447_v13 }
 0x64b   : > { %8370 = vmatpush.bf16.msrb.mxu3 %v9290_v10  ;;  %v9674_v10 = vor.u32 %v9977_v59, %v9671_v9  ;;  %v9993_v59 = vld [vmem:[%s14295_s9 + $0x60] sm:$0xff]  ;;  %v9992_v9 = vld [vmem:[%s14295_s9 + $0x58] sm:$0xff] }
 0x64f   : > { %8371 = vmatpush.bf16.msrb.mxu3 %v9282_v12  ;;  %v9663_v12 = vld [vmem:[%s14293_s7 + $0x3d8] sm:$0xf0] }
 0x650   : > { %v9666_v31 = vor.u32 %v9975_v0, %v9663_v12 }
 0x653   : > { %8372 = vmatpush.bf16.msrb.mxu3 %v9274_v11  ;;  %v9973_v11 = vld [vmem:[%s14293_s7 + $0x3c4] sm:$0xf] }
 0x654   : > { %v9658_v43 = vor.u32 %v9973_v11, %v9655_v33 }
 0x657   : > { %8373 = vmatpush.bf16.msrb.mxu3 %v9266_v45 }
 0x65b   : > { %8374 = vmatpush.bf16.msrb.mxu3 %v9258_v4 }
 0x65f   : > { %8375 = vmatpush.bf16.msrb.mxu3 %v9250_v6  ;;  %v9639_v6 = vld [vmem:[%s14293_s7 + $0x3a8] sm:$0xf0] }
 0x660   : > { %v9642_v26 = vor.u32 %v9969_v61, %v9639_v6 }
 0x663   : > { %8376 = vmatpush.bf16.msrb.mxu3 %v9242_v47  ;;  %v9631_v47 = vld [vmem:[%s14293_s7 + $0x398] sm:$0xf0] }
 0x664   : > { %v14119_v42 = vpop.f32.mrf.mxu1  ;;  %v9634_v15 = vor.u32 %v9967_v55, %v9631_v47 }
 0x666   : > { %8377 = vmatmul.bf16.vlgmr.msrb.gmra.mxu3 %v13742_v18  ;;  %v9455_v18 = vld [vmem:[%s14293_s7 + $0x238] sm:$0xf0] }
 0x667   : > { %8408 = vmatpush.bf16.msra.mxu3 %v9490_v38  ;;  %v9458_v24 = vor.u32 %v9923_v51, %v9455_v18  ;;  %v9988_v38 = vld [vmem:[%s14295_s9 + $0x38] sm:$0xff]  ;;  %v9985_v51 = vld [vmem:[%s14295_s9 + $0x20] sm:$0xff] }
 0x668   : > { %8596 = vmatpush.bf16.msra.mxu2 %v9988_v38  ;;  %v9984_v18 = vld [vmem:[%s14295_s9 + $0x18] sm:$0xff] }
 0x669   : > { %v8261_v35 = vpop.f32.mrf.mxu3  ;;  %v14127_v16 = vpop.f32.mrf.mxu2 }
 0x66a   : > { %v8262_v8 = vadd.f32 %v8261_v35, %v7608_v48 }
 0x66b   : > { %8409 = vmatpush.bf16.msra.mxu3 %v9482_v50  ;;  %v9965_v50 = vld [vmem:[%s14293_s7 + $0x384] sm:$0xf] }
 0x66c   : > { %v8328_v32 = vpop.f32.mrf.mxu1  ;;  %v9626_v63 = vor.u32 %v9965_v50, %v9623_v56  ;;  %8597 = vmatpush.bf16.msra.mxu2 %v9987_v44  ;;  %v10280_v50 = vld [vmem:[#allocation2] ss:$0 sm:$0xff] }
 0x66f   : > { %8410 = vmatpush.bf16.msra.mxu3 %v9474_v5 }
 0x670   : > { %8598 = vmatpush.bf16.msra.mxu2 %v9986_v27 }
 0x671   : > { %v8263_v54 = vpop.f32.mrf.mxu3  ;;  %v8315_v22 = vpop.f32.mrf.mxu2 }
 0x673   : > { %8411 = vmatpush.bf16.msra.mxu3 %v9466_v2 }
 0x674   : > { %v8365_v3 = vpop.f32.mrf.mxu1  ;;  %8599 = vmatpush.bf16.msra.mxu2 %v9985_v51 }
 0x675   : > { %v14156_v34 = vadd.f32 %v8365_v3, %v7609_v36  ;;  %v9995_v3 = vld [vmem:[%s14295_s9 + $0x70] sm:$0xff] }
 0x677   : > { %8412 = vmatpush.bf16.msra.mxu3 %v9458_v24  ;;  %v9983_v24 = vld [vmem:[%s14295_s9 + $0x10] sm:$0xff] }
 0x678   : > { %8600 = vmatpush.bf16.msra.mxu2 %v9984_v18 }
 0x679   : > { %v8274_v49 = vpop.f32.mrf.mxu3  ;;  %v14164_v30 = vpop.f32.mrf.mxu2 }
 0x67a   : > { %v8275_v62 = vadd.f32 %v8274_v49, %v8262_v8  ;;  %v9991_v8 = vld [vmem:[%s14295_s9 + $0x50] sm:$0xff] }
 0x67b   : > { %8413 = vmatpush.bf16.msra.mxu3 %v9450_v14 }
 0x67c   : > { %v8367_v29 = vpop.f32.mrf.mxu1  ;;  %8601 = vmatpush.bf16.msra.mxu2 %v9983_v24 }
 0x67f   : > { %8414 = vmatpush.bf16.msra.mxu3 %v9442_v52  ;;  %v9981_v52 = vld [vmem:[%s14295_s9] sm:$0xff] }
 0x681   : > { %v8276_v53 = vpop.f32.mrf.mxu3  ;;  %v8354_v45 = vpop.f32.mrf.mxu2 }
 0x683   : > { %8415 = vmatpush.bf16.msra.mxu3 %v9434_v28  ;;  %v9994_v28 = vld [vmem:[%s14295_s9 + $0x68] sm:$0xff] }
 0x686   : > { %8416 = vmatmul.bf16.vlgmr.msra.gmra.mxu3 %v13636_v17  ;;  %v9647_v17 = vld [vmem:[%s14293_s7 + $0x3b8] sm:$0xf0]  ;;  %v14185_v4 = vpop.f32.mrf.mxu1 }
 0x687   : > { %8447 = vmatpush.bf16.msrb.mxu3 %v9682_v25  ;;  %v9650_v40 = vor.u32 %v9971_v57, %v9647_v17 }
 0x689   : > { %v8287_v41 = vpop.f32.mrf.mxu3 }
 0x68a   : > { %v14193_v7 = vpop.f32.mrf.mxu2  ;;  %v8288_v46 = vadd.f32 %v8287_v41, %v8275_v62  ;;  %v9997_v41 = vld [vmem:[%s14297_s11] sm:$0xff] }
 0x68b   : > { %8448 = vmatpush.bf16.msrb.mxu3 %v9674_v10  ;;  %v9989_v10 = vld [vmem:[%s14295_s9 + $0x40] sm:$0xff] }
 0x68e   : > { %v8406_v58 = vpop.f32.mrf.mxu1 }
 0x68f   : > { %8449 = vmatpush.bf16.msrb.mxu3 %v9666_v31 }
 0x691   : > { %v8289_v5 = vpop.f32.mrf.mxu3 }
 0x692   : > { %v8393_v2 = vpop.f32.mrf.mxu2 }
 0x693   : > { %8450 = vmatpush.bf16.msrb.mxu3 %v9658_v43 }
 0x697   : > { %8451 = vmatpush.bf16.msrb.mxu3 %v9650_v40  ;;  %v10000_v40 = vld [vmem:[%s14297_s11 + $0x18] sm:$0xff] }
 0x69b   : > { %8452 = vmatpush.bf16.msrb.mxu3 %v9642_v26  ;;  %v10279_v26 = vld [vmem:[%s14296_s10] ss:$0 sm:$0xff] }
 0x69f   : > { %8453 = vmatpush.bf16.msrb.mxu3 %v9634_v15 }
 0x6a3   : > { %8454 = vmatpush.bf16.msrb.mxu3 %v9626_v63 }
 0x6a5   : > { %v8443_v35 = vpop.f32.mrf.mxu1 }
 0x6a6   : > { %8455 = vmatmul.bf16.vlgmr.msrb.gmra.mxu3 %v13744_v20  ;;  %v9982_v20 = vld [vmem:[%s14295_s9 + $0x8] sm:$0xff] }
 0x6a7   : > { %8602 = vmatpush.bf16.msra.mxu2 %v9982_v20  ;;  %8667 = vmatpush.bf16.msra.mxu3 %v10000_v40 }
 0x6a9   : > { %v8300_v13 = vpop.f32.mrf.mxu3 }
 0x6aa   : > { %v8430_v32 = vpop.f32.mrf.mxu2  ;;  %v8301_v14 = vadd.f32 %v8300_v13, %v8288_v46 }
 0x6ab   : > { %8603 = vmatpush.bf16.msra.mxu2 %v9981_v52 }
 0x6ac   : > { %v8314_v21 = vadd.f32 %v14127_v16, %v8301_v14 }
 0x6ad   : > { %v8445_v37 = vpop.f32.mrf.mxu1 }
 0x6ae   : > { %v8327_v39 = vadd.f32 %v14119_v42, %v8314_v21  ;;  %v9996_v42 = vld [vmem:[%s14295_s9 + $0x78] sm:$0xff] }
 0x6af   : > { %8609 = vmatpush.bf16.msrb.mxu1 %v9996_v42 }
 0x6b1   : > { %v8302_v54 = vpop.f32.mrf.mxu3 }
 0x6b2   : > { %v8432_v22 = vpop.f32.mrf.mxu2 }
 0x6b3   : > { %8610 = vmatpush.bf16.msrb.mxu1 %v9995_v3 }
 0x6b7   : > { %8611 = vmatpush.bf16.msrb.mxu1 %v9994_v28 }
 0x6bb   : > { %8612 = vmatpush.bf16.msrb.mxu1 %v9993_v59 }
 0x6bf   : > { %8613 = vmatpush.bf16.msrb.mxu1 %v9992_v9 }
 0x6c3   : > { %8614 = vmatpush.bf16.msrb.mxu1 %v9991_v8 }
 0x6c9   : > { %v8339_v36 = vpop.f32.mrf.mxu3 }
 0x6ca   : > { %v8340_v60 = vadd.f32 %v8339_v36, %v8327_v39 }
 0x6cc   : > { %v8353_v19 = vadd.f32 %v14164_v30, %v8340_v60  ;;  %v9990_v30 = vld [vmem:[%s14295_s9 + $0x48] sm:$0xff] }
 0x6cd   : > { %8615 = vmatpush.bf16.msrb.mxu1 %v9990_v30 }
 0x6ce   : > { %v8460_v16 = vmax.f32 %v8353_v19, 0.0 }
 0x6d0   : > { %v8462_v1 = vpack.c.bf16 %v8460_v16, %v8460_v16 }
 0x6d1   : > { %v8341_v23 = vpop.f32.mrf.mxu3  ;;  %8616 = vmatpush.bf16.msrb.mxu1 %v9989_v10 }
 0x6d2   : > { %8604 = vmatmul.bf16.vlgmr.msra.gmra.mxu2 %v8462_v1 }
 0x6e9   : > { %v8378_v48 = vpop.f32.mrf.mxu3 }
 0x6ea   : > { %v8379_v0 = vadd.f32 %v8378_v48, %v14156_v34  ;;  %v9999_v34 = vld [vmem:[%s14297_s11 + $0x10] sm:$0xff] }
 0x6eb   : > { %8668 = vmatpush.bf16.msra.mxu3 %v9999_v34 }
 0x6ec   : > { %v8392_v12 = vadd.f32 %v14193_v7, %v8379_v0 }
 0x6ee   : > { %v8405_v29 = vadd.f32 %v14185_v4, %v8392_v12  ;;  %v9998_v4 = vld [vmem:[%s14297_s11 + $0x8] sm:$0xff] }
 0x6ef   : > { %8669 = vmatpush.bf16.msra.mxu3 %v9998_v4 }
 0x6f1   : > { %v8380_v25 = vpop.f32.mrf.mxu3 }
 0x6f3   : > { %8670 = vmatpush.bf16.msra.mxu3 %v9997_v41 }
 0x709   : > { %v8417_v49 = vpop.f32.mrf.mxu3 }
 0x70a   : > { %v8418_v31 = vadd.f32 %v8417_v49, %v8405_v29 }
 0x70c   : > { %v8431_v11 = vadd.f32 %v8430_v32, %v8418_v31 }
 0x70e   : > { %v8444_v33 = vadd.f32 %v8443_v35, %v8431_v11 }
 0x711   : > { %v8419_v62 = vpop.f32.mrf.mxu3 }
 0x729   : > { %v8456_v53 = vpop.f32.mrf.mxu3 }
 0x72a   : > { %v8457_v45 = vadd.f32 %v8456_v53, %v8444_v33 }
 0x72c   : > { %v8461_v43 = vmax.f32 %v8457_v45, 0.0 }
 0x72e   : > { %v8463_v57 = vpack.c.bf16 %v8461_v43, %v8461_v43 }
 0x730   : > { %8617 = vmatmul.bf16.vlgmr.msrb.gmra.mxu1 %v8463_v57 }
 0x731   : > { %v8458_v17 = vpop.f32.mrf.mxu3 }
 0x755   : > { %v8605_v61 = vpop.f32.mrf.mxu2 }
 0x756   : > { %v8606_v7 = vadd.f32 %v10279_v26, %v8605_v61 }
 0x75d   : > { %v8607_v6 = vpop.f32.mrf.mxu2 }
 0x7ad   : > { %v8618_v55 = vpop.f32.mrf.mxu1 }
 0x7ae   : > { %v8619_v47 = vadd.f32 %v8618_v55, %v8606_v7 }
 0x7b0   : > { %v8622_v38 = vmax.f32 %v8619_v47, 0.0 }
 0x7b2   : > { %v8623_v58 = vpack.c.bf16 %v8622_v38, %v8622_v38 }
 0x7b4   : > { %9763 = vmatmul.msk.bf16.vlgmr.msra.gmra.mxu3 %vm5859_vm12, %v8623_v58 }
 0x7b5   : > { %v8620_v15 = vpop.f32.mrf.mxu1 }
 0x837   : > { %v8672_v56 = vpop.f32.mrf.mxu3 }
 0x838   : > { %v8673_v44 = vadd.f32 %v10280_v50, %v8672_v56 }
 0x83a   : > { %8677 = vst.msk [vmem:[%s442_s29] sm:$0xff] %vm8676_vm4, %v8673_v44 }
 0x83f   : > { %v8674_v5 = vpop.f32.mrf.mxu3 }
 0x840 PF: > { %s25_s27 = sadd.s32 1, %s10293_s27  }
 0x841   : > { %p22_p5 = scmp.ge.s32.totalorder %s25_s27, 4  }
 0x843   :  { %24 = sbr.rel (!%p22_p5) target bundleno = 3 (0x3), region = 102 }

</bundles_post_ra>
